<compile_context>
chip_gen: v7x
topology: tpu7x:2x2x1
jax: 0.10.0
libtpu: 0.0.40
codegen_flags: <defaults>
</compile_context>

<pallas_src>
import functools

import jax
import jax.numpy as jnp
from jax.experimental import pallas as pl
from jax.experimental.pallas import tpu as pltpu

NEG_SLOPE = 0.1   # LeakyReLU slope (YOLO convention)


# --------------------------- fused Pallas kernel -----------------------------

def _fused_topdown_spp_kernel(
        x_ref, ymap_ref, xmap_ref,
        w_cv1, b_cv1, w_cv2, b_cv2,
        w_c1, b_c1, w_c2, b_c2,
        w_c3, b_c3, w_c4, b_c4,
        o_ref, pad_ref, *, H, W):
    """One grid step = one image. All activations are (C, H*W) f32 values."""
    HW = H * W
    PAD = 2 * W                      # covers the largest shift (dy = +-2 rows)

    ymap = ymap_ref[...]             # (1, HW) int32: pixel -> row index
    xmap = xmap_ref[...]             # (1, HW) int32: pixel -> col index

    # line-buffer scratch used for spatially shifted reads (keep borders finite)
    pad_ref[...] = jnp.zeros(pad_ref.shape, pad_ref.dtype)

    def leaky(v):
        return jnp.where(v > 0, v, NEG_SLOPE * v)

    def stage(a):
        """Write activation a (C, HW) into the interior of the line buffer."""
        c = a.shape[0]
        pad_ref[0:c, PAD:PAD + HW] = a
        return c

    def tap(c, dy, dx, fill):
        """Shifted view: out[:, p] = a[:, p + dy*W + dx] if spatially valid, else fill."""
        o = dy * W + dx
        s = pad_ref[0:c, PAD + o:PAD + o + HW]
        if dy == 0 and dx == 0:
            return s
        valid = None
        if dy != 0:
            vy = (ymap + dy >= 0) & (ymap + dy < H)
            valid = vy if valid is None else valid & vy
        if dx != 0:
            vx = (xmap + dx >= 0) & (xmap + dx < W)
            valid = vx if valid is None else valid & vx
        return jnp.where(valid, s, jnp.float32(fill))

    def conv1x1(a, w_ref, b_ref):
        acc = jnp.dot(w_ref[...], a.astype(jnp.bfloat16),
                      preferred_element_type=jnp.float32)
        return leaky(acc + b_ref[...])

    def conv3x3(a, w_ref, b_ref):
        c = stage(a)
        acc = None
        for dy in (-1, 0, 1):
            for dx in (-1, 0, 1):
                t = (dy + 1) * 3 + (dx + 1)           # matches OIHW tap (dy+1, dx+1)
                d = jnp.dot(w_ref[t],
                            tap(c, dy, dx, 0.0).astype(jnp.bfloat16),
                            preferred_element_type=jnp.float32)
                acc = d if acc is None else acc + d
        return leaky(acc + b_ref[...])

    def maxpool5(a):
        # separable 5x5 / stride 1 / pad 2 max pool (pad value == -inf)
        c = stage(a)
        r = a
        for dx in (-2, -1, 1, 2):
            r = jnp.maximum(r, tap(c, 0, dx, -jnp.inf))
        c = stage(r)
        out = r
        for dy in (-2, -1, 1, 2):
            out = jnp.maximum(out, tap(c, dy, 0, -jnp.inf))
        return out

    x = x_ref[0]                                     # (Cin, HW) bf16

    # ---- SPPF ----
    h = conv1x1(x, w_cv1, b_cv1)                     # (Ch, HW)
    p1 = maxpool5(h)
    p2 = maxpool5(p1)
    p3 = maxpool5(p2)
    # cv2 over concat([h, p1, p2, p3]) == K-split into 4 accumulated dots
    acc = None
    for j, part in enumerate((h, p1, p2, p3)):
        d = jnp.dot(w_cv2[j], part.astype(jnp.bfloat16),
                    preferred_element_type=jnp.float32)
        acc = d if acc is None else acc + d
    z = leaky(acc + b_cv2[...])                      # (Cout, HW)

    # ---- conv1..conv4 ----
    z = conv3x3(z, w_c1, b_c1)                       # (2*Cout, HW)
    z = conv1x1(z, w_c2, b_c2)                       # (Cout, HW)
    z = conv3x3(z, w_c3, b_c3)                       # (2*Cout, HW)
    z = conv1x1(z, w_c4, b_c4)                       # (Cout, HW)

    o_ref[0] = z.astype(o_ref.dtype)


# ------------------------------ wrapper ---------------------------------------

def topdown_spp_forward(prepped, x):
    """x: (B, Cin, H, W) f32 (PyTorch NCHW). Returns (B, Cout, H, W) f32."""
    B, Cin, H, W = x.shape
    HW = H * W
    Ch = prepped["w_cv1"].shape[0]
    Cout = prepped["w_cv2"].shape[1]
    Cmax = max(Ch, Cout)

    x3 = x.reshape(B, Cin, HW).astype(jnp.bfloat16)  # free reshape + bf16 DMA
    pos = jnp.arange(HW, dtype=jnp.int32)
    ymap = (pos // W).reshape(1, HW)
    xmap = (pos % W).reshape(1, HW)

    weight_names = ("w_cv1", "b_cv1", "w_cv2", "b_cv2",
                    "w_c1", "b_c1", "w_c2", "b_c2",
                    "w_c3", "b_c3", "w_c4", "b_c4")
    weights = [prepped[k] for k in weight_names]

    def const_spec(a):
        n = a.ndim
        return pl.BlockSpec(a.shape, lambda b: (0,) * n)

    in_specs = ([pl.BlockSpec((1, Cin, HW), lambda b: (b, 0, 0)),
                 pl.BlockSpec((1, HW), lambda b: (0, 0)),
                 pl.BlockSpec((1, HW), lambda b: (0, 0))]
                + [const_spec(w) for w in weights])

    kernel = functools.partial(_fused_topdown_spp_kernel, H=H, W=W)

    out = pl.pallas_call(
        kernel,
        out_shape=jax.ShapeDtypeStruct((B, Cout, HW), jnp.float32),
        grid_spec=pltpu.PrefetchScalarGridSpec(
            num_scalar_prefetch=0,
            grid=(B,),
            in_specs=in_specs,
            out_specs=pl.BlockSpec((1, Cout, HW), lambda b: (b, 0, 0)),
            scratch_shapes=[pltpu.VMEM((Cmax, HW + 4 * W), jnp.float32)],
        ),
        compiler_params=pltpu.CompilerParams(
            dimension_semantics=("parallel",)),
    )(x3, ymap, xmap, *weights)
    # TODO(synk): for realistic YOLO sizes (large H*W or Cin~1024) add spatial
    # row tiling with halos and a K grid axis + VMEM accumulator so the working
    # set stays under v7x's 64 MiB VMEM.
    return out.reshape(B, Cout, H, W)


# --------------------------- parameters ---------------------------------------

def init_conv(key, cin, cout, k):
    kw, kb = jax.random.split(key)
    w = jax.random.normal(kw, (cout, cin, k, k), jnp.float32) * (2.0 / (cin * k * k)) ** 0.5
    b = jax.random.normal(kb, (cout,), jnp.float32) * 0.01   # BN folded into bias
    return {"w": w, "b": b}


def init_params(key, in_channels, out_channels):
    ch = in_channels // 2
    ks = jax.random.split(key, 6)
    return {
        "cv1":   init_conv(ks[0], in_channels, ch, 1),
        "cv2":   init_conv(ks[1], 4 * ch, out_channels, 1),
        "conv1": init_conv(ks[2], out_channels, 2 * out_channels, 3),
        "conv2": init_conv(ks[3], 2 * out_channels, out_channels, 1),
        "conv3": init_conv(ks[4], out_channels, 2 * out_channels, 3),
        "conv4": init_conv(ks[5], 2 * out_channels, out_channels, 1),
    }


def prepare_params(p):
    """Convert PyTorch-layout (OIHW) f32 weights into kernel layouts (bf16)."""
    def w1x1(w):
        return w[:, :, 0, 0].astype(jnp.bfloat16)                       # (Cout, Cin)

    def w3x3(w):
        cout, cin = w.shape[0], w.shape[1]
        return jnp.transpose(w, (2, 3, 0, 1)).reshape(9, cout, cin).astype(jnp.bfloat16)

    def bias(b):
        return b.reshape(-1, 1).astype(jnp.float32)                     # (Cout, 1)

    ch = p["cv1"]["w"].shape[0]
    w2 = p["cv2"]["w"][:, :, 0, 0]                                      # (Cout, 4*Ch)
    cout = w2.shape[0]
    w2 = w2.reshape(cout, 4, ch).transpose(1, 0, 2).astype(jnp.bfloat16)  # (4, Cout, Ch)

    return {
        "w_cv1": w1x1(p["cv1"]["w"]), "b_cv1": bias(p["cv1"]["b"]),
        "w_cv2": w2,                  "b_cv2": bias(p["cv2"]["b"]),
        "w_c1": w3x3(p["conv1"]["w"]), "b_c1": bias(p["conv1"]["b"]),
        "w_c2": w1x1(p["conv2"]["w"]), "b_c2": bias(p["conv2"]["b"]),
        "w_c3": w3x3(p["conv3"]["w"]), "b_c3": bias(p["conv3"]["b"]),
        "w_c4": w1x1(p["conv4"]["w"]), "b_c4": bias(p["conv4"]["b"]),
    }


# --------------------------- pure-JAX reference --------------------------------

def reference_forward(params, x):
    """Same math in plain XLA (bf16-rounded matmul inputs, f32 accumulation)."""
    f32 = jnp.float32

    def q(a):  # bf16 round-trip to mirror the kernel's MXU input precision
        return a.astype(jnp.bfloat16).astype(f32)

    def conv(xv, w, b, pad):
        y = jax.lax.conv_general_dilated(
            q(xv), q(w), window_strides=(1, 1),
            padding=[(pad, pad), (pad, pad)],
            dimension_numbers=("NCHW", "OIHW", "NCHW"),
            precision=jax.lax.Precision.HIGHEST)
        y = y + b.reshape(1, -1, 1, 1)
        return jnp.where(y > 0, y, NEG_SLOPE * y)

    def maxpool5(v):
        return jax.lax.reduce_window(
            v, -jnp.inf, jax.lax.max, (1, 1, 5, 5), (1, 1, 1, 1),
            [(0, 0), (0, 0), (2, 2), (2, 2)])

    h = conv(x, params["cv1"]["w"], params["cv1"]["b"], 0)
    p1 = maxpool5(h)
    p2 = maxpool5(p1)
    p3 = maxpool5(p2)
    z = conv(jnp.concatenate([h, p1, p2, p3], axis=1),
             params["cv2"]["w"], params["cv2"]["b"], 0)
    z = conv(z, params["conv1"]["w"], params["conv1"]["b"], 1)
    z = conv(z, params["conv2"]["w"], params["conv2"]["b"], 0)
    z = conv(z, params["conv3"]["w"], params["conv3"]["b"], 1)
    z = conv(z, params["conv4"]["w"], params["conv4"]["b"], 0)
    return z


# ------------------------------- main ------------------------------------------

if __name__ == "__main__":
    key = jax.random.PRNGKey(0)
    B, Cin, Cout, H, W = 2, 64, 32, 16, 16
    k_x, k_p = jax.random.split(key)
    x = jax.random.normal(k_x, (B, Cin, H, W), jnp.float32)

    params = init_params(k_p, Cin, Cout)
    prepped = prepare_params(params)

    fwd = jax.jit(topdown_spp_forward)
    out = fwd(prepped, x)
    jax.block_until_ready(out)

    assert out.shape == (B, Cout, H, W), out.shape
    assert bool(jnp.isfinite(out).all())

    ref = jax.jit(reference_forward)(params, x)
    jax.block_until_ready(ref)
    max_err = float(jnp.max(jnp.abs(out - ref)))
    assert max_err < 2e-2, f"mismatch vs reference: {max_err}"

    print("KERNEL_OK")
</pallas_src>

<mosaic_0001>
module attributes {stable_mosaic.version = 11 : i64} {
  func.func @_fused_topdown_spp_kernel(%arg0: i32, %arg1: memref<1x64x256xbf16, #tpu.memory_space<vmem>>, %arg2: memref<1x256xi32, #tpu.memory_space<vmem>>, %arg3: memref<1x256xi32, #tpu.memory_space<vmem>>, %arg4: memref<32x64xbf16, #tpu.memory_space<vmem>>, %arg5: memref<32x1xf32, #tpu.memory_space<vmem>>, %arg6: memref<4x32x32xbf16, #tpu.memory_space<vmem>>, %arg7: memref<32x1xf32, #tpu.memory_space<vmem>>, %arg8: memref<9x64x32xbf16, #tpu.memory_space<vmem>>, %arg9: memref<64x1xf32, #tpu.memory_space<vmem>>, %arg10: memref<32x64xbf16, #tpu.memory_space<vmem>>, %arg11: memref<32x1xf32, #tpu.memory_space<vmem>>, %arg12: memref<9x64x32xbf16, #tpu.memory_space<vmem>>, %arg13: memref<64x1xf32, #tpu.memory_space<vmem>>, %arg14: memref<32x64xbf16, #tpu.memory_space<vmem>>, %arg15: memref<32x1xf32, #tpu.memory_space<vmem>>, %arg16: memref<1x32x256xf32, #tpu.memory_space<vmem>>, %arg17: memref<32x320xf32, #tpu.memory_space<vmem>>) attributes {dimension_semantics = [#tpu.dimension_semantics<parallel>], iteration_bounds = array<i64: 2>, scalar_prefetch = 0 : i64, scratch_operands = 1 : i64, tpu.core_type = #tpu.core_type<tc>, window_params = [{transform_indices = @transform_0, window_bounds = array<i64: 1, 64, 256>}, {pipeline_mode = #tpu.pipeline_mode<synchronous>, transform_indices = @transform_1, window_bounds = array<i64: 1, 256>}, {pipeline_mode = #tpu.pipeline_mode<synchronous>, transform_indices = @transform_2, window_bounds = array<i64: 1, 256>}, {pipeline_mode = #tpu.pipeline_mode<synchronous>, transform_indices = @transform_3, window_bounds = array<i64: 32, 64>}, {pipeline_mode = #tpu.pipeline_mode<synchronous>, transform_indices = @transform_4, window_bounds = array<i64: 32, 1>}, {pipeline_mode = #tpu.pipeline_mode<synchronous>, transform_indices = @transform_5, window_bounds = array<i64: 4, 32, 32>}, {pipeline_mode = #tpu.pipeline_mode<synchronous>, transform_indices = @transform_6, window_bounds = array<i64: 32, 1>}, {pipeline_mode = #tpu.pipeline_mode<synchronous>, transform_indices = @transform_7, window_bounds = array<i64: 9, 64, 32>}, {pipeline_mode = #tpu.pipeline_mode<synchronous>, transform_indices = @transform_8, window_bounds = array<i64: 64, 1>}, {pipeline_mode = #tpu.pipeline_mode<synchronous>, transform_indices = @transform_9, window_bounds = array<i64: 32, 64>}, {pipeline_mode = #tpu.pipeline_mode<synchronous>, transform_indices = @transform_10, window_bounds = array<i64: 32, 1>}, {pipeline_mode = #tpu.pipeline_mode<synchronous>, transform_indices = @transform_11, window_bounds = array<i64: 9, 64, 32>}, {pipeline_mode = #tpu.pipeline_mode<synchronous>, transform_indices = @transform_12, window_bounds = array<i64: 64, 1>}, {pipeline_mode = #tpu.pipeline_mode<synchronous>, transform_indices = @transform_13, window_bounds = array<i64: 32, 64>}, {pipeline_mode = #tpu.pipeline_mode<synchronous>, transform_indices = @transform_14, window_bounds = array<i64: 32, 1>}, {transform_indices = @transform_15, window_bounds = array<i64: 1, 32, 256>}]} {
    %c0 = arith.constant 0 : index
    %c0_0 = arith.constant 0 : index
    %0 = vector.load %arg2[%c0, %c0_0] : memref<1x256xi32, #tpu.memory_space<vmem>>, vector<1x256xi32>
    %c0_1 = arith.constant 0 : index
    %c0_2 = arith.constant 0 : index
    %1 = vector.load %arg3[%c0_1, %c0_2] : memref<1x256xi32, #tpu.memory_space<vmem>>, vector<1x256xi32>
    %cst = arith.constant 0.000000e+00 : f32
    %2 = vector.broadcast %cst : f32 to vector<32x320xf32>
    %c0_3 = arith.constant 0 : index
    %c0_4 = arith.constant 0 : index
    %3 = vector.load %arg17[%c0_3, %c0_4] : memref<32x320xf32, #tpu.memory_space<vmem>>, vector<32x320xf32>
    tpu.vector_store %arg17[%c0_3, %c0_4], %2 {strides = array<i32>} : memref<32x320xf32, #tpu.memory_space<vmem>>, vector<32x320xf32>,
    %c0_5 = arith.constant 0 : index
    %c0_6 = arith.constant 0 : index
    %c0_7 = arith.constant 0 : index
    %4 = vector.load %arg1[%c0_5, %c0_6, %c0_7] : memref<1x64x256xbf16, #tpu.memory_space<vmem>>, vector<1x64x256xbf16>
    %5 = vector.shape_cast %4 : vector<1x64x256xbf16> to vector<64x256xbf16>
    %c0_8 = arith.constant 0 : index
    %c0_9 = arith.constant 0 : index
    %6 = vector.load %arg4[%c0_8, %c0_9] : memref<32x64xbf16, #tpu.memory_space<vmem>>, vector<32x64xbf16>
    %cst_10 = arith.constant dense<0.000000e+00> : vector<32x256xf32>
    %7 = tpu.matmul %6, %5, %cst_10 {dimension_numbers = #tpu.dot_dimension_numbers<[1], [0], [0], [1], [0, 0, 1, 1], [], []>} : vector<32x64xbf16>, vector<64x256xbf16>, vector<32x256xf32> -> vector<32x256xf32>
    %c0_11 = arith.constant 0 : index
    %c0_12 = arith.constant 0 : index
    %8 = vector.load %arg5[%c0_11, %c0_12] : memref<32x1xf32, #tpu.memory_space<vmem>>, vector<32x1xf32>
    %9 = vector.broadcast %8 : vector<32x1xf32> to vector<32x256xf32>
    %10 = arith.addf %7, %9 : vector<32x256xf32>
    %cst_13 = arith.constant 0.000000e+00 : f32
    %11 = vector.broadcast %cst_13 : f32 to vector<32x256xf32>
    %12 = arith.cmpf ogt, %10, %11 : vector<32x256xf32>
    %cst_14 = arith.constant 1.000000e-01 : f32
    %13 = vector.broadcast %cst_14 : f32 to vector<32x256xf32>
    %14 = arith.mulf %13, %10 : vector<32x256xf32>
    %15 = arith.select %12, %10, %14 : vector<32x256xi1>, vector<32x256xf32>
    %c0_15 = arith.constant 0 : index
    %c32 = arith.constant 32 : index
    %16 = vector.load %arg17[%c0_15, %c32] : memref<32x320xf32, #tpu.memory_space<vmem>>, vector<32x256xf32>
    tpu.vector_store %arg17[%c0_15, %c32], %15 {strides = array<i32>} : memref<32x320xf32, #tpu.memory_space<vmem>>, vector<32x256xf32>,
    %c0_16 = arith.constant 0 : index
    %c30 = arith.constant 30 : index
    %17 = vector.load %arg17[%c0_16, %c30] : memref<32x320xf32, #tpu.memory_space<vmem>>, vector<32x256xf32>
    %c-2_i32 = arith.constant -2 : i32
    %18 = vector.broadcast %c-2_i32 : i32 to vector<1x256xi32>
    %19 = arith.addi %1, %18 : vector<1x256xi32>
    %c0_i32 = arith.constant 0 : i32
    %20 = vector.broadcast %c0_i32 : i32 to vector<1x256xi32>
    %21 = arith.cmpi sge, %19, %20 : vector<1x256xi32>
    %c-2_i32_17 = arith.constant -2 : i32
    %22 = vector.broadcast %c-2_i32_17 : i32 to vector<1x256xi32>
    %23 = arith.addi %1, %22 : vector<1x256xi32>
    %c16_i32 = arith.constant 16 : i32
    %24 = vector.broadcast %c16_i32 : i32 to vector<1x256xi32>
    %25 = arith.cmpi slt, %23, %24 : vector<1x256xi32>
    %26 = arith.andi %21, %25 : vector<1x256xi1>
    %cst_18 = arith.constant 0xFF800000 : f32
    %27 = vector.shape_cast %26 : vector<1x256xi1> to vector<1x256xi1>
    %28 = vector.broadcast %27 : vector<1x256xi1> to vector<32x256xi1>
    %29 = vector.broadcast %cst_18 : f32 to vector<32x256xf32>
    %30 = arith.select %28, %17, %29 : vector<32x256xi1>, vector<32x256xf32>
    %31 = arith.maximumf %15, %30 : vector<32x256xf32>
    %c0_19 = arith.constant 0 : index
    %c31 = arith.constant 31 : index
    %32 = vector.load %arg17[%c0_19, %c31] : memref<32x320xf32, #tpu.memory_space<vmem>>, vector<32x256xf32>
    %c-1_i32 = arith.constant -1 : i32
    %33 = vector.broadcast %c-1_i32 : i32 to vector<1x256xi32>
    %34 = arith.addi %1, %33 : vector<1x256xi32>
    %c0_i32_20 = arith.constant 0 : i32
    %35 = vector.broadcast %c0_i32_20 : i32 to vector<1x256xi32>
    %36 = arith.cmpi sge, %34, %35 : vector<1x256xi32>
    %c-1_i32_21 = arith.constant -1 : i32
    %37 = vector.broadcast %c-1_i32_21 : i32 to vector<1x256xi32>
    %38 = arith.addi %1, %37 : vector<1x256xi32>
    %c16_i32_22 = arith.constant 16 : i32
    %39 = vector.broadcast %c16_i32_22 : i32 to vector<1x256xi32>
    %40 = arith.cmpi slt, %38, %39 : vector<1x256xi32>
    %41 = arith.andi %36, %40 : vector<1x256xi1>
    %cst_23 = arith.constant 0xFF800000 : f32
    %42 = vector.shape_cast %41 : vector<1x256xi1> to vector<1x256xi1>
    %43 = vector.broadcast %42 : vector<1x256xi1> to vector<32x256xi1>
    %44 = vector.broadcast %cst_23 : f32 to vector<32x256xf32>
    %45 = arith.select %43, %32, %44 : vector<32x256xi1>, vector<32x256xf32>
    %46 = arith.maximumf %31, %45 : vector<32x256xf32>
    %c0_24 = arith.constant 0 : index
    %c33 = arith.constant 33 : index
    %47 = vector.load %arg17[%c0_24, %c33] : memref<32x320xf32, #tpu.memory_space<vmem>>, vector<32x256xf32>
    %c1_i32 = arith.constant 1 : i32
    %48 = vector.broadcast %c1_i32 : i32 to vector<1x256xi32>
    %49 = arith.addi %1, %48 : vector<1x256xi32>
    %c0_i32_25 = arith.constant 0 : i32
    %50 = vector.broadcast %c0_i32_25 : i32 to vector<1x256xi32>
    %51 = arith.cmpi sge, %49, %50 : vector<1x256xi32>
    %c1_i32_26 = arith.constant 1 : i32
    %52 = vector.broadcast %c1_i32_26 : i32 to vector<1x256xi32>
    %53 = arith.addi %1, %52 : vector<1x256xi32>
    %c16_i32_27 = arith.constant 16 : i32
    %54 = vector.broadcast %c16_i32_27 : i32 to vector<1x256xi32>
    %55 = arith.cmpi slt, %53, %54 : vector<1x256xi32>
    %56 = arith.andi %51, %55 : vector<1x256xi1>
    %cst_28 = arith.constant 0xFF800000 : f32
    %57 = vector.shape_cast %56 : vector<1x256xi1> to vector<1x256xi1>
    %58 = vector.broadcast %57 : vector<1x256xi1> to vector<32x256xi1>
    %59 = vector.broadcast %cst_28 : f32 to vector<32x256xf32>
    %60 = arith.select %58, %47, %59 : vector<32x256xi1>, vector<32x256xf32>
    %61 = arith.maximumf %46, %60 : vector<32x256xf32>
    %c0_29 = arith.constant 0 : index
    %c34 = arith.constant 34 : index
    %62 = vector.load %arg17[%c0_29, %c34] : memref<32x320xf32, #tpu.memory_space<vmem>>, vector<32x256xf32>
    %c2_i32 = arith.constant 2 : i32
    %63 = vector.broadcast %c2_i32 : i32 to vector<1x256xi32>
    %64 = arith.addi %1, %63 : vector<1x256xi32>
    %c0_i32_30 = arith.constant 0 : i32
    %65 = vector.broadcast %c0_i32_30 : i32 to vector<1x256xi32>
    %66 = arith.cmpi sge, %64, %65 : vector<1x256xi32>
    %c2_i32_31 = arith.constant 2 : i32
    %67 = vector.broadcast %c2_i32_31 : i32 to vector<1x256xi32>
    %68 = arith.addi %1, %67 : vector<1x256xi32>
    %c16_i32_32 = arith.constant 16 : i32
    %69 = vector.broadcast %c16_i32_32 : i32 to vector<1x256xi32>
    %70 = arith.cmpi slt, %68, %69 : vector<1x256xi32>
    %71 = arith.andi %66, %70 : vector<1x256xi1>
    %cst_33 = arith.constant 0xFF800000 : f32
    %72 = vector.shape_cast %71 : vector<1x256xi1> to vector<1x256xi1>
    %73 = vector.broadcast %72 : vector<1x256xi1> to vector<32x256xi1>
    %74 = vector.broadcast %cst_33 : f32 to vector<32x256xf32>
    %75 = arith.select %73, %62, %74 : vector<32x256xi1>, vector<32x256xf32>
    %76 = arith.maximumf %61, %75 : vector<32x256xf32>
    %c0_34 = arith.constant 0 : index
    %c32_35 = arith.constant 32 : index
    %77 = vector.load %arg17[%c0_34, %c32_35] : memref<32x320xf32, #tpu.memory_space<vmem>>, vector<32x256xf32>
    tpu.vector_store %arg17[%c0_34, %c32_35], %76 {strides = array<i32>} : memref<32x320xf32, #tpu.memory_space<vmem>>, vector<32x256xf32>,
    %c0_36 = arith.constant 0 : index
    %c0_37 = arith.constant 0 : index
    %78 = vector.load %arg17[%c0_36, %c0_37] : memref<32x320xf32, #tpu.memory_space<vmem>>, vector<32x256xf32>
    %c-2_i32_38 = arith.constant -2 : i32
    %79 = vector.broadcast %c-2_i32_38 : i32 to vector<1x256xi32>
    %80 = arith.addi %0, %79 : vector<1x256xi32>
    %c0_i32_39 = arith.constant 0 : i32
    %81 = vector.broadcast %c0_i32_39 : i32 to vector<1x256xi32>
    %82 = arith.cmpi sge, %80, %81 : vector<1x256xi32>
    %c-2_i32_40 = arith.constant -2 : i32
    %83 = vector.broadcast %c-2_i32_40 : i32 to vector<1x256xi32>
    %84 = arith.addi %0, %83 : vector<1x256xi32>
    %c16_i32_41 = arith.constant 16 : i32
    %85 = vector.broadcast %c16_i32_41 : i32 to vector<1x256xi32>
    %86 = arith.cmpi slt, %84, %85 : vector<1x256xi32>
    %87 = arith.andi %82, %86 : vector<1x256xi1>
    %cst_42 = arith.constant 0xFF800000 : f32
    %88 = vector.shape_cast %87 : vector<1x256xi1> to vector<1x256xi1>
    %89 = vector.broadcast %88 : vector<1x256xi1> to vector<32x256xi1>
    %90 = vector.broadcast %cst_42 : f32 to vector<32x256xf32>
    %91 = arith.select %89, %78, %90 : vector<32x256xi1>, vector<32x256xf32>
    %92 = arith.maximumf %76, %91 : vector<32x256xf32>
    %c0_43 = arith.constant 0 : index
    %c16 = arith.constant 16 : index
    %93 = vector.load %arg17[%c0_43, %c16] : memref<32x320xf32, #tpu.memory_space<vmem>>, vector<32x256xf32>
    %c-1_i32_44 = arith.constant -1 : i32
    %94 = vector.broadcast %c-1_i32_44 : i32 to vector<1x256xi32>
    %95 = arith.addi %0, %94 : vector<1x256xi32>
    %c0_i32_45 = arith.constant 0 : i32
    %96 = vector.broadcast %c0_i32_45 : i32 to vector<1x256xi32>
    %97 = arith.cmpi sge, %95, %96 : vector<1x256xi32>
    %c-1_i32_46 = arith.constant -1 : i32
    %98 = vector.broadcast %c-1_i32_46 : i32 to vector<1x256xi32>
    %99 = arith.addi %0, %98 : vector<1x256xi32>
    %c16_i32_47 = arith.constant 16 : i32
    %100 = vector.broadcast %c16_i32_47 : i32 to vector<1x256xi32>
    %101 = arith.cmpi slt, %99, %100 : vector<1x256xi32>
    %102 = arith.andi %97, %101 : vector<1x256xi1>
    %cst_48 = arith.constant 0xFF800000 : f32
    %103 = vector.shape_cast %102 : vector<1x256xi1> to vector<1x256xi1>
    %104 = vector.broadcast %103 : vector<1x256xi1> to vector<32x256xi1>
    %105 = vector.broadcast %cst_48 : f32 to vector<32x256xf32>
    %106 = arith.select %104, %93, %105 : vector<32x256xi1>, vector<32x256xf32>
    %107 = arith.maximumf %92, %106 : vector<32x256xf32>
    %c0_49 = arith.constant 0 : index
    %c48 = arith.constant 48 : index
    %108 = vector.load %arg17[%c0_49, %c48] : memref<32x320xf32, #tpu.memory_space<vmem>>, vector<32x256xf32>
    %c1_i32_50 = arith.constant 1 : i32
    %109 = vector.broadcast %c1_i32_50 : i32 to vector<1x256xi32>
    %110 = arith.addi %0, %109 : vector<1x256xi32>
    %c0_i32_51 = arith.constant 0 : i32
    %111 = vector.broadcast %c0_i32_51 : i32 to vector<1x256xi32>
    %112 = arith.cmpi sge, %110, %111 : vector<1x256xi32>
    %c1_i32_52 = arith.constant 1 : i32
    %113 = vector.broadcast %c1_i32_52 : i32 to vector<1x256xi32>
    %114 = arith.addi %0, %113 : vector<1x256xi32>
    %c16_i32_53 = arith.constant 16 : i32
    %115 = vector.broadcast %c16_i32_53 : i32 to vector<1x256xi32>
    %116 = arith.cmpi slt, %114, %115 : vector<1x256xi32>
    %117 = arith.andi %112, %116 : vector<1x256xi1>
    %cst_54 = arith.constant 0xFF800000 : f32
    %118 = vector.shape_cast %117 : vector<1x256xi1> to vector<1x256xi1>
    %119 = vector.broadcast %118 : vector<1x256xi1> to vector<32x256xi1>
    %120 = vector.broadcast %cst_54 : f32 to vector<32x256xf32>
    %121 = arith.select %119, %108, %120 : vector<32x256xi1>, vector<32x256xf32>
    %122 = arith.maximumf %107, %121 : vector<32x256xf32>
    %c0_55 = arith.constant 0 : index
    %c64 = arith.constant 64 : index
    %123 = vector.load %arg17[%c0_55, %c64] : memref<32x320xf32, #tpu.memory_space<vmem>>, vector<32x256xf32>
    %c2_i32_56 = arith.constant 2 : i32
    %124 = vector.broadcast %c2_i32_56 : i32 to vector<1x256xi32>
    %125 = arith.addi %0, %124 : vector<1x256xi32>
    %c0_i32_57 = arith.constant 0 : i32
    %126 = vector.broadcast %c0_i32_57 : i32 to vector<1x256xi32>
    %127 = arith.cmpi sge, %125, %126 : vector<1x256xi32>
    %c2_i32_58 = arith.constant 2 : i32
    %128 = vector.broadcast %c2_i32_58 : i32 to vector<1x256xi32>
    %129 = arith.addi %0, %128 : vector<1x256xi32>
    %c16_i32_59 = arith.constant 16 : i32
    %130 = vector.broadcast %c16_i32_59 : i32 to vector<1x256xi32>
    %131 = arith.cmpi slt, %129, %130 : vector<1x256xi32>
    %132 = arith.andi %127, %131 : vector<1x256xi1>
    %cst_60 = arith.constant 0xFF800000 : f32
    %133 = vector.shape_cast %132 : vector<1x256xi1> to vector<1x256xi1>
    %134 = vector.broadcast %133 : vector<1x256xi1> to vector<32x256xi1>
    %135 = vector.broadcast %cst_60 : f32 to vector<32x256xf32>
    %136 = arith.select %134, %123, %135 : vector<32x256xi1>, vector<32x256xf32>
    %137 = arith.maximumf %122, %136 : vector<32x256xf32>
    %c0_61 = arith.constant 0 : index
    %c32_62 = arith.constant 32 : index
    %138 = vector.load %arg17[%c0_61, %c32_62] : memref<32x320xf32, #tpu.memory_space<vmem>>, vector<32x256xf32>
    tpu.vector_store %arg17[%c0_61, %c32_62], %137 {strides = array<i32>} : memref<32x320xf32, #tpu.memory_space<vmem>>, vector<32x256xf32>,
    %c0_63 = arith.constant 0 : index
    %c30_64 = arith.constant 30 : index
    %139 = vector.load %arg17[%c0_63, %c30_64] : memref<32x320xf32, #tpu.memory_space<vmem>>, vector<32x256xf32>
    %c-2_i32_65 = arith.constant -2 : i32
    %140 = vector.broadcast %c-2_i32_65 : i32 to vector<1x256xi32>
    %141 = arith.addi %1, %140 : vector<1x256xi32>
    %c0_i32_66 = arith.constant 0 : i32
    %142 = vector.broadcast %c0_i32_66 : i32 to vector<1x256xi32>
    %143 = arith.cmpi sge, %141, %142 : vector<1x256xi32>
    %c-2_i32_67 = arith.constant -2 : i32
    %144 = vector.broadcast %c-2_i32_67 : i32 to vector<1x256xi32>
    %145 = arith.addi %1, %144 : vector<1x256xi32>
    %c16_i32_68 = arith.constant 16 : i32
    %146 = vector.broadcast %c16_i32_68 : i32 to vector<1x256xi32>
    %147 = arith.cmpi slt, %145, %146 : vector<1x256xi32>
    %148 = arith.andi %143, %147 : vector<1x256xi1>
    %cst_69 = arith.constant 0xFF800000 : f32
    %149 = vector.shape_cast %148 : vector<1x256xi1> to vector<1x256xi1>
    %150 = vector.broadcast %149 : vector<1x256xi1> to vector<32x256xi1>
    %151 = vector.broadcast %cst_69 : f32 to vector<32x256xf32>
    %152 = arith.select %150, %139, %151 : vector<32x256xi1>, vector<32x256xf32>
    %153 = arith.maximumf %137, %152 : vector<32x256xf32>
    %c0_70 = arith.constant 0 : index
    %c31_71 = arith.constant 31 : index
    %154 = vector.load %arg17[%c0_70, %c31_71] : memref<32x320xf32, #tpu.memory_space<vmem>>, vector<32x256xf32>
    %c-1_i32_72 = arith.constant -1 : i32
    %155 = vector.broadcast %c-1_i32_72 : i32 to vector<1x256xi32>
    %156 = arith.addi %1, %155 : vector<1x256xi32>
    %c0_i32_73 = arith.constant 0 : i32
    %157 = vector.broadcast %c0_i32_73 : i32 to vector<1x256xi32>
    %158 = arith.cmpi sge, %156, %157 : vector<1x256xi32>
    %c-1_i32_74 = arith.constant -1 : i32
    %159 = vector.broadcast %c-1_i32_74 : i32 to vector<1x256xi32>
    %160 = arith.addi %1, %159 : vector<1x256xi32>
    %c16_i32_75 = arith.constant 16 : i32
    %161 = vector.broadcast %c16_i32_75 : i32 to vector<1x256xi32>
    %162 = arith.cmpi slt, %160, %161 : vector<1x256xi32>
    %163 = arith.andi %158, %162 : vector<1x256xi1>
    %cst_76 = arith.constant 0xFF800000 : f32
    %164 = vector.shape_cast %163 : vector<1x256xi1> to vector<1x256xi1>
    %165 = vector.broadcast %164 : vector<1x256xi1> to vector<32x256xi1>
    %166 = vector.broadcast %cst_76 : f32 to vector<32x256xf32>
    %167 = arith.select %165, %154, %166 : vector<32x256xi1>, vector<32x256xf32>
    %168 = arith.maximumf %153, %167 : vector<32x256xf32>
    %c0_77 = arith.constant 0 : index
    %c33_78 = arith.constant 33 : index
    %169 = vector.load %arg17[%c0_77, %c33_78] : memref<32x320xf32, #tpu.memory_space<vmem>>, vector<32x256xf32>
    %c1_i32_79 = arith.constant 1 : i32
    %170 = vector.broadcast %c1_i32_79 : i32 to vector<1x256xi32>
    %171 = arith.addi %1, %170 : vector<1x256xi32>
    %c0_i32_80 = arith.constant 0 : i32
    %172 = vector.broadcast %c0_i32_80 : i32 to vector<1x256xi32>
    %173 = arith.cmpi sge, %171, %172 : vector<1x256xi32>
    %c1_i32_81 = arith.constant 1 : i32
    %174 = vector.broadcast %c1_i32_81 : i32 to vector<1x256xi32>
    %175 = arith.addi %1, %174 : vector<1x256xi32>
    %c16_i32_82 = arith.constant 16 : i32
    %176 = vector.broadcast %c16_i32_82 : i32 to vector<1x256xi32>
    %177 = arith.cmpi slt, %175, %176 : vector<1x256xi32>
    %178 = arith.andi %173, %177 : vector<1x256xi1>
    %cst_83 = arith.constant 0xFF800000 : f32
    %179 = vector.shape_cast %178 : vector<1x256xi1> to vector<1x256xi1>
    %180 = vector.broadcast %179 : vector<1x256xi1> to vector<32x256xi1>
    %181 = vector.broadcast %cst_83 : f32 to vector<32x256xf32>
    %182 = arith.select %180, %169, %181 : vector<32x256xi1>, vector<32x256xf32>
    %183 = arith.maximumf %168, %182 : vector<32x256xf32>
    %c0_84 = arith.constant 0 : index
    %c34_85 = arith.constant 34 : index
    %184 = vector.load %arg17[%c0_84, %c34_85] : memref<32x320xf32, #tpu.memory_space<vmem>>, vector<32x256xf32>
    %c2_i32_86 = arith.constant 2 : i32
    %185 = vector.broadcast %c2_i32_86 : i32 to vector<1x256xi32>
    %186 = arith.addi %1, %185 : vector<1x256xi32>
    %c0_i32_87 = arith.constant 0 : i32
    %187 = vector.broadcast %c0_i32_87 : i32 to vector<1x256xi32>
    %188 = arith.cmpi sge, %186, %187 : vector<1x256xi32>
    %c2_i32_88 = arith.constant 2 : i32
    %189 = vector.broadcast %c2_i32_88 : i32 to vector<1x256xi32>
    %190 = arith.addi %1, %189 : vector<1x256xi32>
    %c16_i32_89 = arith.constant 16 : i32
    %191 = vector.broadcast %c16_i32_89 : i32 to vector<1x256xi32>
    %192 = arith.cmpi slt, %190, %191 : vector<1x256xi32>
    %193 = arith.andi %188, %192 : vector<1x256xi1>
    %cst_90 = arith.constant 0xFF800000 : f32
    %194 = vector.shape_cast %193 : vector<1x256xi1> to vector<1x256xi1>
    %195 = vector.broadcast %194 : vector<1x256xi1> to vector<32x256xi1>
    %196 = vector.broadcast %cst_90 : f32 to vector<32x256xf32>
    %197 = arith.select %195, %184, %196 : vector<32x256xi1>, vector<32x256xf32>
    %198 = arith.maximumf %183, %197 : vector<32x256xf32>
    %c0_91 = arith.constant 0 : index
    %c32_92 = arith.constant 32 : index
    %199 = vector.load %arg17[%c0_91, %c32_92] : memref<32x320xf32, #tpu.memory_space<vmem>>, vector<32x256xf32>
    tpu.vector_store %arg17[%c0_91, %c32_92], %198 {strides = array<i32>} : memref<32x320xf32, #tpu.memory_space<vmem>>, vector<32x256xf32>,
    %c0_93 = arith.constant 0 : index
    %c0_94 = arith.constant 0 : index
    %200 = vector.load %arg17[%c0_93, %c0_94] : memref<32x320xf32, #tpu.memory_space<vmem>>, vector<32x256xf32>
    %c-2_i32_95 = arith.constant -2 : i32
    %201 = vector.broadcast %c-2_i32_95 : i32 to vector<1x256xi32>
    %202 = arith.addi %0, %201 : vector<1x256xi32>
    %c0_i32_96 = arith.constant 0 : i32
    %203 = vector.broadcast %c0_i32_96 : i32 to vector<1x256xi32>
    %204 = arith.cmpi sge, %202, %203 : vector<1x256xi32>
    %c-2_i32_97 = arith.constant -2 : i32
    %205 = vector.broadcast %c-2_i32_97 : i32 to vector<1x256xi32>
    %206 = arith.addi %0, %205 : vector<1x256xi32>
    %c16_i32_98 = arith.constant 16 : i32
    %207 = vector.broadcast %c16_i32_98 : i32 to vector<1x256xi32>
    %208 = arith.cmpi slt, %206, %207 : vector<1x256xi32>
    %209 = arith.andi %204, %208 : vector<1x256xi1>
    %cst_99 = arith.constant 0xFF800000 : f32
    %210 = vector.shape_cast %209 : vector<1x256xi1> to vector<1x256xi1>
    %211 = vector.broadcast %210 : vector<1x256xi1> to vector<32x256xi1>
    %212 = vector.broadcast %cst_99 : f32 to vector<32x256xf32>
    %213 = arith.select %211, %200, %212 : vector<32x256xi1>, vector<32x256xf32>
    %214 = arith.maximumf %198, %213 : vector<32x256xf32>
    %c0_100 = arith.constant 0 : index
    %c16_101 = arith.constant 16 : index
    %215 = vector.load %arg17[%c0_100, %c16_101] : memref<32x320xf32, #tpu.memory_space<vmem>>, vector<32x256xf32>
    %c-1_i32_102 = arith.constant -1 : i32
    %216 = vector.broadcast %c-1_i32_102 : i32 to vector<1x256xi32>
    %217 = arith.addi %0, %216 : vector<1x256xi32>
    %c0_i32_103 = arith.constant 0 : i32
    %218 = vector.broadcast %c0_i32_103 : i32 to vector<1x256xi32>
    %219 = arith.cmpi sge, %217, %218 : vector<1x256xi32>
    %c-1_i32_104 = arith.constant -1 : i32
    %220 = vector.broadcast %c-1_i32_104 : i32 to vector<1x256xi32>
    %221 = arith.addi %0, %220 : vector<1x256xi32>
    %c16_i32_105 = arith.constant 16 : i32
    %222 = vector.broadcast %c16_i32_105 : i32 to vector<1x256xi32>
    %223 = arith.cmpi slt, %221, %222 : vector<1x256xi32>
    %224 = arith.andi %219, %223 : vector<1x256xi1>
    %cst_106 = arith.constant 0xFF800000 : f32
    %225 = vector.shape_cast %224 : vector<1x256xi1> to vector<1x256xi1>
    %226 = vector.broadcast %225 : vector<1x256xi1> to vector<32x256xi1>
    %227 = vector.broadcast %cst_106 : f32 to vector<32x256xf32>
    %228 = arith.select %226, %215, %227 : vector<32x256xi1>, vector<32x256xf32>
    %229 = arith.maximumf %214, %228 : vector<32x256xf32>
    %c0_107 = arith.constant 0 : index
    %c48_108 = arith.constant 48 : index
    %230 = vector.load %arg17[%c0_107, %c48_108] : memref<32x320xf32, #tpu.memory_space<vmem>>, vector<32x256xf32>
    %c1_i32_109 = arith.constant 1 : i32
    %231 = vector.broadcast %c1_i32_109 : i32 to vector<1x256xi32>
    %232 = arith.addi %0, %231 : vector<1x256xi32>
    %c0_i32_110 = arith.constant 0 : i32
    %233 = vector.broadcast %c0_i32_110 : i32 to vector<1x256xi32>
    %234 = arith.cmpi sge, %232, %233 : vector<1x256xi32>
    %c1_i32_111 = arith.constant 1 : i32
    %235 = vector.broadcast %c1_i32_111 : i32 to vector<1x256xi32>
    %236 = arith.addi %0, %235 : vector<1x256xi32>
    %c16_i32_112 = arith.constant 16 : i32
    %237 = vector.broadcast %c16_i32_112 : i32 to vector<1x256xi32>
    %238 = arith.cmpi slt, %236, %237 : vector<1x256xi32>
    %239 = arith.andi %234, %238 : vector<1x256xi1>
    %cst_113 = arith.constant 0xFF800000 : f32
    %240 = vector.shape_cast %239 : vector<1x256xi1> to vector<1x256xi1>
    %241 = vector.broadcast %240 : vector<1x256xi1> to vector<32x256xi1>
    %242 = vector.broadcast %cst_113 : f32 to vector<32x256xf32>
    %243 = arith.select %241, %230, %242 : vector<32x256xi1>, vector<32x256xf32>
    %244 = arith.maximumf %229, %243 : vector<32x256xf32>
    %c0_114 = arith.constant 0 : index
    %c64_115 = arith.constant 64 : index
    %245 = vector.load %arg17[%c0_114, %c64_115] : memref<32x320xf32, #tpu.memory_space<vmem>>, vector<32x256xf32>
    %c2_i32_116 = arith.constant 2 : i32
    %246 = vector.broadcast %c2_i32_116 : i32 to vector<1x256xi32>
    %247 = arith.addi %0, %246 : vector<1x256xi32>
    %c0_i32_117 = arith.constant 0 : i32
    %248 = vector.broadcast %c0_i32_117 : i32 to vector<1x256xi32>
    %249 = arith.cmpi sge, %247, %248 : vector<1x256xi32>
    %c2_i32_118 = arith.constant 2 : i32
    %250 = vector.broadcast %c2_i32_118 : i32 to vector<1x256xi32>
    %251 = arith.addi %0, %250 : vector<1x256xi32>
    %c16_i32_119 = arith.constant 16 : i32
    %252 = vector.broadcast %c16_i32_119 : i32 to vector<1x256xi32>
    %253 = arith.cmpi slt, %251, %252 : vector<1x256xi32>
    %254 = arith.andi %249, %253 : vector<1x256xi1>
    %cst_120 = arith.constant 0xFF800000 : f32
    %255 = vector.shape_cast %254 : vector<1x256xi1> to vector<1x256xi1>
    %256 = vector.broadcast %255 : vector<1x256xi1> to vector<32x256xi1>
    %257 = vector.broadcast %cst_120 : f32 to vector<32x256xf32>
    %258 = arith.select %256, %245, %257 : vector<32x256xi1>, vector<32x256xf32>
    %259 = arith.maximumf %244, %258 : vector<32x256xf32>
    %c0_121 = arith.constant 0 : index
    %c32_122 = arith.constant 32 : index
    %260 = vector.load %arg17[%c0_121, %c32_122] : memref<32x320xf32, #tpu.memory_space<vmem>>, vector<32x256xf32>
    tpu.vector_store %arg17[%c0_121, %c32_122], %259 {strides = array<i32>} : memref<32x320xf32, #tpu.memory_space<vmem>>, vector<32x256xf32>,
    %c0_123 = arith.constant 0 : index
    %c30_124 = arith.constant 30 : index
    %261 = vector.load %arg17[%c0_123, %c30_124] : memref<32x320xf32, #tpu.memory_space<vmem>>, vector<32x256xf32>
    %c-2_i32_125 = arith.constant -2 : i32
    %262 = vector.broadcast %c-2_i32_125 : i32 to vector<1x256xi32>
    %263 = arith.addi %1, %262 : vector<1x256xi32>
    %c0_i32_126 = arith.constant 0 : i32
    %264 = vector.broadcast %c0_i32_126 : i32 to vector<1x256xi32>
    %265 = arith.cmpi sge, %263, %264 : vector<1x256xi32>
    %c-2_i32_127 = arith.constant -2 : i32
    %266 = vector.broadcast %c-2_i32_127 : i32 to vector<1x256xi32>
    %267 = arith.addi %1, %266 : vector<1x256xi32>
    %c16_i32_128 = arith.constant 16 : i32
    %268 = vector.broadcast %c16_i32_128 : i32 to vector<1x256xi32>
    %269 = arith.cmpi slt, %267, %268 : vector<1x256xi32>
    %270 = arith.andi %265, %269 : vector<1x256xi1>
    %cst_129 = arith.constant 0xFF800000 : f32
    %271 = vector.shape_cast %270 : vector<1x256xi1> to vector<1x256xi1>
    %272 = vector.broadcast %271 : vector<1x256xi1> to vector<32x256xi1>
    %273 = vector.broadcast %cst_129 : f32 to vector<32x256xf32>
    %274 = arith.select %272, %261, %273 : vector<32x256xi1>, vector<32x256xf32>
    %275 = arith.maximumf %259, %274 : vector<32x256xf32>
    %c0_130 = arith.constant 0 : index
    %c31_131 = arith.constant 31 : index
    %276 = vector.load %arg17[%c0_130, %c31_131] : memref<32x320xf32, #tpu.memory_space<vmem>>, vector<32x256xf32>
    %c-1_i32_132 = arith.constant -1 : i32
    %277 = vector.broadcast %c-1_i32_132 : i32 to vector<1x256xi32>
    %278 = arith.addi %1, %277 : vector<1x256xi32>
    %c0_i32_133 = arith.constant 0 : i32
    %279 = vector.broadcast %c0_i32_133 : i32 to vector<1x256xi32>
    %280 = arith.cmpi sge, %278, %279 : vector<1x256xi32>
    %c-1_i32_134 = arith.constant -1 : i32
    %281 = vector.broadcast %c-1_i32_134 : i32 to vector<1x256xi32>
    %282 = arith.addi %1, %281 : vector<1x256xi32>
    %c16_i32_135 = arith.constant 16 : i32
    %283 = vector.broadcast %c16_i32_135 : i32 to vector<1x256xi32>
    %284 = arith.cmpi slt, %282, %283 : vector<1x256xi32>
    %285 = arith.andi %280, %284 : vector<1x256xi1>
    %cst_136 = arith.constant 0xFF800000 : f32
    %286 = vector.shape_cast %285 : vector<1x256xi1> to vector<1x256xi1>
    %287 = vector.broadcast %286 : vector<1x256xi1> to vector<32x256xi1>
    %288 = vector.broadcast %cst_136 : f32 to vector<32x256xf32>
    %289 = arith.select %287, %276, %288 : vector<32x256xi1>, vector<32x256xf32>
    %290 = arith.maximumf %275, %289 : vector<32x256xf32>
    %c0_137 = arith.constant 0 : index
    %c33_138 = arith.constant 33 : index
    %291 = vector.load %arg17[%c0_137, %c33_138] : memref<32x320xf32, #tpu.memory_space<vmem>>, vector<32x256xf32>
    %c1_i32_139 = arith.constant 1 : i32
    %292 = vector.broadcast %c1_i32_139 : i32 to vector<1x256xi32>
    %293 = arith.addi %1, %292 : vector<1x256xi32>
    %c0_i32_140 = arith.constant 0 : i32
    %294 = vector.broadcast %c0_i32_140 : i32 to vector<1x256xi32>
    %295 = arith.cmpi sge, %293, %294 : vector<1x256xi32>
    %c1_i32_141 = arith.constant 1 : i32
    %296 = vector.broadcast %c1_i32_141 : i32 to vector<1x256xi32>
    %297 = arith.addi %1, %296 : vector<1x256xi32>
    %c16_i32_142 = arith.constant 16 : i32
    %298 = vector.broadcast %c16_i32_142 : i32 to vector<1x256xi32>
    %299 = arith.cmpi slt, %297, %298 : vector<1x256xi32>
    %300 = arith.andi %295, %299 : vector<1x256xi1>
    %cst_143 = arith.constant 0xFF800000 : f32
    %301 = vector.shape_cast %300 : vector<1x256xi1> to vector<1x256xi1>
    %302 = vector.broadcast %301 : vector<1x256xi1> to vector<32x256xi1>
    %303 = vector.broadcast %cst_143 : f32 to vector<32x256xf32>
    %304 = arith.select %302, %291, %303 : vector<32x256xi1>, vector<32x256xf32>
    %305 = arith.maximumf %290, %304 : vector<32x256xf32>
    %c0_144 = arith.constant 0 : index
    %c34_145 = arith.constant 34 : index
    %306 = vector.load %arg17[%c0_144, %c34_145] : memref<32x320xf32, #tpu.memory_space<vmem>>, vector<32x256xf32>
    %c2_i32_146 = arith.constant 2 : i32
    %307 = vector.broadcast %c2_i32_146 : i32 to vector<1x256xi32>
    %308 = arith.addi %1, %307 : vector<1x256xi32>
    %c0_i32_147 = arith.constant 0 : i32
    %309 = vector.broadcast %c0_i32_147 : i32 to vector<1x256xi32>
    %310 = arith.cmpi sge, %308, %309 : vector<1x256xi32>
    %c2_i32_148 = arith.constant 2 : i32
    %311 = vector.broadcast %c2_i32_148 : i32 to vector<1x256xi32>
    %312 = arith.addi %1, %311 : vector<1x256xi32>
    %c16_i32_149 = arith.constant 16 : i32
    %313 = vector.broadcast %c16_i32_149 : i32 to vector<1x256xi32>
    %314 = arith.cmpi slt, %312, %313 : vector<1x256xi32>
    %315 = arith.andi %310, %314 : vector<1x256xi1>
    %cst_150 = arith.constant 0xFF800000 : f32
    %316 = vector.shape_cast %315 : vector<1x256xi1> to vector<1x256xi1>
    %317 = vector.broadcast %316 : vector<1x256xi1> to vector<32x256xi1>
    %318 = vector.broadcast %cst_150 : f32 to vector<32x256xf32>
    %319 = arith.select %317, %306, %318 : vector<32x256xi1>, vector<32x256xf32>
    %320 = arith.maximumf %305, %319 : vector<32x256xf32>
    %c0_151 = arith.constant 0 : index
    %c32_152 = arith.constant 32 : index
    %321 = vector.load %arg17[%c0_151, %c32_152] : memref<32x320xf32, #tpu.memory_space<vmem>>, vector<32x256xf32>
    tpu.vector_store %arg17[%c0_151, %c32_152], %320 {strides = array<i32>} : memref<32x320xf32, #tpu.memory_space<vmem>>, vector<32x256xf32>,
    %c0_153 = arith.constant 0 : index
    %c0_154 = arith.constant 0 : index
    %322 = vector.load %arg17[%c0_153, %c0_154] : memref<32x320xf32, #tpu.memory_space<vmem>>, vector<32x256xf32>
    %c-2_i32_155 = arith.constant -2 : i32
    %323 = vector.broadcast %c-2_i32_155 : i32 to vector<1x256xi32>
    %324 = arith.addi %0, %323 : vector<1x256xi32>
    %c0_i32_156 = arith.constant 0 : i32
    %325 = vector.broadcast %c0_i32_156 : i32 to vector<1x256xi32>
    %326 = arith.cmpi sge, %324, %325 : vector<1x256xi32>
    %c-2_i32_157 = arith.constant -2 : i32
    %327 = vector.broadcast %c-2_i32_157 : i32 to vector<1x256xi32>
    %328 = arith.addi %0, %327 : vector<1x256xi32>
    %c16_i32_158 = arith.constant 16 : i32
    %329 = vector.broadcast %c16_i32_158 : i32 to vector<1x256xi32>
    %330 = arith.cmpi slt, %328, %329 : vector<1x256xi32>
    %331 = arith.andi %326, %330 : vector<1x256xi1>
    %cst_159 = arith.constant 0xFF800000 : f32
    %332 = vector.shape_cast %331 : vector<1x256xi1> to vector<1x256xi1>
    %333 = vector.broadcast %332 : vector<1x256xi1> to vector<32x256xi1>
    %334 = vector.broadcast %cst_159 : f32 to vector<32x256xf32>
    %335 = arith.select %333, %322, %334 : vector<32x256xi1>, vector<32x256xf32>
    %336 = arith.maximumf %320, %335 : vector<32x256xf32>
    %c0_160 = arith.constant 0 : index
    %c16_161 = arith.constant 16 : index
    %337 = vector.load %arg17[%c0_160, %c16_161] : memref<32x320xf32, #tpu.memory_space<vmem>>, vector<32x256xf32>
    %c-1_i32_162 = arith.constant -1 : i32
    %338 = vector.broadcast %c-1_i32_162 : i32 to vector<1x256xi32>
    %339 = arith.addi %0, %338 : vector<1x256xi32>
    %c0_i32_163 = arith.constant 0 : i32
    %340 = vector.broadcast %c0_i32_163 : i32 to vector<1x256xi32>
    %341 = arith.cmpi sge, %339, %340 : vector<1x256xi32>
    %c-1_i32_164 = arith.constant -1 : i32
    %342 = vector.broadcast %c-1_i32_164 : i32 to vector<1x256xi32>
    %343 = arith.addi %0, %342 : vector<1x256xi32>
    %c16_i32_165 = arith.constant 16 : i32
    %344 = vector.broadcast %c16_i32_165 : i32 to vector<1x256xi32>
    %345 = arith.cmpi slt, %343, %344 : vector<1x256xi32>
    %346 = arith.andi %341, %345 : vector<1x256xi1>
    %cst_166 = arith.constant 0xFF800000 : f32
    %347 = vector.shape_cast %346 : vector<1x256xi1> to vector<1x256xi1>
    %348 = vector.broadcast %347 : vector<1x256xi1> to vector<32x256xi1>
    %349 = vector.broadcast %cst_166 : f32 to vector<32x256xf32>
    %350 = arith.select %348, %337, %349 : vector<32x256xi1>, vector<32x256xf32>
    %351 = arith.maximumf %336, %350 : vector<32x256xf32>
    %c0_167 = arith.constant 0 : index
    %c48_168 = arith.constant 48 : index
    %352 = vector.load %arg17[%c0_167, %c48_168] : memref<32x320xf32, #tpu.memory_space<vmem>>, vector<32x256xf32>
    %c1_i32_169 = arith.constant 1 : i32
    %353 = vector.broadcast %c1_i32_169 : i32 to vector<1x256xi32>
    %354 = arith.addi %0, %353 : vector<1x256xi32>
    %c0_i32_170 = arith.constant 0 : i32
    %355 = vector.broadcast %c0_i32_170 : i32 to vector<1x256xi32>
    %356 = arith.cmpi sge, %354, %355 : vector<1x256xi32>
    %c1_i32_171 = arith.constant 1 : i32
    %357 = vector.broadcast %c1_i32_171 : i32 to vector<1x256xi32>
    %358 = arith.addi %0, %357 : vector<1x256xi32>
    %c16_i32_172 = arith.constant 16 : i32
    %359 = vector.broadcast %c16_i32_172 : i32 to vector<1x256xi32>
    %360 = arith.cmpi slt, %358, %359 : vector<1x256xi32>
    %361 = arith.andi %356, %360 : vector<1x256xi1>
    %cst_173 = arith.constant 0xFF800000 : f32
    %362 = vector.shape_cast %361 : vector<1x256xi1> to vector<1x256xi1>
    %363 = vector.broadcast %362 : vector<1x256xi1> to vector<32x256xi1>
    %364 = vector.broadcast %cst_173 : f32 to vector<32x256xf32>
    %365 = arith.select %363, %352, %364 : vector<32x256xi1>, vector<32x256xf32>
    %366 = arith.maximumf %351, %365 : vector<32x256xf32>
    %c0_174 = arith.constant 0 : index
    %c64_175 = arith.constant 64 : index
    %367 = vector.load %arg17[%c0_174, %c64_175] : memref<32x320xf32, #tpu.memory_space<vmem>>, vector<32x256xf32>
    %c2_i32_176 = arith.constant 2 : i32
    %368 = vector.broadcast %c2_i32_176 : i32 to vector<1x256xi32>
    %369 = arith.addi %0, %368 : vector<1x256xi32>
    %c0_i32_177 = arith.constant 0 : i32
    %370 = vector.broadcast %c0_i32_177 : i32 to vector<1x256xi32>
    %371 = arith.cmpi sge, %369, %370 : vector<1x256xi32>
    %c2_i32_178 = arith.constant 2 : i32
    %372 = vector.broadcast %c2_i32_178 : i32 to vector<1x256xi32>
    %373 = arith.addi %0, %372 : vector<1x256xi32>
    %c16_i32_179 = arith.constant 16 : i32
    %374 = vector.broadcast %c16_i32_179 : i32 to vector<1x256xi32>
    %375 = arith.cmpi slt, %373, %374 : vector<1x256xi32>
    %376 = arith.andi %371, %375 : vector<1x256xi1>
    %cst_180 = arith.constant 0xFF800000 : f32
    %377 = vector.shape_cast %376 : vector<1x256xi1> to vector<1x256xi1>
    %378 = vector.broadcast %377 : vector<1x256xi1> to vector<32x256xi1>
    %379 = vector.broadcast %cst_180 : f32 to vector<32x256xf32>
    %380 = arith.select %378, %367, %379 : vector<32x256xi1>, vector<32x256xf32>
    %381 = arith.maximumf %366, %380 : vector<32x256xf32>
    %c0_181 = arith.constant 0 : index
    %c0_182 = arith.constant 0 : index
    %c0_183 = arith.constant 0 : index
    %382 = vector.load %arg6[%c0_181, %c0_182, %c0_183] : memref<4x32x32xbf16, #tpu.memory_space<vmem>>, vector<1x32x32xbf16>
    %383 = vector.shape_cast %382 : vector<1x32x32xbf16> to vector<32x32xbf16>
    %384 = arith.truncf %15 : vector<32x256xf32> to vector<32x256xbf16>
    %cst_184 = arith.constant dense<0.000000e+00> : vector<32x256xf32>
    %385 = tpu.matmul %383, %384, %cst_184 {dimension_numbers = #tpu.dot_dimension_numbers<[1], [0], [0], [1], [0, 0, 1, 1], [], []>} : vector<32x32xbf16>, vector<32x256xbf16>, vector<32x256xf32> -> vector<32x256xf32>
    %c1 = arith.constant 1 : index
    %c0_185 = arith.constant 0 : index
    %c0_186 = arith.constant 0 : index
    %386 = vector.load %arg6[%c1, %c0_185, %c0_186] : memref<4x32x32xbf16, #tpu.memory_space<vmem>>, vector<1x32x32xbf16>
    %387 = vector.shape_cast %386 : vector<1x32x32xbf16> to vector<32x32xbf16>
    %388 = arith.truncf %137 : vector<32x256xf32> to vector<32x256xbf16>
    %cst_187 = arith.constant dense<0.000000e+00> : vector<32x256xf32>
    %389 = tpu.matmul %387, %388, %cst_187 {dimension_numbers = #tpu.dot_dimension_numbers<[1], [0], [0], [1], [0, 0, 1, 1], [], []>} : vector<32x32xbf16>, vector<32x256xbf16>, vector<32x256xf32> -> vector<32x256xf32>
    %390 = arith.addf %385, %389 : vector<32x256xf32>
    %c2 = arith.constant 2 : index
    %c0_188 = arith.constant 0 : index
    %c0_189 = arith.constant 0 : index
    %391 = vector.load %arg6[%c2, %c0_188, %c0_189] : memref<4x32x32xbf16, #tpu.memory_space<vmem>>, vector<1x32x32xbf16>
    %392 = vector.shape_cast %391 : vector<1x32x32xbf16> to vector<32x32xbf16>
    %393 = arith.truncf %259 : vector<32x256xf32> to vector<32x256xbf16>
    %cst_190 = arith.constant dense<0.000000e+00> : vector<32x256xf32>
    %394 = tpu.matmul %392, %393, %cst_190 {dimension_numbers = #tpu.dot_dimension_numbers<[1], [0], [0], [1], [0, 0, 1, 1], [], []>} : vector<32x32xbf16>, vector<32x256xbf16>, vector<32x256xf32> -> vector<32x256xf32>
    %395 = arith.addf %390, %394 : vector<32x256xf32>
    %c3 = arith.constant 3 : index
    %c0_191 = arith.constant 0 : index
    %c0_192 = arith.constant 0 : index
    %396 = vector.load %arg6[%c3, %c0_191, %c0_192] : memref<4x32x32xbf16, #tpu.memory_space<vmem>>, vector<1x32x32xbf16>
    %397 = vector.shape_cast %396 : vector<1x32x32xbf16> to vector<32x32xbf16>
    %398 = arith.truncf %381 : vector<32x256xf32> to vector<32x256xbf16>
    %cst_193 = arith.constant dense<0.000000e+00> : vector<32x256xf32>
    %399 = tpu.matmul %397, %398, %cst_193 {dimension_numbers = #tpu.dot_dimension_numbers<[1], [0], [0], [1], [0, 0, 1, 1], [], []>} : vector<32x32xbf16>, vector<32x256xbf16>, vector<32x256xf32> -> vector<32x256xf32>
    %400 = arith.addf %395, %399 : vector<32x256xf32>
    %c0_194 = arith.constant 0 : index
    %c0_195 = arith.constant 0 : index
    %401 = vector.load %arg7[%c0_194, %c0_195] : memref<32x1xf32, #tpu.memory_space<vmem>>, vector<32x1xf32>
    %402 = vector.broadcast %401 : vector<32x1xf32> to vector<32x256xf32>
    %403 = arith.addf %400, %402 : vector<32x256xf32>
    %cst_196 = arith.constant 0.000000e+00 : f32
    %404 = vector.broadcast %cst_196 : f32 to vector<32x256xf32>
    %405 = arith.cmpf ogt, %403, %404 : vector<32x256xf32>
    %cst_197 = arith.constant 1.000000e-01 : f32
    %406 = vector.broadcast %cst_197 : f32 to vector<32x256xf32>
    %407 = arith.mulf %406, %403 : vector<32x256xf32>
    %408 = arith.select %405, %403, %407 : vector<32x256xi1>, vector<32x256xf32>
    %c0_198 = arith.constant 0 : index
    %c32_199 = arith.constant 32 : index
    %409 = vector.load %arg17[%c0_198, %c32_199] : memref<32x320xf32, #tpu.memory_space<vmem>>, vector<32x256xf32>
    tpu.vector_store %arg17[%c0_198, %c32_199], %408 {strides = array<i32>} : memref<32x320xf32, #tpu.memory_space<vmem>>, vector<32x256xf32>,
    %c0_200 = arith.constant 0 : index
    %c0_201 = arith.constant 0 : index
    %c0_202 = arith.constant 0 : index
    %410 = vector.load %arg8[%c0_200, %c0_201, %c0_202] : memref<9x64x32xbf16, #tpu.memory_space<vmem>>, vector<1x64x32xbf16>
    %411 = vector.shape_cast %410 : vector<1x64x32xbf16> to vector<64x32xbf16>
    %c0_203 = arith.constant 0 : index
    %c15 = arith.constant 15 : index
    %412 = vector.load %arg17[%c0_203, %c15] : memref<32x320xf32, #tpu.memory_space<vmem>>, vector<32x256xf32>
    %c-1_i32_204 = arith.constant -1 : i32
    %413 = vector.broadcast %c-1_i32_204 : i32 to vector<1x256xi32>
    %414 = arith.addi %0, %413 : vector<1x256xi32>
    %c0_i32_205 = arith.constant 0 : i32
    %415 = vector.broadcast %c0_i32_205 : i32 to vector<1x256xi32>
    %416 = arith.cmpi sge, %414, %415 : vector<1x256xi32>
    %c-1_i32_206 = arith.constant -1 : i32
    %417 = vector.broadcast %c-1_i32_206 : i32 to vector<1x256xi32>
    %418 = arith.addi %0, %417 : vector<1x256xi32>
    %c16_i32_207 = arith.constant 16 : i32
    %419 = vector.broadcast %c16_i32_207 : i32 to vector<1x256xi32>
    %420 = arith.cmpi slt, %418, %419 : vector<1x256xi32>
    %421 = arith.andi %416, %420 : vector<1x256xi1>
    %c-1_i32_208 = arith.constant -1 : i32
    %422 = vector.broadcast %c-1_i32_208 : i32 to vector<1x256xi32>
    %423 = arith.addi %1, %422 : vector<1x256xi32>
    %c0_i32_209 = arith.constant 0 : i32
    %424 = vector.broadcast %c0_i32_209 : i32 to vector<1x256xi32>
    %425 = arith.cmpi sge, %423, %424 : vector<1x256xi32>
    %c-1_i32_210 = arith.constant -1 : i32
    %426 = vector.broadcast %c-1_i32_210 : i32 to vector<1x256xi32>
    %427 = arith.addi %1, %426 : vector<1x256xi32>
    %c16_i32_211 = arith.constant 16 : i32
    %428 = vector.broadcast %c16_i32_211 : i32 to vector<1x256xi32>
    %429 = arith.cmpi slt, %427, %428 : vector<1x256xi32>
    %430 = arith.andi %425, %429 : vector<1x256xi1>
    %431 = arith.andi %421, %430 : vector<1x256xi1>
    %cst_212 = arith.constant 0.000000e+00 : f32
    %432 = vector.shape_cast %431 : vector<1x256xi1> to vector<1x256xi1>
    %433 = vector.broadcast %432 : vector<1x256xi1> to vector<32x256xi1>
    %434 = vector.broadcast %cst_212 : f32 to vector<32x256xf32>
    %435 = arith.select %433, %412, %434 : vector<32x256xi1>, vector<32x256xf32>
    %436 = arith.truncf %435 : vector<32x256xf32> to vector<32x256xbf16>
    %cst_213 = arith.constant dense<0.000000e+00> : vector<64x256xf32>
    %437 = tpu.matmul %411, %436, %cst_213 {dimension_numbers = #tpu.dot_dimension_numbers<[1], [0], [0], [1], [0, 0, 1, 1], [], []>} : vector<64x32xbf16>, vector<32x256xbf16>, vector<64x256xf32> -> vector<64x256xf32>
    %c1_214 = arith.constant 1 : index
    %c0_215 = arith.constant 0 : index
    %c0_216 = arith.constant 0 : index
    %438 = vector.load %arg8[%c1_214, %c0_215, %c0_216] : memref<9x64x32xbf16, #tpu.memory_space<vmem>>, vector<1x64x32xbf16>
    %439 = vector.shape_cast %438 : vector<1x64x32xbf16> to vector<64x32xbf16>
    %c0_217 = arith.constant 0 : index
    %c16_218 = arith.constant 16 : index
    %440 = vector.load %arg17[%c0_217, %c16_218] : memref<32x320xf32, #tpu.memory_space<vmem>>, vector<32x256xf32>
    %c-1_i32_219 = arith.constant -1 : i32
    %441 = vector.broadcast %c-1_i32_219 : i32 to vector<1x256xi32>
    %442 = arith.addi %0, %441 : vector<1x256xi32>
    %c0_i32_220 = arith.constant 0 : i32
    %443 = vector.broadcast %c0_i32_220 : i32 to vector<1x256xi32>
    %444 = arith.cmpi sge, %442, %443 : vector<1x256xi32>
    %c-1_i32_221 = arith.constant -1 : i32
    %445 = vector.broadcast %c-1_i32_221 : i32 to vector<1x256xi32>
    %446 = arith.addi %0, %445 : vector<1x256xi32>
    %c16_i32_222 = arith.constant 16 : i32
    %447 = vector.broadcast %c16_i32_222 : i32 to vector<1x256xi32>
    %448 = arith.cmpi slt, %446, %447 : vector<1x256xi32>
    %449 = arith.andi %444, %448 : vector<1x256xi1>
    %cst_223 = arith.constant 0.000000e+00 : f32
    %450 = vector.shape_cast %449 : vector<1x256xi1> to vector<1x256xi1>
    %451 = vector.broadcast %450 : vector<1x256xi1> to vector<32x256xi1>
    %452 = vector.broadcast %cst_223 : f32 to vector<32x256xf32>
    %453 = arith.select %451, %440, %452 : vector<32x256xi1>, vector<32x256xf32>
    %454 = arith.truncf %453 : vector<32x256xf32> to vector<32x256xbf16>
    %cst_224 = arith.constant dense<0.000000e+00> : vector<64x256xf32>
    %455 = tpu.matmul %439, %454, %cst_224 {dimension_numbers = #tpu.dot_dimension_numbers<[1], [0], [0], [1], [0, 0, 1, 1], [], []>} : vector<64x32xbf16>, vector<32x256xbf16>, vector<64x256xf32> -> vector<64x256xf32>
    %456 = arith.addf %437, %455 : vector<64x256xf32>
    %c2_225 = arith.constant 2 : index
    %c0_226 = arith.constant 0 : index
    %c0_227 = arith.constant 0 : index
    %457 = vector.load %arg8[%c2_225, %c0_226, %c0_227] : memref<9x64x32xbf16, #tpu.memory_space<vmem>>, vector<1x64x32xbf16>
    %458 = vector.shape_cast %457 : vector<1x64x32xbf16> to vector<64x32xbf16>
    %c0_228 = arith.constant 0 : index
    %c17 = arith.constant 17 : index
    %459 = vector.load %arg17[%c0_228, %c17] : memref<32x320xf32, #tpu.memory_space<vmem>>, vector<32x256xf32>
    %c-1_i32_229 = arith.constant -1 : i32
    %460 = vector.broadcast %c-1_i32_229 : i32 to vector<1x256xi32>
    %461 = arith.addi %0, %460 : vector<1x256xi32>
    %c0_i32_230 = arith.constant 0 : i32
    %462 = vector.broadcast %c0_i32_230 : i32 to vector<1x256xi32>
    %463 = arith.cmpi sge, %461, %462 : vector<1x256xi32>
    %c-1_i32_231 = arith.constant -1 : i32
    %464 = vector.broadcast %c-1_i32_231 : i32 to vector<1x256xi32>
    %465 = arith.addi %0, %464 : vector<1x256xi32>
    %c16_i32_232 = arith.constant 16 : i32
    %466 = vector.broadcast %c16_i32_232 : i32 to vector<1x256xi32>
    %467 = arith.cmpi slt, %465, %466 : vector<1x256xi32>
    %468 = arith.andi %463, %467 : vector<1x256xi1>
    %c1_i32_233 = arith.constant 1 : i32
    %469 = vector.broadcast %c1_i32_233 : i32 to vector<1x256xi32>
    %470 = arith.addi %1, %469 : vector<1x256xi32>
    %c0_i32_234 = arith.constant 0 : i32
    %471 = vector.broadcast %c0_i32_234 : i32 to vector<1x256xi32>
    %472 = arith.cmpi sge, %470, %471 : vector<1x256xi32>
    %c1_i32_235 = arith.constant 1 : i32
    %473 = vector.broadcast %c1_i32_235 : i32 to vector<1x256xi32>
    %474 = arith.addi %1, %473 : vector<1x256xi32>
    %c16_i32_236 = arith.constant 16 : i32
    %475 = vector.broadcast %c16_i32_236 : i32 to vector<1x256xi32>
    %476 = arith.cmpi slt, %474, %475 : vector<1x256xi32>
    %477 = arith.andi %472, %476 : vector<1x256xi1>
    %478 = arith.andi %468, %477 : vector<1x256xi1>
    %cst_237 = arith.constant 0.000000e+00 : f32
    %479 = vector.shape_cast %478 : vector<1x256xi1> to vector<1x256xi1>
    %480 = vector.broadcast %479 : vector<1x256xi1> to vector<32x256xi1>
    %481 = vector.broadcast %cst_237 : f32 to vector<32x256xf32>
    %482 = arith.select %480, %459, %481 : vector<32x256xi1>, vector<32x256xf32>
    %483 = arith.truncf %482 : vector<32x256xf32> to vector<32x256xbf16>
    %cst_238 = arith.constant dense<0.000000e+00> : vector<64x256xf32>
    %484 = tpu.matmul %458, %483, %cst_238 {dimension_numbers = #tpu.dot_dimension_numbers<[1], [0], [0], [1], [0, 0, 1, 1], [], []>} : vector<64x32xbf16>, vector<32x256xbf16>, vector<64x256xf32> -> vector<64x256xf32>
    %485 = arith.addf %456, %484 : vector<64x256xf32>
    %c3_239 = arith.constant 3 : index
    %c0_240 = arith.constant 0 : index
    %c0_241 = arith.constant 0 : index
    %486 = vector.load %arg8[%c3_239, %c0_240, %c0_241] : memref<9x64x32xbf16, #tpu.memory_space<vmem>>, vector<1x64x32xbf16>
    %487 = vector.shape_cast %486 : vector<1x64x32xbf16> to vector<64x32xbf16>
    %c0_242 = arith.constant 0 : index
    %c31_243 = arith.constant 31 : index
    %488 = vector.load %arg17[%c0_242, %c31_243] : memref<32x320xf32, #tpu.memory_space<vmem>>, vector<32x256xf32>
    %c-1_i32_244 = arith.constant -1 : i32
    %489 = vector.broadcast %c-1_i32_244 : i32 to vector<1x256xi32>
    %490 = arith.addi %1, %489 : vector<1x256xi32>
    %c0_i32_245 = arith.constant 0 : i32
    %491 = vector.broadcast %c0_i32_245 : i32 to vector<1x256xi32>
    %492 = arith.cmpi sge, %490, %491 : vector<1x256xi32>
    %c-1_i32_246 = arith.constant -1 : i32
    %493 = vector.broadcast %c-1_i32_246 : i32 to vector<1x256xi32>
    %494 = arith.addi %1, %493 : vector<1x256xi32>
    %c16_i32_247 = arith.constant 16 : i32
    %495 = vector.broadcast %c16_i32_247 : i32 to vector<1x256xi32>
    %496 = arith.cmpi slt, %494, %495 : vector<1x256xi32>
    %497 = arith.andi %492, %496 : vector<1x256xi1>
    %cst_248 = arith.constant 0.000000e+00 : f32
    %498 = vector.shape_cast %497 : vector<1x256xi1> to vector<1x256xi1>
    %499 = vector.broadcast %498 : vector<1x256xi1> to vector<32x256xi1>
    %500 = vector.broadcast %cst_248 : f32 to vector<32x256xf32>
    %501 = arith.select %499, %488, %500 : vector<32x256xi1>, vector<32x256xf32>
    %502 = arith.truncf %501 : vector<32x256xf32> to vector<32x256xbf16>
    %cst_249 = arith.constant dense<0.000000e+00> : vector<64x256xf32>
    %503 = tpu.matmul %487, %502, %cst_249 {dimension_numbers = #tpu.dot_dimension_numbers<[1], [0], [0], [1], [0, 0, 1, 1], [], []>} : vector<64x32xbf16>, vector<32x256xbf16>, vector<64x256xf32> -> vector<64x256xf32>
    %504 = arith.addf %485, %503 : vector<64x256xf32>
    %c4 = arith.constant 4 : index
    %c0_250 = arith.constant 0 : index
    %c0_251 = arith.constant 0 : index
    %505 = vector.load %arg8[%c4, %c0_250, %c0_251] : memref<9x64x32xbf16, #tpu.memory_space<vmem>>, vector<1x64x32xbf16>
    %506 = vector.shape_cast %505 : vector<1x64x32xbf16> to vector<64x32xbf16>
    %c0_252 = arith.constant 0 : index
    %c32_253 = arith.constant 32 : index
    %507 = vector.load %arg17[%c0_252, %c32_253] : memref<32x320xf32, #tpu.memory_space<vmem>>, vector<32x256xf32>
    %508 = arith.truncf %507 : vector<32x256xf32> to vector<32x256xbf16>
    %cst_254 = arith.constant dense<0.000000e+00> : vector<64x256xf32>
    %509 = tpu.matmul %506, %508, %cst_254 {dimension_numbers = #tpu.dot_dimension_numbers<[1], [0], [0], [1], [0, 0, 1, 1], [], []>} : vector<64x32xbf16>, vector<32x256xbf16>, vector<64x256xf32> -> vector<64x256xf32>
    %510 = arith.addf %504, %509 : vector<64x256xf32>
    %c5 = arith.constant 5 : index
    %c0_255 = arith.constant 0 : index
    %c0_256 = arith.constant 0 : index
    %511 = vector.load %arg8[%c5, %c0_255, %c0_256] : memref<9x64x32xbf16, #tpu.memory_space<vmem>>, vector<1x64x32xbf16>
    %512 = vector.shape_cast %511 : vector<1x64x32xbf16> to vector<64x32xbf16>
    %c0_257 = arith.constant 0 : index
    %c33_258 = arith.constant 33 : index
    %513 = vector.load %arg17[%c0_257, %c33_258] : memref<32x320xf32, #tpu.memory_space<vmem>>, vector<32x256xf32>
    %c1_i32_259 = arith.constant 1 : i32
    %514 = vector.broadcast %c1_i32_259 : i32 to vector<1x256xi32>
    %515 = arith.addi %1, %514 : vector<1x256xi32>
    %c0_i32_260 = arith.constant 0 : i32
    %516 = vector.broadcast %c0_i32_260 : i32 to vector<1x256xi32>
    %517 = arith.cmpi sge, %515, %516 : vector<1x256xi32>
    %c1_i32_261 = arith.constant 1 : i32
    %518 = vector.broadcast %c1_i32_261 : i32 to vector<1x256xi32>
    %519 = arith.addi %1, %518 : vector<1x256xi32>
    %c16_i32_262 = arith.constant 16 : i32
    %520 = vector.broadcast %c16_i32_262 : i32 to vector<1x256xi32>
    %521 = arith.cmpi slt, %519, %520 : vector<1x256xi32>
    %522 = arith.andi %517, %521 : vector<1x256xi1>
    %cst_263 = arith.constant 0.000000e+00 : f32
    %523 = vector.shape_cast %522 : vector<1x256xi1> to vector<1x256xi1>
    %524 = vector.broadcast %523 : vector<1x256xi1> to vector<32x256xi1>
    %525 = vector.broadcast %cst_263 : f32 to vector<32x256xf32>
    %526 = arith.select %524, %513, %525 : vector<32x256xi1>, vector<32x256xf32>
    %527 = arith.truncf %526 : vector<32x256xf32> to vector<32x256xbf16>
    %cst_264 = arith.constant dense<0.000000e+00> : vector<64x256xf32>
    %528 = tpu.matmul %512, %527, %cst_264 {dimension_numbers = #tpu.dot_dimension_numbers<[1], [0], [0], [1], [0, 0, 1, 1], [], []>} : vector<64x32xbf16>, vector<32x256xbf16>, vector<64x256xf32> -> vector<64x256xf32>
    %529 = arith.addf %510, %528 : vector<64x256xf32>
    %c6 = arith.constant 6 : index
    %c0_265 = arith.constant 0 : index
    %c0_266 = arith.constant 0 : index
    %530 = vector.load %arg8[%c6, %c0_265, %c0_266] : memref<9x64x32xbf16, #tpu.memory_space<vmem>>, vector<1x64x32xbf16>
    %531 = vector.shape_cast %530 : vector<1x64x32xbf16> to vector<64x32xbf16>
    %c0_267 = arith.constant 0 : index
    %c47 = arith.constant 47 : index
    %532 = vector.load %arg17[%c0_267, %c47] : memref<32x320xf32, #tpu.memory_space<vmem>>, vector<32x256xf32>
    %c1_i32_268 = arith.constant 1 : i32
    %533 = vector.broadcast %c1_i32_268 : i32 to vector<1x256xi32>
    %534 = arith.addi %0, %533 : vector<1x256xi32>
    %c0_i32_269 = arith.constant 0 : i32
    %535 = vector.broadcast %c0_i32_269 : i32 to vector<1x256xi32>
    %536 = arith.cmpi sge, %534, %535 : vector<1x256xi32>
    %c1_i32_270 = arith.constant 1 : i32
    %537 = vector.broadcast %c1_i32_270 : i32 to vector<1x256xi32>
    %538 = arith.addi %0, %537 : vector<1x256xi32>
    %c16_i32_271 = arith.constant 16 : i32
    %539 = vector.broadcast %c16_i32_271 : i32 to vector<1x256xi32>
    %540 = arith.cmpi slt, %538, %539 : vector<1x256xi32>
    %541 = arith.andi %536, %540 : vector<1x256xi1>
    %c-1_i32_272 = arith.constant -1 : i32
    %542 = vector.broadcast %c-1_i32_272 : i32 to vector<1x256xi32>
    %543 = arith.addi %1, %542 : vector<1x256xi32>
    %c0_i32_273 = arith.constant 0 : i32
    %544 = vector.broadcast %c0_i32_273 : i32 to vector<1x256xi32>
    %545 = arith.cmpi sge, %543, %544 : vector<1x256xi32>
    %c-1_i32_274 = arith.constant -1 : i32
    %546 = vector.broadcast %c-1_i32_274 : i32 to vector<1x256xi32>
    %547 = arith.addi %1, %546 : vector<1x256xi32>
    %c16_i32_275 = arith.constant 16 : i32
    %548 = vector.broadcast %c16_i32_275 : i32 to vector<1x256xi32>
    %549 = arith.cmpi slt, %547, %548 : vector<1x256xi32>
    %550 = arith.andi %545, %549 : vector<1x256xi1>
    %551 = arith.andi %541, %550 : vector<1x256xi1>
    %cst_276 = arith.constant 0.000000e+00 : f32
    %552 = vector.shape_cast %551 : vector<1x256xi1> to vector<1x256xi1>
    %553 = vector.broadcast %552 : vector<1x256xi1> to vector<32x256xi1>
    %554 = vector.broadcast %cst_276 : f32 to vector<32x256xf32>
    %555 = arith.select %553, %532, %554 : vector<32x256xi1>, vector<32x256xf32>
    %556 = arith.truncf %555 : vector<32x256xf32> to vector<32x256xbf16>
    %cst_277 = arith.constant dense<0.000000e+00> : vector<64x256xf32>
    %557 = tpu.matmul %531, %556, %cst_277 {dimension_numbers = #tpu.dot_dimension_numbers<[1], [0], [0], [1], [0, 0, 1, 1], [], []>} : vector<64x32xbf16>, vector<32x256xbf16>, vector<64x256xf32> -> vector<64x256xf32>
    %558 = arith.addf %529, %557 : vector<64x256xf32>
    %c7 = arith.constant 7 : index
    %c0_278 = arith.constant 0 : index
    %c0_279 = arith.constant 0 : index
    %559 = vector.load %arg8[%c7, %c0_278, %c0_279] : memref<9x64x32xbf16, #tpu.memory_space<vmem>>, vector<1x64x32xbf16>
    %560 = vector.shape_cast %559 : vector<1x64x32xbf16> to vector<64x32xbf16>
    %c0_280 = arith.constant 0 : index
    %c48_281 = arith.constant 48 : index
    %561 = vector.load %arg17[%c0_280, %c48_281] : memref<32x320xf32, #tpu.memory_space<vmem>>, vector<32x256xf32>
    %c1_i32_282 = arith.constant 1 : i32
    %562 = vector.broadcast %c1_i32_282 : i32 to vector<1x256xi32>
    %563 = arith.addi %0, %562 : vector<1x256xi32>
    %c0_i32_283 = arith.constant 0 : i32
    %564 = vector.broadcast %c0_i32_283 : i32 to vector<1x256xi32>
    %565 = arith.cmpi sge, %563, %564 : vector<1x256xi32>
    %c1_i32_284 = arith.constant 1 : i32
    %566 = vector.broadcast %c1_i32_284 : i32 to vector<1x256xi32>
    %567 = arith.addi %0, %566 : vector<1x256xi32>
    %c16_i32_285 = arith.constant 16 : i32
    %568 = vector.broadcast %c16_i32_285 : i32 to vector<1x256xi32>
    %569 = arith.cmpi slt, %567, %568 : vector<1x256xi32>
    %570 = arith.andi %565, %569 : vector<1x256xi1>
    %cst_286 = arith.constant 0.000000e+00 : f32
    %571 = vector.shape_cast %570 : vector<1x256xi1> to vector<1x256xi1>
    %572 = vector.broadcast %571 : vector<1x256xi1> to vector<32x256xi1>
    %573 = vector.broadcast %cst_286 : f32 to vector<32x256xf32>
    %574 = arith.select %572, %561, %573 : vector<32x256xi1>, vector<32x256xf32>
    %575 = arith.truncf %574 : vector<32x256xf32> to vector<32x256xbf16>
    %cst_287 = arith.constant dense<0.000000e+00> : vector<64x256xf32>
    %576 = tpu.matmul %560, %575, %cst_287 {dimension_numbers = #tpu.dot_dimension_numbers<[1], [0], [0], [1], [0, 0, 1, 1], [], []>} : vector<64x32xbf16>, vector<32x256xbf16>, vector<64x256xf32> -> vector<64x256xf32>
    %577 = arith.addf %558, %576 : vector<64x256xf32>
    %c8 = arith.constant 8 : index
    %c0_288 = arith.constant 0 : index
    %c0_289 = arith.constant 0 : index
    %578 = vector.load %arg8[%c8, %c0_288, %c0_289] : memref<9x64x32xbf16, #tpu.memory_space<vmem>>, vector<1x64x32xbf16>
    %579 = vector.shape_cast %578 : vector<1x64x32xbf16> to vector<64x32xbf16>
    %c0_290 = arith.constant 0 : index
    %c49 = arith.constant 49 : index
    %580 = vector.load %arg17[%c0_290, %c49] : memref<32x320xf32, #tpu.memory_space<vmem>>, vector<32x256xf32>
    %c1_i32_291 = arith.constant 1 : i32
    %581 = vector.broadcast %c1_i32_291 : i32 to vector<1x256xi32>
    %582 = arith.addi %0, %581 : vector<1x256xi32>
    %c0_i32_292 = arith.constant 0 : i32
    %583 = vector.broadcast %c0_i32_292 : i32 to vector<1x256xi32>
    %584 = arith.cmpi sge, %582, %583 : vector<1x256xi32>
    %c1_i32_293 = arith.constant 1 : i32
    %585 = vector.broadcast %c1_i32_293 : i32 to vector<1x256xi32>
    %586 = arith.addi %0, %585 : vector<1x256xi32>
    %c16_i32_294 = arith.constant 16 : i32
    %587 = vector.broadcast %c16_i32_294 : i32 to vector<1x256xi32>
    %588 = arith.cmpi slt, %586, %587 : vector<1x256xi32>
    %589 = arith.andi %584, %588 : vector<1x256xi1>
    %c1_i32_295 = arith.constant 1 : i32
    %590 = vector.broadcast %c1_i32_295 : i32 to vector<1x256xi32>
    %591 = arith.addi %1, %590 : vector<1x256xi32>
    %c0_i32_296 = arith.constant 0 : i32
    %592 = vector.broadcast %c0_i32_296 : i32 to vector<1x256xi32>
    %593 = arith.cmpi sge, %591, %592 : vector<1x256xi32>
    %c1_i32_297 = arith.constant 1 : i32
    %594 = vector.broadcast %c1_i32_297 : i32 to vector<1x256xi32>
    %595 = arith.addi %1, %594 : vector<1x256xi32>
    %c16_i32_298 = arith.constant 16 : i32
    %596 = vector.broadcast %c16_i32_298 : i32 to vector<1x256xi32>
    %597 = arith.cmpi slt, %595, %596 : vector<1x256xi32>
    %598 = arith.andi %593, %597 : vector<1x256xi1>
    %599 = arith.andi %589, %598 : vector<1x256xi1>
    %cst_299 = arith.constant 0.000000e+00 : f32
    %600 = vector.shape_cast %599 : vector<1x256xi1> to vector<1x256xi1>
    %601 = vector.broadcast %600 : vector<1x256xi1> to vector<32x256xi1>
    %602 = vector.broadcast %cst_299 : f32 to vector<32x256xf32>
    %603 = arith.select %601, %580, %602 : vector<32x256xi1>, vector<32x256xf32>
    %604 = arith.truncf %603 : vector<32x256xf32> to vector<32x256xbf16>
    %cst_300 = arith.constant dense<0.000000e+00> : vector<64x256xf32>
    %605 = tpu.matmul %579, %604, %cst_300 {dimension_numbers = #tpu.dot_dimension_numbers<[1], [0], [0], [1], [0, 0, 1, 1], [], []>} : vector<64x32xbf16>, vector<32x256xbf16>, vector<64x256xf32> -> vector<64x256xf32>
    %606 = arith.addf %577, %605 : vector<64x256xf32>
    %c0_301 = arith.constant 0 : index
    %c0_302 = arith.constant 0 : index
    %607 = vector.load %arg9[%c0_301, %c0_302] : memref<64x1xf32, #tpu.memory_space<vmem>>, vector<64x1xf32>
    %608 = vector.broadcast %607 : vector<64x1xf32> to vector<64x256xf32>
    %609 = arith.addf %606, %608 : vector<64x256xf32>
    %cst_303 = arith.constant 0.000000e+00 : f32
    %610 = vector.broadcast %cst_303 : f32 to vector<64x256xf32>
    %611 = arith.cmpf ogt, %609, %610 : vector<64x256xf32>
    %cst_304 = arith.constant 1.000000e-01 : f32
    %612 = vector.broadcast %cst_304 : f32 to vector<64x256xf32>
    %613 = arith.mulf %612, %609 : vector<64x256xf32>
    %614 = arith.select %611, %609, %613 : vector<64x256xi1>, vector<64x256xf32>
    %c0_305 = arith.constant 0 : index
    %c0_306 = arith.constant 0 : index
    %615 = vector.load %arg10[%c0_305, %c0_306] : memref<32x64xbf16, #tpu.memory_space<vmem>>, vector<32x64xbf16>
    %616 = arith.truncf %614 : vector<64x256xf32> to vector<64x256xbf16>
    %cst_307 = arith.constant dense<0.000000e+00> : vector<32x256xf32>
    %617 = tpu.matmul %615, %616, %cst_307 {dimension_numbers = #tpu.dot_dimension_numbers<[1], [0], [0], [1], [0, 0, 1, 1], [], []>} : vector<32x64xbf16>, vector<64x256xbf16>, vector<32x256xf32> -> vector<32x256xf32>
    %c0_308 = arith.constant 0 : index
    %c0_309 = arith.constant 0 : index
    %618 = vector.load %arg11[%c0_308, %c0_309] : memref<32x1xf32, #tpu.memory_space<vmem>>, vector<32x1xf32>
    %619 = vector.broadcast %618 : vector<32x1xf32> to vector<32x256xf32>
    %620 = arith.addf %617, %619 : vector<32x256xf32>
    %cst_310 = arith.constant 0.000000e+00 : f32
    %621 = vector.broadcast %cst_310 : f32 to vector<32x256xf32>
    %622 = arith.cmpf ogt, %620, %621 : vector<32x256xf32>
    %cst_311 = arith.constant 1.000000e-01 : f32
    %623 = vector.broadcast %cst_311 : f32 to vector<32x256xf32>
    %624 = arith.mulf %623, %620 : vector<32x256xf32>
    %625 = arith.select %622, %620, %624 : vector<32x256xi1>, vector<32x256xf32>
    %c0_312 = arith.constant 0 : index
    %c32_313 = arith.constant 32 : index
    %626 = vector.load %arg17[%c0_312, %c32_313] : memref<32x320xf32, #tpu.memory_space<vmem>>, vector<32x256xf32>
    tpu.vector_store %arg17[%c0_312, %c32_313], %625 {strides = array<i32>} : memref<32x320xf32, #tpu.memory_space<vmem>>, vector<32x256xf32>,
    %c0_314 = arith.constant 0 : index
    %c0_315 = arith.constant 0 : index
    %c0_316 = arith.constant 0 : index
    %627 = vector.load %arg12[%c0_314, %c0_315, %c0_316] : memref<9x64x32xbf16, #tpu.memory_space<vmem>>, vector<1x64x32xbf16>
    %628 = vector.shape_cast %627 : vector<1x64x32xbf16> to vector<64x32xbf16>
    %c0_317 = arith.constant 0 : index
    %c15_318 = arith.constant 15 : index
    %629 = vector.load %arg17[%c0_317, %c15_318] : memref<32x320xf32, #tpu.memory_space<vmem>>, vector<32x256xf32>
    %c-1_i32_319 = arith.constant -1 : i32
    %630 = vector.broadcast %c-1_i32_319 : i32 to vector<1x256xi32>
    %631 = arith.addi %0, %630 : vector<1x256xi32>
    %c0_i32_320 = arith.constant 0 : i32
    %632 = vector.broadcast %c0_i32_320 : i32 to vector<1x256xi32>
    %633 = arith.cmpi sge, %631, %632 : vector<1x256xi32>
    %c-1_i32_321 = arith.constant -1 : i32
    %634 = vector.broadcast %c-1_i32_321 : i32 to vector<1x256xi32>
    %635 = arith.addi %0, %634 : vector<1x256xi32>
    %c16_i32_322 = arith.constant 16 : i32
    %636 = vector.broadcast %c16_i32_322 : i32 to vector<1x256xi32>
    %637 = arith.cmpi slt, %635, %636 : vector<1x256xi32>
    %638 = arith.andi %633, %637 : vector<1x256xi1>
    %c-1_i32_323 = arith.constant -1 : i32
    %639 = vector.broadcast %c-1_i32_323 : i32 to vector<1x256xi32>
    %640 = arith.addi %1, %639 : vector<1x256xi32>
    %c0_i32_324 = arith.constant 0 : i32
    %641 = vector.broadcast %c0_i32_324 : i32 to vector<1x256xi32>
    %642 = arith.cmpi sge, %640, %641 : vector<1x256xi32>
    %c-1_i32_325 = arith.constant -1 : i32
    %643 = vector.broadcast %c-1_i32_325 : i32 to vector<1x256xi32>
    %644 = arith.addi %1, %643 : vector<1x256xi32>
    %c16_i32_326 = arith.constant 16 : i32
    %645 = vector.broadcast %c16_i32_326 : i32 to vector<1x256xi32>
    %646 = arith.cmpi slt, %644, %645 : vector<1x256xi32>
    %647 = arith.andi %642, %646 : vector<1x256xi1>
    %648 = arith.andi %638, %647 : vector<1x256xi1>
    %cst_327 = arith.constant 0.000000e+00 : f32
    %649 = vector.shape_cast %648 : vector<1x256xi1> to vector<1x256xi1>
    %650 = vector.broadcast %649 : vector<1x256xi1> to vector<32x256xi1>
    %651 = vector.broadcast %cst_327 : f32 to vector<32x256xf32>
    %652 = arith.select %650, %629, %651 : vector<32x256xi1>, vector<32x256xf32>
    %653 = arith.truncf %652 : vector<32x256xf32> to vector<32x256xbf16>
    %cst_328 = arith.constant dense<0.000000e+00> : vector<64x256xf32>
    %654 = tpu.matmul %628, %653, %cst_328 {dimension_numbers = #tpu.dot_dimension_numbers<[1], [0], [0], [1], [0, 0, 1, 1], [], []>} : vector<64x32xbf16>, vector<32x256xbf16>, vector<64x256xf32> -> vector<64x256xf32>
    %c1_329 = arith.constant 1 : index
    %c0_330 = arith.constant 0 : index
    %c0_331 = arith.constant 0 : index
    %655 = vector.load %arg12[%c1_329, %c0_330, %c0_331] : memref<9x64x32xbf16, #tpu.memory_space<vmem>>, vector<1x64x32xbf16>
    %656 = vector.shape_cast %655 : vector<1x64x32xbf16> to vector<64x32xbf16>
    %c0_332 = arith.constant 0 : index
    %c16_333 = arith.constant 16 : index
    %657 = vector.load %arg17[%c0_332, %c16_333] : memref<32x320xf32, #tpu.memory_space<vmem>>, vector<32x256xf32>
    %c-1_i32_334 = arith.constant -1 : i32
    %658 = vector.broadcast %c-1_i32_334 : i32 to vector<1x256xi32>
    %659 = arith.addi %0, %658 : vector<1x256xi32>
    %c0_i32_335 = arith.constant 0 : i32
    %660 = vector.broadcast %c0_i32_335 : i32 to vector<1x256xi32>
    %661 = arith.cmpi sge, %659, %660 : vector<1x256xi32>
    %c-1_i32_336 = arith.constant -1 : i32
    %662 = vector.broadcast %c-1_i32_336 : i32 to vector<1x256xi32>
    %663 = arith.addi %0, %662 : vector<1x256xi32>
    %c16_i32_337 = arith.constant 16 : i32
    %664 = vector.broadcast %c16_i32_337 : i32 to vector<1x256xi32>
    %665 = arith.cmpi slt, %663, %664 : vector<1x256xi32>
    %666 = arith.andi %661, %665 : vector<1x256xi1>
    %cst_338 = arith.constant 0.000000e+00 : f32
    %667 = vector.shape_cast %666 : vector<1x256xi1> to vector<1x256xi1>
    %668 = vector.broadcast %667 : vector<1x256xi1> to vector<32x256xi1>
    %669 = vector.broadcast %cst_338 : f32 to vector<32x256xf32>
    %670 = arith.select %668, %657, %669 : vector<32x256xi1>, vector<32x256xf32>
    %671 = arith.truncf %670 : vector<32x256xf32> to vector<32x256xbf16>
    %cst_339 = arith.constant dense<0.000000e+00> : vector<64x256xf32>
    %672 = tpu.matmul %656, %671, %cst_339 {dimension_numbers = #tpu.dot_dimension_numbers<[1], [0], [0], [1], [0, 0, 1, 1], [], []>} : vector<64x32xbf16>, vector<32x256xbf16>, vector<64x256xf32> -> vector<64x256xf32>
    %673 = arith.addf %654, %672 : vector<64x256xf32>
    %c2_340 = arith.constant 2 : index
    %c0_341 = arith.constant 0 : index
    %c0_342 = arith.constant 0 : index
    %674 = vector.load %arg12[%c2_340, %c0_341, %c0_342] : memref<9x64x32xbf16, #tpu.memory_space<vmem>>, vector<1x64x32xbf16>
    %675 = vector.shape_cast %674 : vector<1x64x32xbf16> to vector<64x32xbf16>
    %c0_343 = arith.constant 0 : index
    %c17_344 = arith.constant 17 : index
    %676 = vector.load %arg17[%c0_343, %c17_344] : memref<32x320xf32, #tpu.memory_space<vmem>>, vector<32x256xf32>
    %c-1_i32_345 = arith.constant -1 : i32
    %677 = vector.broadcast %c-1_i32_345 : i32 to vector<1x256xi32>
    %678 = arith.addi %0, %677 : vector<1x256xi32>
    %c0_i32_346 = arith.constant 0 : i32
    %679 = vector.broadcast %c0_i32_346 : i32 to vector<1x256xi32>
    %680 = arith.cmpi sge, %678, %679 : vector<1x256xi32>
    %c-1_i32_347 = arith.constant -1 : i32
    %681 = vector.broadcast %c-1_i32_347 : i32 to vector<1x256xi32>
    %682 = arith.addi %0, %681 : vector<1x256xi32>
    %c16_i32_348 = arith.constant 16 : i32
    %683 = vector.broadcast %c16_i32_348 : i32 to vector<1x256xi32>
    %684 = arith.cmpi slt, %682, %683 : vector<1x256xi32>
    %685 = arith.andi %680, %684 : vector<1x256xi1>
    %c1_i32_349 = arith.constant 1 : i32
    %686 = vector.broadcast %c1_i32_349 : i32 to vector<1x256xi32>
    %687 = arith.addi %1, %686 : vector<1x256xi32>
    %c0_i32_350 = arith.constant 0 : i32
    %688 = vector.broadcast %c0_i32_350 : i32 to vector<1x256xi32>
    %689 = arith.cmpi sge, %687, %688 : vector<1x256xi32>
    %c1_i32_351 = arith.constant 1 : i32
    %690 = vector.broadcast %c1_i32_351 : i32 to vector<1x256xi32>
    %691 = arith.addi %1, %690 : vector<1x256xi32>
    %c16_i32_352 = arith.constant 16 : i32
    %692 = vector.broadcast %c16_i32_352 : i32 to vector<1x256xi32>
    %693 = arith.cmpi slt, %691, %692 : vector<1x256xi32>
    %694 = arith.andi %689, %693 : vector<1x256xi1>
    %695 = arith.andi %685, %694 : vector<1x256xi1>
    %cst_353 = arith.constant 0.000000e+00 : f32
    %696 = vector.shape_cast %695 : vector<1x256xi1> to vector<1x256xi1>
    %697 = vector.broadcast %696 : vector<1x256xi1> to vector<32x256xi1>
    %698 = vector.broadcast %cst_353 : f32 to vector<32x256xf32>
    %699 = arith.select %697, %676, %698 : vector<32x256xi1>, vector<32x256xf32>
    %700 = arith.truncf %699 : vector<32x256xf32> to vector<32x256xbf16>
    %cst_354 = arith.constant dense<0.000000e+00> : vector<64x256xf32>
    %701 = tpu.matmul %675, %700, %cst_354 {dimension_numbers = #tpu.dot_dimension_numbers<[1], [0], [0], [1], [0, 0, 1, 1], [], []>} : vector<64x32xbf16>, vector<32x256xbf16>, vector<64x256xf32> -> vector<64x256xf32>
    %702 = arith.addf %673, %701 : vector<64x256xf32>
    %c3_355 = arith.constant 3 : index
    %c0_356 = arith.constant 0 : index
    %c0_357 = arith.constant 0 : index
    %703 = vector.load %arg12[%c3_355, %c0_356, %c0_357] : memref<9x64x32xbf16, #tpu.memory_space<vmem>>, vector<1x64x32xbf16>
    %704 = vector.shape_cast %703 : vector<1x64x32xbf16> to vector<64x32xbf16>
    %c0_358 = arith.constant 0 : index
    %c31_359 = arith.constant 31 : index
    %705 = vector.load %arg17[%c0_358, %c31_359] : memref<32x320xf32, #tpu.memory_space<vmem>>, vector<32x256xf32>
    %c-1_i32_360 = arith.constant -1 : i32
    %706 = vector.broadcast %c-1_i32_360 : i32 to vector<1x256xi32>
    %707 = arith.addi %1, %706 : vector<1x256xi32>
    %c0_i32_361 = arith.constant 0 : i32
    %708 = vector.broadcast %c0_i32_361 : i32 to vector<1x256xi32>
    %709 = arith.cmpi sge, %707, %708 : vector<1x256xi32>
    %c-1_i32_362 = arith.constant -1 : i32
    %710 = vector.broadcast %c-1_i32_362 : i32 to vector<1x256xi32>
    %711 = arith.addi %1, %710 : vector<1x256xi32>
    %c16_i32_363 = arith.constant 16 : i32
    %712 = vector.broadcast %c16_i32_363 : i32 to vector<1x256xi32>
    %713 = arith.cmpi slt, %711, %712 : vector<1x256xi32>
    %714 = arith.andi %709, %713 : vector<1x256xi1>
    %cst_364 = arith.constant 0.000000e+00 : f32
    %715 = vector.shape_cast %714 : vector<1x256xi1> to vector<1x256xi1>
    %716 = vector.broadcast %715 : vector<1x256xi1> to vector<32x256xi1>
    %717 = vector.broadcast %cst_364 : f32 to vector<32x256xf32>
    %718 = arith.select %716, %705, %717 : vector<32x256xi1>, vector<32x256xf32>
    %719 = arith.truncf %718 : vector<32x256xf32> to vector<32x256xbf16>
    %cst_365 = arith.constant dense<0.000000e+00> : vector<64x256xf32>
    %720 = tpu.matmul %704, %719, %cst_365 {dimension_numbers = #tpu.dot_dimension_numbers<[1], [0], [0], [1], [0, 0, 1, 1], [], []>} : vector<64x32xbf16>, vector<32x256xbf16>, vector<64x256xf32> -> vector<64x256xf32>
    %721 = arith.addf %702, %720 : vector<64x256xf32>
    %c4_366 = arith.constant 4 : index
    %c0_367 = arith.constant 0 : index
    %c0_368 = arith.constant 0 : index
    %722 = vector.load %arg12[%c4_366, %c0_367, %c0_368] : memref<9x64x32xbf16, #tpu.memory_space<vmem>>, vector<1x64x32xbf16>
    %723 = vector.shape_cast %722 : vector<1x64x32xbf16> to vector<64x32xbf16>
    %c0_369 = arith.constant 0 : index
    %c32_370 = arith.constant 32 : index
    %724 = vector.load %arg17[%c0_369, %c32_370] : memref<32x320xf32, #tpu.memory_space<vmem>>, vector<32x256xf32>
    %725 = arith.truncf %724 : vector<32x256xf32> to vector<32x256xbf16>
    %cst_371 = arith.constant dense<0.000000e+00> : vector<64x256xf32>
    %726 = tpu.matmul %723, %725, %cst_371 {dimension_numbers = #tpu.dot_dimension_numbers<[1], [0], [0], [1], [0, 0, 1, 1], [], []>} : vector<64x32xbf16>, vector<32x256xbf16>, vector<64x256xf32> -> vector<64x256xf32>
    %727 = arith.addf %721, %726 : vector<64x256xf32>
    %c5_372 = arith.constant 5 : index
    %c0_373 = arith.constant 0 : index
    %c0_374 = arith.constant 0 : index
    %728 = vector.load %arg12[%c5_372, %c0_373, %c0_374] : memref<9x64x32xbf16, #tpu.memory_space<vmem>>, vector<1x64x32xbf16>
    %729 = vector.shape_cast %728 : vector<1x64x32xbf16> to vector<64x32xbf16>
    %c0_375 = arith.constant 0 : index
    %c33_376 = arith.constant 33 : index
    %730 = vector.load %arg17[%c0_375, %c33_376] : memref<32x320xf32, #tpu.memory_space<vmem>>, vector<32x256xf32>
    %c1_i32_377 = arith.constant 1 : i32
    %731 = vector.broadcast %c1_i32_377 : i32 to vector<1x256xi32>
    %732 = arith.addi %1, %731 : vector<1x256xi32>
    %c0_i32_378 = arith.constant 0 : i32
    %733 = vector.broadcast %c0_i32_378 : i32 to vector<1x256xi32>
    %734 = arith.cmpi sge, %732, %733 : vector<1x256xi32>
    %c1_i32_379 = arith.constant 1 : i32
    %735 = vector.broadcast %c1_i32_379 : i32 to vector<1x256xi32>
    %736 = arith.addi %1, %735 : vector<1x256xi32>
    %c16_i32_380 = arith.constant 16 : i32
    %737 = vector.broadcast %c16_i32_380 : i32 to vector<1x256xi32>
    %738 = arith.cmpi slt, %736, %737 : vector<1x256xi32>
    %739 = arith.andi %734, %738 : vector<1x256xi1>
    %cst_381 = arith.constant 0.000000e+00 : f32
    %740 = vector.shape_cast %739 : vector<1x256xi1> to vector<1x256xi1>
    %741 = vector.broadcast %740 : vector<1x256xi1> to vector<32x256xi1>
    %742 = vector.broadcast %cst_381 : f32 to vector<32x256xf32>
    %743 = arith.select %741, %730, %742 : vector<32x256xi1>, vector<32x256xf32>
    %744 = arith.truncf %743 : vector<32x256xf32> to vector<32x256xbf16>
    %cst_382 = arith.constant dense<0.000000e+00> : vector<64x256xf32>
    %745 = tpu.matmul %729, %744, %cst_382 {dimension_numbers = #tpu.dot_dimension_numbers<[1], [0], [0], [1], [0, 0, 1, 1], [], []>} : vector<64x32xbf16>, vector<32x256xbf16>, vector<64x256xf32> -> vector<64x256xf32>
    %746 = arith.addf %727, %745 : vector<64x256xf32>
    %c6_383 = arith.constant 6 : index
    %c0_384 = arith.constant 0 : index
    %c0_385 = arith.constant 0 : index
    %747 = vector.load %arg12[%c6_383, %c0_384, %c0_385] : memref<9x64x32xbf16, #tpu.memory_space<vmem>>, vector<1x64x32xbf16>
    %748 = vector.shape_cast %747 : vector<1x64x32xbf16> to vector<64x32xbf16>
    %c0_386 = arith.constant 0 : index
    %c47_387 = arith.constant 47 : index
    %749 = vector.load %arg17[%c0_386, %c47_387] : memref<32x320xf32, #tpu.memory_space<vmem>>, vector<32x256xf32>
    %c1_i32_388 = arith.constant 1 : i32
    %750 = vector.broadcast %c1_i32_388 : i32 to vector<1x256xi32>
    %751 = arith.addi %0, %750 : vector<1x256xi32>
    %c0_i32_389 = arith.constant 0 : i32
    %752 = vector.broadcast %c0_i32_389 : i32 to vector<1x256xi32>
    %753 = arith.cmpi sge, %751, %752 : vector<1x256xi32>
    %c1_i32_390 = arith.constant 1 : i32
    %754 = vector.broadcast %c1_i32_390 : i32 to vector<1x256xi32>
    %755 = arith.addi %0, %754 : vector<1x256xi32>
    %c16_i32_391 = arith.constant 16 : i32
    %756 = vector.broadcast %c16_i32_391 : i32 to vector<1x256xi32>
    %757 = arith.cmpi slt, %755, %756 : vector<1x256xi32>
    %758 = arith.andi %753, %757 : vector<1x256xi1>
    %c-1_i32_392 = arith.constant -1 : i32
    %759 = vector.broadcast %c-1_i32_392 : i32 to vector<1x256xi32>
    %760 = arith.addi %1, %759 : vector<1x256xi32>
    %c0_i32_393 = arith.constant 0 : i32
    %761 = vector.broadcast %c0_i32_393 : i32 to vector<1x256xi32>
    %762 = arith.cmpi sge, %760, %761 : vector<1x256xi32>
    %c-1_i32_394 = arith.constant -1 : i32
    %763 = vector.broadcast %c-1_i32_394 : i32 to vector<1x256xi32>
    %764 = arith.addi %1, %763 : vector<1x256xi32>
    %c16_i32_395 = arith.constant 16 : i32
    %765 = vector.broadcast %c16_i32_395 : i32 to vector<1x256xi32>
    %766 = arith.cmpi slt, %764, %765 : vector<1x256xi32>
    %767 = arith.andi %762, %766 : vector<1x256xi1>
    %768 = arith.andi %758, %767 : vector<1x256xi1>
    %cst_396 = arith.constant 0.000000e+00 : f32
    %769 = vector.shape_cast %768 : vector<1x256xi1> to vector<1x256xi1>
    %770 = vector.broadcast %769 : vector<1x256xi1> to vector<32x256xi1>
    %771 = vector.broadcast %cst_396 : f32 to vector<32x256xf32>
    %772 = arith.select %770, %749, %771 : vector<32x256xi1>, vector<32x256xf32>
    %773 = arith.truncf %772 : vector<32x256xf32> to vector<32x256xbf16>
    %cst_397 = arith.constant dense<0.000000e+00> : vector<64x256xf32>
    %774 = tpu.matmul %748, %773, %cst_397 {dimension_numbers = #tpu.dot_dimension_numbers<[1], [0], [0], [1], [0, 0, 1, 1], [], []>} : vector<64x32xbf16>, vector<32x256xbf16>, vector<64x256xf32> -> vector<64x256xf32>
    %775 = arith.addf %746, %774 : vector<64x256xf32>
    %c7_398 = arith.constant 7 : index
    %c0_399 = arith.constant 0 : index
    %c0_400 = arith.constant 0 : index
    %776 = vector.load %arg12[%c7_398, %c0_399, %c0_400] : memref<9x64x32xbf16, #tpu.memory_space<vmem>>, vector<1x64x32xbf16>
    %777 = vector.shape_cast %776 : vector<1x64x32xbf16> to vector<64x32xbf16>
    %c0_401 = arith.constant 0 : index
    %c48_402 = arith.constant 48 : index
    %778 = vector.load %arg17[%c0_401, %c48_402] : memref<32x320xf32, #tpu.memory_space<vmem>>, vector<32x256xf32>
    %c1_i32_403 = arith.constant 1 : i32
    %779 = vector.broadcast %c1_i32_403 : i32 to vector<1x256xi32>
    %780 = arith.addi %0, %779 : vector<1x256xi32>
    %c0_i32_404 = arith.constant 0 : i32
    %781 = vector.broadcast %c0_i32_404 : i32 to vector<1x256xi32>
    %782 = arith.cmpi sge, %780, %781 : vector<1x256xi32>
    %c1_i32_405 = arith.constant 1 : i32
    %783 = vector.broadcast %c1_i32_405 : i32 to vector<1x256xi32>
    %784 = arith.addi %0, %783 : vector<1x256xi32>
    %c16_i32_406 = arith.constant 16 : i32
    %785 = vector.broadcast %c16_i32_406 : i32 to vector<1x256xi32>
    %786 = arith.cmpi slt, %784, %785 : vector<1x256xi32>
    %787 = arith.andi %782, %786 : vector<1x256xi1>
    %cst_407 = arith.constant 0.000000e+00 : f32
    %788 = vector.shape_cast %787 : vector<1x256xi1> to vector<1x256xi1>
    %789 = vector.broadcast %788 : vector<1x256xi1> to vector<32x256xi1>
    %790 = vector.broadcast %cst_407 : f32 to vector<32x256xf32>
    %791 = arith.select %789, %778, %790 : vector<32x256xi1>, vector<32x256xf32>
    %792 = arith.truncf %791 : vector<32x256xf32> to vector<32x256xbf16>
    %cst_408 = arith.constant dense<0.000000e+00> : vector<64x256xf32>
    %793 = tpu.matmul %777, %792, %cst_408 {dimension_numbers = #tpu.dot_dimension_numbers<[1], [0], [0], [1], [0, 0, 1, 1], [], []>} : vector<64x32xbf16>, vector<32x256xbf16>, vector<64x256xf32> -> vector<64x256xf32>
    %794 = arith.addf %775, %793 : vector<64x256xf32>
    %c8_409 = arith.constant 8 : index
    %c0_410 = arith.constant 0 : index
    %c0_411 = arith.constant 0 : index
    %795 = vector.load %arg12[%c8_409, %c0_410, %c0_411] : memref<9x64x32xbf16, #tpu.memory_space<vmem>>, vector<1x64x32xbf16>
    %796 = vector.shape_cast %795 : vector<1x64x32xbf16> to vector<64x32xbf16>
    %c0_412 = arith.constant 0 : index
    %c49_413 = arith.constant 49 : index
    %797 = vector.load %arg17[%c0_412, %c49_413] : memref<32x320xf32, #tpu.memory_space<vmem>>, vector<32x256xf32>
    %c1_i32_414 = arith.constant 1 : i32
    %798 = vector.broadcast %c1_i32_414 : i32 to vector<1x256xi32>
    %799 = arith.addi %0, %798 : vector<1x256xi32>
    %c0_i32_415 = arith.constant 0 : i32
    %800 = vector.broadcast %c0_i32_415 : i32 to vector<1x256xi32>
    %801 = arith.cmpi sge, %799, %800 : vector<1x256xi32>
    %c1_i32_416 = arith.constant 1 : i32
    %802 = vector.broadcast %c1_i32_416 : i32 to vector<1x256xi32>
    %803 = arith.addi %0, %802 : vector<1x256xi32>
    %c16_i32_417 = arith.constant 16 : i32
    %804 = vector.broadcast %c16_i32_417 : i32 to vector<1x256xi32>
    %805 = arith.cmpi slt, %803, %804 : vector<1x256xi32>
    %806 = arith.andi %801, %805 : vector<1x256xi1>
    %c1_i32_418 = arith.constant 1 : i32
    %807 = vector.broadcast %c1_i32_418 : i32 to vector<1x256xi32>
    %808 = arith.addi %1, %807 : vector<1x256xi32>
    %c0_i32_419 = arith.constant 0 : i32
    %809 = vector.broadcast %c0_i32_419 : i32 to vector<1x256xi32>
    %810 = arith.cmpi sge, %808, %809 : vector<1x256xi32>
    %c1_i32_420 = arith.constant 1 : i32
    %811 = vector.broadcast %c1_i32_420 : i32 to vector<1x256xi32>
    %812 = arith.addi %1, %811 : vector<1x256xi32>
    %c16_i32_421 = arith.constant 16 : i32
    %813 = vector.broadcast %c16_i32_421 : i32 to vector<1x256xi32>
    %814 = arith.cmpi slt, %812, %813 : vector<1x256xi32>
    %815 = arith.andi %810, %814 : vector<1x256xi1>
    %816 = arith.andi %806, %815 : vector<1x256xi1>
    %cst_422 = arith.constant 0.000000e+00 : f32
    %817 = vector.shape_cast %816 : vector<1x256xi1> to vector<1x256xi1>
    %818 = vector.broadcast %817 : vector<1x256xi1> to vector<32x256xi1>
    %819 = vector.broadcast %cst_422 : f32 to vector<32x256xf32>
    %820 = arith.select %818, %797, %819 : vector<32x256xi1>, vector<32x256xf32>
    %821 = arith.truncf %820 : vector<32x256xf32> to vector<32x256xbf16>
    %cst_423 = arith.constant dense<0.000000e+00> : vector<64x256xf32>
    %822 = tpu.matmul %796, %821, %cst_423 {dimension_numbers = #tpu.dot_dimension_numbers<[1], [0], [0], [1], [0, 0, 1, 1], [], []>} : vector<64x32xbf16>, vector<32x256xbf16>, vector<64x256xf32> -> vector<64x256xf32>
    %823 = arith.addf %794, %822 : vector<64x256xf32>
    %c0_424 = arith.constant 0 : index
    %c0_425 = arith.constant 0 : index
    %824 = vector.load %arg13[%c0_424, %c0_425] : memref<64x1xf32, #tpu.memory_space<vmem>>, vector<64x1xf32>
    %825 = vector.broadcast %824 : vector<64x1xf32> to vector<64x256xf32>
    %826 = arith.addf %823, %825 : vector<64x256xf32>
    %cst_426 = arith.constant 0.000000e+00 : f32
    %827 = vector.broadcast %cst_426 : f32 to vector<64x256xf32>
    %828 = arith.cmpf ogt, %826, %827 : vector<64x256xf32>
    %cst_427 = arith.constant 1.000000e-01 : f32
    %829 = vector.broadcast %cst_427 : f32 to vector<64x256xf32>
    %830 = arith.mulf %829, %826 : vector<64x256xf32>
    %831 = arith.select %828, %826, %830 : vector<64x256xi1>, vector<64x256xf32>
    %c0_428 = arith.constant 0 : index
    %c0_429 = arith.constant 0 : index
    %832 = vector.load %arg14[%c0_428, %c0_429] : memref<32x64xbf16, #tpu.memory_space<vmem>>, vector<32x64xbf16>
    %833 = arith.truncf %831 : vector<64x256xf32> to vector<64x256xbf16>
    %cst_430 = arith.constant dense<0.000000e+00> : vector<32x256xf32>
    %834 = tpu.matmul %832, %833, %cst_430 {dimension_numbers = #tpu.dot_dimension_numbers<[1], [0], [0], [1], [0, 0, 1, 1], [], []>} : vector<32x64xbf16>, vector<64x256xbf16>, vector<32x256xf32> -> vector<32x256xf32>
    %c0_431 = arith.constant 0 : index
    %c0_432 = arith.constant 0 : index
    %835 = vector.load %arg15[%c0_431, %c0_432] : memref<32x1xf32, #tpu.memory_space<vmem>>, vector<32x1xf32>
    %836 = vector.broadcast %835 : vector<32x1xf32> to vector<32x256xf32>
    %837 = arith.addf %834, %836 : vector<32x256xf32>
    %cst_433 = arith.constant 0.000000e+00 : f32
    %838 = vector.broadcast %cst_433 : f32 to vector<32x256xf32>
    %839 = arith.cmpf ogt, %837, %838 : vector<32x256xf32>
    %cst_434 = arith.constant 1.000000e-01 : f32
    %840 = vector.broadcast %cst_434 : f32 to vector<32x256xf32>
    %841 = arith.mulf %840, %837 : vector<32x256xf32>
    %842 = arith.select %839, %837, %841 : vector<32x256xi1>, vector<32x256xf32>
    %c0_435 = arith.constant 0 : index
    %c0_436 = arith.constant 0 : index
    %c0_437 = arith.constant 0 : index
    %843 = vector.load %arg16[%c0_435, %c0_436, %c0_437] : memref<1x32x256xf32, #tpu.memory_space<vmem>>, vector<1x32x256xf32>
    %844 = vector.shape_cast %843 : vector<1x32x256xf32> to vector<32x256xf32>
    %845 = vector.shape_cast %842 : vector<32x256xf32> to vector<1x32x256xf32>
    tpu.vector_store %arg16[%c0_435, %c0_436, %c0_437], %845 {strides = array<i32>} : memref<1x32x256xf32, #tpu.memory_space<vmem>>, vector<1x32x256xf32>,
    return
  }
  func.func @transform_0(%arg0: i32) -> (i32, i32, i32) {
    %c0_i32 = arith.constant 0 : i32
    %c0_i32_0 = arith.constant 0 : i32
    %c0_i32_1 = arith.constant 0 : i32
    return %arg0, %c0_i32, %c0_i32_0 : i32, i32, i32
  }
  func.func @transform_1(%arg0: i32) -> (i32, i32) {
    %c0_i32 = arith.constant 0 : i32
    %c0_i32_0 = arith.constant 0 : i32
    %c0_i32_1 = arith.constant 0 : i32
    return %c0_i32, %c0_i32_0 : i32, i32
  }
  func.func @transform_2(%arg0: i32) -> (i32, i32) {
    %c0_i32 = arith.constant 0 : i32
    %c0_i32_0 = arith.constant 0 : i32
    %c0_i32_1 = arith.constant 0 : i32
    return %c0_i32, %c0_i32_0 : i32, i32
  }
  func.func @transform_3(%arg0: i32) -> (i32, i32) {
    %c0_i32 = arith.constant 0 : i32
    %c0_i32_0 = arith.constant 0 : i32
    %c0_i32_1 = arith.constant 0 : i32
    return %c0_i32, %c0_i32_0 : i32, i32
  }
  func.func @transform_4(%arg0: i32) -> (i32, i32) {
    %c0_i32 = arith.constant 0 : i32
    %c0_i32_0 = arith.constant 0 : i32
    %c0_i32_1 = arith.constant 0 : i32
    return %c0_i32, %c0_i32_0 : i32, i32
  }
  func.func @transform_5(%arg0: i32) -> (i32, i32, i32) {
    %c0_i32 = arith.constant 0 : i32
    %c0_i32_0 = arith.constant 0 : i32
    %c0_i32_1 = arith.constant 0 : i32
    %c0_i32_2 = arith.constant 0 : i32
    return %c0_i32, %c0_i32_0, %c0_i32_1 : i32, i32, i32
  }
  func.func @transform_6(%arg0: i32) -> (i32, i32) {
    %c0_i32 = arith.constant 0 : i32
    %c0_i32_0 = arith.constant 0 : i32
    %c0_i32_1 = arith.constant 0 : i32
    return %c0_i32, %c0_i32_0 : i32, i32
  }
  func.func @transform_7(%arg0: i32) -> (i32, i32, i32) {
    %c0_i32 = arith.constant 0 : i32
    %c0_i32_0 = arith.constant 0 : i32
    %c0_i32_1 = arith.constant 0 : i32
    %c0_i32_2 = arith.constant 0 : i32
    return %c0_i32, %c0_i32_0, %c0_i32_1 : i32, i32, i32
  }
  func.func @transform_8(%arg0: i32) -> (i32, i32) {
    %c0_i32 = arith.constant 0 : i32
    %c0_i32_0 = arith.constant 0 : i32
    %c0_i32_1 = arith.constant 0 : i32
    return %c0_i32, %c0_i32_0 : i32, i32
  }
  func.func @transform_9(%arg0: i32) -> (i32, i32) {
    %c0_i32 = arith.constant 0 : i32
    %c0_i32_0 = arith.constant 0 : i32
    %c0_i32_1 = arith.constant 0 : i32
    return %c0_i32, %c0_i32_0 : i32, i32
  }
  func.func @transform_10(%arg0: i32) -> (i32, i32) {
    %c0_i32 = arith.constant 0 : i32
    %c0_i32_0 = arith.constant 0 : i32
    %c0_i32_1 = arith.constant 0 : i32
    return %c0_i32, %c0_i32_0 : i32, i32
  }
  func.func @transform_11(%arg0: i32) -> (i32, i32, i32) {
    %c0_i32 = arith.constant 0 : i32
    %c0_i32_0 = arith.constant 0 : i32
    %c0_i32_1 = arith.constant 0 : i32
    %c0_i32_2 = arith.constant 0 : i32
    return %c0_i32, %c0_i32_0, %c0_i32_1 : i32, i32, i32
  }
  func.func @transform_12(%arg0: i32) -> (i32, i32) {
    %c0_i32 = arith.constant 0 : i32
    %c0_i32_0 = arith.constant 0 : i32
    %c0_i32_1 = arith.constant 0 : i32
    return %c0_i32, %c0_i32_0 : i32, i32
  }
  func.func @transform_13(%arg0: i32) -> (i32, i32) {
    %c0_i32 = arith.constant 0 : i32
    %c0_i32_0 = arith.constant 0 : i32
    %c0_i32_1 = arith.constant 0 : i32
    return %c0_i32, %c0_i32_0 : i32, i32
  }
  func.func @transform_14(%arg0: i32) -> (i32, i32) {
    %c0_i32 = arith.constant 0 : i32
    %c0_i32_0 = arith.constant 0 : i32
    %c0_i32_1 = arith.constant 0 : i32
    return %c0_i32, %c0_i32_0 : i32, i32
  }
  func.func @transform_15(%arg0: i32) -> (i32, i32, i32) {
    %c0_i32 = arith.constant 0 : i32
    %c0_i32_0 = arith.constant 0 : i32
    %c0_i32_1 = arith.constant 0 : i32
    return %arg0, %c0_i32, %c0_i32_0 : i32, i32, i32
  }
}

</mosaic_0001>

<bundles_post_ra>
// kernel: topdown_spp_forward.1
= control target key start
LH: loop header
LB: loop body
LE: loop exit
PB: predicated region body
PF: predicated region fallthrough
CT: control target
= control target key end

     0   :  { %s8392_s18 = smov 0   ;;  %s10921_s0 = inlined_call_operand.vmem [shape: bf16[2,64,256], index: 0, kind: input, shape index: {}]   ;;  %s10922_s1 = inlined_call_operand.vmem [shape: s32[1,256], index: 1, kind: input, shape index: {}]   ;;  %s10923_s2 = inlined_call_operand.vmem [shape: s32[1,256], index: 2, kind: input, shape index: {}]   ;;  %s10924_s3 = inlined_call_operand.vmem [shape: bf16[32,64], index: 3, kind: input, shape index: {}]   ;;  %s10925_s4 = inlined_call_operand.vmem [shape: f32[32,1], index: 4, kind: input, shape index: {}]   ;;  %s10926_s5 = inlined_call_operand.vmem [shape: bf16[4,32,32], index: 5, kind: input, shape index: {}]   ;;  %s10927_s6 = inlined_call_operand.vmem [shape: f32[32,1], index: 6, kind: input, shape index: {}]   ;;  %s10928_s7 = inlined_call_operand.vmem [shape: bf16[9,64,32], index: 7, kind: input, shape index: {}]   ;;  %s10929_s8 = inlined_call_operand.vmem [shape: f32[64,1], index: 8, kind: input, shape index: {}]   ;;  %s10930_s9 = inlined_call_operand.vmem [shape: bf16[32,64], index: 9, kind: input, shape index: {}]   ;;  %s10931_s10 = inlined_call_operand.vmem [shape: f32[32,1], index: 10, kind: input, shape index: {}]   ;;  %s10932_s11 = inlined_call_operand.vmem [shape: bf16[9,64,32], index: 11, kind: input, shape index: {}]   ;;  %s10933_s12 = inlined_call_operand.vmem [shape: f32[64,1], index: 12, kind: input, shape index: {}]   ;;  %s10934_s13 = inlined_call_operand.vmem [shape: bf16[32,64], index: 13, kind: input, shape index: {}]   ;;  %s10935_s14 = inlined_call_operand.vmem [shape: f32[32,1], index: 14, kind: input, shape index: {}]   ;;  %s10936_s15 = inlined_call_operand.vmem [shape: f32[2,32,256], index: 15, kind: output, shape index: {}]  }
   0x1 LB: > { %s6791_s19 = sadd.s32 4294967295, %s8295_s18   ;;  %p6795_p0 = scmp.ge.s32.totalorder %s8295_s18, 1  ;;  %s8295_s18 = sphi %s8392_s18, %s25_s18  }
   0x2   : > { %p437_p1 = scmp.lt.s32.totalorder %s8295_s18, 3 }
   0x4   : > { %p438_p2 = pnand %p6795_p0, %p437_p1 }
   0x5   : > { %p485_p3 = scmp.lt.s32.totalorder (!%p438_p2), %s6791_s19, 1  ;;  %v8297_v0 = vmov (!%p438_p2), 0   ;;  %v523_v1 = vld [vmem:[%s10925_s4] sm:$0xff] (!%p438_p2)  ;;  %v524_v2 = vld [vmem:[%s10925_s4 + $0x8] sm:$0xff] (!%p438_p2)  ;;  %v525_v3 = vld [vmem:[%s10925_s4 + $0x10] sm:$0xff] (!%p438_p2)  ;;  %vm10937_vm0 = vcmask (!%p438_p2), 523264  }
   0x6   : > { %441 = sbr.rel (%p438_p2) target bundleno = 4098 (0x1002), region = 80  ;;  %635 = vmatprep.mubr.bf16.mxu0 (!%p438_p2), %v8297_v0  ;;  %7619 = vset.pattern.permute.xlu0 (!%p438_p2), %v8297_v0  ;;  %v526_v4 = vld [vmem:[%s10925_s4 + $0x18] sm:$0xff] (!%p438_p2)  ;;  %v8203_v13 = vld [vmem:[%s10924_s3] sm:$0xff] (!%p438_p2)   ;;  %v8204_v14 = vld [vmem:[%s10924_s3 + $0x8] sm:$0xff] (!%p438_p2)   ;;  %v8298_v15 = vmov (!%p438_p2), 0.0   ;;  %s8299_s23 = smov (!%p438_p2), 32  }
   0x7   : > { %7620 = vset.pattern.permute.xlu1 (!%p438_p2), %v8297_v0  ;;  %2622 = vmatprep.mubr.bf16.mxu1 (!%p438_p2), %v8297_v0  ;;  %498 = vst [vmem:[#allocation2] sm:$0xff] (!%p438_p2), %v8298_v15  ;;  %501 = vst.msk [vmem:[#allocation2 + $0x10] sm:$0xff] (!%p438_p2), %vm10937_vm0, %v8298_v15  ;;  %vm10943_vm9 = vcmask (!%p438_p2), 1047808   ;;  %vm10942_vm10 = vcmask (!%p438_p2), 261120   ;;  %s8300_s24 = smov (!%p438_p2), 98   ;;  %s10988_s25 = smov (!%p438_p2), 97  }
   0x8   : > { %529 = vperm.xlu0 (!%p438_p2), %7619, %v523_v1   ;;  %539 = vperm.xlu1 (!%p438_p2), %7620, %v525_v3   ;;  %502 = vst [vmem:[#allocation2 + $0x18] sm:$0xff] (!%p438_p2), %v8298_v15  ;;  %504 = vst.msk [vmem:[#allocation2 + $0x28] sm:$0xff] (!%p438_p2), %vm10937_vm0, %v8298_v15  ;;  %s10984_s27 = smov (!%p438_p2), 95   ;;  %s8303_s28 = smov (!%p438_p2), 94  }
   0x9   : > { %505 = vst [vmem:[#allocation2 + $0x30] sm:$0xff] (!%p438_p2), %v8298_v15  ;;  %507 = vst.msk [vmem:[#allocation2 + $0x40] sm:$0xff] (!%p438_p2), %vm10937_vm0, %v8298_v15  ;;  %s10980_s17 = smov (!%p438_p2), 80   ;;  %s8306_s20 = smov (!%p438_p2), 64  }
   0xa   : > { %508 = vst [vmem:[#allocation2 + $0x48] sm:$0xff] (!%p438_p2), %v8298_v15  ;;  %510 = vst.msk [vmem:[#allocation2 + $0x58] sm:$0xff] (!%p438_p2), %vm10937_vm0, %v8298_v15  ;;  %v751_v15 = vlaneseq (!%p438_p2)  ;;  %s8307_s30 = smov (!%p438_p2), 113   ;;  %s10982_s21 = smov (!%p438_p2), 81  }
   0xb   : > { %s11251_s22 = smov (!%p438_p2), 80  }
   0xc   : > { %534 = vperm.xlu0 (!%p438_p2), %7619, %v524_v2   ;;  %544 = vperm.xlu1 (!%p438_p2), %7620, %v526_v4  }
   0xd   : > { %s11476_s19 = smov (!%p485_p3, %s6791_s19), 1 }
   0xe   : > { %s10979_s26 = sshll.u32 %s11476_s19, 6 }
   0xf   : > { %s489_s16 = scalar_lea.vmem %s10921_s0, %s10979_s26  ;;  %s8311_s26 = smov 79  }
  0x10   : > { %v8191_v5 = vld [vmem:[%s489_s16 + $0x4] ss:$8 sps:$4 sm:$0xff]   ;;  %v8193_v6 = vld [vmem:[%s489_s16] ss:$8 sps:$4 sm:$0xff]   ;;  %v8194_v7 = vld [vmem:[%s489_s16 + $0x14] ss:$8 sps:$4 sm:$0xff]  }
  0x11   : > { %603 = vmatprep.subr.bf16.mxu0 %v8191_v5  ;;  %v8196_v8 = vld [vmem:[%s489_s16 + $0x10] ss:$8 sps:$4 sm:$0xff]   ;;  %v8197_v9 = vld [vmem:[%s489_s16 + $0x24] ss:$8 sps:$4 sm:$0xff]   ;;  %v8199_v10 = vld [vmem:[%s489_s16 + $0x20] ss:$8 sps:$4 sm:$0xff]  }
  0x12   : > { %604 = vmatpush1.bf16.msra.mxu0 %v8193_v6  ;;  %v8200_v11 = vld [vmem:[%s489_s16 + $0x34] ss:$8 sps:$4 sm:$0xff]   ;;  %v8202_v12 = vld [vmem:[%s489_s16 + $0x30] ss:$8 sps:$4 sm:$0xff]   ;;  %s8304_s16 = smov 112  }
  0x13   : > { %605 = vmatprep.subr.bf16.mxu0 %v8194_v7 }
  0x16   : > { %606 = vmatpush1.bf16.msra.mxu0 %v8196_v8 }
  0x17   : > { %607 = vmatprep.subr.bf16.mxu0 %v8197_v9 }
  0x1a   : > { %608 = vmatpush1.bf16.msra.mxu0 %v8199_v10 }
  0x1b   : > { %609 = vmatprep.subr.bf16.mxu0 %v8200_v11 }
  0x1e   : > { %610 = vmatpush1.bf16.msra.mxu0 %v8202_v12 }
  0x21   : > { %6810 = vmatmul.mubr.msk.bf16.vlgmr.msra.gmra.mrb[0].mxu0 %vm10937_vm0, %v8203_v13  ;;  %v497_v13 = vld [vmem:[%s10923_s2] sm:$0x3] }
  0x22   : > { %645 = vmatprep.mubr.bf16.mxu0 %v8297_v0 }
  0x29   : > { %6811 = vmatmul.mubr.msk.bf16.gmra.mrb[4].mxu0 %vm10937_vm0, %v8204_v14  ;;  %v746_v14 = vadd.s32 4294967294, %v497_v13 }
  0x2a   : > { %2553 = vmatprep.mubr.bf16.mxu0 %v8297_v0 }
  0x2b   : > { %vm747_vm11 = vcmp.ge.s32.totalorder %v746_v14, 0  ;;  %vm748_vm12 = vcmp.lt.s32.totalorder %v746_v14, 16 }
  0x2c   : > { %vm749_vm15 = vmand %vm747_vm11, %vm748_vm12  ;;  %vm10940_vm11 = vcmask 793600  }
  0x87   : > { %v530_v16 = vpop.permute.xlu0 %529  ;;  %v540_v20 = vpop.permute.xlu1 %539 }
  0x8b   : > { %v535_v21 = vpop.permute.xlu0 %534  ;;  %v545_v36 = vpop.permute.xlu1 %544 }
  0xf4   : > { %v637_v17 = vpop.f32.mrb[0].mxu0 }
  0xf5   : > { %v638_v18 = vadd.f32 %v637_v17, %v530_v16  ;;  %v639_v19 = vpop.f32.mrb[1].mxu0 }
  0xf6   : > { %v640_v22 = vadd.f32 %v639_v19, %v530_v16  ;;  %v641_v23 = vpop.f32.mrb[2].mxu0  ;;  %v902_v19 = vadd.s32 1, %v497_v13 }
  0xf7   : > { %v664_v24 = vmul.f32 0.1, %v638_v18  ;;  %v642_v25 = vadd.f32 %v641_v23, %v535_v21  ;;  %v643_v26 = vpop.f32.mrb[3].mxu0  ;;  %vm656_vm1 = vcmp.gt.f32.partialorder %v638_v18, 0.0  ;;  %v974_v23 = vadd.s32 2, %v497_v13 }
  0xf8   : > { %v665_v27 = vmul.f32 0.1, %v640_v22  ;;  %v644_v28 = vadd.f32 %v643_v26, %v535_v21  ;;  %vm657_vm2 = vcmp.gt.f32.partialorder %v640_v22, 0.0  ;;  %v750_v26 = vsel %vm749_vm15, 1, %v8297_v0 }
  0xf9   : > { %v666_v29 = vmul.f32 0.1, %v642_v25  ;;  %v8438_v30 = vsel %vm656_vm1, %v638_v18, %v664_v24  ;;  %vm658_vm3 = vcmp.gt.f32.partialorder %v642_v25, 0.0  ;;  %v830_v18 = vadd.s32 4294967295, %v497_v13 }
  0xfa   : > { %v667_v31 = vmul.f32 0.1, %v644_v28  ;;  %688 = vrot.lane.b32.xlu0 %v8438_v30, %s8299_s23  ;;  %v8442_v32 = vsel %vm657_vm2, %v640_v22, %v665_v27  ;;  %vm659_vm4 = vcmp.gt.f32.partialorder %v644_v28, 0.0  ;;  %vm903_vm1 = vcmp.ge.s32.totalorder %v902_v19, 0 }
  0xfb   : > { %690 = vrot.lane.b32.xlu1 %v8442_v32, %s8299_s23  ;;  %v8446_v33 = vsel %vm658_vm3, %v642_v25, %v666_v29  ;;  %vm831_vm13 = vcmp.ge.s32.totalorder %v830_v18, 0  ;;  %vm832_vm14 = vcmp.lt.s32.totalorder %v830_v18, 16  ;;  %vm904_vm2 = vcmp.lt.s32.totalorder %v902_v19, 16 }
  0xfc   : > { %v8448_v34 = vsel %vm659_vm4, %v644_v28, %v667_v31  ;;  %v647_v35 = vpop.f32.mrb[4].mxu0  ;;  %v2492_v40 = vpack.c.bf16 %v8446_v33, %v8438_v30  ;;  %vm8545_vm3 = vmand %vm831_vm13, %vm832_vm14  ;;  %v11013_v25 = vmov 0  ;;  %v11015_v29 = vmov 0 }
  0xfd   : > { %v2493_v37 = vpack.c.bf16 %v8448_v34, %v8442_v32  ;;  %v648_v38 = vadd.f32 %v647_v35, %v540_v20  ;;  %v649_v39 = vpop.f32.mrb[5].mxu0  ;;  %v11014_v25 = vsel %vm8545_vm3, 4294967295, %v11013_v25  ;;  %vm8550_vm4 = vmand %vm903_vm1, %vm904_vm2  ;;  %v834_v31 = vsel %vm8545_vm3, 1, %v8297_v0 }
  0xfe   : > { %692 = vrot.lane.b32.xlu0 %v8446_v33, %s8299_s23  ;;  %v650_v41 = vadd.f32 %v649_v39, %v540_v20  ;;  %v651_v42 = vpop.f32.mrb[6].mxu0  ;;  %v752_v20 = vshrl.u32 %v751_v15, 7  ;;  %v11016_v29 = vsel %vm8550_vm4, 4294967295, %v11015_v29  ;;  %vm10939_vm13 = vcmask 777216  }
  0xff   : > { %694 = vrot.lane.b32.xlu1 %v8448_v34, %s8299_s23  ;;  %2590 = vmatprep.subr.bf16.mxu1 %v2493_v37  ;;  %v668_v43 = vmul.f32 0.1, %v648_v38  ;;  %v652_v44 = vadd.f32 %v651_v42, %v545_v36  ;;  %v653_v45 = vpop.f32.mrb[7].mxu0  ;;  %vm660_vm5 = vcmp.gt.f32.partialorder %v648_v38, 0.0  ;;  %v906_v37 = vsel %vm8550_vm4, 1, %v8297_v0 }
 0x100   : > { %2591 = vmatpush1.bf16.msra.mxu1 %v2492_v40  ;;  %v669_v46 = vmul.f32 0.1, %v650_v41  ;;  %v654_v47 = vadd.f32 %v653_v45, %v545_v36  ;;  %vm661_vm6 = vcmp.gt.f32.partialorder %v650_v41, 0.0  ;;  %v8543_v24 = vsub.s32 0, %v752_v20 }
 0x101   : > { %v8458_v48 = vsel %vm660_vm5, %v648_v38, %v668_v43  ;;  %vm662_vm7 = vcmp.gt.f32.partialorder %v652_v44, 0.0  ;;  %v670_v49 = vmul.f32 0.1, %v652_v44  ;;  %v8557_v35 = vsub.s32 1, %v752_v20 }
 0x102   : > { %v671_v50 = vmul.f32 0.1, %v654_v47  ;;  %v8460_v51 = vsel %vm661_vm6, %v650_v41, %v669_v46  ;;  %696 = vrot.lane.b32.xlu0 %v8458_v48, %s8299_s23  ;;  %vm663_vm8 = vcmp.gt.f32.partialorder %v654_v47, 0.0  ;;  %vm975_vm5 = vcmp.ge.s32.totalorder %v974_v23, 0 }
 0x103   : > { %698 = vrot.lane.b32.xlu1 %v8460_v51, %s8299_s23  ;;  %v8466_v52 = vsel %vm662_vm7, %v652_v44, %v670_v49  ;;  %vm976_vm6 = vcmp.lt.s32.totalorder %v974_v23, 16  ;;  %v754_v36 = vrot.slane %v750_v26, %v8543_v24  ;;  %vm10941_vm7 = vcmask 801792  }
 0x104   : > { %v8468_v53 = vsel %vm663_vm8, %v654_v47, %v671_v50  ;;  %v2494_v54 = vpack.c.bf16 %v8466_v52, %v8458_v48  ;;  %v838_v40 = vrot.slane %v834_v31, %v8543_v24  ;;  %vm977_vm8 = vmand %vm975_vm5, %vm976_vm6  ;;  %v758_v41 = vrot.slane %v750_v26, %v8557_v35 }
 0x105   : > { %v2495_v55 = vpack.c.bf16 %v8468_v53, %v8460_v51  ;;  %v910_v42 = vrot.slane %v906_v37, %v8543_v24  ;;  %vm8566_vm12 = vcmp.eq.s32.totalorder %v754_v36, 1  ;;  %v978_v47 = vsel %vm977_vm8, 1, %v8297_v0 }
 0x106   : > { %700 = vrot.lane.b32.xlu0 %v8466_v52, %s8299_s23  ;;  %vm8572_vm14 = vcmp.eq.s32.totalorder %v838_v40, 1  ;;  %vm8580_vm15 = vcmp.eq.s32.totalorder %v758_v41, 1  ;;  %vm10938_vm5 = vcmask 769024   ;;  %v11031_v20 = vmov 0 }
 0x107   : > { %702 = vrot.lane.b32.xlu1 %v8468_v53, %s8299_s23  ;;  %2592 = vmatprep.subr.bf16.mxu1 %v2495_v55  ;;  %vm8584_vm1 = vcmp.eq.s32.totalorder %v910_v42, 1 }
 0x108   : > { %2593 = vmatpush1.bf16.msra.mxu1 %v2494_v54  ;;  %v842_v54 = vrot.slane %v834_v31, %v8557_v35 }
 0x10a   : > { %vm8595_vm2 = vcmp.eq.s32.totalorder %v842_v54, 1 }
 0x16c   : > { %v689_v56 = vpop.permute.xlu0 %688 }
 0x16d   : > { %722 = vst.msk [vmem:[#allocation2] sm:$0xff] %vm10943_vm9, %v689_v56  ;;  %v691_v57 = vpop.permute.xlu1 %690 }
 0x16e   : > { %v705_v58 = vsel %vm10942_vm10, %v689_v56, %v691_v57  ;;  %724 = vst.msk [vmem:[#allocation2 + $0x10] sm:$0xff] %vm10942_vm10, %v691_v57 }
 0x16f   : > { %775 = vrot.lane.b32.xlu1 %v705_v58, %s8300_s24 }
 0x170   : > { %v693_v59 = vpop.permute.xlu0 %692 }
 0x171   : > { %725 = vst.msk [vmem:[#allocation2 + $0x18] sm:$0xff] %vm10943_vm9, %v693_v59  ;;  %v695_v60 = vpop.permute.xlu1 %694 }
 0x172   : > { %727 = vst.msk [vmem:[#allocation2 + $0x28] sm:$0xff] %vm10942_vm10, %v695_v60  ;;  %v706_v5 = vsel %vm10942_vm10, %v693_v59, %v695_v60  ;;  %v914_v60 = vrot.slane %v906_v37, %v8557_v35 }
 0x174   : > { %v734_v61 = vld [vmem:[#allocation2] sm:$0xff]  ;;  %v697_v62 = vpop.permute.xlu0 %696  ;;  %vm8604_vm6 = vcmp.eq.s32.totalorder %v914_v60, 1 }
 0x175   : > { %773 = vrot.lane.b32.xlu0 %v734_v61, %s8300_s24  ;;  %v699_v63 = vpop.permute.xlu1 %698  ;;  %728 = vst.msk [vmem:[#allocation2 + $0x30] sm:$0xff] %vm10943_vm9, %v697_v62  ;;  %v736_v4 = vld [vmem:[#allocation2 + $0x10] sm:$0xff] }
 0x176   : > { %730 = vst.msk [vmem:[#allocation2 + $0x40] sm:$0xff] %vm10942_vm10, %v699_v63  ;;  %v707_v7 = vsel %vm10942_vm10, %v697_v62, %v699_v63 }
 0x178   : > { %v737_v1 = vld [vmem:[#allocation2 + $0x18] sm:$0xff]  ;;  %v701_v2 = vpop.permute.xlu0 %700 }
 0x179   : > { %845 = vrot.lane.b32.xlu0 %v734_v61, %s10988_s25  ;;  %779 = vrot.lane.b32.xlu1 %v737_v1, %s8300_s24  ;;  %v703_v3 = vpop.permute.xlu1 %702  ;;  %731 = vst.msk [vmem:[#allocation2 + $0x48] sm:$0xff] %vm10943_vm9, %v701_v2  ;;  %v739_v6 = vld [vmem:[#allocation2 + $0x28] sm:$0xff] }
 0x17a   : > { %733 = vst.msk [vmem:[#allocation2 + $0x58] sm:$0xff] %vm10942_vm10, %v703_v3  ;;  %v708_v11 = vsel %vm10942_vm10, %v701_v2, %v703_v3  ;;  %v8219_v3 = vld [vmem:[%s10928_s7 + $0x10] sm:$0xff]  }
 0x17c   : > { %v740_v8 = vld [vmem:[#allocation2 + $0x30] sm:$0xff] }
 0x17d   : > { %917 = vrot.lane.b32.xlu0 %v734_v61, %s10984_s27  ;;  %847 = vrot.lane.b32.xlu1 %v705_v58, %s10988_s25  ;;  %v742_v10 = vld [vmem:[#allocation2 + $0x40] sm:$0xff] }
 0x180   : > { %v743_v9 = vld [vmem:[#allocation2 + $0x48] sm:$0xff] }
 0x181   : > { %989 = vrot.lane.b32.xlu0 %v734_v61, %s8303_s28  ;;  %851 = vrot.lane.b32.xlu1 %v737_v1, %s10988_s25  ;;  %v745_v12 = vld [vmem:[#allocation2 + $0x58] sm:$0xff]  ;;  %v982_v61 = vrot.slane %v978_v47, %v8543_v24 }
 0x183   : > { %vm8608_vm8 = vcmp.eq.s32.totalorder %v982_v61, 1 }
 0x185   : > { %777 = vrot.lane.b32.xlu0 %v736_v4, %s8300_s24  ;;  %919 = vrot.lane.b32.xlu1 %v705_v58, %s10984_s27 }
 0x189   : > { %849 = vrot.lane.b32.xlu0 %v736_v4, %s10988_s25  ;;  %923 = vrot.lane.b32.xlu1 %v737_v1, %s10984_s27 }
 0x18d   : > { %921 = vrot.lane.b32.xlu0 %v736_v4, %s10984_s27  ;;  %991 = vrot.lane.b32.xlu1 %v705_v58, %s8303_s28 }
 0x191   : > { %993 = vrot.lane.b32.xlu0 %v736_v4, %s8303_s28  ;;  %995 = vrot.lane.b32.xlu1 %v737_v1, %s8303_s28 }
 0x195   : > { %781 = vrot.lane.b32.xlu0 %v706_v5, %s8300_s24  ;;  %783 = vrot.lane.b32.xlu1 %v739_v6, %s8300_s24 }
 0x199   : > { %853 = vrot.lane.b32.xlu0 %v706_v5, %s10988_s25  ;;  %855 = vrot.lane.b32.xlu1 %v739_v6, %s10988_s25 }
 0x19d   : > { %925 = vrot.lane.b32.xlu0 %v706_v5, %s10984_s27  ;;  %927 = vrot.lane.b32.xlu1 %v739_v6, %s10984_s27 }
 0x1a1   : > { %997 = vrot.lane.b32.xlu0 %v706_v5, %s8303_s28  ;;  %999 = vrot.lane.b32.xlu1 %v739_v6, %s8303_s28 }
 0x1a5   : > { %785 = vrot.lane.b32.xlu0 %v740_v8, %s8300_s24  ;;  %787 = vrot.lane.b32.xlu1 %v707_v7, %s8300_s24 }
 0x1a9   : > { %857 = vrot.lane.b32.xlu0 %v740_v8, %s10988_s25  ;;  %791 = vrot.lane.b32.xlu1 %v743_v9, %s8300_s24 }
 0x1ad   : > { %929 = vrot.lane.b32.xlu0 %v740_v8, %s10984_s27  ;;  %859 = vrot.lane.b32.xlu1 %v707_v7, %s10988_s25 }
 0x1b1   : > { %1001 = vrot.lane.b32.xlu0 %v740_v8, %s8303_s28  ;;  %863 = vrot.lane.b32.xlu1 %v743_v9, %s10988_s25  ;;  %v11027_v8 = vmov 0 }
 0x1b2   : > { %v11028_v8 = vsel %vm8604_vm6, 4294967295, %v11027_v8 }
 0x1b5   : > { %789 = vrot.lane.b32.xlu0 %v742_v10, %s8300_s24  ;;  %931 = vrot.lane.b32.xlu1 %v707_v7, %s10984_s27 }
 0x1b9   : > { %861 = vrot.lane.b32.xlu0 %v742_v10, %s10988_s25  ;;  %935 = vrot.lane.b32.xlu1 %v743_v9, %s10984_s27 }
 0x1bd   : > { %933 = vrot.lane.b32.xlu0 %v742_v10, %s10984_s27  ;;  %1003 = vrot.lane.b32.xlu1 %v707_v7, %s8303_s28 }
 0x1c1   : > { %1005 = vrot.lane.b32.xlu0 %v742_v10, %s8303_s28  ;;  %1007 = vrot.lane.b32.xlu1 %v743_v9, %s8303_s28  ;;  %v986_v9 = vrot.slane %v978_v47, %v8557_v35 }
 0x1c3   : > { %vm8622_vm0 = vcmp.eq.s32.totalorder %v986_v9, 1 }
 0x1c4   : > { %v11032_v20 = vsel %vm8622_vm0, 4294967295, %v11031_v20 }
 0x1c5   : > { %793 = vrot.lane.b32.xlu0 %v708_v11, %s8300_s24  ;;  %795 = vrot.lane.b32.xlu1 %v745_v12, %s8300_s24 }
 0x1c9   : > { %865 = vrot.lane.b32.xlu0 %v708_v11, %s10988_s25  ;;  %867 = vrot.lane.b32.xlu1 %v745_v12, %s10988_s25 }
 0x1cd   : > { %937 = vrot.lane.b32.xlu0 %v708_v11, %s10984_s27  ;;  %939 = vrot.lane.b32.xlu1 %v745_v12, %s10984_s27 }
 0x1d1   : > { %1009 = vrot.lane.b32.xlu0 %v708_v11, %s8303_s28  ;;  %1011 = vrot.lane.b32.xlu1 %v745_v12, %s8303_s28 }
 0x1e1   : > { %v776_v17 = vpop.permute.xlu1 %775 }
 0x1e7   : > { %v774_v16 = vpop.permute.xlu0 %773 }
 0x1e8   : > { %v798_v44 = vsel %vm10941_vm7, %v774_v16, %v776_v17 }
 0x1e9   : > { %v814_v55 = vsel %vm8566_vm12, %v798_v44, -inf }
 0x1ea   : > { %v822_v2 = vmax.f32 %v8438_v30, %v814_v55  ;;  %v11029_v30 = vmov 0 }
 0x1eb   : > { %v846_v21 = vpop.permute.xlu0 %845  ;;  %v8541_v22 = vpop.permute.xlu1 %779  ;;  %v11030_v30 = vsel %vm8608_vm8, 4294967295, %v11029_v30 }
 0x1ef   : > { %v918_v27 = vpop.permute.xlu0 %917  ;;  %v848_v28 = vpop.permute.xlu1 %847 }
 0x1f0   : > { %v870_v50 = vsel %vm10940_vm11, %v846_v21, %v848_v28 }
 0x1f1   : > { %v886_v62 = vsel %vm8572_vm14, %v870_v50, -inf }
 0x1f2   : > { %v894_v7 = vmax.f32 %v822_v2, %v886_v62 }
 0x1f3   : > { %v990_v38 = vpop.permute.xlu0 %989  ;;  %v852_v39 = vpop.permute.xlu1 %851 }
 0x1f7   : > { %v778_v45 = vpop.permute.xlu0 %777  ;;  %v920_v46 = vpop.permute.xlu1 %919 }
 0x1f8   : > { %v799_v58 = vsel %vm10941_vm7, %v776_v17, %v778_v45  ;;  %v942_v59 = vsel %vm10939_vm13, %v918_v27, %v920_v46 }
 0x1f9   : > { %v815_v5 = vsel %vm8580_vm15, %v799_v58, -inf  ;;  %v958_v6 = vsel %vm8584_vm1, %v942_v59, -inf }
 0x1fa   : > { %v823_v13 = vmax.f32 %v8442_v32, %v815_v5  ;;  %v966_v14 = vmax.f32 %v894_v7, %v958_v6 }
 0x1fb   : > { %v850_v63 = vpop.permute.xlu0 %849  ;;  %v924_v1 = vpop.permute.xlu1 %923 }
 0x1fc   : > { %v871_v4 = vsel %vm10940_vm11, %v848_v28, %v850_v63 }
 0x1fd   : > { %v887_v10 = vsel %vm8595_vm2, %v871_v4, -inf }
 0x1fe   : > { %v895_v19 = vmax.f32 %v823_v13, %v887_v10 }
 0x1ff   : > { %v922_v11 = vpop.permute.xlu0 %921  ;;  %v992_v12 = vpop.permute.xlu1 %991 }
 0x200   : > { %v943_v15 = vsel %vm10939_vm13, %v920_v46, %v922_v11  ;;  %v1014_v16 = vsel %vm10938_vm5, %v990_v38, %v992_v12 }
 0x201   : > { %v959_v17 = vsel %vm8604_vm6, %v943_v15, -inf  ;;  %v1030_v18 = vsel %vm8608_vm8, %v1014_v16, -inf }
 0x202   : > { %v8626_v21 = vmax.f32 %v966_v14, %v1030_v18  ;;  %v967_v26 = vmax.f32 %v895_v19, %v959_v17 }
 0x203   : > { %v994_v23 = vpop.permute.xlu0 %993  ;;  %v996_v32 = vpop.permute.xlu1 %995 }
 0x204   : > { %v1015_v27 = vsel %vm10938_vm5, %v992_v12, %v994_v23  ;;  %1054 = vrot.lane.b32.xlu0 %v8626_v21, %s8299_s23 }
 0x205   : > { %v1031_v28 = vsel %vm8622_vm0, %v1015_v27, -inf }
 0x206   : > { %v8633_v31 = vmax.f32 %v967_v26, %v1031_v28 }
 0x207   : > { %v782_v36 = vpop.permute.xlu0 %781  ;;  %v784_v37 = vpop.permute.xlu1 %783 }
 0x208   : > { %1056 = vrot.lane.b32.xlu1 %v8633_v31, %s8299_s23  ;;  %v800_v38 = vsel %vm10941_vm7, %v8541_v22, %v782_v36  ;;  %v801_v40 = vsel %vm10941_vm7, %v782_v36, %v784_v37 }
 0x209   : > { %v816_v46 = vsel %vm8566_vm12, %v800_v38, -inf  ;;  %v817_v47 = vsel %vm8580_vm15, %v801_v40, -inf }
 0x20a   : > { %v824_v58 = vmax.f32 %v8446_v33, %v816_v46 }
 0x20b   : > { %v854_v41 = vpop.permute.xlu0 %853  ;;  %v856_v42 = vpop.permute.xlu1 %855 }
 0x20c   : > { %v872_v44 = vsel %vm10940_vm11, %v852_v39, %v854_v41  ;;  %v873_v45 = vsel %vm10940_vm11, %v854_v41, %v856_v42  ;;  %v825_v39 = vmax.f32 %v8448_v34, %v817_v47 }
 0x20d   : > { %v888_v50 = vsel %vm8572_vm14, %v872_v44, -inf  ;;  %v889_v22 = vsel %vm8595_vm2, %v873_v45, -inf }
 0x20e   : > { %v896_v63 = vmax.f32 %v824_v58, %v888_v50  ;;  %v897_v2 = vmax.f32 %v825_v39, %v889_v22 }
 0x20f   : > { %v926_v54 = vpop.permute.xlu0 %925  ;;  %v928_v55 = vpop.permute.xlu1 %927 }
 0x210   : > { %v944_v59 = vsel %vm10939_vm13, %v924_v1, %v926_v54  ;;  %v945_v60 = vsel %vm10939_vm13, %v926_v54, %v928_v55 }
 0x211   : > { %v960_v61 = vsel %vm8584_vm1, %v944_v59, -inf  ;;  %v961_v62 = vsel %vm8604_vm6, %v945_v60, -inf }
 0x212   : > { %v968_v6 = vmax.f32 %v896_v63, %v960_v61  ;;  %v969_v7 = vmax.f32 %v897_v2, %v961_v62 }
 0x213   : > { %v998_v4 = vpop.permute.xlu0 %997  ;;  %v1000_v5 = vpop.permute.xlu1 %999 }
 0x214   : > { %v1016_v33 = vsel %vm10938_vm5, %v996_v32, %v998_v4  ;;  %v1017_v34 = vsel %vm10938_vm5, %v998_v4, %v1000_v5 }
 0x215   : > { %v1032_v1 = vsel %vm8608_vm8, %v1016_v33, -inf  ;;  %v1033_v9 = vsel %vm8622_vm0, %v1017_v34, -inf }
 0x216   : > { %v8664_v10 = vmax.f32 %v969_v7, %v1033_v9  ;;  %v8666_v11 = vmax.f32 %v968_v6, %v1032_v1 }
 0x217   : > { %v786_v12 = vpop.permute.xlu0 %785  ;;  %v788_v13 = vpop.permute.xlu1 %787 }
 0x218   : > { %1058 = vrot.lane.b32.xlu0 %v8666_v11, %s8299_s23  ;;  %1060 = vrot.lane.b32.xlu1 %v8664_v10, %s8299_s23  ;;  %v802_v23 = vsel %vm10941_vm7, %v786_v12, %v788_v13 }
 0x219   : > { %v818_v28 = vsel %vm8566_vm12, %v802_v23, -inf }
 0x21a   : > { %v826_v42 = vmax.f32 %v8458_v48, %v818_v28 }
 0x21b   : > { %v858_v14 = vpop.permute.xlu0 %857  ;;  %v792_v15 = vpop.permute.xlu1 %791 }
 0x21f   : > { %v930_v16 = vpop.permute.xlu0 %929  ;;  %v860_v17 = vpop.permute.xlu1 %859 }
 0x220   : > { %v874_v27 = vsel %vm10940_vm11, %v858_v14, %v860_v17 }
 0x221   : > { %v890_v38 = vsel %vm8572_vm14, %v874_v27, -inf }
 0x222   : > { %v898_v47 = vmax.f32 %v826_v42, %v890_v38 }
 0x223   : > { %v1002_v18 = vpop.permute.xlu0 %1001  ;;  %v864_v19 = vpop.permute.xlu1 %863 }
 0x227   : > { %v790_v32 = vpop.permute.xlu0 %789  ;;  %v932_v26 = vpop.permute.xlu1 %931 }
 0x228   : > { %v803_v36 = vsel %vm10941_vm7, %v788_v13, %v790_v32  ;;  %v946_v37 = vsel %vm10939_vm13, %v930_v16, %v932_v26 }
 0x229   : > { %v819_v45 = vsel %vm8580_vm15, %v803_v36, -inf  ;;  %v962_v46 = vsel %vm8584_vm1, %v946_v37, -inf }
 0x22a   : > { %v827_v55 = vmax.f32 %v8460_v51, %v819_v45  ;;  %v970_v58 = vmax.f32 %v898_v47, %v962_v46 }
 0x22b   : > { %v862_v40 = vpop.permute.xlu0 %861  ;;  %v936_v41 = vpop.permute.xlu1 %935 }
 0x22c   : > { %v875_v44 = vsel %vm10940_vm11, %v860_v17, %v862_v40 }
 0x22d   : > { %v891_v50 = vsel %vm8595_vm2, %v875_v44, -inf }
 0x22e   : > { %v899_v61 = vmax.f32 %v827_v55, %v891_v50 }
 0x22f   : > { %v934_v22 = vpop.permute.xlu0 %933  ;;  %v1004_v54 = vpop.permute.xlu1 %1003 }
 0x230   : > { %v947_v39 = vsel %vm10939_vm13, %v932_v26, %v934_v22  ;;  %v1018_v48 = vsel %vm10938_vm5, %v1002_v18, %v1004_v54 }
 0x231   : > { %v963_v59 = vsel %vm8604_vm6, %v947_v39, -inf  ;;  %v1034_v60 = vsel %vm8608_vm8, %v1018_v48, -inf }
 0x232   : > { %v8695_v62 = vmax.f32 %v970_v58, %v1034_v60  ;;  %v971_v4 = vmax.f32 %v899_v61, %v963_v59 }
 0x233   : > { %v1006_v63 = vpop.permute.xlu0 %1005  ;;  %v1008_v2 = vpop.permute.xlu1 %1007 }
 0x234   : > { %v1019_v5 = vsel %vm10938_vm5, %v1004_v54, %v1006_v63  ;;  %1062 = vrot.lane.b32.xlu0 %v8695_v62, %s8299_s23 }
 0x235   : > { %v1035_v51 = vsel %vm8622_vm0, %v1019_v5, -inf }
 0x236   : > { %v8702_v6 = vmax.f32 %v971_v4, %v1035_v51 }
 0x237   : > { %v794_v7 = vpop.permute.xlu0 %793  ;;  %v796_v33 = vpop.permute.xlu1 %795 }
 0x238   : > { %1064 = vrot.lane.b32.xlu1 %v8702_v6, %s8299_s23  ;;  %v804_v34 = vsel %vm10941_vm7, %v792_v15, %v794_v7  ;;  %v805_v1 = vsel %vm10941_vm7, %v794_v7, %v796_v33 }
 0x239   : > { %v820_v16 = vsel %vm8566_vm12, %v804_v34, -inf  ;;  %v821_v17 = vsel %vm8580_vm15, %v805_v1, -inf }
 0x23a   : > { %v828_v26 = vmax.f32 %v8466_v52, %v820_v16 }
 0x23b   : > { %v866_v9 = vpop.permute.xlu0 %865  ;;  %v868_v12 = vpop.permute.xlu1 %867 }
 0x23c   : > { %v876_v13 = vsel %vm10940_vm11, %v864_v19, %v866_v9  ;;  %v877_v14 = vsel %vm10940_vm11, %v866_v9, %v868_v12  ;;  %v829_v19 = vmax.f32 %v8468_v53, %v821_v17 }
 0x23d   : > { %v892_v18 = vsel %vm8572_vm14, %v876_v13, -inf  ;;  %v893_v15 = vsel %vm8595_vm2, %v877_v14, -inf  ;;  %v496_v14 = vld [vmem:[%s10922_s1] sm:$0x3] }
 0x23e   : > { %v900_v38 = vmax.f32 %v828_v26, %v892_v18  ;;  %v901_v40 = vmax.f32 %v829_v19, %v893_v15  ;;  %v1106_v16 = vadd.s32 4294967294, %v496_v14  ;;  %v1141_v17 = vadd.s32 4294967295, %v496_v14 }
 0x23f   : > { %v938_v23 = vpop.permute.xlu0 %937  ;;  %v940_v32 = vpop.permute.xlu1 %939  ;;  %v1225_v18 = vadd.s32 1, %v496_v14  ;;  %v1297_v15 = vadd.s32 2, %v496_v14  ;;  %v11035_v26 = vmov 0 }
 0x240   : > { %v948_v27 = vsel %vm10939_vm13, %v936_v41, %v938_v23  ;;  %v949_v28 = vsel %vm10939_vm13, %v938_v23, %v940_v32  ;;  %vm1108_vm13 = vcmp.lt.s32.totalorder %v1106_v16, 16  ;;  %vm1142_vm11 = vcmp.ge.s32.totalorder %v1141_v17, 0 }
 0x241   : > { %v964_v36 = vsel %vm8584_vm1, %v948_v27, -inf  ;;  %v965_v37 = vsel %vm8604_vm6, %v949_v28, -inf  ;;  %vm1143_vm7 = vcmp.lt.s32.totalorder %v1141_v17, 16  ;;  %vm1227_vm4 = vcmp.lt.s32.totalorder %v1225_v18, 16 }
 0x242   : > { %v972_v45 = vmax.f32 %v900_v38, %v964_v36  ;;  %v973_v46 = vmax.f32 %v901_v40, %v965_v37  ;;  %vm8831_vm3 = vmand %vm1142_vm11, %vm1143_vm7  ;;  %v11033_v23 = vmov 0 }
 0x243   : > { %v1010_v42 = vpop.permute.xlu0 %1009  ;;  %v1012_v44 = vpop.permute.xlu1 %1011  ;;  %v11034_v23 = vsel %vm8831_vm3, 4294967295, %v11033_v23  ;;  %v1145_v27 = vsel %vm8831_vm3, 1, %v8297_v0 }
 0x244   : > { %v1020_v52 = vsel %vm10938_vm5, %v1008_v2, %v1010_v42  ;;  %v1021_v53 = vsel %vm10938_vm5, %v1010_v42, %v1012_v44  ;;  %vm1107_vm5 = vcmp.ge.s32.totalorder %v1106_v16, 0  ;;  %v1149_v40 = vrot.slane %v1145_v27, %v8543_v24 }
 0x245   : > { %v1036_v41 = vsel %vm8608_vm8, %v1020_v52, -inf  ;;  %v1037_v47 = vsel %vm8622_vm0, %v1021_v53, -inf  ;;  %vm1298_vm8 = vcmp.ge.s32.totalorder %v1297_v15, 0  ;;  %v11039_v53 = vmov 0 }
 0x246   : > { %v8732_v50 = vmax.f32 %v973_v46, %v1037_v47  ;;  %v8734_v22 = vmax.f32 %v972_v45, %v1036_v41  ;;  %vm8855_vm11 = vcmp.eq.s32.totalorder %v1149_v40, 1  ;;  %v1153_v47 = vrot.slane %v1145_v27, %v8557_v35 }
 0x247   : > { %v11040_v53 = vsel %vm8855_vm11, 4294967295, %v11039_v53  ;;  %v11047_v16 = vmov 0 }
 0x248   : > { %1066 = vrot.lane.b32.xlu0 %v8734_v22, %s8299_s23  ;;  %1068 = vrot.lane.b32.xlu1 %v8732_v50, %s8299_s23 }
 0x276   : > { %v1055_v54 = vpop.permute.xlu0 %1054 }
 0x277   : > { %1086 = vst.msk [vmem:[#allocation2] sm:$0xff] %vm10943_vm9, %v1055_v54 }
 0x27a   : > { %v1057_v55 = vpop.permute.xlu1 %1056 }
 0x27b   : > { %v8742_v58 = vsel %vm10942_vm10, %v1055_v54, %v1057_v55  ;;  %1088 = vst.msk [vmem:[#allocation2 + $0x10] sm:$0xff] %vm10942_vm10, %v1057_v55 }
 0x27c   : > { %1170 = vrot.lane.b32.xlu1 %v8742_v58, %s8304_s16 }
 0x27e   : > { %v8747_v39 = vld [vmem:[#allocation2] sm:$0xff] }
 0x27f   : > { %1168 = vrot.lane.b32.xlu0 %v8747_v39, %s8304_s16 }
 0x280   : > { %1242 = vrot.lane.b32.xlu1 %v8742_v58, %s10980_s17 }
 0x282   : > { %v1137_v48 = vld [vmem:[#allocation2 + $0x10] sm:$0xff] }
 0x283   : > { %1172 = vrot.lane.b32.xlu0 %v1137_v48, %s8304_s16 }
 0x284   : > { %1314 = vrot.lane.b32.xlu1 %v8742_v58, %s8306_s20 }
 0x287   : > { %1240 = vrot.lane.b32.xlu0 %v8747_v39, %s10980_s17 }
 0x28a   : > { %v1059_v59 = vpop.permute.xlu0 %1058  ;;  %v1061_v60 = vpop.permute.xlu1 %1060 }
 0x28b   : > { %1089 = vst.msk [vmem:[#allocation2 + $0x18] sm:$0xff] %vm10943_vm9, %v1059_v59  ;;  %1244 = vrot.lane.b32.xlu0 %v1137_v48, %s10980_s17  ;;  %v8769_v63 = vsel %vm10942_vm10, %v1059_v59, %v1061_v60 }
 0x28c   : > { %1091 = vst.msk [vmem:[#allocation2 + $0x28] sm:$0xff] %vm10942_vm10, %v1061_v60  ;;  %v11043_v60 = vmov 0 }
 0x28f   : > { %1312 = vrot.lane.b32.xlu0 %v8747_v39, %s8306_s20 }
 0x292   : > { %v8763_v61 = vld [vmem:[#allocation2 + $0x18] sm:$0xff] }
 0x293   : > { %1174 = vrot.lane.b32.xlu1 %v8763_v61, %s8304_s16  ;;  %1316 = vrot.lane.b32.xlu0 %v1137_v48, %s8306_s20  ;;  %v1138_v2 = vld [vmem:[#allocation2 + $0x28] sm:$0xff] }
 0x297   : > { %1178 = vrot.lane.b32.xlu1 %v1138_v2, %s8304_s16  ;;  %1176 = vrot.lane.b32.xlu0 %v8769_v63, %s8304_s16 }
 0x29b   : > { %1246 = vrot.lane.b32.xlu1 %v8763_v61, %s10980_s17  ;;  %1248 = vrot.lane.b32.xlu0 %v8769_v63, %s10980_s17 }
 0x29f   : > { %1250 = vrot.lane.b32.xlu1 %v1138_v2, %s10980_s17  ;;  %1320 = vrot.lane.b32.xlu0 %v8769_v63, %s8306_s20 }
 0x2a3   : > { %1318 = vrot.lane.b32.xlu1 %v8763_v61, %s8306_s20 }
 0x2a6   : > { %v1063_v4 = vpop.permute.xlu0 %1062 }
 0x2a7   : > { %1322 = vrot.lane.b32.xlu1 %v1138_v2, %s8306_s20  ;;  %1092 = vst.msk [vmem:[#allocation2 + $0x30] sm:$0xff] %vm10943_vm9, %v1063_v4 }
 0x2aa   : > { %v1065_v5 = vpop.permute.xlu1 %1064 }
 0x2ab   : > { %v8786_v51 = vsel %vm10942_vm10, %v1063_v4, %v1065_v5  ;;  %1094 = vst.msk [vmem:[#allocation2 + $0x40] sm:$0xff] %vm10942_vm10, %v1065_v5 }
 0x2ac   : > { %1182 = vrot.lane.b32.xlu1 %v8786_v51, %s8304_s16 }
 0x2ae   : > { %v8791_v7 = vld [vmem:[#allocation2 + $0x30] sm:$0xff] }
 0x2af   : > { %1180 = vrot.lane.b32.xlu0 %v8791_v7, %s8304_s16 }
 0x2b0   : > { %1254 = vrot.lane.b32.xlu1 %v8786_v51, %s10980_s17 }
 0x2b2   : > { %v1139_v33 = vld [vmem:[#allocation2 + $0x40] sm:$0xff] }
 0x2b3   : > { %1184 = vrot.lane.b32.xlu0 %v1139_v33, %s8304_s16 }
 0x2b4   : > { %1326 = vrot.lane.b32.xlu1 %v8786_v51, %s8306_s20 }
 0x2b7   : > { %1252 = vrot.lane.b32.xlu0 %v8791_v7, %s10980_s17 }
 0x2ba   : > { %v1067_v34 = vpop.permute.xlu0 %1066  ;;  %v1069_v1 = vpop.permute.xlu1 %1068 }
 0x2bb   : > { %1095 = vst.msk [vmem:[#allocation2 + $0x48] sm:$0xff] %vm10943_vm9, %v1067_v34  ;;  %1256 = vrot.lane.b32.xlu0 %v1139_v33, %s10980_s17  ;;  %v8813_v12 = vsel %vm10942_vm10, %v1067_v34, %v1069_v1  ;;  %vm1226_vm9 = vcmp.ge.s32.totalorder %v1225_v18, 0  ;;  %v11045_v34 = vmov 0  ;;  %v11049_v18 = vmov 0 }
 0x2bc   : > { %1097 = vst.msk [vmem:[#allocation2 + $0x58] sm:$0xff] %vm10942_vm10, %v1069_v1  ;;  %vm1109_vm10 = vmand %vm1107_vm5, %vm1108_vm13  ;;  %vm1299_vm13 = vcmp.lt.s32.totalorder %v1297_v15, 16 }
 0x2bd   : > { %vm8835_vm0 = vmand %vm1226_vm9, %vm1227_vm4  ;;  %v1110_v19 = vsel %vm1109_vm10, 1, %v8297_v0  ;;  %vm10954_vm4 = vcmask 916480   ;;  %vm10955_vm10 = vcmask 654336  }
 0x2be   : > { %v11036_v26 = vsel %vm8835_vm0, 4294967295, %v11035_v26  ;;  %v1114_v28 = vrot.slane %v1110_v19, %v8543_v24  ;;  %v1229_v38 = vsel %vm8835_vm0, 1, %v8297_v0  ;;  %vm1300_vm9 = vmand %vm1298_vm8, %vm1299_vm13  ;;  %v1118_v44 = vrot.slane %v1110_v19, %v8557_v35 }
 0x2bf   : > { %1324 = vrot.lane.b32.xlu0 %v8791_v7, %s8306_s20  ;;  %v1233_v45 = vrot.slane %v1229_v38, %v8543_v24  ;;  %v1301_v52 = vsel %vm1300_vm9, 1, %v8297_v0  ;;  %v1237_v48 = vrot.slane %v1229_v38, %v8557_v35  ;;  %vm8878_vm13 = vcmp.eq.s32.totalorder %v1153_v47, 1 }
 0x2c0   : > { %vm8848_vm7 = vcmp.eq.s32.totalorder %v1114_v28, 1  ;;  %vm8865_vm5 = vcmp.eq.s32.totalorder %v1118_v44, 1  ;;  %v1305_v4 = vrot.slane %v1301_v52, %v8543_v24  ;;  %v11046_v34 = vsel %vm8878_vm13, 4294967295, %v11045_v34 }
 0x2c1   : > { %v1121_v54 = vsel %vm8848_vm7, %v8747_v39, -inf  ;;  %vm8869_vm8 = vcmp.eq.s32.totalorder %v1233_v45, 1  ;;  %vm8888_vm9 = vcmp.eq.s32.totalorder %v1237_v48, 1  ;;  %v1309_v15 = vrot.slane %v1301_v52, %v8557_v35 }
 0x2c2   : > { %v8807_v9 = vld [vmem:[#allocation2 + $0x48] sm:$0xff]  ;;  %v11044_v60 = vsel %vm8869_vm8, 4294967295, %v11043_v60  ;;  %v1129_v39 = vmax.f32 %v8626_v21, %v1121_v54  ;;  %v11048_v16 = vsel %vm8888_vm9, 4294967295, %v11047_v16  ;;  %vm8893_vm0 = vcmp.eq.s32.totalorder %v1305_v4, 1 }
 0x2c3   : > { %1186 = vrot.lane.b32.xlu1 %v8807_v9, %s8304_s16  ;;  %1328 = vrot.lane.b32.xlu0 %v1139_v33, %s8306_s20  ;;  %v1140_v13 = vld [vmem:[#allocation2 + $0x58] sm:$0xff]  ;;  %v11050_v18 = vsel %vm8893_vm0, 4294967295, %v11049_v18  ;;  %v11052_v45 = vmov 0 }
 0x2c7   : > { %1190 = vrot.lane.b32.xlu1 %v1140_v13, %s8304_s16  ;;  %1188 = vrot.lane.b32.xlu0 %v8813_v12, %s8304_s16 }
 0x2cb   : > { %1258 = vrot.lane.b32.xlu1 %v8807_v9, %s10980_s17  ;;  %1260 = vrot.lane.b32.xlu0 %v8813_v12, %s10980_s17 }
 0x2cf   : > { %1262 = vrot.lane.b32.xlu1 %v1140_v13, %s10980_s17  ;;  %1332 = vrot.lane.b32.xlu0 %v8813_v12, %s8306_s20 }
 0x2d3   : > { %1330 = vrot.lane.b32.xlu1 %v8807_v9, %s8306_s20 }
 0x2d7   : > { %1334 = vrot.lane.b32.xlu1 %v1140_v13, %s8306_s20  ;;  %v1122_v13 = vsel %vm8865_vm5, %v8742_v58, -inf }
 0x2d8   : > { %v1130_v27 = vmax.f32 %v8633_v31, %v1122_v13 }
 0x2ee   : > { %v1171_v36 = vpop.permute.xlu1 %1170 }
 0x2f1   : > { %v1169_v32 = vpop.permute.xlu0 %1168 }
 0x2f2   : > { %v1193_v41 = vsel %vm10954_vm4, %v1169_v32, %v1171_v36  ;;  %v1243_v55 = vpop.permute.xlu1 %1242 }
 0x2f3   : > { %v1209_v5 = vsel %vm8855_vm11, %v1193_v41, -inf }
 0x2f4   : > { %v1217_v17 = vmax.f32 %v1129_v39, %v1209_v5 }
 0x2f5   : > { %v1173_v37 = vpop.permute.xlu0 %1172 }
 0x2f6   : > { %v1194_v1 = vsel %vm10954_vm4, %v1171_v36, %v1173_v37  ;;  %v1315_v58 = vpop.permute.xlu1 %1314  ;;  %vm11051_vm4 = vcmask 523264  }
 0x2f7   : > { %v1210_v32 = vsel %vm8878_vm13, %v1194_v1, -inf  ;;  %vm11054_vm3 = vmmov %vm11051_vm4 }
 0x2f8   : > { %v1218_v40 = vmax.f32 %v1130_v27, %v1210_v32 }
 0x2f9   : > { %v1241_v46 = vpop.permute.xlu0 %1240 }
 0x2fa   : > { %v1265_v2 = vsel %vm10955_vm10, %v1241_v46, %v1243_v55 }
 0x2fb   : > { %v1281_v14 = vsel %vm8869_vm8, %v1265_v2, -inf }
 0x2fc   : > { %v1289_v28 = vmax.f32 %v1217_v17, %v1281_v14 }
 0x2fd   : > { %v1245_v33 = vpop.permute.xlu0 %1244 }
 0x2fe   : > { %v1266_v21 = vsel %vm10955_vm10, %v1243_v55, %v1245_v33  ;;  %vm8908_vm10 = vcmp.eq.s32.totalorder %v1309_v15, 1  ;;  %v1123_v33 = vsel %vm8848_vm7, %v8763_v61, -inf }
 0x2ff   : > { %v1282_v37 = vsel %vm8888_vm9, %v1266_v21, -inf  ;;  %v11053_v45 = vsel %vm8908_vm10, 4294967295, %v11052_v45  ;;  %v1131_v14 = vmax.f32 %v8666_v11, %v1123_v33  ;;  %v1124_v21 = vsel %vm8865_vm5, %v8769_v63, -inf }
 0x300   : > { %v1290_v41 = vmax.f32 %v1218_v40, %v1282_v37 }
 0x301   : > { %v1313_v19 = vpop.permute.xlu0 %1312 }
 0x302   : > { %v1336_v36 = vsel %vm11051_vm4, %v1313_v19, %v1315_v58  ;;  %vm11055_vm4 = vcmask 916480  }
 0x303   : > { %v1352_v38 = vsel %vm8893_vm0, %v1336_v36, -inf  ;;  %vm11057_vm6 = vmmov %vm11055_vm4 }
 0x304   : > { %v8906_v44 = vmax.f32 %v1289_v28, %v1352_v38  ;;  %v1132_v28 = vmax.f32 %v8664_v10, %v1124_v21 }
 0x305   : > { %v1175_v46 = vpop.permute.xlu1 %1174  ;;  %v1317_v52 = vpop.permute.xlu0 %1316 }
 0x306   : > { %v1337_v31 = vsel %vm11054_vm3, %v1315_v58, %v1317_v52  ;;  %1376 = vrot.lane.b32.xlu0 %v8906_v44, %s8299_s23  ;;  %vm11056_vm3 = vcmask 654336  }
 0x307   : > { %v1353_v47 = vsel %vm8908_vm10, %v1337_v31, -inf }
 0x308   : > { %v8917_v54 = vmax.f32 %v1290_v41, %v1353_v47 }
 0x309   : > { %v1179_v55 = vpop.permute.xlu1 %1178  ;;  %v1177_v48 = vpop.permute.xlu0 %1176 }
 0x30a   : > { %1378 = vrot.lane.b32.xlu1 %v8917_v54, %s8299_s23  ;;  %v1195_v5 = vsel %vm11055_vm4, %v1175_v46, %v1177_v48  ;;  %v1196_v17 = vsel %vm11057_vm6, %v1177_v48, %v1179_v55  ;;  %vm11058_vm4 = vmmov %vm11056_vm3 }
 0x30b   : > { %v1211_v1 = vsel %vm8855_vm11, %v1195_v5, -inf  ;;  %v1212_v58 = vsel %vm8878_vm13, %v1196_v17, -inf }
 0x30c   : > { %v1219_v32 = vmax.f32 %v1131_v14, %v1211_v1  ;;  %v1220_v38 = vmax.f32 %v1132_v28, %v1212_v58 }
 0x30d   : > { %v1247_v2 = vpop.permute.xlu1 %1246  ;;  %v1249_v4 = vpop.permute.xlu0 %1248 }
 0x30e   : > { %v1267_v39 = vsel %vm11056_vm3, %v1247_v2, %v1249_v4  ;;  %vm11059_vm3 = vcmask 523264  }
 0x30f   : > { %v1283_v15 = vsel %vm8869_vm8, %v1267_v39, -inf  ;;  %vm11060_vm6 = vmmov %vm11059_vm3  ;;  %v1125_v39 = vsel %vm8848_vm7, %v8791_v7, -inf }
 0x310   : > { %v1291_v11 = vmax.f32 %v1219_v32, %v1283_v15  ;;  %v1133_v21 = vmax.f32 %v8695_v62, %v1125_v39  ;;  %v1126_v32 = vsel %vm8865_vm5, %v8786_v51, -inf }
 0x311   : > { %v1251_v13 = vpop.permute.xlu1 %1250  ;;  %v1321_v19 = vpop.permute.xlu0 %1320 }
 0x312   : > { %v1268_v61 = vsel %vm11058_vm4, %v1249_v4, %v1251_v13  ;;  %vm11061_vm4 = vcmask 916480  }
 0x313   : > { %v1284_v37 = vsel %vm8888_vm9, %v1268_v61, -inf }
 0x314   : > { %v1292_v52 = vmax.f32 %v1220_v38, %v1284_v37 }
 0x315   : > { %v1319_v27 = vpop.permute.xlu1 %1318 }
 0x316   : > { %v1338_v36 = vsel %vm11059_vm3, %v1319_v27, %v1321_v19  ;;  %vm11062_vm3 = vcmask 654336  }
 0x317   : > { %v1354_v63 = vsel %vm8893_vm0, %v1338_v36, -inf }
 0x318   : > { %v8944_v40 = vmax.f32 %v1291_v11, %v1354_v63  ;;  %v1134_v11 = vmax.f32 %v8702_v6, %v1126_v32 }
 0x319   : > { %v1323_v46 = vpop.permute.xlu1 %1322 }
 0x31a   : > { %v1339_v41 = vsel %vm11060_vm6, %v1321_v19, %v1323_v46  ;;  %1380 = vrot.lane.b32.xlu0 %v8944_v40, %s8299_s23  ;;  %v2501_v55 = vpack.c.bf16 %v8944_v40, %v8906_v44  ;;  %vm11063_vm6 = vmmov %vm11061_vm4 }
 0x31b   : > { %v1355_v10 = vsel %vm8908_vm10, %v1339_v41, -inf }
 0x31c   : > { %v8951_v31 = vmax.f32 %v1292_v52, %v1355_v10 }
 0x31e   : > { %1382 = vrot.lane.b32.xlu1 %v8951_v31, %s8299_s23  ;;  %v2502_v47 = vpack.c.bf16 %v8951_v31, %v8917_v54  ;;  %v1183_v2 = vpop.permute.xlu1 %1182 }
 0x320   : > { %2521 = vmatprep.subr.bf16.mxu0 %v2502_v47 }
 0x321   : > { %2522 = vmatpush1.bf16.msra.mxu0 %v2501_v55  ;;  %v1181_v48 = vpop.permute.xlu0 %1180 }
 0x322   : > { %v1197_v33 = vsel %vm11061_vm4, %v1181_v48, %v1183_v2  ;;  %v1255_v1 = vpop.permute.xlu1 %1254  ;;  %vm11064_vm4 = vmmov %vm11062_vm3 }
 0x323   : > { %v1213_v14 = vsel %vm8855_vm11, %v1197_v33, -inf  ;;  %v1127_v33 = vsel %vm8848_vm7, %v8807_v9, -inf }
 0x324   : > { %v1221_v58 = vmax.f32 %v1133_v21, %v1213_v14  ;;  %v1135_v14 = vmax.f32 %v8734_v22, %v1127_v33  ;;  %v1128_v21 = vsel %vm8865_vm5, %v8813_v12, -inf }
 0x325   : > { %v1185_v4 = vpop.permute.xlu0 %1184 }
 0x326   : > { %v1198_v15 = vsel %vm11063_vm6, %v1183_v2, %v1185_v4  ;;  %v1327_v27 = vpop.permute.xlu1 %1326 }
 0x327   : > { %v1214_v19 = vsel %vm8878_vm13, %v1198_v15, -inf }
 0x328   : > { %v1222_v63 = vmax.f32 %v1134_v11, %v1214_v19  ;;  %v1136_v19 = vmax.f32 %v8732_v50, %v1128_v21 }
 0x329   : > { %v1253_v5 = vpop.permute.xlu0 %1252 }
 0x32a   : > { %v1269_v13 = vsel %vm11062_vm3, %v1253_v5, %v1255_v1  ;;  %vm11065_vm3 = vcmask 523264  }
 0x32b   : > { %v1285_v61 = vsel %vm8869_vm8, %v1269_v13, -inf  ;;  %vm11066_vm6 = vmmov %vm11065_vm3 }
 0x32c   : > { %v1293_v62 = vmax.f32 %v1221_v58, %v1285_v61 }
 0x32d   : > { %v1257_v17 = vpop.permute.xlu0 %1256 }
 0x32e   : > { %v1270_v7 = vsel %vm11064_vm4, %v1255_v1, %v1257_v17  ;;  %vm11067_vm4 = vcmask 916480  }
 0x32f   : > { %v1286_v37 = vsel %vm8888_vm9, %v1270_v7, -inf }
 0x330   : > { %v1294_v41 = vmax.f32 %v1222_v63, %v1286_v37 }
 0x331   : > { %v1325_v28 = vpop.permute.xlu0 %1324 }
 0x332   : > { %v1340_v36 = vsel %vm11065_vm3, %v1325_v28, %v1327_v27  ;;  %vm11068_vm3 = vcmask 654336  }
 0x333   : > { %v1356_v51 = vsel %vm8893_vm0, %v1340_v36, -inf }
 0x334   : > { %v8982_v38 = vmax.f32 %v1293_v62, %v1356_v51 }
 0x335   : > { %v1187_v46 = vpop.permute.xlu1 %1186  ;;  %v1329_v52 = vpop.permute.xlu0 %1328 }
 0x336   : > { %v1341_v10 = vsel %vm11066_vm6, %v1327_v27, %v1329_v52  ;;  %1384 = vrot.lane.b32.xlu0 %v8982_v38, %s8299_s23  ;;  %vm11069_vm6 = vmmov %vm11067_vm4 }
 0x337   : > { %v1357_v6 = vsel %vm8908_vm10, %v1341_v10, -inf }
 0x338   : > { %v8989_v47 = vmax.f32 %v1294_v41, %v1357_v6 }
 0x339   : > { %v1191_v55 = vpop.permute.xlu1 %1190  ;;  %v1189_v48 = vpop.permute.xlu0 %1188 }
 0x33a   : > { %1386 = vrot.lane.b32.xlu1 %v8989_v47, %s8299_s23  ;;  %v1199_v5 = vsel %vm11067_vm4, %v1187_v46, %v1189_v48  ;;  %v1200_v17 = vsel %vm11069_vm6, %v1189_v48, %v1191_v55  ;;  %vm11070_vm4 = vmmov %vm11068_vm3 }
 0x33b   : > { %v1215_v1 = vsel %vm8855_vm11, %v1199_v5, -inf  ;;  %v1216_v61 = vsel %vm8878_vm13, %v1200_v17, -inf }
 0x33c   : > { %v1223_v32 = vmax.f32 %v1135_v14, %v1215_v1  ;;  %v1224_v11 = vmax.f32 %v1136_v19, %v1216_v61 }
 0x33d   : > { %v1259_v2 = vpop.permute.xlu1 %1258  ;;  %v1261_v4 = vpop.permute.xlu0 %1260 }
 0x33e   : > { %v1271_v39 = vsel %vm11068_vm3, %v1259_v2, %v1261_v4  ;;  %vm11071_vm3 = vcmask 523264  }
 0x33f   : > { %v1287_v15 = vsel %vm8869_vm8, %v1271_v39, -inf  ;;  %vm11072_vm6 = vmmov %vm11071_vm3  ;;  %vm11094_vm8 = vcmask 777216  }
 0x340   : > { %v1295_v22 = vmax.f32 %v1223_v32, %v1287_v15 }
 0x341   : > { %v1263_v13 = vpop.permute.xlu1 %1262  ;;  %v1333_v58 = vpop.permute.xlu0 %1332 }
 0x342   : > { %v1272_v9 = vsel %vm11070_vm4, %v1261_v4, %v1263_v13  ;;  %vm11073_vm4 = vcmask 1047808  }
 0x343   : > { %v1288_v28 = vsel %vm8888_vm9, %v1272_v9, -inf  ;;  %vm11091_vm9 = vcmask 793600  }
 0x344   : > { %v1296_v37 = vmax.f32 %v1224_v11, %v1288_v28  ;;  %vm11093_vm13 = vmmov %vm11091_vm9 }
 0x345   : > { %v1331_v7 = vpop.permute.xlu1 %1330 }
 0x346   : > { %v1342_v27 = vsel %vm11071_vm3, %v1331_v7, %v1333_v58  ;;  %vm11074_vm3 = vcmask 261120  }
 0x347   : > { %v1358_v12 = vsel %vm8893_vm0, %v1342_v27, -inf }
 0x348   : > { %v9016_v62 = vmax.f32 %v1295_v22, %v1358_v12 }
 0x349   : > { %v1335_v36 = vpop.permute.xlu1 %1334 }
 0x34a   : > { %v1343_v51 = vsel %vm11072_vm6, %v1333_v58, %v1335_v36  ;;  %1388 = vrot.lane.b32.xlu0 %v9016_v62, %s8299_s23  ;;  %v2503_v52 = vpack.c.bf16 %v9016_v62, %v8982_v38  ;;  %vm11075_vm6 = vmmov %vm11074_vm3 }
 0x34b   : > { %v1359_v50 = vsel %vm8908_vm10, %v1343_v51, -inf  ;;  %vm11082_vm10 = vcmask 777216  }
 0x34c   : > { %v9023_v63 = vmax.f32 %v1296_v37, %v1359_v50 }
 0x34e   : > { %1390 = vrot.lane.b32.xlu1 %v9023_v63, %s8299_s23  ;;  %v2504_v46 = vpack.c.bf16 %v9023_v63, %v8989_v47 }
 0x350   : > { %2523 = vmatprep.subr.bf16.mxu0 %v2504_v46 }
 0x351   : > { %2524 = vmatpush1.bf16.msra.mxu0 %v2503_v52 }
 0x378   : > { %v1377_v41 = vpop.permute.xlu0 %1376 }
 0x379   : > { %1408 = vst.msk [vmem:[#allocation2] sm:$0xff] %vm11073_vm4, %v1377_v41 }
 0x37c   : > { %v1379_v10 = vpop.permute.xlu1 %1378 }
 0x37d   : > { %v1392_v6 = vsel %vm11074_vm3, %v1377_v41, %v1379_v10  ;;  %1410 = vst.msk [vmem:[#allocation2 + $0x10] sm:$0xff] %vm11075_vm6, %v1379_v10  ;;  %vm11076_vm6 = vmmov %vm11074_vm3 }
 0x37e   : > { %1446 = vrot.lane.b32.xlu1 %v1392_v6, %s8300_s24 }
 0x380   : > { %v1420_v55 = vld [vmem:[#allocation2] sm:$0xff] }
 0x381   : > { %1444 = vrot.lane.b32.xlu0 %v1420_v55, %s8300_s24 }
 0x382   : > { %1502 = vrot.lane.b32.xlu1 %v1392_v6, %s10988_s25 }
 0x384   : > { %v1422_v48 = vld [vmem:[#allocation2 + $0x10] sm:$0xff] }
 0x385   : > { %1448 = vrot.lane.b32.xlu0 %v1422_v48, %s8300_s24 }
 0x386   : > { %1558 = vrot.lane.b32.xlu1 %v1392_v6, %s10984_s27 }
 0x389   : > { %1500 = vrot.lane.b32.xlu0 %v1420_v55, %s10988_s25 }
 0x38a   : > { %1614 = vrot.lane.b32.xlu1 %v1392_v6, %s8303_s28 }
 0x38c   : > { %v1381_v2 = vpop.permute.xlu0 %1380 }
 0x38d   : > { %1411 = vst.msk [vmem:[#allocation2 + $0x18] sm:$0xff] %vm11073_vm4, %v1381_v2  ;;  %1504 = vrot.lane.b32.xlu0 %v1422_v48, %s10988_s25 }
 0x390   : > { %v1383_v4 = vpop.permute.xlu1 %1382 }
 0x391   : > { %1413 = vst.msk [vmem:[#allocation2 + $0x28] sm:$0xff] %vm11074_vm3, %v1383_v4  ;;  %1556 = vrot.lane.b32.xlu0 %v1420_v55, %s10984_s27  ;;  %v1393_v39 = vsel %vm11076_vm6, %v1381_v2, %v1383_v4  ;;  %vm11077_vm6 = vmmov %vm11074_vm3 }
 0x394   : > { %v1423_v5 = vld [vmem:[#allocation2 + $0x18] sm:$0xff] }
 0x395   : > { %1560 = vrot.lane.b32.xlu0 %v1422_v48, %s10984_s27  ;;  %1450 = vrot.lane.b32.xlu1 %v1423_v5, %s8300_s24 }
 0x398   : > { %v1425_v33 = vld [vmem:[#allocation2 + $0x28] sm:$0xff] }
 0x399   : > { %1612 = vrot.lane.b32.xlu0 %v1420_v55, %s8303_s28  ;;  %1454 = vrot.lane.b32.xlu1 %v1425_v33, %s8300_s24 }
 0x39d   : > { %1616 = vrot.lane.b32.xlu0 %v1422_v48, %s8303_s28  ;;  %1506 = vrot.lane.b32.xlu1 %v1423_v5, %s10988_s25 }
 0x3a1   : > { %1452 = vrot.lane.b32.xlu0 %v1393_v39, %s8300_s24  ;;  %1510 = vrot.lane.b32.xlu1 %v1425_v33, %s10988_s25 }
 0x3a5   : > { %1508 = vrot.lane.b32.xlu0 %v1393_v39, %s10988_s25  ;;  %1562 = vrot.lane.b32.xlu1 %v1423_v5, %s10984_s27 }
 0x3a8   : > { %v1385_v1 = vpop.permute.xlu0 %1384 }
 0x3a9   : > { %1414 = vst.msk [vmem:[#allocation2 + $0x30] sm:$0xff] %vm11073_vm4, %v1385_v1  ;;  %1564 = vrot.lane.b32.xlu0 %v1393_v39, %s10984_s27  ;;  %1566 = vrot.lane.b32.xlu1 %v1425_v33, %s10984_s27 }
 0x3ac   : > { %v1387_v13 = vpop.permute.xlu1 %1386 }
 0x3ad   : > { %1416 = vst.msk [vmem:[#allocation2 + $0x40] sm:$0xff] %vm11074_vm3, %v1387_v13  ;;  %1620 = vrot.lane.b32.xlu0 %v1393_v39, %s8303_s28  ;;  %1618 = vrot.lane.b32.xlu1 %v1423_v5, %s8303_s28  ;;  %v1394_v17 = vsel %vm11077_vm6, %v1385_v1, %v1387_v13  ;;  %vm11078_vm6 = vmmov %vm11074_vm3 }
 0x3b0   : > { %v1426_v14 = vld [vmem:[#allocation2 + $0x30] sm:$0xff] }
 0x3b1   : > { %1456 = vrot.lane.b32.xlu0 %v1426_v14, %s8300_s24  ;;  %1622 = vrot.lane.b32.xlu1 %v1425_v33, %s8303_s28 }
 0x3b4   : > { %v1428_v21 = vld [vmem:[#allocation2 + $0x40] sm:$0xff] }
 0x3b5   : > { %1460 = vrot.lane.b32.xlu0 %v1428_v21, %s8300_s24  ;;  %1458 = vrot.lane.b32.xlu1 %v1394_v17, %s8300_s24 }
 0x3b9   : > { %1512 = vrot.lane.b32.xlu0 %v1426_v14, %s10988_s25  ;;  %1514 = vrot.lane.b32.xlu1 %v1394_v17, %s10988_s25 }
 0x3bc   : > { %v1389_v15 = vpop.permute.xlu0 %1388 }
 0x3bd   : > { %1417 = vst.msk [vmem:[#allocation2 + $0x48] sm:$0xff] %vm11073_vm4, %v1389_v15  ;;  %1516 = vrot.lane.b32.xlu0 %v1428_v21, %s10988_s25  ;;  %1570 = vrot.lane.b32.xlu1 %v1394_v17, %s10984_s27  ;;  %vm11079_vm4 = vcmask 801792  }
 0x3c0   : > { %v1391_v32 = vpop.permute.xlu1 %1390 }
 0x3c1   : > { %1419 = vst.msk [vmem:[#allocation2 + $0x58] sm:$0xff] %vm11074_vm3, %v1391_v32  ;;  %1568 = vrot.lane.b32.xlu0 %v1426_v14, %s10984_s27  ;;  %1626 = vrot.lane.b32.xlu1 %v1394_v17, %s8303_s28  ;;  %v1395_v58 = vsel %vm11078_vm6, %v1389_v15, %v1391_v32  ;;  %vm11080_vm3 = vcmask 793600   ;;  %vm11081_vm6 = vmmov %vm11079_vm4 }
 0x3c2   : > { %vm11083_vm0 = vmmov %vm11080_vm3 }
 0x3c4   : > { %v1429_v9 = vld [vmem:[#allocation2 + $0x48] sm:$0xff] }
 0x3c5   : > { %1572 = vrot.lane.b32.xlu0 %v1428_v21, %s10984_s27  ;;  %1462 = vrot.lane.b32.xlu1 %v1429_v9, %s8300_s24 }
 0x3c8   : > { %v1431_v61 = vld [vmem:[#allocation2 + $0x58] sm:$0xff] }
 0x3c9   : > { %1624 = vrot.lane.b32.xlu0 %v1426_v14, %s8303_s28  ;;  %1466 = vrot.lane.b32.xlu1 %v1431_v61, %s8300_s24 }
 0x3cd   : > { %1628 = vrot.lane.b32.xlu0 %v1428_v21, %s8303_s28  ;;  %1518 = vrot.lane.b32.xlu1 %v1429_v9, %s10988_s25 }
 0x3d1   : > { %1464 = vrot.lane.b32.xlu0 %v1395_v58, %s8300_s24  ;;  %1522 = vrot.lane.b32.xlu1 %v1431_v61, %s10988_s25 }
 0x3d5   : > { %1520 = vrot.lane.b32.xlu0 %v1395_v58, %s10988_s25  ;;  %1574 = vrot.lane.b32.xlu1 %v1429_v9, %s10984_s27 }
 0x3d9   : > { %1576 = vrot.lane.b32.xlu0 %v1395_v58, %s10984_s27  ;;  %1578 = vrot.lane.b32.xlu1 %v1431_v61, %s10984_s27 }
 0x3dd   : > { %1632 = vrot.lane.b32.xlu0 %v1395_v58, %s8303_s28  ;;  %1630 = vrot.lane.b32.xlu1 %v1429_v9, %s8303_s28 }
 0x3e1   : > { %1634 = vrot.lane.b32.xlu1 %v1431_v61, %s8303_s28 }
 0x3f0   : > { %v1447_v7 = vpop.permute.xlu1 %1446 }
 0x3f3   : > { %v1445_v19 = vpop.permute.xlu0 %1444 }
 0x3f4   : > { %v1503_v27 = vpop.permute.xlu1 %1502  ;;  %v1468_v36 = vsel %vm11079_vm4, %v1445_v19, %v1447_v7  ;;  %vm11084_vm4 = vmmov %vm11082_vm10 }
 0x3f5   : > { %v1484_v46 = vsel %vm8566_vm12, %v1468_v36, -inf }
 0x3f6   : > { %v1492_v48 = vmax.f32 %v8906_v44, %v1484_v46 }
 0x3f7   : > { %v1449_v22 = vpop.permute.xlu0 %1448 }
 0x3f8   : > { %v1559_v12 = vpop.permute.xlu1 %1558  ;;  %v1469_v52 = vsel %vm11081_vm6, %v1447_v7, %v1449_v22 }
 0x3f9   : > { %v1485_v4 = vsel %vm8580_vm15, %v1469_v52, -inf }
 0x3fa   : > { %v1493_v17 = vmax.f32 %v8917_v54, %v1485_v4 }
 0x3fb   : > { %v1501_v28 = vpop.permute.xlu0 %1500 }
 0x3fc   : > { %v1615_v51 = vpop.permute.xlu1 %1614  ;;  %v1524_v50 = vsel %vm11080_vm3, %v1501_v28, %v1503_v27  ;;  %vm11087_vm3 = vnez %v11030_v30 }
 0x3fd   : > { %v1540_v10 = vsel %vm8572_vm14, %v1524_v50, -inf }
 0x3fe   : > { %v1548_v33 = vmax.f32 %v1492_v48, %v1540_v10 }
 0x3ff   : > { %v1505_v11 = vpop.permute.xlu0 %1504 }
 0x400   : > { %v1525_v2 = vsel %vm11083_vm0, %v1503_v27, %v1505_v11  ;;  %vm11086_vm0 = vnez %v11028_v8 }
 0x401   : > { %v1541_v1 = vsel %vm8595_vm2, %v1525_v2, -inf }
 0x402   : > { %v1549_v9 = vmax.f32 %v1493_v17, %v1541_v1 }
 0x403   : > { %v1557_v37 = vpop.permute.xlu0 %1556 }
 0x404   : > { %v1580_v41 = vsel %vm11082_vm10, %v1557_v37, %v1559_v12  ;;  %vm11085_vm10 = vcmask 769024  }
 0x405   : > { %v1596_v5 = vsel %vm8584_vm1, %v1580_v41, -inf  ;;  %vm11088_vm6 = vmmov %vm11085_vm10 }
 0x406   : > { %v1604_v21 = vmax.f32 %v1548_v33, %v1596_v5 }
 0x407   : > { %v1561_v6 = vpop.permute.xlu0 %1560  ;;  %v1451_v55 = vpop.permute.xlu1 %1450 }
 0x408   : > { %v1581_v39 = vsel %vm11084_vm4, %v1559_v12, %v1561_v6  ;;  %vm11089_vm4 = vnez %v11032_v20 }
 0x409   : > { %v1597_v15 = vsel %vm11086_vm0, %v1581_v39, -inf }
 0x40a   : > { %v1605_v19 = vmax.f32 %v1549_v9, %v1597_v15 }
 0x40b   : > { %v1613_v13 = vpop.permute.xlu0 %1612  ;;  %v1455_v14 = vpop.permute.xlu1 %1454 }
 0x40c   : > { %v1636_v44 = vsel %vm11085_vm10, %v1613_v13, %v1615_v51  ;;  %vm11090_vm10 = vcmask 801792  }
 0x40d   : > { %v1652_v32 = vsel %vm11087_vm3, %v1636_v44, -inf }
 0x40e   : > { %v9114_v61 = vmax.f32 %v1604_v21, %v1652_v32 }
 0x40f   : > { %v1617_v58 = vpop.permute.xlu0 %1616  ;;  %v1507_v7 = vpop.permute.xlu1 %1506 }
 0x410   : > { %v1637_v22 = vsel %vm11088_vm6, %v1615_v51, %v1617_v58  ;;  %1676 = vrot.lane.b32.xlu0 %v9114_v61, %s8299_s23  ;;  %vm11092_vm6 = vmmov %vm11090_vm10 }
 0x411   : > { %v1653_v54 = vsel %vm11089_vm4, %v1637_v22, -inf }
 0x412   : > { %v9121_v27 = vmax.f32 %v1605_v19, %v1653_v54 }
 0x413   : > { %v1453_v28 = vpop.permute.xlu0 %1452  ;;  %v1511_v12 = vpop.permute.xlu1 %1510 }
 0x414   : > { %1678 = vrot.lane.b32.xlu1 %v9121_v27, %s8299_s23  ;;  %v1470_v11 = vsel %vm11090_vm10, %v1451_v55, %v1453_v28  ;;  %v1471_v46 = vsel %vm11092_vm6, %v1453_v28, %v1455_v14  ;;  %vm11098_vm10 = vmmov %vm11092_vm6  ;;  %vm11099_vm6 = vcmask 793600  }
 0x415   : > { %v1486_v51 = vsel %vm8566_vm12, %v1470_v11, -inf  ;;  %v1487_v2 = vsel %vm8580_vm15, %v1471_v46, -inf }
 0x416   : > { %v1494_v6 = vmax.f32 %v8944_v40, %v1486_v51  ;;  %v1495_v40 = vmax.f32 %v8951_v31, %v1487_v2 }
 0x417   : > { %v1509_v36 = vpop.permute.xlu0 %1508  ;;  %v1563_v37 = vpop.permute.xlu1 %1562 }
 0x418   : > { %v1526_v50 = vsel %vm11091_vm9, %v1507_v7, %v1509_v36  ;;  %v1527_v48 = vsel %vm11093_vm13, %v1509_v36, %v1511_v12  ;;  %vm11095_vm9 = vmmov %vm11094_vm8  ;;  %vm11096_vm13 = vcmask 769024  }
 0x419   : > { %v1542_v52 = vsel %vm8572_vm14, %v1526_v50, -inf  ;;  %v1543_v39 = vsel %vm8595_vm2, %v1527_v48, -inf }
 0x41a   : > { %v1550_v5 = vmax.f32 %v1494_v6, %v1542_v52  ;;  %v1551_v15 = vmax.f32 %v1495_v40, %v1543_v39 }
 0x41b   : > { %v1565_v41 = vpop.permute.xlu0 %1564  ;;  %v1567_v10 = vpop.permute.xlu1 %1566 }
 0x41c   : > { %v1582_v55 = vsel %vm11094_vm8, %v1563_v37, %v1565_v41  ;;  %v1583_v33 = vsel %vm11095_vm9, %v1565_v41, %v1567_v10  ;;  %vm11097_vm8 = vmmov %vm11096_vm13 }
 0x41d   : > { %v1598_v4 = vsel %vm8584_vm1, %v1582_v55, -inf  ;;  %v1599_v21 = vsel %vm11086_vm0, %v1583_v33, -inf  ;;  %vm11100_vm9 = vmmov %vm11098_vm10 }
 0x41e   : > { %v1606_v14 = vmax.f32 %v1550_v5, %v1598_v4  ;;  %v1607_v7 = vmax.f32 %v1551_v15, %v1599_v21 }
 0x41f   : > { %v1621_v1 = vpop.permute.xlu0 %1620  ;;  %v1619_v13 = vpop.permute.xlu1 %1618 }
 0x420   : > { %v1638_v17 = vsel %vm11096_vm13, %v1619_v13, %v1621_v1  ;;  %vm11101_vm13 = vcmask 777216  }
 0x421   : > { %v1654_v44 = vsel %vm11087_vm3, %v1638_v17, -inf }
 0x422   : > { %v9148_v32 = vmax.f32 %v1606_v14, %v1654_v44 }
 0x423   : > { %v1457_v9 = vpop.permute.xlu0 %1456  ;;  %v1623_v58 = vpop.permute.xlu1 %1622 }
 0x424   : > { %v1639_v19 = vsel %vm11097_vm8, %v1621_v1, %v1623_v58  ;;  %1680 = vrot.lane.b32.xlu0 %v9148_v32, %s8299_s23  ;;  %vm11102_vm8 = vmmov %vm11099_vm6 }
 0x425   : > { %v1655_v31 = vsel %vm11089_vm4, %v1639_v19, -inf }
 0x426   : > { %v9155_v22 = vmax.f32 %v1607_v7, %v1655_v31 }
 0x427   : > { %v1461_v54 = vpop.permute.xlu0 %1460  ;;  %v1459_v28 = vpop.permute.xlu1 %1458 }
 0x428   : > { %1682 = vrot.lane.b32.xlu1 %v9155_v22, %s8299_s23  ;;  %v1472_v50 = vsel %vm11098_vm10, %v1457_v9, %v1459_v28  ;;  %v1473_v10 = vsel %vm11100_vm9, %v1459_v28, %v1461_v54  ;;  %vm11103_vm10 = vmmov %vm11101_vm13 }
 0x429   : > { %v1488_v41 = vsel %vm8566_vm12, %v1472_v50, -inf  ;;  %v1489_v33 = vsel %vm8580_vm15, %v1473_v10, -inf }
 0x42a   : > { %v1496_v4 = vmax.f32 %v8982_v38, %v1488_v41  ;;  %v1497_v21 = vmax.f32 %v8989_v47, %v1489_v33 }
 0x42b   : > { %v1513_v12 = vpop.permute.xlu0 %1512  ;;  %v1515_v11 = vpop.permute.xlu1 %1514 }
 0x42c   : > { %v1528_v52 = vsel %vm11099_vm6, %v1513_v12, %v1515_v11  ;;  %vm11104_vm6 = vcmask 769024  }
 0x42d   : > { %v1544_v48 = vsel %vm8572_vm14, %v1528_v52, -inf  ;;  %vm11105_vm9 = vmmov %vm11104_vm6 }
 0x42e   : > { %v1552_v1 = vmax.f32 %v1496_v4, %v1544_v48 }
 0x42f   : > { %v1517_v36 = vpop.permute.xlu0 %1516  ;;  %v1571_v37 = vpop.permute.xlu1 %1570 }
 0x430   : > { %v1529_v5 = vsel %vm11102_vm8, %v1515_v11, %v1517_v36 }
 0x431   : > { %v1545_v40 = vsel %vm8595_vm2, %v1529_v5, -inf }
 0x432   : > { %v1553_v58 = vmax.f32 %v1497_v21, %v1545_v40 }
 0x433   : > { %v1569_v51 = vpop.permute.xlu0 %1568  ;;  %v1627_v46 = vpop.permute.xlu1 %1626 }
 0x434   : > { %v1584_v6 = vsel %vm11101_vm13, %v1569_v51, %v1571_v37  ;;  %vm11106_vm13 = vcmask 801792  }
 0x435   : > { %v1600_v39 = vsel %vm8584_vm1, %v1584_v6, -inf }
 0x436   : > { %v1608_v44 = vmax.f32 %v1552_v1, %v1600_v39 }
 0x437   : > { %v1573_v55 = vpop.permute.xlu0 %1572  ;;  %v1463_v2 = vpop.permute.xlu1 %1462 }
 0x438   : > { %v1585_v13 = vsel %vm11103_vm10, %v1571_v37, %v1573_v55  ;;  %vm11107_vm10 = vmmov %vm11106_vm13 }
 0x439   : > { %v1601_v15 = vsel %vm11086_vm0, %v1585_v13, -inf }
 0x43a   : > { %v1609_v54 = vmax.f32 %v1553_v58, %v1601_v15 }
 0x43b   : > { %v1625_v14 = vpop.permute.xlu0 %1624  ;;  %v1467_v17 = vpop.permute.xlu1 %1466 }
 0x43c   : > { %v1640_v38 = vsel %vm11104_vm6, %v1625_v14, %v1627_v46  ;;  %vm11108_vm6 = vmmov %vm11102_vm8 }
 0x43d   : > { %v1656_v9 = vsel %vm11087_vm3, %v1640_v38, -inf }
 0x43e   : > { %v9182_v7 = vmax.f32 %v1608_v44, %v1656_v9 }
 0x43f   : > { %v1629_v19 = vpop.permute.xlu0 %1628  ;;  %v1519_v31 = vpop.permute.xlu1 %1518 }
 0x440   : > { %v1641_v28 = vsel %vm11105_vm9, %v1627_v46, %v1629_v19  ;;  %1684 = vrot.lane.b32.xlu0 %v9182_v7, %s8299_s23  ;;  %vm11109_vm9 = vcmask 777216  }
 0x441   : > { %v1657_v47 = vsel %vm11089_vm4, %v1641_v28, -inf }
 0x442   : > { %v9189_v12 = vmax.f32 %v1609_v54, %v1657_v47 }
 0x443   : > { %v1465_v11 = vpop.permute.xlu0 %1464  ;;  %v1523_v36 = vpop.permute.xlu1 %1522 }
 0x444   : > { %1686 = vrot.lane.b32.xlu1 %v9189_v12, %s8299_s23  ;;  %v1474_v37 = vsel %vm11106_vm13, %v1463_v2, %v1465_v11  ;;  %v1475_v41 = vsel %vm11107_vm10, %v1465_v11, %v1467_v17  ;;  %vm11110_vm13 = vmmov %vm11109_vm9 }
 0x445   : > { %v1490_v46 = vsel %vm8566_vm12, %v1474_v37, -inf  ;;  %v1491_v5 = vsel %vm8580_vm15, %v1475_v41, -inf }
 0x446   : > { %v1498_v55 = vmax.f32 %v9016_v62, %v1490_v46  ;;  %v1499_v62 = vmax.f32 %v9023_v63, %v1491_v5 }
 0x447   : > { %v1521_v50 = vpop.permute.xlu0 %1520  ;;  %v1575_v51 = vpop.permute.xlu1 %1574 }
 0x448   : > { %v1530_v52 = vsel %vm11102_vm8, %v1519_v31, %v1521_v50  ;;  %v1531_v4 = vsel %vm11108_vm6, %v1521_v50, %v1523_v36  ;;  %vm11111_vm8 = vcmask 769024   ;;  %vm11113_vm6 = vcmask 1047808  }
 0x449   : > { %v1546_v10 = vsel %vm8572_vm14, %v1530_v52, -inf  ;;  %v1547_v13 = vsel %vm8595_vm2, %v1531_v4, -inf  ;;  %vm11112_vm10 = vmmov %vm11111_vm8 }
 0x44a   : > { %v1554_v39 = vmax.f32 %v1498_v55, %v1546_v10  ;;  %v1555_v15 = vmax.f32 %v1499_v62, %v1547_v13  ;;  %v8205_v10 = vld [vmem:[%s10926_s5] sm:$0xff]  }
 0x44b   : > { %v1577_v6 = vpop.permute.xlu0 %1576  ;;  %v1579_v48 = vpop.permute.xlu1 %1578 }
 0x44c   : > { %v1586_v2 = vsel %vm11109_vm9, %v1575_v51, %v1577_v6  ;;  %v1587_v1 = vsel %vm11110_vm13, %v1577_v6, %v1579_v48  ;;  %vm11114_vm9 = vcmask 261120  }
 0x44d   : > { %v1602_v33 = vsel %vm8584_vm1, %v1586_v2, -inf  ;;  %v1603_v44 = vsel %vm11086_vm0, %v1587_v1, -inf  ;;  %vm11115_vm13 = vmmov %vm11114_vm9 }
 0x44e   : > { %v1610_v17 = vmax.f32 %v1554_v39, %v1602_v33  ;;  %v1611_v19 = vmax.f32 %v1555_v15, %v1603_v44 }
 0x44f   : > { %v1633_v40 = vpop.permute.xlu0 %1632  ;;  %v1631_v14 = vpop.permute.xlu1 %1630 }
 0x450   : > { %v1642_v21 = vsel %vm11111_vm8, %v1631_v14, %v1633_v40  ;;  %vm11116_vm8 = vmmov %vm11113_vm6 }
 0x451   : > { %v1658_v38 = vsel %vm11087_vm3, %v1642_v21, -inf  ;;  %vm11136_vm3 = vnez %v11053_v45 }
 0x452   : > { %v9216_v9 = vmax.f32 %v1610_v17, %v1658_v38 }
 0x453   : > { %v1635_v58 = vpop.permute.xlu1 %1634 }
 0x454   : > { %v1643_v31 = vsel %vm11112_vm10, %v1633_v40, %v1635_v58  ;;  %1688 = vrot.lane.b32.xlu0 %v9216_v9, %s8299_s23  ;;  %vm11117_vm10 = vmmov %vm11114_vm9 }
 0x455   : > { %v1659_v63 = vsel %vm11089_vm4, %v1643_v31, -inf  ;;  %vm11134_vm4 = vnez %v11050_v18 }
 0x456   : > { %v9223_v54 = vmax.f32 %v1611_v19, %v1659_v63 }
 0x458   : > { %1690 = vrot.lane.b32.xlu1 %v9223_v54, %s8299_s23 }
 0x482   : > { %v1677_v28 = vpop.permute.xlu0 %1676 }
 0x483   : > { %1708 = vst.msk [vmem:[#allocation2] sm:$0xff] %vm11113_vm6, %v1677_v28  ;;  %vm11118_vm6 = vmmov %vm11114_vm9 }
 0x486   : > { %v1679_v47 = vpop.permute.xlu1 %1678 }
 0x487   : > { %v9229_v11 = vsel %vm11114_vm9, %v1677_v28, %v1679_v47  ;;  %1710 = vst.msk [vmem:[#allocation2 + $0x10] sm:$0xff] %vm11115_vm13, %v1679_v47  ;;  %vm11119_vm9 = vmmov %vm11118_vm6 }
 0x488   : > { %1762 = vrot.lane.b32.xlu1 %v9229_v11, %s8304_s16  ;;  %6822 = vmatmul.mubr.msk.bf16.vlgmr.msra.gmra.mrb[0].mxu1 %vm11119_vm9, %v8205_v10  ;;  %vm11120_vm13 = vmmov %vm11116_vm8  ;;  %v1729_v28 = vsel %vm8865_vm5, %v9229_v11, -inf }
 0x489   : > { %2632 = vmatprep.mubr.bf16.mxu1 %v8297_v0  ;;  %v1737_v10 = vmax.f32 %v9121_v27, %v1729_v28 }
 0x48a   : > { %v9234_v36 = vld [vmem:[#allocation2] sm:$0xff] }
 0x48b   : > { %1760 = vrot.lane.b32.xlu0 %v9234_v36, %s8304_s16  ;;  %v1728_v44 = vsel %vm8848_vm7, %v9234_v36, -inf }
 0x48c   : > { %1818 = vrot.lane.b32.xlu1 %v9229_v11, %s10980_s17  ;;  %v1736_v31 = vmax.f32 %v9114_v61, %v1728_v44 }
 0x48e   : > { %v1744_v37 = vld [vmem:[#allocation2 + $0x10] sm:$0xff] }
 0x48f   : > { %1764 = vrot.lane.b32.xlu0 %v1744_v37, %s8304_s16 }
 0x490   : > { %1874 = vrot.lane.b32.xlu1 %v9229_v11, %s8306_s20 }
 0x493   : > { %1816 = vrot.lane.b32.xlu0 %v9234_v36, %s10980_s17 }
 0x496   : > { %v1681_v50 = vpop.permute.xlu0 %1680 }
 0x497   : > { %1820 = vrot.lane.b32.xlu0 %v1744_v37, %s10980_s17  ;;  %1711 = vst.msk [vmem:[#allocation2 + $0x18] sm:$0xff] %vm11116_vm8, %v1681_v50  ;;  %vm11121_vm8 = vmmov %vm11118_vm6 }
 0x498   : > { %vm11124_vm9 = vmmov %vm11121_vm8 }
 0x49a   : > { %v1683_v51 = vpop.permute.xlu1 %1682 }
 0x49b   : > { %1713 = vst.msk [vmem:[#allocation2 + $0x28] sm:$0xff] %vm11117_vm10, %v1683_v51  ;;  %1872 = vrot.lane.b32.xlu0 %v9234_v36, %s8306_s20  ;;  %v9256_v46 = vsel %vm11118_vm6, %v1681_v50, %v1683_v51  ;;  %vm11122_vm10 = vmmov %vm11118_vm6 }
 0x49c   : > { %vm11123_vm6 = vmmov %vm11120_vm13 }
 0x49e   : > { %v9250_v52 = vld [vmem:[#allocation2 + $0x18] sm:$0xff] }
 0x49f   : > { %1876 = vrot.lane.b32.xlu0 %v1744_v37, %s8306_s20  ;;  %1766 = vrot.lane.b32.xlu1 %v9250_v52, %s8304_s16 }
 0x4a2   : > { %v1745_v41 = vld [vmem:[#allocation2 + $0x28] sm:$0xff] }
 0x4a3   : > { %1770 = vrot.lane.b32.xlu1 %v1745_v41, %s8304_s16  ;;  %1768 = vrot.lane.b32.xlu0 %v9256_v46, %s8304_s16 }
 0x4a7   : > { %1822 = vrot.lane.b32.xlu1 %v9250_v52, %s10980_s17  ;;  %1824 = vrot.lane.b32.xlu0 %v9256_v46, %s10980_s17 }
 0x4ab   : > { %1826 = vrot.lane.b32.xlu1 %v1745_v41, %s10980_s17  ;;  %1880 = vrot.lane.b32.xlu0 %v9256_v46, %s8306_s20 }
 0x4af   : > { %1878 = vrot.lane.b32.xlu1 %v9250_v52, %s8306_s20 }
 0x4b2   : > { %v1685_v6 = vpop.permute.xlu0 %1684 }
 0x4b3   : > { %1714 = vst.msk [vmem:[#allocation2 + $0x30] sm:$0xff] %vm11120_vm13, %v1685_v6  ;;  %1882 = vrot.lane.b32.xlu1 %v1745_v41, %s8306_s20  ;;  %vm11125_vm13 = vmmov %vm11121_vm8 }
 0x4b6   : > { %v1687_v48 = vpop.permute.xlu1 %1686 }
 0x4b7   : > { %v9278_v55 = vsel %vm11121_vm8, %v1685_v6, %v1687_v48  ;;  %1716 = vst.msk [vmem:[#allocation2 + $0x40] sm:$0xff] %vm11122_vm10, %v1687_v48  ;;  %vm11126_vm8 = vcmask 916480   ;;  %vm11127_vm10 = vcmask 654336  }
 0x4b8   : > { %1774 = vrot.lane.b32.xlu1 %v9278_v55, %s8304_s16 }
 0x4ba   : > { %v9283_v4 = vld [vmem:[#allocation2 + $0x30] sm:$0xff] }
 0x4bb   : > { %1772 = vrot.lane.b32.xlu0 %v9283_v4, %s8304_s16 }
 0x4bc   : > { %1830 = vrot.lane.b32.xlu1 %v9278_v55, %s10980_s17 }
 0x4be   : > { %v1746_v2 = vld [vmem:[#allocation2 + $0x40] sm:$0xff] }
 0x4bf   : > { %1776 = vrot.lane.b32.xlu0 %v1746_v2, %s8304_s16 }
 0x4c0   : > { %1886 = vrot.lane.b32.xlu1 %v9278_v55, %s8306_s20 }
 0x4c3   : > { %1828 = vrot.lane.b32.xlu0 %v9283_v4, %s10980_s17 }
 0x4c6   : > { %v1689_v5 = vpop.permute.xlu0 %1688 }
 0x4c7   : > { %1832 = vrot.lane.b32.xlu0 %v1746_v2, %s10980_s17  ;;  %1717 = vst.msk [vmem:[#allocation2 + $0x48] sm:$0xff] %vm11123_vm6, %v1689_v5  ;;  %vm11128_vm6 = vmmov %vm11126_vm8 }
 0x4ca   : > { %v1691_v33 = vpop.permute.xlu1 %1690 }
 0x4cb   : > { %1719 = vst.msk [vmem:[#allocation2 + $0x58] sm:$0xff] %vm11124_vm9, %v1691_v33  ;;  %1884 = vrot.lane.b32.xlu0 %v9283_v4, %s8306_s20  ;;  %v9305_v1 = vsel %vm11125_vm13, %v1689_v5, %v1691_v33  ;;  %vm11129_vm9 = vnez %v11044_v60  ;;  %vm11130_vm13 = vmmov %vm11127_vm10 }
 0x4ce   : > { %v9299_v39 = vld [vmem:[#allocation2 + $0x48] sm:$0xff] }
 0x4cf   : > { %1888 = vrot.lane.b32.xlu0 %v1746_v2, %s8306_s20  ;;  %1778 = vrot.lane.b32.xlu1 %v9299_v39, %s8304_s16 }
 0x4d2   : > { %v1747_v13 = vld [vmem:[#allocation2 + $0x58] sm:$0xff] }
 0x4d3   : > { %1782 = vrot.lane.b32.xlu1 %v1747_v13, %s8304_s16  ;;  %1780 = vrot.lane.b32.xlu0 %v9305_v1, %s8304_s16 }
 0x4d7   : > { %1834 = vrot.lane.b32.xlu1 %v9299_v39, %s10980_s17  ;;  %1836 = vrot.lane.b32.xlu0 %v9305_v1, %s10980_s17 }
 0x4db   : > { %1838 = vrot.lane.b32.xlu1 %v1747_v13, %s10980_s17  ;;  %1892 = vrot.lane.b32.xlu0 %v9305_v1, %s8306_s20 }
 0x4df   : > { %1890 = vrot.lane.b32.xlu1 %v9299_v39, %s8306_s20 }
 0x4e3   : > { %1894 = vrot.lane.b32.xlu1 %v1747_v13, %s8306_s20 }
 0x4fa   : > { %v1763_v62 = vpop.permute.xlu1 %1762 }
 0x4fd   : > { %v1761_v40 = vpop.permute.xlu0 %1760 }
 0x4fe   : > { %v1784_v21 = vsel %vm11126_vm8, %v1761_v40, %v1763_v62  ;;  %v1819_v38 = vpop.permute.xlu1 %1818  ;;  %vm11131_vm8 = vnez %v11046_v34  ;;  %v4709_v34 = vld [vmem:[%s10931_s10] sm:$0xff] }
 0x4ff   : > { %v1800_v58 = vsel %vm8855_vm11, %v1784_v21, -inf }
 0x500   : > { %v1808_v37 = vmax.f32 %v1736_v31, %v1800_v58  ;;  %v1730_v58 = vsel %vm8848_vm7, %v9250_v52, -inf }
 0x501   : > { %v1765_v14 = vpop.permute.xlu0 %1764  ;;  %v1738_v28 = vmax.f32 %v9148_v32, %v1730_v58 }
 0x502   : > { %v1785_v63 = vsel %vm11128_vm6, %v1763_v62, %v1765_v14  ;;  %v1875_v51 = vpop.permute.xlu1 %1874  ;;  %vm11133_vm6 = vnez %v11048_v16 }
 0x503   : > { %v1801_v50 = vsel %vm11131_vm8, %v1785_v63, -inf }
 0x504   : > { %v1809_v2 = vmax.f32 %v1737_v10, %v1801_v50 }
 0x505   : > { %v1817_v17 = vpop.permute.xlu0 %1816 }
 0x506   : > { %v1840_v15 = vsel %vm11127_vm10, %v1817_v17, %v1819_v38  ;;  %vm11132_vm10 = vcmask 523264  }
 0x507   : > { %v1856_v47 = vsel %vm11129_vm9, %v1840_v15, -inf }
 0x508   : > { %v1864_v61 = vmax.f32 %v1808_v37, %v1856_v47  ;;  %v1731_v37 = vsel %vm8865_vm5, %v9256_v46, -inf }
 0x509   : > { %v1821_v19 = vpop.permute.xlu0 %1820 }
 0x50a   : > { %v1841_v36 = vsel %vm11130_vm13, %v1819_v38, %v1821_v19  ;;  %vm11135_vm13 = vmmov %vm11132_vm10 }
 0x50b   : > { %v1857_v48 = vsel %vm11133_vm6, %v1841_v36, -inf }
 0x50c   : > { %v1865_v40 = vmax.f32 %v1809_v2, %v1857_v48 }
 0x50d   : > { %v1873_v41 = vpop.permute.xlu0 %1872 }
 0x50e   : > { %v1896_v6 = vsel %vm11132_vm10, %v1873_v41, %v1875_v51  ;;  %vm11137_vm10 = vcmask 916480  }
 0x50f   : > { %v1912_v11 = vsel %vm11134_vm4, %v1896_v6, -inf  ;;  %vm11139_vm0 = vmmov %vm11137_vm10 }
 0x510   : > { %v9343_v5 = vmax.f32 %v1864_v61, %v1912_v11  ;;  %v1739_v61 = vmax.f32 %v9155_v22, %v1731_v37 }
 0x511   : > { %v1877_v33 = vpop.permute.xlu0 %1876  ;;  %v1767_v13 = vpop.permute.xlu1 %1766 }
 0x512   : > { %v1897_v14 = vsel %vm11135_vm13, %v1875_v51, %v1877_v33  ;;  %1936 = vrot.lane.b32.xlu0 %v9343_v5, %s8299_s23  ;;  %vm11138_vm13 = vcmask 654336  }
 0x513   : > { %v1913_v27 = vsel %vm11136_vm3, %v1897_v14, -inf }
 0x514   : > { %v9350_v62 = vmax.f32 %v1865_v40, %v1913_v27 }
 0x515   : > { %v1771_v17 = vpop.permute.xlu1 %1770  ;;  %v1769_v21 = vpop.permute.xlu0 %1768 }
 0x516   : > { %1938 = vrot.lane.b32.xlu1 %v9350_v62, %s8299_s23  ;;  %v1786_v15 = vsel %vm11137_vm10, %v1767_v13, %v1769_v21  ;;  %v1787_v47 = vsel %vm11139_vm0, %v1769_v21, %v1771_v17  ;;  %vm11140_vm10 = vmmov %vm11138_vm13 }
 0x517   : > { %v1802_v31 = vsel %vm8855_vm11, %v1786_v15, -inf  ;;  %v1803_v51 = vsel %vm11131_vm8, %v1787_v47, -inf }
 0x518   : > { %v1810_v50 = vmax.f32 %v1738_v28, %v1802_v31  ;;  %v1811_v11 = vmax.f32 %v1739_v61, %v1803_v51 }
 0x519   : > { %v1823_v44 = vpop.permute.xlu1 %1822  ;;  %v1825_v38 = vpop.permute.xlu0 %1824 }
 0x51a   : > { %v1842_v19 = vsel %vm11138_vm13, %v1823_v44, %v1825_v38  ;;  %vm11141_vm13 = vcmask 523264  }
 0x51b   : > { %v1858_v36 = vsel %vm11129_vm9, %v1842_v19, -inf  ;;  %vm11142_vm0 = vmmov %vm11141_vm13  ;;  %v1732_v19 = vsel %vm8848_vm7, %v9283_v4, -inf }
 0x51c   : > { %v1866_v32 = vmax.f32 %v1810_v50, %v1858_v36  ;;  %v1740_v37 = vmax.f32 %v9182_v7, %v1732_v19  ;;  %v1733_v50 = vsel %vm8865_vm5, %v9278_v55, -inf }
 0x51d   : > { %v1827_v63 = vpop.permute.xlu1 %1826  ;;  %v1881_v41 = vpop.permute.xlu0 %1880 }
 0x51e   : > { %v1843_v52 = vsel %vm11140_vm10, %v1825_v38, %v1827_v63  ;;  %vm11143_vm10 = vcmask 916480  }
 0x51f   : > { %v1859_v48 = vsel %vm11133_vm6, %v1843_v52, -inf }
 0x520   : > { %v1867_v13 = vmax.f32 %v1811_v11, %v1859_v48 }
 0x521   : > { %v1879_v10 = vpop.permute.xlu1 %1878 }
 0x522   : > { %v1898_v6 = vsel %vm11141_vm13, %v1879_v10, %v1881_v41  ;;  %vm11144_vm13 = vcmask 654336  }
 0x523   : > { %v1914_v46 = vsel %vm11134_vm4, %v1898_v6, -inf }
 0x524   : > { %v9377_v2 = vmax.f32 %v1866_v32, %v1914_v46  ;;  %v1741_v32 = vmax.f32 %v9189_v12, %v1733_v50 }
 0x525   : > { %v1883_v33 = vpop.permute.xlu1 %1882 }
 0x526   : > { %v1899_v40 = vsel %vm11142_vm0, %v1881_v41, %v1883_v33  ;;  %1940 = vrot.lane.b32.xlu0 %v9377_v2, %s8299_s23  ;;  %v2648_v17 = vpack.c.bf16 %v9377_v2, %v9343_v5  ;;  %vm11145_vm0 = vmmov %vm11143_vm10 }
 0x527   : > { %v1915_v22 = vsel %vm11136_vm3, %v1899_v40, -inf }
 0x528   : > { %v9384_v14 = vmax.f32 %v1867_v13, %v1915_v22 }
 0x52a   : > { %1942 = vrot.lane.b32.xlu1 %v9384_v14, %s8299_s23  ;;  %v2649_v27 = vpack.c.bf16 %v9384_v14, %v9350_v62  ;;  %v1775_v38 = vpop.permute.xlu1 %1774 }
 0x52c   : > { %2668 = vmatprep.subr.bf16.mxu1 %v2649_v27 }
 0x52d   : > { %v1773_v21 = vpop.permute.xlu0 %1772  ;;  %2669 = vmatpush1.bf16.msra.mxu1 %v2648_v17 }
 0x52e   : > { %v1788_v58 = vsel %vm11143_vm10, %v1773_v21, %v1775_v38  ;;  %v1831_v31 = vpop.permute.xlu1 %1830  ;;  %vm11146_vm10 = vmmov %vm11144_vm13 }
 0x52f   : > { %v1804_v28 = vsel %vm8855_vm11, %v1788_v58, -inf  ;;  %v1734_v58 = vsel %vm8848_vm7, %v9299_v39, -inf }
 0x530   : > { %v1812_v51 = vmax.f32 %v1740_v37, %v1804_v28  ;;  %v1742_v28 = vmax.f32 %v9216_v9, %v1734_v58  ;;  %v1735_v37 = vsel %vm8865_vm5, %v9305_v1, -inf }
 0x531   : > { %v1777_v44 = vpop.permute.xlu0 %1776 }
 0x532   : > { %v1789_v36 = vsel %vm11145_vm0, %v1775_v38, %v1777_v44  ;;  %v1887_v10 = vpop.permute.xlu1 %1886 }
 0x533   : > { %v1805_v41 = vsel %vm11131_vm8, %v1789_v36, -inf }
 0x534   : > { %v1813_v46 = vmax.f32 %v1741_v32, %v1805_v41  ;;  %v1743_v41 = vmax.f32 %v9223_v54, %v1735_v37 }
 0x535   : > { %v1829_v15 = vpop.permute.xlu0 %1828 }
 0x536   : > { %v1844_v63 = vsel %vm11144_vm13, %v1829_v15, %v1831_v31  ;;  %vm11147_vm13 = vcmask 523264  }
 0x537   : > { %v1860_v52 = vsel %vm11129_vm9, %v1844_v63, -inf  ;;  %vm11148_vm0 = vmmov %vm11147_vm13 }
 0x538   : > { %v1868_v7 = vmax.f32 %v1812_v51, %v1860_v52 }
 0x539   : > { %v1833_v47 = vpop.permute.xlu0 %1832 }
 0x53a   : > { %v1845_v4 = vsel %vm11146_vm10, %v1831_v31, %v1833_v47  ;;  %vm11149_vm10 = vcmask 916480  }
 0x53b   : > { %v1861_v48 = vsel %vm11133_vm6, %v1845_v4, -inf }
 0x53c   : > { %v1869_v40 = vmax.f32 %v1813_v46, %v1861_v48 }
 0x53d   : > { %v1885_v61 = vpop.permute.xlu0 %1884 }
 0x53e   : > { %v1900_v6 = vsel %vm11147_vm13, %v1885_v61, %v1887_v10  ;;  %vm11150_vm13 = vcmask 654336  }
 0x53f   : > { %v1916_v55 = vsel %vm11134_vm4, %v1900_v6, -inf }
 0x540   : > { %v9415_v11 = vmax.f32 %v1868_v7, %v1916_v55 }
 0x541   : > { %v1889_v33 = vpop.permute.xlu0 %1888  ;;  %v1779_v13 = vpop.permute.xlu1 %1778 }
 0x542   : > { %v1901_v22 = vsel %vm11148_vm0, %v1887_v10, %v1889_v33  ;;  %1944 = vrot.lane.b32.xlu0 %v9415_v11, %s8299_s23  ;;  %vm11151_vm0 = vmmov %vm11149_vm10 }
 0x543   : > { %v1917_v12 = vsel %vm11136_vm3, %v1901_v22, -inf }
 0x544   : > { %v9422_v27 = vmax.f32 %v1869_v40, %v1917_v12 }
 0x545   : > { %v1783_v17 = vpop.permute.xlu1 %1782  ;;  %v1781_v21 = vpop.permute.xlu0 %1780 }
 0x546   : > { %1946 = vrot.lane.b32.xlu1 %v9422_v27, %s8299_s23  ;;  %v1790_v15 = vsel %vm11149_vm10, %v1779_v13, %v1781_v21  ;;  %v1791_v47 = vsel %vm11151_vm0, %v1781_v21, %v1783_v17  ;;  %vm11152_vm10 = vmmov %vm11150_vm13 }
 0x547   : > { %v1806_v31 = vsel %vm8855_vm11, %v1790_v15, -inf  ;;  %v1807_v52 = vsel %vm11131_vm8, %v1791_v47, -inf  ;;  %vm11176_vm11 = vcmask 777216  }
 0x548   : > { %v1814_v50 = vmax.f32 %v1742_v28, %v1806_v31  ;;  %v1815_v32 = vmax.f32 %v1743_v41, %v1807_v52 }
 0x549   : > { %v1835_v44 = vpop.permute.xlu1 %1834  ;;  %v1837_v38 = vpop.permute.xlu0 %1836 }
 0x54a   : > { %v1846_v19 = vsel %vm11150_vm13, %v1835_v44, %v1837_v38  ;;  %vm11153_vm13 = vcmask 523264  }
 0x54b   : > { %v1862_v36 = vsel %vm11129_vm9, %v1846_v19, -inf  ;;  %vm11154_vm0 = vmmov %vm11153_vm13  ;;  %vm11173_vm9 = vcmask 793600  }
 0x54c   : > { %v1870_v9 = vmax.f32 %v1814_v50, %v1862_v36 }
 0x54d   : > { %v1839_v63 = vpop.permute.xlu1 %1838  ;;  %v1893_v51 = vpop.permute.xlu0 %1892 }
 0x54e   : > { %v1847_v39 = vsel %vm11152_vm10, %v1837_v38, %v1839_v63  ;;  %vm11155_vm10 = vcmask 1047808  }
 0x54f   : > { %v1863_v61 = vsel %vm11133_vm6, %v1847_v39, -inf  ;;  %vm11175_vm6 = vmmov %vm11173_vm9 }
 0x550   : > { %v1871_v48 = vmax.f32 %v1815_v32, %v1863_v61 }
 0x551   : > { %v1891_v4 = vpop.permute.xlu1 %1890 }
 0x552   : > { %v1902_v10 = vsel %vm11153_vm13, %v1891_v4, %v1893_v51  ;;  %vm11156_vm13 = vcmask 261120  }
 0x553   : > { %v1918_v1 = vsel %vm11134_vm4, %v1902_v10, -inf }
 0x554   : > { %v9449_v7 = vmax.f32 %v1870_v9, %v1918_v1 }
 0x555   : > { %v1895_v6 = vpop.permute.xlu1 %1894 }
 0x556   : > { %v1903_v55 = vsel %vm11154_vm0, %v1893_v51, %v1895_v6  ;;  %1948 = vrot.lane.b32.xlu0 %v9449_v7, %s8299_s23  ;;  %v2650_v13 = vpack.c.bf16 %v9449_v7, %v9415_v11  ;;  %vm11157_vm0 = vmmov %vm11156_vm13 }
 0x557   : > { %v1919_v54 = vsel %vm11136_vm3, %v1903_v55, -inf  ;;  %vm11164_vm3 = vcmask 777216  }
 0x558   : > { %v9456_v46 = vmax.f32 %v1871_v48, %v1919_v54 }
 0x55a   : > { %1950 = vrot.lane.b32.xlu1 %v9456_v46, %s8299_s23  ;;  %v2651_v33 = vpack.c.bf16 %v9456_v46, %v9422_v27 }
 0x55c   : > { %2670 = vmatprep.subr.bf16.mxu1 %v2651_v33 }
 0x55d   : > { %2671 = vmatpush1.bf16.msra.mxu1 %v2650_v13 }
 0x584   : > { %v1937_v40 = vpop.permute.xlu0 %1936 }
 0x585   : > { %1968 = vst.msk [vmem:[#allocation2] sm:$0xff] %vm11155_vm10, %v1937_v40 }
 0x588   : > { %v1939_v22 = vpop.permute.xlu1 %1938 }
 0x589   : > { %v1952_v12 = vsel %vm11156_vm13, %v1937_v40, %v1939_v22  ;;  %1970 = vst.msk [vmem:[#allocation2 + $0x10] sm:$0xff] %vm11157_vm0, %v1939_v22  ;;  %vm11158_vm13 = vmmov %vm11157_vm0 }
 0x58a   : > { %2006 = vrot.lane.b32.xlu1 %v1952_v12, %s8300_s24 }
 0x58c   : > { %v1980_v17 = vld [vmem:[#allocation2] sm:$0xff] }
 0x58d   : > { %2004 = vrot.lane.b32.xlu0 %v1980_v17, %s8300_s24 }
 0x58e   : > { %2062 = vrot.lane.b32.xlu1 %v1952_v12, %s10988_s25 }
 0x590   : > { %v1982_v21 = vld [vmem:[#allocation2 + $0x10] sm:$0xff] }
 0x591   : > { %2008 = vrot.lane.b32.xlu0 %v1982_v21, %s8300_s24 }
 0x592   : > { %2118 = vrot.lane.b32.xlu1 %v1952_v12, %s10984_s27 }
 0x595   : > { %2060 = vrot.lane.b32.xlu0 %v1980_v17, %s10988_s25 }
 0x596   : > { %2174 = vrot.lane.b32.xlu1 %v1952_v12, %s8303_s28 }
 0x598   : > { %v1941_v44 = vpop.permute.xlu0 %1940 }
 0x599   : > { %2064 = vrot.lane.b32.xlu0 %v1982_v21, %s10988_s25  ;;  %1971 = vst.msk [vmem:[#allocation2 + $0x18] sm:$0xff] %vm11155_vm10, %v1941_v44 }
 0x59c   : > { %v1943_v38 = vpop.permute.xlu1 %1942 }
 0x59d   : > { %1973 = vst.msk [vmem:[#allocation2 + $0x28] sm:$0xff] %vm11158_vm13, %v1943_v38  ;;  %2116 = vrot.lane.b32.xlu0 %v1980_v17, %s10984_s27  ;;  %v1953_v19 = vsel %vm11157_vm0, %v1941_v44, %v1943_v38  ;;  %vm11159_vm13 = vmmov %vm11157_vm0 }
 0x5a0   : > { %v1983_v15 = vld [vmem:[#allocation2 + $0x18] sm:$0xff] }
 0x5a1   : > { %2120 = vrot.lane.b32.xlu0 %v1982_v21, %s10984_s27  ;;  %2010 = vrot.lane.b32.xlu1 %v1983_v15, %s8300_s24 }
 0x5a4   : > { %v1985_v58 = vld [vmem:[#allocation2 + $0x28] sm:$0xff] }
 0x5a5   : > { %2172 = vrot.lane.b32.xlu0 %v1980_v17, %s8303_s28  ;;  %2014 = vrot.lane.b32.xlu1 %v1985_v58, %s8300_s24 }
 0x5a9   : > { %2176 = vrot.lane.b32.xlu0 %v1982_v21, %s8303_s28  ;;  %2066 = vrot.lane.b32.xlu1 %v1983_v15, %s10988_s25 }
 0x5ad   : > { %2012 = vrot.lane.b32.xlu0 %v1953_v19, %s8300_s24  ;;  %2070 = vrot.lane.b32.xlu1 %v1985_v58, %s10988_s25 }
 0x5b1   : > { %2068 = vrot.lane.b32.xlu0 %v1953_v19, %s10988_s25  ;;  %2122 = vrot.lane.b32.xlu1 %v1983_v15, %s10984_s27 }
 0x5b4   : > { %v1945_v31 = vpop.permute.xlu0 %1944 }
 0x5b5   : > { %1974 = vst.msk [vmem:[#allocation2 + $0x30] sm:$0xff] %vm11155_vm10, %v1945_v31  ;;  %2124 = vrot.lane.b32.xlu0 %v1953_v19, %s10984_s27  ;;  %2126 = vrot.lane.b32.xlu1 %v1985_v58, %s10984_s27 }
 0x5b8   : > { %v1947_v63 = vpop.permute.xlu1 %1946 }
 0x5b9   : > { %1976 = vst.msk [vmem:[#allocation2 + $0x40] sm:$0xff] %vm11159_vm13, %v1947_v63  ;;  %2180 = vrot.lane.b32.xlu0 %v1953_v19, %s8303_s28  ;;  %2178 = vrot.lane.b32.xlu1 %v1983_v15, %s8303_s28  ;;  %v1954_v47 = vsel %vm11157_vm0, %v1945_v31, %v1947_v63  ;;  %vm11160_vm13 = vmmov %vm11157_vm0 }
 0x5bc   : > { %v1986_v28 = vld [vmem:[#allocation2 + $0x30] sm:$0xff] }
 0x5bd   : > { %2016 = vrot.lane.b32.xlu0 %v1986_v28, %s8300_s24  ;;  %2182 = vrot.lane.b32.xlu1 %v1985_v58, %s8303_s28 }
 0x5c0   : > { %v1988_v37 = vld [vmem:[#allocation2 + $0x40] sm:$0xff] }
 0x5c1   : > { %2020 = vrot.lane.b32.xlu0 %v1988_v37, %s8300_s24  ;;  %2018 = vrot.lane.b32.xlu1 %v1954_v47, %s8300_s24 }
 0x5c5   : > { %2072 = vrot.lane.b32.xlu0 %v1986_v28, %s10988_s25  ;;  %2074 = vrot.lane.b32.xlu1 %v1954_v47, %s10988_s25 }
 0x5c8   : > { %v1949_v36 = vpop.permute.xlu0 %1948 }
 0x5c9   : > { %2076 = vrot.lane.b32.xlu0 %v1988_v37, %s10988_s25  ;;  %1977 = vst.msk [vmem:[#allocation2 + $0x48] sm:$0xff] %vm11155_vm10, %v1949_v36  ;;  %2130 = vrot.lane.b32.xlu1 %v1954_v47, %s10984_s27  ;;  %vm11161_vm10 = vcmask 801792  }
 0x5cc   : > { %v1951_v50 = vpop.permute.xlu1 %1950 }
 0x5cd   : > { %1979 = vst.msk [vmem:[#allocation2 + $0x58] sm:$0xff] %vm11160_vm13, %v1951_v50  ;;  %2128 = vrot.lane.b32.xlu0 %v1986_v28, %s10984_s27  ;;  %2186 = vrot.lane.b32.xlu1 %v1954_v47, %s8303_s28  ;;  %v1955_v51 = vsel %vm11157_vm0, %v1949_v36, %v1951_v50  ;;  %vm11162_vm13 = vcmask 793600   ;;  %vm11163_vm0 = vmmov %vm11161_vm10 }
 0x5ce   : > { %vm11165_vm4 = vmmov %vm11162_vm13 }
 0x5d0   : > { %v1989_v39 = vld [vmem:[#allocation2 + $0x48] sm:$0xff] }
 0x5d1   : > { %2132 = vrot.lane.b32.xlu0 %v1988_v37, %s10984_s27  ;;  %2022 = vrot.lane.b32.xlu1 %v1989_v39, %s8300_s24 }
 0x5d4   : > { %v1991_v52 = vld [vmem:[#allocation2 + $0x58] sm:$0xff] }
 0x5d5   : > { %2184 = vrot.lane.b32.xlu0 %v1986_v28, %s8303_s28  ;;  %2026 = vrot.lane.b32.xlu1 %v1991_v52, %s8300_s24 }
 0x5d9   : > { %2188 = vrot.lane.b32.xlu0 %v1988_v37, %s8303_s28  ;;  %2078 = vrot.lane.b32.xlu1 %v1989_v39, %s10988_s25 }
 0x5dd   : > { %2024 = vrot.lane.b32.xlu0 %v1955_v51, %s8300_s24  ;;  %2082 = vrot.lane.b32.xlu1 %v1991_v52, %s10988_s25  ;;  %s10990_s24 = smov 111  }
 0x5e1   : > { %2080 = vrot.lane.b32.xlu0 %v1955_v51, %s10988_s25  ;;  %2134 = vrot.lane.b32.xlu1 %v1989_v39, %s10984_s27 }
 0x5e5   : > { %2136 = vrot.lane.b32.xlu0 %v1955_v51, %s10984_s27  ;;  %2138 = vrot.lane.b32.xlu1 %v1991_v52, %s10984_s27 }
 0x5e9   : > { %2192 = vrot.lane.b32.xlu0 %v1955_v51, %s8303_s28  ;;  %2190 = vrot.lane.b32.xlu1 %v1989_v39, %s8303_s28 }
 0x5ed   : > { %2194 = vrot.lane.b32.xlu1 %v1991_v52, %s8303_s28  ;;  %s10986_s28 = smov 96  }
 0x5fc   : > { %v2007_v4 = vpop.permute.xlu1 %2006 }
 0x5ff   : > { %v2005_v41 = vpop.permute.xlu0 %2004 }
 0x600   : > { %v2063_v10 = vpop.permute.xlu1 %2062  ;;  %v2028_v6 = vsel %vm11161_vm10, %v2005_v41, %v2007_v4  ;;  %vm11166_vm10 = vmmov %vm11164_vm3 }
 0x601   : > { %v2044_v33 = vsel %vm8566_vm12, %v2028_v6, -inf }
 0x602   : > { %v2052_v21 = vmax.f32 %v9343_v5, %v2044_v33 }
 0x603   : > { %v2009_v9 = vpop.permute.xlu0 %2008 }
 0x604   : > { %v2119_v1 = vpop.permute.xlu1 %2118  ;;  %v2029_v13 = vsel %vm11163_vm0, %v2007_v4, %v2009_v9 }
 0x605   : > { %v2045_v38 = vsel %vm8580_vm15, %v2029_v13, -inf }
 0x606   : > { %v2053_v47 = vmax.f32 %v9350_v62, %v2045_v38 }
 0x607   : > { %v2061_v61 = vpop.permute.xlu0 %2060 }
 0x608   : > { %v2175_v55 = vpop.permute.xlu1 %2174  ;;  %v2084_v54 = vsel %vm11162_vm13, %v2061_v61, %v2063_v10  ;;  %vm11169_vm13 = vnez %v11030_v30 }
 0x609   : > { %v2100_v22 = vsel %vm8572_vm14, %v2084_v54, -inf }
 0x60a   : > { %v2108_v58 = vmax.f32 %v2052_v21, %v2100_v22 }
 0x60b   : > { %v2065_v32 = vpop.permute.xlu0 %2064 }
 0x60c   : > { %v2085_v44 = vsel %vm11165_vm4, %v2063_v10, %v2065_v32  ;;  %vm11168_vm4 = vnez %v11028_v8  ;;  %v8227_v8 = vld [vmem:[%s10928_s7 + $0x70] sm:$0xff]  }
 0x60d   : > { %v2101_v31 = vsel %vm8595_vm2, %v2085_v44, -inf }
 0x60e   : > { %v2109_v39 = vmax.f32 %v2053_v47, %v2101_v31 }
 0x60f   : > { %v2117_v48 = vpop.permute.xlu0 %2116 }
 0x610   : > { %v2140_v40 = vsel %vm11164_vm3, %v2117_v48, %v2119_v1  ;;  %vm11167_vm3 = vcmask 769024  }
 0x611   : > { %v2156_v15 = vsel %vm8584_vm1, %v2140_v40, -inf  ;;  %vm11170_vm0 = vmmov %vm11167_vm3 }
 0x612   : > { %v2164_v37 = vmax.f32 %v2108_v58, %v2156_v15 }
 0x613   : > { %v2121_v12 = vpop.permute.xlu0 %2120  ;;  %v2011_v17 = vpop.permute.xlu1 %2010 }
 0x614   : > { %v2141_v19 = vsel %vm11166_vm10, %v2119_v1, %v2121_v12  ;;  %vm11171_vm10 = vnez %v11032_v20 }
 0x615   : > { %v2157_v36 = vsel %vm11168_vm4, %v2141_v19, -inf }
 0x616   : > { %v2165_v41 = vmax.f32 %v2109_v39, %v2157_v36 }
 0x617   : > { %v2173_v63 = vpop.permute.xlu0 %2172  ;;  %v2015_v28 = vpop.permute.xlu1 %2014 }
 0x618   : > { %v2196_v5 = vsel %vm11167_vm3, %v2173_v63, %v2175_v55  ;;  %vm11172_vm3 = vcmask 801792  }
 0x619   : > { %v2212_v50 = vsel %vm11169_vm13, %v2196_v5, -inf }
 0x61a   : > { %v9547_v52 = vmax.f32 %v2164_v37, %v2212_v50 }
 0x61b   : > { %v2177_v51 = vpop.permute.xlu0 %2176  ;;  %v2067_v4 = vpop.permute.xlu1 %2066 }
 0x61c   : > { %v2197_v9 = vsel %vm11170_vm0, %v2175_v55, %v2177_v51  ;;  %2236 = vrot.lane.b32.xlu0 %v9547_v52, %s8299_s23  ;;  %vm11174_vm0 = vmmov %vm11172_vm3 }
 0x61d   : > { %v2213_v62 = vsel %vm11171_vm10, %v2197_v9, -inf }
 0x61e   : > { %v9554_v10 = vmax.f32 %v2165_v41, %v2213_v62 }
 0x61f   : > { %v2013_v61 = vpop.permute.xlu0 %2012  ;;  %v2071_v1 = vpop.permute.xlu1 %2070 }
 0x620   : > { %2238 = vrot.lane.b32.xlu1 %v9554_v10, %s8299_s23  ;;  %v2030_v32 = vsel %vm11172_vm3, %v2011_v17, %v2013_v61  ;;  %v2031_v33 = vsel %vm11174_vm0, %v2013_v61, %v2015_v28  ;;  %vm11180_vm3 = vmmov %vm11174_vm0  ;;  %vm11181_vm0 = vcmask 793600  }
 0x621   : > { %v2046_v55 = vsel %vm8566_vm12, %v2030_v32, -inf  ;;  %v2047_v44 = vsel %vm8580_vm15, %v2031_v33, -inf }
 0x622   : > { %v2054_v12 = vmax.f32 %v9377_v2, %v2046_v55  ;;  %v2055_v2 = vmax.f32 %v9384_v14, %v2047_v44 }
 0x623   : > { %v2069_v6 = vpop.permute.xlu0 %2068  ;;  %v2123_v48 = vpop.permute.xlu1 %2122 }
 0x624   : > { %v2086_v54 = vsel %vm11173_vm9, %v2067_v4, %v2069_v6  ;;  %v2087_v21 = vsel %vm11175_vm6, %v2069_v6, %v2071_v1  ;;  %vm11177_vm9 = vmmov %vm11176_vm11  ;;  %vm11178_vm6 = vcmask 769024  }
 0x625   : > { %v2102_v13 = vsel %vm8572_vm14, %v2086_v54, -inf  ;;  %v2103_v19 = vsel %vm8595_vm2, %v2087_v21, -inf }
 0x626   : > { %v2110_v15 = vmax.f32 %v2054_v12, %v2102_v13  ;;  %v2111_v36 = vmax.f32 %v2055_v2, %v2103_v19 }
 0x627   : > { %v2125_v40 = vpop.permute.xlu0 %2124  ;;  %v2127_v22 = vpop.permute.xlu1 %2126 }
 0x628   : > { %v2142_v17 = vsel %vm11176_vm11, %v2123_v48, %v2125_v40  ;;  %v2143_v58 = vsel %vm11177_vm9, %v2125_v40, %v2127_v22  ;;  %vm11179_vm11 = vmmov %vm11178_vm6 }
 0x629   : > { %v2158_v38 = vsel %vm8584_vm1, %v2142_v17, -inf  ;;  %v2159_v37 = vsel %vm11168_vm4, %v2143_v58, -inf  ;;  %vm11182_vm9 = vmmov %vm11180_vm3 }
 0x62a   : > { %v2166_v28 = vmax.f32 %v2110_v15, %v2158_v38  ;;  %v2167_v4 = vmax.f32 %v2111_v36, %v2159_v37 }
 0x62b   : > { %v2181_v31 = vpop.permute.xlu0 %2180  ;;  %v2179_v63 = vpop.permute.xlu1 %2178 }
 0x62c   : > { %v2198_v47 = vsel %vm11178_vm6, %v2179_v63, %v2181_v31  ;;  %vm11183_vm6 = vcmask 777216  }
 0x62d   : > { %v2214_v5 = vsel %vm11169_vm13, %v2198_v47, -inf }
 0x62e   : > { %v9581_v50 = vmax.f32 %v2166_v28, %v2214_v5 }
 0x62f   : > { %v2017_v39 = vpop.permute.xlu0 %2016  ;;  %v2183_v51 = vpop.permute.xlu1 %2182 }
 0x630   : > { %v2199_v41 = vsel %vm11179_vm11, %v2181_v31, %v2183_v51  ;;  %2240 = vrot.lane.b32.xlu0 %v9581_v50, %s8299_s23  ;;  %vm11184_vm11 = vmmov %vm11181_vm0 }
 0x631   : > { %v2215_v14 = vsel %vm11171_vm10, %v2199_v41, -inf }
 0x632   : > { %v9588_v9 = vmax.f32 %v2167_v4, %v2215_v14 }
 0x633   : > { %v2021_v62 = vpop.permute.xlu0 %2020  ;;  %v2019_v61 = vpop.permute.xlu1 %2018 }
 0x634   : > { %2242 = vrot.lane.b32.xlu1 %v9588_v9, %s8299_s23  ;;  %v2032_v54 = vsel %vm11180_vm3, %v2017_v39, %v2019_v61  ;;  %v2033_v22 = vsel %vm11182_vm9, %v2019_v61, %v2021_v62  ;;  %vm11185_vm3 = vmmov %vm11183_vm6 }
 0x635   : > { %v2048_v40 = vsel %vm8566_vm12, %v2032_v54, -inf  ;;  %v2049_v58 = vsel %vm8580_vm15, %v2033_v22, -inf }
 0x636   : > { %v2056_v38 = vmax.f32 %v9415_v11, %v2048_v40  ;;  %v2057_v37 = vmax.f32 %v9422_v27, %v2049_v58 }
 0x637   : > { %v2073_v1 = vpop.permute.xlu0 %2072  ;;  %v2075_v32 = vpop.permute.xlu1 %2074 }
 0x638   : > { %v2088_v13 = vsel %vm11181_vm0, %v2073_v1, %v2075_v32  ;;  %vm11186_vm0 = vcmask 769024  }
 0x639   : > { %v2104_v21 = vsel %vm8572_vm14, %v2088_v13, -inf  ;;  %vm11187_vm9 = vmmov %vm11186_vm0 }
 0x63a   : > { %v2112_v31 = vmax.f32 %v2056_v38, %v2104_v21 }
 0x63b   : > { %v2077_v6 = vpop.permute.xlu0 %2076  ;;  %v2131_v48 = vpop.permute.xlu1 %2130 }
 0x63c   : > { %v2089_v15 = vsel %vm11184_vm11, %v2075_v32, %v2077_v6 }
 0x63d   : > { %v2105_v2 = vsel %vm8595_vm2, %v2089_v15, -inf }
 0x63e   : > { %v2113_v51 = vmax.f32 %v2057_v37, %v2105_v2 }
 0x63f   : > { %v2129_v55 = vpop.permute.xlu0 %2128  ;;  %v2187_v33 = vpop.permute.xlu1 %2186 }
 0x640   : > { %v2144_v12 = vsel %vm11183_vm6, %v2129_v55, %v2131_v48  ;;  %vm11188_vm6 = vcmask 801792  }
 0x641   : > { %v2160_v19 = vsel %vm8584_vm1, %v2144_v12, -inf }
 0x642   : > { %v2168_v5 = vmax.f32 %v2112_v31, %v2160_v19 }
 0x643   : > { %v2133_v17 = vpop.permute.xlu0 %2132  ;;  %v2023_v44 = vpop.permute.xlu1 %2022 }
 0x644   : > { %v2145_v63 = vsel %vm11185_vm3, %v2131_v48, %v2133_v17  ;;  %vm11189_vm3 = vmmov %vm11188_vm6 }
 0x645   : > { %v2161_v36 = vsel %vm11168_vm4, %v2145_v63, -inf }
 0x646   : > { %v2169_v62 = vmax.f32 %v2113_v51, %v2161_v36 }
 0x647   : > { %v2185_v28 = vpop.permute.xlu0 %2184  ;;  %v2027_v47 = vpop.permute.xlu1 %2026 }
 0x648   : > { %v2200_v11 = vsel %vm11186_vm0, %v2185_v28, %v2187_v33  ;;  %vm11190_vm0 = vmmov %vm11184_vm11 }
 0x649   : > { %v2216_v39 = vsel %vm11169_vm13, %v2200_v11, -inf }
 0x64a   : > { %v9615_v4 = vmax.f32 %v2168_v5, %v2216_v39 }
 0x64b   : > { %v2189_v41 = vpop.permute.xlu0 %2188  ;;  %v2079_v14 = vpop.permute.xlu1 %2078 }
 0x64c   : > { %v2201_v61 = vsel %vm11187_vm9, %v2187_v33, %v2189_v41  ;;  %2244 = vrot.lane.b32.xlu0 %v9615_v4, %s8299_s23  ;;  %vm11191_vm9 = vcmask 777216  }
 0x64d   : > { %v2217_v27 = vsel %vm11171_vm10, %v2201_v61, -inf }
 0x64e   : > { %v9622_v1 = vmax.f32 %v2169_v62, %v2217_v27 }
 0x64f   : > { %v2025_v32 = vpop.permute.xlu0 %2024  ;;  %v2083_v6 = vpop.permute.xlu1 %2082 }
 0x650   : > { %2246 = vrot.lane.b32.xlu1 %v9622_v1, %s8299_s23  ;;  %v2034_v48 = vsel %vm11188_vm6, %v2023_v44, %v2025_v32  ;;  %v2035_v40 = vsel %vm11189_vm3, %v2025_v32, %v2027_v47  ;;  %vm11193_vm6 = vcmask 769024  }
 0x651   : > { %v2050_v33 = vsel %vm8566_vm12, %v2034_v48, -inf  ;;  %v2051_v15 = vsel %vm8580_vm15, %v2035_v40, -inf  ;;  %vm11192_vm12 = vmmov %vm11191_vm9 }
 0x652   : > { %v2058_v17 = vmax.f32 %v9449_v7, %v2050_v33  ;;  %v2059_v7 = vmax.f32 %v9456_v46, %v2051_v15  ;;  %vm11194_vm15 = vmmov %vm11193_vm6 }
 0x653   : > { %v2081_v54 = vpop.permute.xlu0 %2080  ;;  %v2135_v55 = vpop.permute.xlu1 %2134 }
 0x654   : > { %v2090_v13 = vsel %vm11184_vm11, %v2079_v14, %v2081_v54  ;;  %v2091_v38 = vsel %vm11190_vm0, %v2081_v54, %v2083_v6  ;;  %vm11196_vm11 = vcmask 261120  }
 0x655   : > { %v2106_v22 = vsel %vm8572_vm14, %v2090_v13, -inf  ;;  %v2107_v31 = vsel %vm8595_vm2, %v2091_v38, -inf  ;;  %vm11197_vm3 = vmmov %vm11196_vm11 }
 0x656   : > { %v2114_v58 = vmax.f32 %v2058_v17, %v2106_v22  ;;  %v2115_v5 = vmax.f32 %v2059_v7, %v2107_v31  ;;  %vm11199_vm0 = vmmov %vm11197_vm3  ;;  %v8207_v22 = vld [vmem:[%s10926_s5 + $0x20] sm:$0xff]   ;;  %v8208_v7 = vld [vmem:[%s10926_s5 + $0x28] sm:$0xff]  }
 0x657   : > { %v2137_v12 = vpop.permute.xlu0 %2136  ;;  %v2139_v21 = vpop.permute.xlu1 %2138 }
 0x658   : > { %v2146_v44 = vsel %vm11191_vm9, %v2135_v55, %v2137_v12  ;;  %v2147_v19 = vsel %vm11192_vm12, %v2137_v12, %v2139_v21  ;;  %v8206_v55 = vld [vmem:[%s10926_s5 + $0x8] sm:$0xff]   ;;  %vm11200_vm9 = vmmov %vm11199_vm0 }
 0x659   : > { %v2162_v43 = vsel %vm8584_vm1, %v2146_v44, -inf  ;;  %v2163_v56 = vsel %vm11168_vm4, %v2147_v19, -inf  ;;  %vm11201_vm12 = vmmov %vm11199_vm0 }
 0x65a   : > { %v2170_v28 = vmax.f32 %v2114_v58, %v2162_v43  ;;  %v2171_v39 = vmax.f32 %v2115_v5, %v2163_v56  ;;  %6823 = vmatmul.mubr.msk.bf16.gmra.mrb[4].mxu1 %vm11201_vm12, %v8206_v55  ;;  %v2815_v56 = vld [vmem:[%s10927_s6] sm:$0xff]  ;;  %vm11209_vm12 = vmmov %vm11199_vm0  ;;  %v2816_v5 = vld [vmem:[%s10927_s6 + $0x8] sm:$0xff] }
 0x65b   : > { %v2193_v63 = vpop.permute.xlu0 %2192  ;;  %v2191_v2 = vpop.permute.xlu1 %2190  ;;  %2700 = vmatprep.mubr.bf16.mxu1 %v8297_v0 }
 0x65c   : > { %v2202_v47 = vsel %vm11193_vm6, %v2191_v2, %v2193_v63  ;;  %vm11202_vm6 = vmmov %vm11199_vm0 }
 0x65d   : > { %v2218_v37 = vsel %vm11169_vm13, %v2202_v47, -inf  ;;  %vm11195_vm13 = vcmask 1047808   ;;  %v8209_v47 = vld [vmem:[%s10926_s5 + $0x10] sm:$0xff]  }
 0x65e   : > { %v9649_v11 = vmax.f32 %v2170_v28, %v2218_v37  ;;  %6818 = vmatmul.mubr.msk.bf16.vlgmr.msra.gmra.mrb[8].mxu0 %vm11209_vm12, %v8209_v47  ;;  %v2817_v37 = vld [vmem:[%s10927_s6 + $0x10] sm:$0xff]  ;;  %vm11218_vm12 = vcmask 523264  }
 0x65f   : > { %v2195_v36 = vpop.permute.xlu1 %2194  ;;  %2563 = vmatprep.mubr.bf16.mxu0 %v8297_v0 }
 0x660   : > { %v2203_v51 = vsel %vm11194_vm15, %v2193_v63, %v2195_v36  ;;  %2248 = vrot.lane.b32.xlu0 %v9649_v11, %s8299_s23  ;;  %v8211_v36 = vld [vmem:[%s10926_s5 + $0x18] sm:$0xff]  }
 0x661   : > { %v2219_v46 = vsel %vm11171_vm10, %v2203_v51, -inf  ;;  %vm11198_vm10 = vmmov %vm11195_vm13 }
 0x662   : > { %v9656_v41 = vmax.f32 %v2171_v39, %v2219_v46  ;;  %6830 = vmatmul.mubr.msk.bf16.vlgmr.msra.gmra.mrb[0].mxu1 %vm11202_vm6, %v8207_v22  ;;  %vm11203_vm15 = vmmov %vm11198_vm10  ;;  %v2818_v39 = vld [vmem:[%s10927_s6 + $0x18] sm:$0xff] }
 0x663   : > { %2710 = vmatprep.mubr.bf16.mxu1 %v8297_v0  ;;  %vm11210_vm6 = vmmov %vm11199_vm0 }
 0x664   : > { %2250 = vrot.lane.b32.xlu1 %v9656_v41, %s8299_s23 }
 0x666   : > { %6819 = vmatmul.mubr.msk.bf16.gmra.mrb[12].mxu0 %vm11210_vm6, %v8211_v36  ;;  %vm11219_vm6 = vmmov %vm11218_vm12 }
 0x667   : > { %3145 = vmatprep.mubr.bf16.mxu0 %v8297_v0 }
 0x68e   : > { %v2237_v30 = vpop.permute.xlu0 %2236 }
 0x68f   : > { %2268 = vst.msk [vmem:[#allocation2] sm:$0xff] %vm11195_vm13, %v2237_v30  ;;  %vm11204_vm13 = vmmov %vm11199_vm0 }
 0x692   : > { %v2239_v14 = vpop.permute.xlu1 %2238 }
 0x693   : > { %2270 = vst.msk [vmem:[#allocation2 + $0x10] sm:$0xff] %vm11196_vm11, %v2239_v14  ;;  %v9663_v62 = vsel %vm11197_vm3, %v2237_v30, %v2239_v14  ;;  %vm11205_vm11 = vmmov %vm11199_vm0 }
 0x694   : > { %vm11206_vm3 = vmmov %vm11198_vm10 }
 0x696   : > { %v9671_v6 = vld [vmem:[#allocation2] sm:$0xff] }
 0x69a   : > { %v2304_v61 = vld [vmem:[#allocation2 + $0x10] sm:$0xff] }
 0x69b   : > { %v7626_v27 = vpack.i.bf16 %v2304_v61, %v9663_v62 }
 0x69d   : > { %7627 = vrot.lane.b32.xlu1 %v7626_v27, %s10980_s17  ;;  %7622 = vrot.lane.b32.xlu0 %v7626_v27, %s8304_s16 }
 0x6a1   : > { %7632 = vrot.lane.b32.xlu0 %v7626_v27, %s8306_s20 }
 0x6a2   : > { %v2241_v20 = vpop.permute.xlu0 %2240 }
 0x6a3   : > { %2271 = vst.msk [vmem:[#allocation2 + $0x18] sm:$0xff] %vm11198_vm10, %v2241_v20  ;;  %vm11207_vm10 = vmmov %vm11199_vm0 }
 0x6a6   : > { %v2243_v32 = vpop.permute.xlu1 %2242 }
 0x6a7   : > { %2273 = vst.msk [vmem:[#allocation2 + $0x28] sm:$0xff] %vm11199_vm0, %v2243_v32  ;;  %v9683_v13 = vsel %vm11200_vm9, %v2241_v20, %v2243_v32  ;;  %vm11208_vm9 = vmmov %vm11199_vm0 }
 0x6a8   : > { %6831 = vmatmul.mubr.msk.bf16.gmra.mrb[4].mxu1 %vm11208_vm9, %v8208_v7  ;;  %v2291_v7 = vsel %vm8865_vm5, %v9683_v13, -inf  ;;  %vm11217_vm9 = vnez %v11044_v60 }
 0x6a9   : > { %2786 = vmatprep.mubr.bf16.mxu1 %v8297_v0 }
 0x6aa   : > { %v9673_v48 = vld [vmem:[#allocation2 + $0x18] sm:$0xff] }
 0x6ab   : > { %v7641_v54 = vpack.i.bf16 %v9673_v48, %v9671_v6 }
 0x6ad   : > { %7642 = vrot.lane.b32.xlu1 %v7641_v54, %s10980_s17  ;;  %7637 = vrot.lane.b32.xlu0 %v7641_v54, %s8304_s16 }
 0x6ae   : > { %v2305_v33 = vld [vmem:[#allocation2 + $0x28] sm:$0xff] }
 0x6af   : > { %v7656_v40 = vpack.i.bf16 %v2305_v33, %v9683_v13 }
 0x6b1   : > { %7647 = vrot.lane.b32.xlu1 %v7641_v54, %s8306_s20  ;;  %7657 = vrot.lane.b32.xlu0 %v7656_v40, %s10980_s17  ;;  %v2289_v54 = vsel %vm8865_vm5, %v9663_v62, -inf }
 0x6b5   : > { %7652 = vrot.lane.b32.xlu1 %v7656_v40, %s8304_s16 }
 0x6b9   : > { %7662 = vrot.lane.b32.xlu1 %v7656_v40, %s8306_s20  ;;  %v2288_v40 = vsel %vm8848_vm7, %v9671_v6, -inf  ;;  %v2290_v6 = vsel %vm8848_vm7, %v9673_v48, -inf }
 0x6be   : > { %v2245_v12 = vpop.permute.xlu0 %2244 }
 0x6bf   : > { %2274 = vst.msk [vmem:[#allocation2 + $0x30] sm:$0xff] %vm11203_vm15, %v2245_v12  ;;  %vm11211_vm15 = vcmask 916480  }
 0x6c2   : > { %v2247_v21 = vpop.permute.xlu1 %2246 }
 0x6c3   : > { %2276 = vst.msk [vmem:[#allocation2 + $0x40] sm:$0xff] %vm11204_vm13, %v2247_v21  ;;  %v9700_v17 = vsel %vm11205_vm11, %v2245_v12, %v2247_v21  ;;  %vm11212_vm13 = vmmov %vm11211_vm15  ;;  %vm11213_vm11 = vcmask 654336  }
 0x6c6   : > { %v9708_v58 = vld [vmem:[#allocation2 + $0x30] sm:$0xff] }
 0x6ca   : > { %v2306_v38 = vld [vmem:[#allocation2 + $0x40] sm:$0xff] }
 0x6cb   : > { %v7676_v44 = vpack.i.bf16 %v2306_v38, %v9700_v17 }
 0x6cd   : > { %7677 = vrot.lane.b32.xlu1 %v7676_v44, %s8306_s20  ;;  %7667 = vrot.lane.b32.xlu0 %v7676_v44, %s8304_s16 }
 0x6d1   : > { %7672 = vrot.lane.b32.xlu0 %v7676_v44, %s10980_s17  ;;  %v2296_v44 = vmax.f32 %v9547_v52, %v2288_v40 }
 0x6d2   : > { %v2249_v15 = vpop.permute.xlu0 %2248 }
 0x6d3   : > { %2277 = vst.msk [vmem:[#allocation2 + $0x48] sm:$0xff] %vm11206_vm3, %v2249_v15  ;;  %vm11214_vm3 = vnez %v11040_v53  ;;  %v4710_v53 = vld [vmem:[%s10931_s10 + $0x8] sm:$0xff] }
 0x6d6   : > { %v2251_v43 = vpop.permute.xlu1 %2250 }
 0x6d7   : > { %2279 = vst.msk [vmem:[#allocation2 + $0x58] sm:$0xff] %vm11207_vm10, %v2251_v43  ;;  %v9716_v63 = vsel %vm11199_vm0, %v2249_v15, %v2251_v43  ;;  %vm11215_vm10 = vmmov %vm11213_vm11  ;;  %vm11216_vm0 = vnez %v11048_v16  ;;  %v8235_v16 = vld [vmem:[%s10928_s7 + $0xb0] sm:$0xff]  }
 0x6da   : > { %v9710_v19 = vld [vmem:[#allocation2 + $0x48] sm:$0xff] }
 0x6db   : > { %v7681_v31 = vpack.i.bf16 %v9710_v19, %v9708_v58 }
 0x6dd   : > { %7682 = vrot.lane.b32.xlu0 %v7681_v31, %s8304_s16 }
 0x6de   : > { %v2307_v2 = vld [vmem:[#allocation2 + $0x58] sm:$0xff] }
 0x6df   : > { %v7691_v28 = vpack.i.bf16 %v2307_v2, %v9716_v63 }
 0x6e1   : > { %7687 = vrot.lane.b32.xlu0 %v7681_v31, %s10980_s17  ;;  %7692 = vrot.lane.b32.xlu1 %v7691_v28, %s8304_s16 }
 0x6e5   : > { %7702 = vrot.lane.b32.xlu0 %v7691_v28, %s8306_s20  ;;  %7697 = vrot.lane.b32.xlu1 %v7691_v28, %s10980_s17 }
 0x6e9   : > { %2821 = vperm.xlu0 %7619, %v2815_v56   ;;  %7707 = vrot.lane.b32.xlu1 %v7681_v31, %s8306_s20  ;;  %v2297_v31 = vmax.f32 %v9554_v10, %v2289_v54 }
 0x6ed   : > { %2831 = vperm.xlu0 %7619, %v2817_v37   ;;  %2826 = vperm.xlu1 %7620, %v2816_v5  }
 0x6f1   : > { %2836 = vperm.xlu1 %7620, %v2818_v39   ;;  %v2298_v39 = vmax.f32 %v9581_v50, %v2290_v6 }
 0x70f   : > { %v7623_v51 = vpop.permute.xlu0 %7622  ;;  %v7628_v46 = vpop.permute.xlu1 %7627 }
 0x710   : > { %v7625_v30 = vunpack.i.h.bf16 %v7623_v51  ;;  %v7624_v14 = vunpack.i.l.bf16 %v7623_v51  ;;  %v7630_v55 = vunpack.i.h.bf16 %v7628_v46  ;;  %v7629_v33 = vunpack.i.l.bf16 %v7628_v46 }
 0x711   : > { %v2299_v46 = vmax.f32 %v9588_v9, %v2291_v7 }
 0x712   : > { %v2345_v27 = vsel %vm11211_vm15, %v7624_v14, %v7625_v30  ;;  %v2401_v62 = vsel %vm11213_vm11, %v7629_v33, %v7630_v55  ;;  %vm11220_vm15 = vmmov %vm11215_vm10  ;;  %vm11222_vm11 = vcmask 916480  }
 0x713   : > { %v7633_v61 = vpop.permute.xlu0 %7632  ;;  %v2361_v12 = vsel %vm11131_vm8, %v2345_v27, -inf  ;;  %v2417_v48 = vsel %vm11216_vm0, %v2401_v62, -inf }
 0x714   : > { %v7635_v28 = vunpack.i.h.bf16 %v7633_v61  ;;  %v7634_v47 = vunpack.i.l.bf16 %v7633_v61  ;;  %v2369_v56 = vmax.f32 %v2297_v31, %v2361_v12 }
 0x716   : > { %v2425_v55 = vmax.f32 %v2369_v56, %v2417_v48 }
 0x71f   : > { %v7643_v20 = vpop.permute.xlu1 %7642  ;;  %v7638_v32 = vpop.permute.xlu0 %7637 }
 0x720   : > { %v7639_v22 = vunpack.i.l.bf16 %v7638_v32  ;;  %v7644_v21 = vunpack.i.l.bf16 %v7643_v20  ;;  %v7645_v30 = vunpack.i.h.bf16 %v7643_v20 }
 0x722   : > { %v2344_v38 = vsel %vm11212_vm13, %v7639_v22, %v7624_v14  ;;  %v2400_v37 = vsel %vm11215_vm10, %v7644_v21, %v7629_v33  ;;  %v7640_v14 = vunpack.i.h.bf16 %v7638_v32  ;;  %v2457_v33 = vsel %vm11219_vm6, %v7634_v47, %v7635_v28  ;;  %vm11221_vm13 = vmmov %vm11215_vm10 }
 0x723   : > { %v7648_v15 = vpop.permute.xlu1 %7647  ;;  %v7658_v43 = vpop.permute.xlu0 %7657  ;;  %v2360_v2 = vsel %vm11214_vm3, %v2344_v38, -inf  ;;  %v2416_v61 = vsel %vm11217_vm9, %v2400_v37, -inf  ;;  %vm11223_vm10 = vmmov %vm11222_vm11  ;;  %vm11225_vm6 = vnez %v11053_v45 }
 0x724   : > { %v7649_v52 = vunpack.i.l.bf16 %v7648_v15  ;;  %v7660_v10 = vunpack.i.h.bf16 %v7658_v43  ;;  %v7659_v5 = vunpack.i.l.bf16 %v7658_v43  ;;  %v2368_v36 = vmax.f32 %v2296_v44, %v2360_v2 }
 0x725   : > { %v7650_v20 = vunpack.i.h.bf16 %v7648_v15  ;;  %v2473_v7 = vsel %vm11225_vm6, %v2457_v33, -inf }
 0x726   : > { %v2456_v54 = vsel %vm11218_vm12, %v7649_v52, %v7634_v47  ;;  %v2402_v50 = vsel %vm11220_vm15, %v7645_v30, %v7659_v5  ;;  %v2403_v40 = vsel %vm11221_vm13, %v7659_v5, %v7660_v10  ;;  %v2424_v38 = vmax.f32 %v2368_v36, %v2416_v61 }
 0x727   : > { %v7653_v51 = vpop.permute.xlu1 %7652  ;;  %vm11224_vm12 = vnez %v11050_v18  ;;  %v2418_v6 = vsel %vm11217_vm9, %v2402_v50, -inf  ;;  %v2419_v15 = vsel %vm11216_vm0, %v2403_v40, -inf  ;;  %vm11226_vm15 = vcmask 523264   ;;  %v8212_v18 = vld [vmem:[%s10926_s5 + $0x38] sm:$0xff]  }
 0x728   : > { %v7655_v13 = vunpack.i.h.bf16 %v7653_v51  ;;  %v7654_v27 = vunpack.i.l.bf16 %v7653_v51  ;;  %v2472_v2 = vsel %vm11224_vm12, %v2456_v54, -inf  ;;  %vm11227_vm13 = vmmov %vm11226_vm15  ;;  %v2481_v5 = vmax.f32 %v2425_v55, %v2473_v7 }
 0x729   : > { %v2293_v55 = vsel %vm8865_vm5, %v9700_v17, -inf  ;;  %v2295_v17 = vsel %vm8865_vm5, %v9716_v63, -inf }
 0x72a   : > { %v2346_v9 = vsel %vm11222_vm11, %v7640_v14, %v7654_v27  ;;  %v2347_v22 = vsel %vm11223_vm10, %v7654_v27, %v7655_v13  ;;  %vm11228_vm11 = vmmov %vm11223_vm10  ;;  %vm11229_vm10 = vcmask 654336  }
 0x72b   : > { %v2362_v32 = vsel %vm11214_vm3, %v2346_v9, -inf  ;;  %v2363_v12 = vsel %vm11131_vm8, %v2347_v22, -inf  ;;  %v7663_v21 = vpop.permute.xlu1 %7662  ;;  %vm11232_vm5 = vmmov %vm11229_vm10 }
 0x72c   : > { %v2370_v44 = vmax.f32 %v2298_v39, %v2362_v32  ;;  %v7665_v43 = vunpack.i.h.bf16 %v7663_v21  ;;  %v7664_v31 = vunpack.i.l.bf16 %v7663_v21  ;;  %v2371_v62 = vmax.f32 %v2299_v46, %v2363_v12 }
 0x72d   : > { %v2480_v39 = vmax.f32 %v2424_v38, %v2472_v2  ;;  %v2292_v32 = vsel %vm8848_vm7, %v9708_v58, -inf  ;;  %v2294_v38 = vsel %vm8848_vm7, %v9710_v19, -inf  ;;  %v2301_v2 = vmax.f32 %v9622_v1, %v2293_v55  ;;  %vm11231_vm7 = vmmov %vm11227_vm13 }
 0x72e   : > { %v2458_v28 = vsel %vm11226_vm15, %v7650_v20, %v7664_v31  ;;  %v2427_v47 = vmax.f32 %v2371_v62, %v2419_v15  ;;  %v2459_v52 = vsel %vm11227_vm13, %v7664_v31, %v7665_v43  ;;  %v2426_v56 = vmax.f32 %v2370_v44, %v2418_v6  ;;  %vm11230_vm15 = vmmov %vm11228_vm11 }
 0x72f   : > { %v2474_v37 = vsel %vm11224_vm12, %v2458_v28, -inf  ;;  %v2475_v10 = vsel %vm11225_vm6, %v2459_v52, -inf  ;;  %v2300_v6 = vmax.f32 %v9615_v4, %v2292_v32  ;;  %v2302_v42 = vmax.f32 %v9649_v11, %v2294_v38  ;;  %vm11233_vm13 = vmmov %vm11228_vm11 }
 0x730   : > { %v2483_v36 = vmax.f32 %v2427_v47, %v2475_v10  ;;  %v2482_v51 = vmax.f32 %v2426_v56, %v2474_v37  ;;  %v2303_v19 = vmax.f32 %v9656_v41, %v2295_v17 }
 0x731   : > { %v2555_v45 = vpop.f32.mrb[8].mxu0 }
 0x732   : > { %v2735_v46 = vpack.c.bf16 %v2483_v36, %v2481_v5  ;;  %v2734_v48 = vpack.c.bf16 %v2482_v51, %v2480_v39 }
 0x734   : > { %2754 = vmatprep.subr.bf16.mxu1 %v2735_v46 }
 0x735   : > { %2755 = vmatpush1.bf16.msra.mxu1 %v2734_v48 }
 0x73f   : > { %v7668_v30 = vpop.permute.xlu0 %7667  ;;  %v7678_v61 = vpop.permute.xlu1 %7677 }
 0x740   : > { %v7670_v13 = vunpack.i.h.bf16 %v7668_v30  ;;  %v7669_v27 = vunpack.i.l.bf16 %v7668_v30  ;;  %v7680_v9 = vunpack.i.h.bf16 %v7678_v61  ;;  %v7679_v22 = vunpack.i.l.bf16 %v7678_v61 }
 0x742   : > { %v2349_v20 = vsel %vm11228_vm11, %v7669_v27, %v7670_v13  ;;  %v2461_v63 = vsel %vm11231_vm7, %v7679_v22, %v7680_v9 }
 0x743   : > { %v7673_v14 = vpop.permute.xlu0 %7672  ;;  %v2365_v58 = vsel %vm11131_vm8, %v2349_v20, -inf }
 0x744   : > { %v7675_v54 = vunpack.i.h.bf16 %v7673_v14  ;;  %v7674_v33 = vunpack.i.l.bf16 %v7673_v14  ;;  %v2373_v10 = vmax.f32 %v2301_v2, %v2365_v58 }
 0x746   : > { %v2405_v12 = vsel %vm11229_vm10, %v7674_v33, %v7675_v54  ;;  %vm11234_vm10 = vmmov %vm11232_vm5 }
 0x747   : > { %v2421_v59 = vsel %vm11216_vm0, %v2405_v12, -inf  ;;  %v2477_v12 = vsel %vm11225_vm6, %v2461_v63, -inf }
 0x748   : > { %v2429_v14 = vmax.f32 %v2373_v10, %v2421_v59 }
 0x74f   : > { %v7683_v50 = vpop.permute.xlu0 %7682 }
 0x750   : > { %v7684_v40 = vunpack.i.l.bf16 %v7683_v50  ;;  %v7685_v15 = vunpack.i.h.bf16 %v7683_v50 }
 0x752   : > { %v2348_v43 = vsel %vm11230_vm15, %v7684_v40, %v7669_v27  ;;  %vm11235_vm15 = vmmov %vm11232_vm5 }
 0x753   : > { %v7688_v21 = vpop.permute.xlu0 %7687  ;;  %v7693_v44 = vpop.permute.xlu1 %7692  ;;  %v2364_v28 = vsel %vm11214_vm3, %v2348_v43, -inf }
 0x754   : > { %v7689_v31 = vunpack.i.l.bf16 %v7688_v21  ;;  %v7695_v62 = vunpack.i.h.bf16 %v7693_v44  ;;  %v7694_v7 = vunpack.i.l.bf16 %v7693_v44  ;;  %v7690_v5 = vunpack.i.h.bf16 %v7688_v21 }
 0x755   : > { %v2372_v46 = vmax.f32 %v2300_v6, %v2364_v28 }
 0x756   : > { %v2404_v1 = vsel %vm11232_vm5, %v7689_v31, %v7674_v33  ;;  %v2350_v47 = vsel %vm11233_vm13, %v7685_v15, %v7694_v7  ;;  %v2351_v4 = vsel %vm11228_vm11, %v7694_v7, %v7695_v62  ;;  %vm11236_vm5 = vmmov %vm11231_vm7  ;;  %v2485_v62 = vmax.f32 %v2429_v14, %v2477_v12 }
 0x757   : > { %v7703_v52 = vpop.permute.xlu0 %7702  ;;  %v7698_v56 = vpop.permute.xlu1 %7697  ;;  %v2366_v11 = vsel %vm11214_vm3, %v2350_v47, -inf  ;;  %v2367_v41 = vsel %vm11131_vm8, %v2351_v4, -inf  ;;  %v2420_v48 = vsel %vm11217_vm9, %v2404_v1, -inf  ;;  %vm11237_vm13 = vmmov %vm11236_vm5  ;;  %vm11238_vm11 = vcmask 261120  }
 0x758   : > { %v7705_v37 = vunpack.i.h.bf16 %v7703_v52  ;;  %v7704_v36 = vunpack.i.l.bf16 %v7703_v52  ;;  %v7700_v39 = vunpack.i.h.bf16 %v7698_v56  ;;  %v7699_v51 = vunpack.i.l.bf16 %v7698_v56 }
 0x759   : > { %v2374_v30 = vmax.f32 %v2302_v42, %v2366_v11  ;;  %v2375_v54 = vmax.f32 %v2303_v19, %v2367_v41  ;;  %v2428_v20 = vmax.f32 %v2372_v46, %v2420_v48  ;;  %v2557_v42 = vpop.f32.mrb[9].mxu0 }
 0x75a   : > { %v2406_v13 = vsel %vm11234_vm10, %v7690_v5, %v7699_v51  ;;  %v2407_v27 = vsel %vm11235_vm15, %v7699_v51, %v7700_v39  ;;  %v2463_v33 = vsel %vm11231_vm7, %v7704_v36, %v7705_v37  ;;  %v2559_v19 = vpop.f32.mrb[10].mxu0 }
 0x75b   : > { %v7708_v61 = vpop.permute.xlu1 %7707  ;;  %v2422_v50 = vsel %vm11217_vm9, %v2406_v13, -inf  ;;  %v2423_v9 = vsel %vm11216_vm0, %v2407_v27, -inf  ;;  %v2479_v17 = vsel %vm11225_vm6, %v2463_v33, -inf  ;;  %v2561_v59 = vpop.f32.mrb[11].mxu0 }
 0x75c   : > { %v7710_v40 = vunpack.i.h.bf16 %v7708_v61  ;;  %v7709_v55 = vunpack.i.l.bf16 %v7708_v61  ;;  %v2431_v32 = vmax.f32 %v2375_v54, %v2423_v9  ;;  %v2430_v21 = vmax.f32 %v2374_v30, %v2422_v50  ;;  %v2565_v63 = vpop.f32.mrb[12].mxu0 }
 0x75d   : > { %v2567_v28 = vpop.f32.mrb[13].mxu0 }
 0x75e   : > { %v2460_v38 = vsel %vm11236_vm5, %v7709_v55, %v7679_v22  ;;  %v2462_v44 = vsel %vm11237_vm13, %v7710_v40, %v7704_v36  ;;  %v2487_v2 = vmax.f32 %v2431_v32, %v2479_v17  ;;  %v8210_v22 = vld [vmem:[%s10926_s5 + $0x30] sm:$0xff]   ;;  %v2569_v1 = vpop.f32.mrb[14].mxu0 }
 0x75f   : > { %v2476_v43 = vsel %vm11224_vm12, %v2460_v38, -inf  ;;  %v2478_v31 = vsel %vm11224_vm12, %v2462_v44, -inf  ;;  %vm11239_vm12 = vmmov %vm11238_vm11  ;;  %v2571_v47 = vpop.f32.mrb[15].mxu0 }
 0x760   : > { %v2484_v58 = vmax.f32 %v2428_v20, %v2476_v43  ;;  %v2486_v6 = vmax.f32 %v2430_v21, %v2478_v31  ;;  %v2737_v15 = vpack.c.bf16 %v2487_v2, %v2485_v62 }
 0x762   : > { %v2736_v7 = vpack.c.bf16 %v2486_v6, %v2484_v58  ;;  %2756 = vmatprep.subr.bf16.mxu1 %v2737_v15 }
 0x764   : > { %2757 = vmatpush1.bf16.msra.mxu1 %v2736_v7 }
 0x767   : > { %6838 = vmatmul.mubr.msk.bf16.vlgmr.msra.gmra.mrb[0].mxu1 %vm11238_vm11, %v8210_v22 }
 0x768   : > { %2796 = vmatprep.mubr.bf16.mxu1 %v8297_v0  ;;  %v2822_v11 = vpop.permute.xlu0 %2821 }
 0x76c   : > { %v2827_v39 = vpop.permute.xlu1 %2826  ;;  %v2832_v9 = vpop.permute.xlu0 %2831 }
 0x76f   : > { %6839 = vmatmul.mubr.msk.bf16.gmra.mrb[4].mxu1 %vm11239_vm12, %v8212_v18 }
 0x770   : > { %4781 = vmatprep.mubr.bf16.mxu1 %v8297_v0  ;;  %v2837_v17 = vpop.permute.xlu1 %2836 }
 0x83a   : > { %v2788_v4 = vpop.f32.mrb[0].mxu1 }
 0x83b   : > { %v7316_v52 = vadd.f32 %v2788_v4, %v2555_v45  ;;  %v2790_v56 = vpop.f32.mrb[1].mxu1 }
 0x83c   : > { %v7317_v41 = vadd.f32 %v2790_v56, %v2557_v42  ;;  %v2792_v37 = vpop.f32.mrb[2].mxu1 }
 0x83d   : > { %v2839_v10 = vadd.f32 %v7316_v52, %v2822_v11  ;;  %v7318_v5 = vadd.f32 %v2792_v37, %v2559_v19  ;;  %v2794_v36 = vpop.f32.mrb[3].mxu1 }
 0x83e   : > { %v2840_v51 = vadd.f32 %v7317_v41, %v2822_v11  ;;  %v7319_v46 = vadd.f32 %v2794_v36, %v2561_v59 }
 0x83f   : > { %v2855_v48 = vmul.f32 0.1, %v2839_v10  ;;  %v2841_v30 = vadd.f32 %v7318_v5, %v2827_v39  ;;  %vm2847_vm6 = vcmp.gt.f32.partialorder %v2839_v10, 0.0 }
 0x840   : > { %v2856_v14 = vmul.f32 0.1, %v2840_v51  ;;  %v2842_v13 = vadd.f32 %v7319_v46, %v2827_v39  ;;  %vm2848_vm10 = vcmp.gt.f32.partialorder %v2840_v51, 0.0 }
 0x841   : > { %v2857_v27 = vmul.f32 0.1, %v2841_v30  ;;  %v2863_v61 = vsel %vm2847_vm6, %v2839_v10, %v2855_v48  ;;  %vm2849_vm15 = vcmp.gt.f32.partialorder %v2841_v30, 0.0  ;;  %vm11240_vm6 = vcmask 1047808  }
 0x842   : > { %v2858_v54 = vmul.f32 0.1, %v2842_v13  ;;  %2879 = vrot.lane.b32.xlu0 %v2863_v61, %s8299_s23  ;;  %v2798_v33 = vpop.f32.mrb[4].mxu1  ;;  %v2864_v50 = vsel %vm2848_vm10, %v2840_v51, %v2856_v14  ;;  %vm2850_vm7 = vcmp.gt.f32.partialorder %v2842_v13, 0.0  ;;  %vm11241_vm10 = vcmask 261120  }
 0x843   : > { %v7320_v40 = vadd.f32 %v2798_v33, %v2565_v63  ;;  %2881 = vrot.lane.b32.xlu1 %v2864_v50, %s8299_s23  ;;  %v2800_v55 = vpop.f32.mrb[5].mxu1  ;;  %v2865_v44 = vsel %vm2849_vm15, %v2841_v30, %v2857_v27  ;;  %vm11242_vm15 = vmmov %vm11240_vm6 }
 0x844   : > { %v7321_v20 = vadd.f32 %v2800_v55, %v2567_v28  ;;  %v2802_v32 = vpop.f32.mrb[6].mxu1  ;;  %v2866_v62 = vsel %vm2850_vm7, %v2842_v13, %v2858_v54  ;;  %vm11243_vm7 = vmmov %vm11241_vm10 }
 0x845   : > { %v2843_v12 = vadd.f32 %v7320_v40, %v2832_v9  ;;  %v7322_v21 = vadd.f32 %v2802_v32, %v2569_v1  ;;  %v2804_v38 = vpop.f32.mrb[7].mxu1 }
 0x846   : > { %v2844_v43 = vadd.f32 %v7321_v20, %v2832_v9  ;;  %v7323_v31 = vadd.f32 %v2804_v38, %v2571_v47  ;;  %2883 = vrot.lane.b32.xlu0 %v2865_v44, %s8299_s23  ;;  %v4586_v38 = vld [vmem:[%s10929_s8 + $0x8] sm:$0xff]  ;;  %v4587_v44 = vld [vmem:[%s10929_s8 + $0x10] sm:$0xff] }
 0x847   : > { %v2859_v2 = vmul.f32 0.1, %v2843_v12  ;;  %v2845_v58 = vadd.f32 %v7322_v21, %v2837_v17  ;;  %2885 = vrot.lane.b32.xlu1 %v2866_v62, %s8299_s23  ;;  %vm2851_vm5 = vcmp.gt.f32.partialorder %v2843_v12, 0.0  ;;  %v4585_v21 = vld [vmem:[%s10929_s8] sm:$0xff] }
 0x848   : > { %v2860_v6 = vmul.f32 0.1, %v2844_v43  ;;  %v2846_v15 = vadd.f32 %v7323_v31, %v2837_v17  ;;  %vm2852_vm13 = vcmp.gt.f32.partialorder %v2844_v43, 0.0  ;;  %v4588_v17 = vld [vmem:[%s10929_s8 + $0x18] sm:$0xff] }
 0x849   : > { %v2861_v7 = vmul.f32 0.1, %v2845_v58  ;;  %v2867_v22 = vsel %vm2851_vm5, %v2843_v12, %v2859_v2  ;;  %vm2853_vm11 = vcmp.gt.f32.partialorder %v2845_v58, 0.0  ;;  %vm11244_vm5 = vmmov %vm11243_vm7  ;;  %v4589_v2 = vld [vmem:[%s10929_s8 + $0x20] sm:$0xff] }
 0x84a   : > { %v2862_v18 = vmul.f32 0.1, %v2846_v15  ;;  %2887 = vrot.lane.b32.xlu0 %v2867_v22, %s8299_s23  ;;  %v2868_v45 = vsel %vm2852_vm13, %v2844_v43, %v2860_v6  ;;  %vm2854_vm12 = vcmp.gt.f32.partialorder %v2846_v15, 0.0  ;;  %vm11245_vm13 = vmmov %vm11240_vm6 }
 0x84b   : > { %2889 = vrot.lane.b32.xlu1 %v2868_v45, %s8299_s23  ;;  %v2869_v42 = vsel %vm2853_vm11, %v2845_v58, %v2861_v7  ;;  %vm11246_vm11 = vmmov %vm11244_vm5  ;;  %v4590_v58 = vld [vmem:[%s10929_s8 + $0x28] sm:$0xff] }
 0x84c   : > { %v2870_v19 = vsel %vm2854_vm12, %v2846_v15, %v2862_v18  ;;  %vm11247_vm12 = vmmov %vm11244_vm5 }
 0x84e   : > { %2891 = vrot.lane.b32.xlu0 %v2869_v42, %s8299_s23 }
 0x84f   : > { %2893 = vrot.lane.b32.xlu1 %v2870_v19, %s8299_s23 }
 0x8b4   : > { %v2880_v59 = vpop.permute.xlu0 %2879 }
 0x8b5   : > { %2911 = vst.msk [vmem:[#allocation2] sm:$0xff] %vm11240_vm6, %v2880_v59  ;;  %v2882_v63 = vpop.permute.xlu1 %2881 }
 0x8b6   : > { %2913 = vst.msk [vmem:[#allocation2 + $0x10] sm:$0xff] %vm11241_vm10, %v2882_v63  ;;  %v2895_v4 = vsel %vm11244_vm5, %v2880_v59, %v2882_v63  ;;  %vm11248_vm10 = vmmov %vm11244_vm5 }
 0x8b8   : > { %v2884_v28 = vpop.permute.xlu0 %2883 }
 0x8b9   : > { %2914 = vst.msk [vmem:[#allocation2 + $0x18] sm:$0xff] %vm11242_vm15, %v2884_v28  ;;  %v2886_v1 = vpop.permute.xlu1 %2885  ;;  %vm11249_vm15 = vmmov %vm11244_vm5 }
 0x8ba   : > { %2916 = vst.msk [vmem:[#allocation2 + $0x28] sm:$0xff] %vm11243_vm7, %v2886_v1  ;;  %v2896_v5 = vsel %vm11247_vm12, %v2884_v28, %v2886_v1  ;;  %vm11250_vm7 = vmmov %vm11244_vm5  ;;  %vm11252_vm5 = vnez %v11014_v25  ;;  %vm11254_vm12 = vcmask 916480   ;;  %v4591_v28 = vld [vmem:[%s10929_s8 + $0x30] sm:$0xff]  ;;  %v4592_v1 = vld [vmem:[%s10929_s8 + $0x38] sm:$0xff] }
 0x8bb   : > { %v3678_v55 = vpack.c.bf16 %v2896_v5, %v2895_v4 }
 0x8bc   : > { %v2888_v47 = vpop.permute.xlu0 %2887  ;;  %v2931_v37 = vld [vmem:[#allocation2] sm:$0xff] }
 0x8bd   : > { %2917 = vst.msk [vmem:[#allocation2 + $0x30] sm:$0xff] %vm11245_vm13, %v2888_v47  ;;  %v2890_v52 = vpop.permute.xlu1 %2889  ;;  %v2933_v56 = vld [vmem:[#allocation2 + $0x10] sm:$0xff]  ;;  %vm11253_vm13 = vnez %v11034_v23 }
 0x8be   : > { %2919 = vst.msk [vmem:[#allocation2 + $0x40] sm:$0xff] %vm11246_vm11, %v2890_v52  ;;  %v9880_v11 = vpack.i.bf16 %v2933_v56, %v2895_v4  ;;  %v2897_v48 = vsel %vm11249_vm15, %v2888_v47, %v2890_v52  ;;  %vm2943_vm11 = vmand %vm11253_vm13, %vm11252_vm5 }
 0x8c0   : > { %v2892_v41 = vpop.permute.xlu0 %2891  ;;  %7712 = vrot.lane.b32.xlu0 %v9880_v11, %s8304_s16  ;;  %v2934_v10 = vld [vmem:[#allocation2 + $0x18] sm:$0xff] }
 0x8c1   : > { %2920 = vst.msk [vmem:[#allocation2 + $0x48] sm:$0xff] %vm11240_vm6, %v2892_v41  ;;  %v2894_v36 = vpop.permute.xlu1 %2893  ;;  %v9886_v39 = vpack.i.bf16 %v2934_v10, %v2931_v37  ;;  %v2936_v51 = vld [vmem:[#allocation2 + $0x28] sm:$0xff]  ;;  %v3677_v9 = vpack.c.bf16 %v2934_v10, %v2931_v37  ;;  %vm11255_vm6 = vmmov %vm11254_vm12 }
 0x8c2   : > { %2922 = vst.msk [vmem:[#allocation2 + $0x58] sm:$0xff] %vm11248_vm10, %v2894_v36  ;;  %v9889_v46 = vpack.i.bf16 %v2936_v51, %v2896_v5  ;;  %v2898_v61 = vsel %vm11250_vm7, %v2892_v41, %v2894_v36  ;;  %v3679_v40 = vpack.c.bf16 %v2936_v51, %v2933_v56  ;;  %vm11256_vm10 = vmmov %vm11255_vm6  ;;  %v2944_v41 = vsel %vm2943_vm11, 1, %v8297_v0 }
 0x8c3   : > { %v3681_v20 = vpack.c.bf16 %v2898_v61, %v2897_v48  ;;  %vm11257_vm15 = vmmov %vm11255_vm6 }
 0x8c4   : > { %7717 = vrot.lane.b32.xlu0 %v9886_v39, %s8304_s16  ;;  %7722 = vrot.lane.b32.xlu1 %v9889_v46, %s8304_s16  ;;  %v2937_v13 = vld [vmem:[#allocation2 + $0x30] sm:$0xff]  ;;  %vm10014_vm7 = vmpackc.low %vm11131_vm8, %vm11131_vm8  ;;  %vm10992_vm8 = vcmask 924672  }
 0x8c5   : > { %v2939_v30 = vld [vmem:[#allocation2 + $0x40] sm:$0xff] }
 0x8c6   : > { %v9896_v14 = vpack.i.bf16 %v2939_v30, %v2897_v48 }
 0x8c8   : > { %7727 = vrot.lane.b32.xlu1 %v9896_v14, %s8304_s16  ;;  %v2940_v27 = vld [vmem:[#allocation2 + $0x48] sm:$0xff] }
 0x8c9   : > { %v7736_v54 = vpack.i.bf16 %v2940_v27, %v2937_v13  ;;  %v2942_v33 = vld [vmem:[#allocation2 + $0x58] sm:$0xff]  ;;  %v3680_v12 = vpack.c.bf16 %v2940_v27, %v2937_v13 }
 0x8ca   : > { %v7731_v50 = vpack.i.bf16 %v2942_v33, %v2898_v61  ;;  %v3682_v32 = vpack.c.bf16 %v2942_v33, %v2939_v30  ;;  %v4712_v33 = vld [vmem:[%s10931_s10 + $0x18] sm:$0xff] }
 0x8cc   : > { %7737 = vrot.lane.b32.xlu1 %v7736_v54, %s8304_s16  ;;  %7732 = vrot.lane.b32.xlu0 %v7731_v50, %s8304_s16 }
 0x8d0   : > { %7747 = vrot.lane.b32.xlu1 %v9889_v46, %s8307_s30  ;;  %7742 = vrot.lane.b32.xlu0 %v9880_v11, %s8307_s30 }
 0x8d4   : > { %7757 = vrot.lane.b32.xlu1 %v9896_v14, %s8307_s30  ;;  %7752 = vrot.lane.b32.xlu0 %v9886_v39, %s8307_s30 }
 0x8d8   : > { %7767 = vrot.lane.b32.xlu1 %v7736_v54, %s8307_s30  ;;  %7762 = vrot.lane.b32.xlu0 %v7731_v50, %s8307_s30 }
 0x8dc   : > { %7777 = vrot.lane.b32.xlu1 %v9889_v46, %s10990_s24  ;;  %7772 = vrot.lane.b32.xlu0 %v9880_v11, %s10990_s24 }
 0x8e0   : > { %7787 = vrot.lane.b32.xlu1 %v9896_v14, %s10990_s24  ;;  %7782 = vrot.lane.b32.xlu0 %v9886_v39, %s10990_s24 }
 0x8e4   : > { %7797 = vrot.lane.b32.xlu1 %v7736_v54, %s10990_s24  ;;  %7792 = vrot.lane.b32.xlu0 %v7731_v50, %s10990_s24 }
 0x8e8   : > { %7807 = vrot.lane.b32.xlu1 %v9889_v46, %s10988_s25  ;;  %7802 = vrot.lane.b32.xlu0 %v9880_v11, %s10988_s25 }
 0x8ec   : > { %7817 = vrot.lane.b32.xlu1 %v9896_v14, %s10988_s25  ;;  %7812 = vrot.lane.b32.xlu0 %v9886_v39, %s10988_s25 }
 0x8f0   : > { %7827 = vrot.lane.b32.xlu1 %v7736_v54, %s10988_s25  ;;  %7822 = vrot.lane.b32.xlu0 %v7731_v50, %s10988_s25  ;;  %s11363_s25 = smov 95  }
 0x8f4   : > { %3713 = vrot.lane.b32.xlu1 %v3679_v40, %s10986_s28  ;;  %3711 = vrot.lane.b32.xlu0 %v3678_v55, %s10986_s28 }
 0x8f8   : > { %3709 = vrot.lane.b32.xlu0 %v3677_v9, %s10986_s28  ;;  %3717 = vrot.lane.b32.xlu1 %v3681_v20, %s10986_s28  ;;  %v2948_v20 = vrot.slane %v2944_v41, %v8543_v24 }
 0x8fc   : > { %3719 = vrot.lane.b32.xlu0 %v3682_v32, %s10986_s28  ;;  %3715 = vrot.lane.b32.xlu1 %v3680_v12, %s10986_s28 }
 0x900   : > { %7832 = vrot.lane.b32.xlu0 %v9880_v11, %s10984_s27  ;;  %7837 = vrot.lane.b32.xlu1 %v9889_v46, %s10984_s27 }
 0x904   : > { %7842 = vrot.lane.b32.xlu0 %v9886_v39, %s10984_s27  ;;  %7847 = vrot.lane.b32.xlu1 %v9896_v14, %s10984_s27 }
 0x908   : > { %7852 = vrot.lane.b32.xlu0 %v7731_v50, %s10984_s27  ;;  %7857 = vrot.lane.b32.xlu1 %v7736_v54, %s10984_s27  ;;  %s11364_s27 = smov 81  }
 0x90c   : > { %7862 = vrot.lane.b32.xlu0 %v9880_v11, %s10982_s21  ;;  %7867 = vrot.lane.b32.xlu1 %v9889_v46, %s10982_s21 }
 0x910   : > { %7872 = vrot.lane.b32.xlu0 %v9886_v39, %s10982_s21  ;;  %7877 = vrot.lane.b32.xlu1 %v9896_v14, %s10982_s21 }
 0x914   : > { %7882 = vrot.lane.b32.xlu0 %v7731_v50, %s10982_s21  ;;  %7887 = vrot.lane.b32.xlu1 %v7736_v54, %s10982_s21 }
 0x918   : > { %7892 = vrot.lane.b32.xlu0 %v9880_v11, %s11251_s22  ;;  %7897 = vrot.lane.b32.xlu1 %v9889_v46, %s11251_s22 }
 0x91c   : > { %7902 = vrot.lane.b32.xlu0 %v9886_v39, %s11251_s22  ;;  %7907 = vrot.lane.b32.xlu1 %v9896_v14, %s11251_s22 }
 0x920   : > { %7912 = vrot.lane.b32.xlu0 %v7731_v50, %s11251_s22  ;;  %7917 = vrot.lane.b32.xlu1 %v7736_v54, %s11251_s22 }
 0x924   : > { %7922 = vrot.lane.b32.xlu0 %v9880_v11, %s8311_s26  ;;  %7927 = vrot.lane.b32.xlu1 %v9889_v46, %s8311_s26  ;;  %v11260_v11 = vmov 0 }
 0x928   : > { %7932 = vrot.lane.b32.xlu0 %v9886_v39, %s8311_s26  ;;  %7937 = vrot.lane.b32.xlu1 %v9896_v14, %s8311_s26  ;;  %v2952_v39 = vrot.slane %v2944_v41, %v8557_v35 }
 0x92c   : > { %7942 = vrot.lane.b32.xlu0 %v7731_v50, %s8311_s26  ;;  %7947 = vrot.lane.b32.xlu1 %v7736_v54, %s8311_s26  ;;  %v4711_v54 = vld [vmem:[%s10931_s10 + $0x10] sm:$0xff] }
 0x930   : > { %4595 = vperm.xlu0 %7619, %v4585_v21   ;;  %4600 = vperm.xlu1 %7620, %v4586_v38  }
 0x932   : > { %v7713_v43 = vpop.permute.xlu0 %7712 }
 0x933   : > { %v7715_v31 = vunpack.i.h.bf16 %v7713_v43  ;;  %v7714_v62 = vunpack.i.l.bf16 %v7713_v43  ;;  %v8213_v43 = vld [vmem:[%s10928_s7 + $0x20] sm:$0xff]  }
 0x934   : > { %4605 = vperm.xlu0 %7619, %v4587_v44   ;;  %4610 = vperm.xlu1 %7620, %v4588_v17  }
 0x935   : > { %v3054_v42 = vsel %vm11254_vm12, %v7714_v62, %v7715_v31  ;;  %vm10021_vm12 = vmpackc.low %vm11214_vm3, %vm11214_vm3  ;;  %v11267_v31 = vmov 0 }
 0x936   : > { %v7718_v6 = vpop.permute.xlu0 %7717  ;;  %v7723_v15 = vpop.permute.xlu1 %7722  ;;  %v11261_v11 = vsel %vm10021_vm12, 4294967295, %v11260_v11  ;;  %vm11262_vm3 = vmmov %vm11255_vm6 }
 0x937   : > { %v7720_v7 = vunpack.i.h.bf16 %v7718_v6  ;;  %v7719_v22 = vunpack.i.l.bf16 %v7718_v6  ;;  %v7725_v18 = vunpack.i.h.bf16 %v7723_v15  ;;  %v7724_v45 = vunpack.i.l.bf16 %v7723_v15  ;;  %vm11263_vm11 = vmmov %vm11262_vm3 }
 0x938   : > { %4615 = vperm.xlu0 %7619, %v4589_v2   ;;  %4620 = vperm.xlu1 %7620, %v4590_v58  }
 0x939   : > { %v3053_v19 = vsel %vm11255_vm6, %v7719_v22, %v7714_v62  ;;  %v3055_v59 = vsel %vm11256_vm10, %v7720_v7, %v7724_v45  ;;  %v3056_v63 = vsel %vm11257_vm15, %v7724_v45, %v7725_v18  ;;  %vm11264_vm6 = vmmov %vm11262_vm3  ;;  %vm2954_vm15 = vcmp.eq.s32.totalorder %v2952_v39, 1 }
 0x93a   : > { %v6856_v47 = vpack.c.bf16 %v3055_v59, %v3053_v19  ;;  %v7728_v4 = vpop.permute.xlu1 %7727  ;;  %v6853_v56 = vpack.c.bf16 %v3056_v63, %v3054_v42  ;;  %vm11265_vm10 = vmmov %vm11262_vm3  ;;  %v11270_v42 = vmov 0 }
 0x93b   : > { %v7730_v37 = vunpack.i.h.bf16 %v7728_v4  ;;  %v7729_v10 = vunpack.i.l.bf16 %v7728_v4 }
 0x93c   : > { %4625 = vperm.xlu0 %7619, %v4591_v28   ;;  %4630 = vperm.xlu1 %7620, %v4592_v1  }
 0x93d   : > { %6854 = vmatprep.subr.msk.bf16.mxu0 %vm10014_vm7, %v6853_v56  ;;  %v3058_v14 = vsel %vm11262_vm3, %v7729_v10, %v7730_v37  ;;  %vm11266_vm3 = vnez %v11016_v29 }
 0x93e   : > { %6857 = vmatpush1.bf16.msk.msra.mxu0 %vm10021_vm12, %v6856_v47  ;;  %v7733_v5 = vpop.permute.xlu0 %7732  ;;  %v7738_v36 = vpop.permute.xlu1 %7737 }
 0x93f   : > { %v7735_v51 = vunpack.i.h.bf16 %v7733_v5  ;;  %v7734_v46 = vunpack.i.l.bf16 %v7733_v5  ;;  %v7740_v48 = vunpack.i.h.bf16 %v7738_v36  ;;  %v7739_v30 = vunpack.i.l.bf16 %v7738_v36 }
 0x940   : > { %4715 = vperm.xlu0 %7619, %v4709_v34   ;;  %4720 = vperm.xlu1 %7620, %v4710_v53   ;;  %v8214_v53 = vld [vmem:[%s10928_s7 + $0x28] sm:$0xff]  }
 0x941   : > { %v3060_v13 = vsel %vm11263_vm11, %v7734_v46, %v7735_v51  ;;  %v3059_v27 = vsel %vm11264_vm6, %v7740_v48, %v7734_v46  ;;  %v3057_v61 = vsel %vm11265_vm10, %v7739_v30, %v7729_v10  ;;  %vm3300_vm11 = vmand %vm11253_vm13, %vm11266_vm3  ;;  %vm2953_vm13 = vcmp.eq.s32.totalorder %v2948_v20, 1  ;;  %v8216_v20 = vld [vmem:[%s10928_s7 + $0x38] sm:$0xff]  }
 0x942   : > { %v6862_v50 = vpack.c.bf16 %v3059_v27, %v3057_v61  ;;  %v7743_v40 = vpop.permute.xlu0 %7742  ;;  %v7748_v55 = vpop.permute.xlu1 %7747  ;;  %v6859_v9 = vpack.c.bf16 %v3060_v13, %v3058_v14  ;;  %vm10059_vm6 = vmpackc.low %vm2954_vm15, %vm2954_vm15  ;;  %v3301_v15 = vsel %vm3300_vm11, 1, %v8297_v0  ;;  %vm11269_vm10 = vcmask 261120   ;;  %v8257_v61 = vld [vmem:[%s10932_s11 + $0x10] sm:$0xff]  }
 0x943   : > { %v7745_v32 = vunpack.i.h.bf16 %v7743_v40  ;;  %v7744_v12 = vunpack.i.l.bf16 %v7743_v40  ;;  %v7750_v21 = vunpack.i.h.bf16 %v7748_v55  ;;  %v7749_v38 = vunpack.i.l.bf16 %v7748_v55  ;;  %vm10071_vm15 = vmpackc.low %vm2953_vm13, %vm2953_vm13 }
 0x944   : > { %4725 = vperm.xlu0 %7619, %v4711_v54   ;;  %4730 = vperm.xlu1 %7620, %v4712_v33   ;;  %v11268_v31 = vsel %vm10059_vm6, 4294967295, %v11267_v31  ;;  %v11271_v42 = vsel %vm10071_vm15, 4294967295, %v11270_v42  ;;  %v3309_v28 = vrot.slane %v3301_v15, %v8557_v35  ;;  %vm10999_vm11 = vcmask 908288   ;;  %v8215_v33 = vld [vmem:[%s10928_s7 + $0x30] sm:$0xff]  }
 0x945   : > { %v2993_v44 = vsel %vm10992_vm8, %v7744_v12, %v7745_v32  ;;  %v2995_v17 = vsel %vm10992_vm8, %v7749_v38, %v7750_v21  ;;  %6860 = vmatprep.subr.msk.bf16.mxu0 %vm10014_vm7, %v6859_v9 }
 0x946   : > { %6863 = vmatpush1.bf16.msk.msra.mxu0 %vm10021_vm12, %v6862_v50  ;;  %v7753_v23 = vpop.permute.xlu0 %7752  ;;  %v7758_v62 = vpop.permute.xlu1 %7757  ;;  %v6873_v2 = vpack.c.bf16 %v2995_v17, %v2993_v44  ;;  %vm3311_vm13 = vcmp.eq.s32.totalorder %v3309_v28, 1 }
 0x947   : > { %v7755_v58 = vunpack.i.h.bf16 %v7753_v23  ;;  %v7754_v6 = vunpack.i.l.bf16 %v7753_v23  ;;  %v7760_v18 = vunpack.i.h.bf16 %v7758_v62  ;;  %v7759_v45 = vunpack.i.l.bf16 %v7758_v62 }
 0x948   : > { %6874 = vmatprep.subr.msk.bf16.mxu0 %vm10059_vm6, %v6873_v2 }
 0x949   : > { %v2992_v7 = vsel %vm10992_vm8, %v7754_v6, %v7744_v12  ;;  %v2994_v22 = vsel %vm10992_vm8, %v7755_v58, %v7749_v38  ;;  %6864 = vmatmul.mubr.msk.bf16.vlgmr.msra.gmra.mrb[16].mxu0 %vm11269_vm10, %v8213_v43  ;;  %v2997_v41 = vsel %vm10992_vm8, %v7759_v45, %v7760_v18  ;;  %v3305_v12 = vrot.slane %v3301_v15, %v8543_v24 }
 0x94a   : > { %v6876_v19 = vpack.c.bf16 %v2994_v22, %v2992_v7  ;;  %v7763_v59 = vpop.permute.xlu0 %7762  ;;  %v7768_v63 = vpop.permute.xlu1 %7767  ;;  %3155 = vmatprep.mubr.bf16.mxu0 %v8297_v0  ;;  %v8217_v22 = vld [vmem:[%s10928_s7] sm:$0xff]  }
 0x94b   : > { %v7765_v1 = vunpack.i.h.bf16 %v7763_v59  ;;  %v7764_v47 = vunpack.i.l.bf16 %v7763_v59  ;;  %v7770_v4 = vunpack.i.h.bf16 %v7768_v63  ;;  %v7769_v56 = vunpack.i.l.bf16 %v7768_v63 }
 0x94c   : > { %6877 = vmatpush1.bf16.msk.msra.mxu0 %vm10071_vm15, %v6876_v19  ;;  %v11275_v63 = vmov 0 }
 0x94d   : > { %v2999_v37 = vsel %vm10992_vm8, %v7764_v47, %v7765_v1  ;;  %v2998_v10 = vsel %vm10992_vm8, %v7770_v4, %v7764_v47  ;;  %v2996_v34 = vsel %vm10992_vm8, %v7769_v56, %v7759_v45  ;;  %vm10091_vm8 = vmpackc.low %vm3311_vm13, %vm3311_vm13 }
 0x94e   : > { %v6882_v5 = vpack.c.bf16 %v2998_v10, %v2996_v34  ;;  %v7773_v36 = vpop.permute.xlu0 %7772  ;;  %v7778_v39 = vpop.permute.xlu1 %7777  ;;  %v6879_v51 = vpack.c.bf16 %v2999_v37, %v2997_v41  ;;  %vm11274_vm13 = vmmov %vm11269_vm10  ;;  %v8261_v34 = vld [vmem:[%s10932_s11 + $0x50] sm:$0xff]  }
 0x94f   : > { %v7775_v46 = vunpack.i.h.bf16 %v7773_v36  ;;  %v7774_v48 = vunpack.i.l.bf16 %v7773_v36  ;;  %v7780_v30 = vunpack.i.h.bf16 %v7778_v39  ;;  %v7779_v14 = vunpack.i.l.bf16 %v7778_v39 }
 0x950   : > { %6880 = vmatprep.subr.msk.bf16.mxu0 %vm10059_vm6, %v6879_v51  ;;  %vm11278_vm6 = vcmask 793600   ;;  %v8220_v51 = vld [vmem:[%s10928_s7 + $0x18] sm:$0xff]  }
 0x951   : > { %v3338_v13 = vsel %vm10999_vm11, %v7774_v48, %v7775_v46  ;;  %v3340_v27 = vsel %vm10999_vm11, %v7779_v14, %v7780_v30  ;;  %6865 = vmatmul.mubr.msk.bf16.gmra.mrb[20].mxu0 %vm11269_vm10, %v8214_v53  ;;  %vm11279_vm12 = vmmov %vm11278_vm6 }
 0x952   : > { %6883 = vmatpush1.bf16.msk.msra.mxu0 %vm10071_vm15, %v6882_v5  ;;  %v6901_v54 = vpack.c.bf16 %v3340_v27, %v3338_v13  ;;  %3165 = vmatprep.mubr.bf16.mxu0 %v8297_v0  ;;  %v7783_v50 = vpop.permute.xlu0 %7782  ;;  %v7788_v40 = vpop.permute.xlu1 %7787  ;;  %vm11277_vm15 = vcmask 261120   ;;  %v8218_v5 = vld [vmem:[%s10928_s7 + $0x8] sm:$0xff]  }
 0x953   : > { %v7784_v32 = vunpack.i.l.bf16 %v7783_v50  ;;  %v7785_v21 = vunpack.i.h.bf16 %v7783_v50  ;;  %v7790_v62 = vunpack.i.h.bf16 %v7788_v40  ;;  %v7789_v2 = vunpack.i.l.bf16 %v7788_v40 }
 0x954   : > { %6902 = vmatprep.subr.msk.bf16.mxu0 %vm10091_vm8, %v6901_v54 }
 0x955   : > { %v3337_v23 = vsel %vm10999_vm11, %v7784_v32, %v7774_v48  ;;  %v3339_v58 = vsel %vm10999_vm11, %v7785_v21, %v7779_v14  ;;  %v3342_v1 = vsel %vm10999_vm11, %v7789_v2, %v7790_v62 }
 0x956   : > { %v7793_v55 = vpop.permute.xlu0 %7792  ;;  %v7798_v9 = vpop.permute.xlu1 %7797  ;;  %v6904_v28 = vpack.c.bf16 %v3339_v58, %v3337_v23 }
 0x957   : > { %v7795_v38 = vunpack.i.h.bf16 %v7793_v55  ;;  %v7794_v44 = vunpack.i.l.bf16 %v7793_v55  ;;  %v7800_v7 = vunpack.i.h.bf16 %v7798_v9  ;;  %v7799_v15 = vunpack.i.l.bf16 %v7798_v9 }
 0x959   : > { %6866 = vmatmul.mubr.msk.bf16.gmra.mrb[24].mxu0 %vm11269_vm10, %v8215_v33  ;;  %vm3310_vm10 = vcmp.eq.s32.totalorder %v3305_v12, 1  ;;  %v3344_v6 = vsel %vm10999_vm11, %v7794_v44, %v7795_v38  ;;  %v3343_v47 = vsel %vm10999_vm11, %v7800_v7, %v7794_v44  ;;  %v3341_v4 = vsel %vm10999_vm11, %v7799_v15, %v7789_v2  ;;  %v8222_v2 = vld [vmem:[%s10928_s7 + $0x48] sm:$0xff]  }
 0x95a   : > { %3175 = vmatprep.mubr.bf16.mxu0 %v8297_v0  ;;  %v7803_v17 = vpop.permute.xlu0 %7802  ;;  %v7808_v43 = vpop.permute.xlu1 %7807  ;;  %v6907_v56 = vpack.c.bf16 %v3344_v6, %v3342_v1  ;;  %v6910_v10 = vpack.c.bf16 %v3343_v47, %v3341_v4  ;;  %v11288_v12 = vmov 0  ;;  %v8223_v6 = vld [vmem:[%s10928_s7 + $0x50] sm:$0xff]  }
 0x95b   : > { %v7805_v18 = vunpack.i.h.bf16 %v7803_v17  ;;  %v7804_v45 = vunpack.i.l.bf16 %v7803_v17  ;;  %v7810_v19 = vunpack.i.h.bf16 %v7808_v43  ;;  %v7809_v59 = vunpack.i.l.bf16 %v7808_v43 }
 0x95d   : > { %v3520_v41 = vsel %vm11278_vm6, %v7804_v45, %v7805_v18  ;;  %v3522_v37 = vsel %vm11279_vm12, %v7809_v59, %v7810_v19  ;;  %vm11282_vm12 = vmmov %vm11277_vm15 }
 0x95e   : > { %v6929_v53 = vpack.c.bf16 %v3522_v37, %v3520_v41  ;;  %v7813_v36 = vpop.permute.xlu0 %7812  ;;  %v7818_v39 = vpop.permute.xlu1 %7817 }
 0x95f   : > { %v7815_v48 = vunpack.i.h.bf16 %v7813_v36  ;;  %v7814_v30 = vunpack.i.l.bf16 %v7813_v36  ;;  %v7820_v54 = vunpack.i.h.bf16 %v7818_v39  ;;  %v7819_v33 = vunpack.i.l.bf16 %v7818_v39  ;;  %v8226_v39 = vld [vmem:[%s10928_s7 + $0x68] sm:$0xff]  }
 0x961   : > { %6867 = vmatmul.mubr.msk.bf16.gmra.mrb[28].mxu0 %vm11274_vm13, %v8216_v20  ;;  %vm10117_vm13 = vmpackc.low %vm3310_vm10, %vm3310_vm10  ;;  %v8221_v20 = vld [vmem:[%s10928_s7 + $0x40] sm:$0xff]  }
 0x962   : > { %3250 = vmatprep.mubr.bf16.mxu0 %v8297_v0  ;;  %v11276_v63 = vsel %vm10117_vm13, 4294967295, %v11275_v63  ;;  %vm10135_vm10 = vmpackc.low %vm8595_vm2, %vm8595_vm2  ;;  %v7823_v46 = vpop.permute.xlu0 %7822  ;;  %v7828_v27 = vpop.permute.xlu1 %7827 }
 0x963   : > { %vm11283_vm2 = vmmov %vm11282_vm12  ;;  %v7825_v14 = vunpack.i.h.bf16 %v7823_v46  ;;  %v7824_v13 = vunpack.i.l.bf16 %v7823_v46  ;;  %v7830_v55 = vunpack.i.h.bf16 %v7828_v27  ;;  %v7829_v9 = vunpack.i.l.bf16 %v7828_v27 }
 0x964   : > { %vm11284_vm6 = vmmov %vm11283_vm2 }
 0x966   : > { %v3712_v49 = vpop.permute.xlu0 %3711  ;;  %v3714_v23 = vpop.permute.xlu1 %3713 }
 0x969   : > { %6884 = vmatmul.mubr.msk.bf16.vlgmr.msra.gmra.mrb[16].mxu0 %vm11277_vm15, %v8217_v22  ;;  %vm11285_vm15 = vcmask 793600  }
 0x96a   : > { %6905 = vmatpush1.bf16.msk.msra.mxu0 %vm10117_vm13, %v6904_v28  ;;  %3260 = vmatprep.mubr.bf16.mxu0 %v8297_v0  ;;  %v3519_v50 = vsel %vm11285_vm15, %v7814_v30, %v7804_v45  ;;  %v3710_v7 = vpop.permute.xlu0 %3709  ;;  %v3718_v15 = vpop.permute.xlu1 %3717  ;;  %v8224_v45 = vld [vmem:[%s10928_s7 + $0x58] sm:$0xff]   ;;  %v8225_v28 = vld [vmem:[%s10928_s7 + $0x60] sm:$0xff]  }
 0x96b   : > { %6908 = vmatprep.subr.msk.bf16.mxu0 %vm10091_vm8, %v6907_v56 }
 0x96e   : > { %6911 = vmatpush1.bf16.msk.msra.mxu0 %vm10117_vm13, %v6910_v10  ;;  %vm11293_vm13 = vcmask 261120   ;;  %v3720_v22 = vpop.permute.xlu0 %3719  ;;  %v3716_v18 = vpop.permute.xlu1 %3715 }
 0x96f   : > { %6930 = vmatprep.subr.msk.bf16.mxu0 %vm10135_vm10, %v6929_v53 }
 0x971   : > { %6885 = vmatmul.mubr.msk.bf16.gmra.mrb[20].mxu0 %vm11282_vm12, %v8218_v5  ;;  %vm11286_vm12 = vmmov %vm11285_vm15  ;;  %v8269_v5 = vld [vmem:[%s10932_s11 + $0x90] sm:$0xff]  }
 0x972   : > { %3270 = vmatprep.mubr.bf16.mxu0 %v8297_v0  ;;  %v3521_v40 = vsel %vm11286_vm12, %v7815_v48, %v7809_v59  ;;  %v7833_v19 = vpop.permute.xlu0 %7832  ;;  %v7838_v59 = vpop.permute.xlu1 %7837 }
 0x973   : > { %v6932_v21 = vpack.c.bf16 %v3521_v40, %v3519_v50  ;;  %v7835_v1 = vunpack.i.h.bf16 %v7833_v19  ;;  %v7834_v47 = vunpack.i.l.bf16 %v7833_v19  ;;  %v7840_v4 = vunpack.i.h.bf16 %v7838_v59 }
 0x974   : > { %v7839_v56 = vunpack.i.l.bf16 %v7838_v59  ;;  %v8273_v59 = vld [vmem:[%s10932_s11 + $0xb0] sm:$0xff]  }
 0x976   : > { %v7848_v46 = vpop.permute.xlu1 %7847 }
 0x979   : > { %6886 = vmatmul.mubr.msk.bf16.gmra.mrb[24].mxu0 %vm11283_vm2, %v8219_v3  ;;  %vm11287_vm2 = vmmov %vm11286_vm12 }
 0x97a   : > { %3280 = vmatprep.mubr.bf16.mxu0 %v8297_v0  ;;  %v3526_v32 = vsel %vm11287_vm2, %v7824_v13, %v7825_v14  ;;  %vm11290_vm11 = vmmov %vm11287_vm2  ;;  %v7858_v30 = vpop.permute.xlu1 %7857  ;;  %v8228_v14 = vld [vmem:[%s10928_s7 + $0x78] sm:$0xff]  }
 0x97b   : > { %v3524_v38 = vsel %vm11290_vm11, %v7819_v33, %v7820_v54  ;;  %vm11291_vm15 = vmmov %vm11287_vm2 }
 0x97c   : > { %v3525_v44 = vsel %vm11291_vm15, %v7830_v55, %v7824_v13  ;;  %vm11292_vm12 = vmmov %vm11287_vm2  ;;  %v6935_v43 = vpack.c.bf16 %v3526_v32, %v3524_v38  ;;  %v7849_v32 = vunpack.i.l.bf16 %v7848_v46 }
 0x97d   : > { %v3523_v17 = vsel %vm11292_vm12, %v7829_v9, %v7819_v33  ;;  %vm11294_vm11 = vmmov %vm11293_vm13  ;;  %vm11298_vm12 = vcmask 777216  }
 0x97e   : > { %v6938_v62 = vpack.c.bf16 %v3525_v44, %v3523_v17  ;;  %vm11296_vm2 = vmmov %vm11294_vm11  ;;  %v3865_v37 = vsel %vm11298_vm12, %v7834_v47, %v7835_v1  ;;  %v7868_v55 = vpop.permute.xlu1 %7867  ;;  %v7860_v44 = vunpack.i.h.bf16 %v7858_v30  ;;  %v7859_v17 = vunpack.i.l.bf16 %v7858_v30  ;;  %v8230_v1 = vld [vmem:[%s10928_s7 + $0x88] sm:$0xff]  }
 0x97f   : > { %vm11297_vm15 = vmmov %vm11296_vm2 }
 0x981   : > { %6887 = vmatmul.mubr.msk.bf16.gmra.mrb[28].mxu0 %vm11284_vm6, %v8220_v51  ;;  %vm10167_vm6 = vmpackc.low %vm8572_vm14, %vm8572_vm14  ;;  %vm11002_vm14 = vcmask 785408   ;;  %v7843_v51 = vpop.permute.xlu0 %7842 }
 0x982   : > { %3429 = vmatprep.mubr.bf16.mxu0 %v8297_v0  ;;  %v11289_v12 = vsel %vm10167_vm6, 4294967295, %v11288_v12  ;;  %v3723_v58 = vsel %vm11002_vm14, %v3712_v49, %v3714_v23  ;;  %v3722_v41 = vsel %vm11002_vm14, %v3710_v7, %v3712_v49  ;;  %v3725_v53 = vsel %vm11002_vm14, %v3718_v15, %v3720_v22 }
 0x983   : > { %v3724_v3 = vsel %vm11002_vm14, %v3716_v18, %v3718_v15  ;;  %v7844_v13 = vunpack.i.l.bf16 %v7843_v51  ;;  %v7845_v27 = vunpack.i.h.bf16 %v7843_v51  ;;  %vm11312_vm14 = vcmask 261120  }
 0x985   : > { %v7853_v48 = vpop.permute.xlu0 %7852 }
 0x986   : > { %v7855_v54 = vunpack.i.h.bf16 %v7853_v48  ;;  %v7854_v33 = vunpack.i.l.bf16 %v7853_v48 }
 0x989   : > { %6912 = vmatmul.mubr.msk.bf16.vlgmr.msra.gmra.mrb[16].mxu0 %vm11293_vm13, %v8221_v20  ;;  %vm11295_vm13 = vmmov %vm11294_vm11  ;;  %v7863_v40 = vpop.permute.xlu0 %7862  ;;  %v7850_v20 = vunpack.i.h.bf16 %v7848_v46 }
 0x98a   : > { %6933 = vmatpush1.bf16.msk.msra.mxu0 %vm10167_vm6, %v6932_v21  ;;  %3439 = vmatprep.mubr.bf16.mxu0 %v8297_v0  ;;  %v7865_v49 = vunpack.i.h.bf16 %v7863_v40  ;;  %v7864_v23 = vunpack.i.l.bf16 %v7863_v40 }
 0x98b   : > { %6936 = vmatprep.subr.msk.bf16.mxu0 %vm10135_vm10, %v6935_v43  ;;  %v8229_v43 = vld [vmem:[%s10928_s7 + $0x80] sm:$0xff]  }
 0x98e   : > { %6939 = vmatpush1.bf16.msk.msra.mxu0 %vm10167_vm6, %v6938_v62  ;;  %v7870_v62 = vunpack.i.h.bf16 %v7868_v55 }
 0x98f   : > { %3742 = vmatprep.subr.bf16.mxu0 %v3723_v58 }
 0x991   : > { %6913 = vmatmul.mubr.msk.bf16.gmra.mrb[20].mxu0 %vm11294_vm11, %v8222_v2  ;;  %vm11299_vm11 = vmmov %vm11298_vm12  ;;  %v7869_v2 = vunpack.i.l.bf16 %v7868_v55 }
 0x992   : > { %3449 = vmatprep.mubr.bf16.mxu0 %v8297_v0  ;;  %v3867_v10 = vsel %vm11299_vm11, %v7839_v56, %v7840_v4  ;;  %vm11304_vm11 = vmmov %vm11296_vm2  ;;  %v7873_v4 = vpop.permute.xlu0 %7872 }
 0x993   : > { %v6973_v36 = vpack.c.bf16 %v3867_v10, %v3865_v37  ;;  %v8232_v10 = vld [vmem:[%s10928_s7 + $0x98] sm:$0xff]  }
 0x999   : > { %6914 = vmatmul.mubr.msk.bf16.gmra.mrb[24].mxu0 %vm11295_vm13, %v8223_v6  ;;  %vm10210_vm13 = vmpackc.low %vm11168_vm4, %vm11168_vm4 }
 0x99a   : > { %3459 = vmatprep.mubr.bf16.mxu0 %v8297_v0  ;;  %vm11302_vm4 = vmmov %vm11296_vm2 }
 0x9a1   : > { %6915 = vmatmul.mubr.msk.bf16.gmra.mrb[28].mxu0 %vm11296_vm2, %v8224_v45 }
 0x9a2   : > { %3611 = vmatprep.mubr.bf16.mxu0 %v8297_v0 }
 0x9a9   : > { %6940 = vmatmul.mubr.msk.bf16.vlgmr.msra.gmra.mrb[16].mxu0 %vm11297_vm15, %v8225_v28  ;;  %vm11303_vm15 = vnez %v11036_v26 }
 0x9aa   : > { %3743 = vmatpush1.bf16.msra.mxu0 %v3722_v41  ;;  %3621 = vmatprep.mubr.bf16.mxu0 %v8297_v0  ;;  %vm4022_vm12 = vmand %vm11303_vm15, %vm11252_vm5  ;;  %v7883_v41 = vpop.permute.xlu0 %7882 }
 0x9ab   : > { %3744 = vmatprep.subr.bf16.mxu0 %v3725_v53  ;;  %v4023_v50 = vsel %vm4022_vm12, 1, %v8297_v0  ;;  %vm11005_vm12 = vcmask 662528   ;;  %v7874_v53 = vunpack.i.l.bf16 %v7873_v4 }
 0x9ac   : > { %v4031_v25 = vrot.slane %v4023_v50, %v8557_v35  ;;  %v4060_v45 = vsel %vm11005_vm12, %v7864_v23, %v7865_v49  ;;  %v4062_v57 = vsel %vm11005_vm12, %v7869_v2, %v7870_v62  ;;  %v8277_v62 = vld [vmem:[%s10932_s11 + $0xd0] sm:$0xff]  }
 0x9ad   : > { %v7001_v28 = vpack.c.bf16 %v4062_v57, %v4060_v45  ;;  %v4059_v48 = vsel %vm11005_vm12, %v7874_v53, %v7864_v23  ;;  %v8236_v45 = vld [vmem:[%s10928_s7 + $0xb8] sm:$0xff]  }
 0x9ae   : > { %3745 = vmatpush1.bf16.msra.mxu0 %v3724_v3  ;;  %vm4033_vm6 = vcmp.eq.s32.totalorder %v4031_v25, 1  ;;  %v4027_v3 = vrot.slane %v4023_v50, %v8543_v24  ;;  %v7893_v51 = vpop.permute.xlu0 %7892  ;;  %v8233_v50 = vld [vmem:[%s10928_s7 + $0xa0] sm:$0xff]  }
 0x9af   : > { %6974 = vmatprep.subr.msk.bf16.mxu0 %vm10210_vm13, %v6973_v36  ;;  %v7875_v36 = vunpack.i.h.bf16 %v7873_v4  ;;  %v7895_v40 = vunpack.i.h.bf16 %v7893_v51  ;;  %v7894_v55 = vunpack.i.l.bf16 %v7893_v51 }
 0x9b1   : > { %6941 = vmatmul.mubr.msk.bf16.gmra.mrb[20].mxu0 %vm11296_vm2, %v8226_v39  ;;  %vm11305_vm2 = vcmask 777216   ;;  %v7885_v39 = vunpack.i.h.bf16 %v7883_v41 }
 0x9b2   : > { %3631 = vmatprep.mubr.bf16.mxu0 %v8297_v0  ;;  %v3864_v9 = vsel %vm11305_vm2, %v7844_v13, %v7834_v47  ;;  %vm11307_vm5 = vmmov %vm11305_vm2  ;;  %v3869_v7 = vsel %vm11305_vm2, %v7849_v32, %v7850_v20  ;;  %v8231_v47 = vld [vmem:[%s10928_s7 + $0x90] sm:$0xff]   ;;  %v4061_v13 = vsel %vm11005_vm12, %v7875_v36, %v7869_v2 }
 0x9b3   : > { %v3871_v38 = vsel %vm11307_vm5, %v7854_v33, %v7855_v54  ;;  %vm11311_vm5 = vmmov %vm11305_vm2  ;;  %v7004_v25 = vpack.c.bf16 %v4061_v13, %v4059_v48 }
 0x9b4   : > { %v3868_v22 = vsel %vm11311_vm5, %v7859_v17, %v7849_v32  ;;  %v6979_v18 = vpack.c.bf16 %v3871_v38, %v3869_v7  ;;  %v7903_v7 = vpop.permute.xlu0 %7902 }
 0x9b5   : > { %v7904_v57 = vunpack.i.l.bf16 %v7903_v7 }
 0x9b9   : > { %6942 = vmatmul.mubr.msk.bf16.gmra.mrb[24].mxu0 %vm11302_vm4, %v8227_v8  ;;  %vm11306_vm4 = vmmov %vm11305_vm2  ;;  %v7884_v8 = vunpack.i.l.bf16 %v7883_v41 }
 0x9ba   : > { %3641 = vmatprep.mubr.bf16.mxu0 %v8297_v0  ;;  %v3866_v21 = vsel %vm11306_vm4, %v7845_v27, %v7839_v56  ;;  %vm11310_vm4 = vmmov %vm11305_vm2  ;;  %v7878_v56 = vpop.permute.xlu1 %7877 }
 0x9bb   : > { %v6976_v6 = vpack.c.bf16 %v3866_v21, %v3864_v9  ;;  %v3870_v15 = vsel %vm11310_vm4, %v7860_v44, %v7854_v33  ;;  %v7880_v30 = vunpack.i.h.bf16 %v7878_v56  ;;  %vm4032_vm4 = vcmp.eq.s32.totalorder %v4027_v3, 1 }
 0x9bc   : > { %v6982_v19 = vpack.c.bf16 %v3870_v15, %v3868_v22  ;;  %v4066_v27 = vsel %vm11005_vm12, %v7884_v8, %v7885_v39  ;;  %vm10292_vm5 = vmpackc.low %vm4032_vm4, %vm4032_vm4  ;;  %v7913_v22 = vpop.permute.xlu0 %7912  ;;  %v8237_v39 = vld [vmem:[%s10928_s7 + $0xc0] sm:$0xff]  }
 0x9bd   : > { %vm10310_vm4 = vmpackc.low %vm11216_vm0, %vm11216_vm0 }
 0x9be   : > { %v7888_v37 = vpop.permute.xlu1 %7887 }
 0x9bf   : > { %v7890_v54 = vunpack.i.h.bf16 %v7888_v37  ;;  %v7889_v33 = vunpack.i.l.bf16 %v7888_v37 }
 0x9c0   : > { %v7923_v4 = vpop.permute.xlu0 %7922 }
 0x9c1   : > { %6943 = vmatmul.mubr.msk.bf16.gmra.mrb[28].mxu0 %vm11304_vm11, %v8228_v14  ;;  %vm10247_vm11 = vmpackc.low %vm8584_vm1, %vm8584_vm1  ;;  %v7879_v14 = vunpack.i.l.bf16 %v7878_v56  ;;  %v4065_v38 = vsel %vm11005_vm12, %v7890_v54, %v7884_v8  ;;  %v7925_v8 = vunpack.i.h.bf16 %v7923_v4  ;;  %v7924_v51 = vunpack.i.l.bf16 %v7923_v4 }
 0x9c2   : > { %3774 = vmatprep.mubr.bf16.mxu0 %v8297_v0  ;;  %vm10262_vm1 = vmpackc.low %vm4033_vm6, %vm4033_vm6  ;;  %v7898_v46 = vpop.permute.xlu1 %7897 }
 0x9c3   : > { %vm11315_vm6 = vmmov %vm11312_vm14  ;;  %v7900_v9 = vunpack.i.h.bf16 %v7898_v46  ;;  %v7899_v20 = vunpack.i.l.bf16 %v7898_v46  ;;  %v4064_v21 = vsel %vm11005_vm12, %v7879_v14, %v7880_v30  ;;  %v4063_v44 = vsel %vm11005_vm12, %v7889_v33, %v7879_v14 }
 0x9c4   : > { %vm11316_vm2 = vmmov %vm11315_vm6  ;;  %v7007_v17 = vpack.c.bf16 %v4066_v27, %v4064_v21  ;;  %v7010_v23 = vpack.c.bf16 %v4065_v38, %v4063_v44  ;;  %v8240_v38 = vld [vmem:[%s10928_s7 + $0xd8] sm:$0xff]  }
 0x9c6   : > { %v7908_v15 = vpop.permute.xlu1 %7907 }
 0x9c7   : > { %v7910_v37 = vunpack.i.h.bf16 %v7908_v15 }
 0x9c9   : > { %6956 = vmatmul.mubr.msk.bf16.vlgmr.msra.gmra.mrb[16].mxu0 %vm11312_vm14, %v8229_v43 }
 0x9ca   : > { %6977 = vmatpush1.bf16.msk.msra.mxu0 %vm10247_vm11, %v6976_v6  ;;  %3784 = vmatprep.mubr.bf16.mxu0 %v8297_v0  ;;  %v8234_v6 = vld [vmem:[%s10928_s7 + $0xa8] sm:$0xff]  }
 0x9cb   : > { %6980 = vmatprep.subr.msk.bf16.mxu0 %vm10210_vm13, %v6979_v18  ;;  %v7918_v18 = vpop.permute.xlu1 %7917 }
 0x9cc   : > { %v7920_v3 = vunpack.i.h.bf16 %v7918_v18  ;;  %v7919_v36 = vunpack.i.l.bf16 %v7918_v18 }
 0x9ce   : > { %6983 = vmatpush1.bf16.msk.msra.mxu0 %vm10247_vm11, %v6982_v19  ;;  %v7905_v19 = vunpack.i.h.bf16 %v7903_v7 }
 0x9cf   : > { %7002 = vmatprep.subr.msk.bf16.mxu0 %vm10262_vm1, %v7001_v28  ;;  %v7915_v28 = vunpack.i.h.bf16 %v7913_v22  ;;  %v7928_v56 = vpop.permute.xlu1 %7927 }
 0x9d0   : > { %v7930_v46 = vunpack.i.h.bf16 %v7928_v56  ;;  %v7929_v48 = vunpack.i.l.bf16 %v7928_v56 }
 0x9d1   : > { %6957 = vmatmul.mubr.msk.bf16.gmra.mrb[20].mxu0 %vm11312_vm14, %v8230_v1  ;;  %vm11319_vm14 = vmmov %vm11316_vm2  ;;  %v7914_v1 = vunpack.i.l.bf16 %v7913_v22 }
 0x9d2   : > { %3794 = vmatprep.mubr.bf16.mxu0 %v8297_v0  ;;  %vm11324_vm0 = vmmov %vm11319_vm14 }
 0x9d3   : > { %v7938_v21 = vpop.permute.xlu1 %7937 }
 0x9d4   : > { %v7939_v7 = vunpack.i.l.bf16 %v7938_v21 }
 0x9d9   : > { %6958 = vmatmul.mubr.msk.bf16.gmra.mrb[24].mxu0 %vm11315_vm6, %v8231_v47  ;;  %vm11320_vm6 = vcmask 654336  }
 0x9da   : > { %3804 = vmatprep.mubr.bf16.mxu0 %v8297_v0  ;;  %v4242_v43 = vsel %vm11320_vm6, %v7894_v55, %v7895_v40  ;;  %v11334_v40 = vmov 0 }
 0x9e1   : > { %6959 = vmatmul.mubr.msk.bf16.gmra.mrb[28].mxu0 %vm11316_vm2, %v8232_v10  ;;  %vm11321_vm2 = vmmov %vm11320_vm6  ;;  %v7909_v10 = vunpack.i.l.bf16 %v7908_v15 }
 0x9e2   : > { %3956 = vmatprep.mubr.bf16.mxu0 %v8297_v0  ;;  %v4244_v49 = vsel %vm11321_vm2, %v7899_v20, %v7900_v9  ;;  %vm4399_vm6 = vmand %vm11303_vm15, %vm11266_vm3  ;;  %vm11006_vm15 = vcmask 646144   ;;  %v8238_v9 = vld [vmem:[%s10928_s7 + $0xc8] sm:$0xff]  }
 0x9e3   : > { %v7029_v2 = vpack.c.bf16 %v4244_v49, %v4242_v43  ;;  %vm11325_vm2 = vmmov %vm11324_vm0  ;;  %v4400_v47 = vsel %vm4399_vm6, 1, %v8297_v0  ;;  %v4437_v33 = vsel %vm11006_vm15, %v7924_v51, %v7925_v8  ;;  %v4439_v60 = vsel %vm11006_vm15, %v7929_v48, %v7930_v46 }
 0x9e4   : > { %v4408_v29 = vrot.slane %v4400_v47, %v8557_v35  ;;  %vm10348_vm6 = vmpackc.low %vm11217_vm9, %vm11217_vm9  ;;  %v11329_v35 = vmov 0 }
 0x9e5   : > { %v11330_v35 = vsel %vm10348_vm6, 4294967295, %v11329_v35 }
 0x9e6   : > { %vm4410_vm12 = vcmp.eq.s32.totalorder %v4408_v29, 1  ;;  %v8244_v29 = vld [vmem:[%s10928_s7 + $0xf8] sm:$0xff]  }
 0x9e7   : > { %vm10363_vm9 = vmpackc.low %vm4410_vm12, %vm4410_vm12 }
 0x9e8   : > { %v11335_v40 = vsel %vm10363_vm9, 4294967295, %v11334_v40 }
 0x9e9   : > { %6984 = vmatmul.mubr.msk.bf16.vlgmr.msra.gmra.mrb[16].mxu0 %vm11319_vm14, %v8233_v50 }
 0x9ea   : > { %7005 = vmatpush1.bf16.msk.msra.mxu0 %vm10292_vm5, %v7004_v25  ;;  %3966 = vmatprep.mubr.bf16.mxu0 %v8297_v0  ;;  %v7933_v25 = vpop.permute.xlu0 %7932 }
 0x9eb   : > { %7008 = vmatprep.subr.msk.bf16.mxu0 %vm10262_vm1, %v7007_v17  ;;  %v4404_v17 = vrot.slane %v4400_v47, %v8543_v24  ;;  %v7935_v43 = vunpack.i.h.bf16 %v7933_v25  ;;  %v7934_v49 = vunpack.i.l.bf16 %v7933_v25  ;;  %v8241_v24 = vld [vmem:[%s10928_s7 + $0xe0] sm:$0xff]  }
 0x9ed   : > { %v4436_v15 = vsel %vm11006_vm15, %v7934_v49, %v7924_v51  ;;  %v4438_v22 = vsel %vm11006_vm15, %v7935_v43, %v7929_v48 }
 0x9ee   : > { %7011 = vmatpush1.bf16.msk.msra.mxu0 %vm10292_vm5, %v7010_v23  ;;  %v7943_v44 = vpop.permute.xlu0 %7942 }
 0x9ef   : > { %7030 = vmatprep.subr.msk.bf16.mxu0 %vm10310_vm4, %v7029_v2  ;;  %v7945_v23 = vunpack.i.h.bf16 %v7943_v44  ;;  %v7944_v2 = vunpack.i.l.bf16 %v7943_v44 }
 0x9f1   : > { %6985 = vmatmul.mubr.msk.bf16.gmra.mrb[20].mxu0 %vm11319_vm14, %v8234_v6  ;;  %vm11326_vm14 = vcmask 654336   ;;  %v7948_v6 = vpop.permute.xlu1 %7947 }
 0x9f2   : > { %3976 = vmatprep.mubr.bf16.mxu0 %v8297_v0  ;;  %v4241_v41 = vsel %vm11326_vm14, %v7904_v57, %v7894_v55  ;;  %v7057_v55 = vpack.c.bf16 %v4439_v60, %v4437_v33  ;;  %v7950_v18 = vunpack.i.h.bf16 %v7948_v6  ;;  %v4443_v57 = vsel %vm11006_vm15, %v7944_v2, %v7945_v23 }
 0x9f4   : > { %v4442_v4 = vsel %vm11006_vm15, %v7950_v18, %v7944_v2 }
 0x9f5   : > { %v4601_v48 = vpop.permute.xlu1 %4600 }
 0x9f9   : > { %6986 = vmatmul.mubr.msk.bf16.gmra.mrb[24].mxu0 %vm11324_vm0, %v8235_v16  ;;  %vm11327_vm0 = vmmov %vm11326_vm14  ;;  %v7940_v16 = vunpack.i.h.bf16 %v7938_v21  ;;  %v4611_v2 = vpop.permute.xlu1 %4610 }
 0x9fa   : > { %3986 = vmatprep.mubr.bf16.mxu0 %v8297_v0  ;;  %v4243_v26 = vsel %vm11327_vm0, %v7905_v19, %v7899_v20  ;;  %vm11328_vm3 = vmmov %vm11327_vm0  ;;  %v4245_v54 = vsel %vm11327_vm0, %v7919_v36, %v7909_v10  ;;  %v8239_v20 = vld [vmem:[%s10928_s7 + $0xd0] sm:$0xff]   ;;  %v11339_v19 = vmov 0  ;;  %v8248_v36 = vld [vmem:[%s10928_s7 + $0x118] sm:$0xff]  }
 0x9fb   : > { %v4248_v53 = vsel %vm11328_vm3, %v7914_v1, %v7915_v28  ;;  %v7032_v30 = vpack.c.bf16 %v4243_v26, %v4241_v41  ;;  %vm11332_vm14 = vmmov %vm11327_vm0  ;;  %vm11333_vm3 = vcmask 261120   ;;  %v7060_v28 = vpack.c.bf16 %v4438_v22, %v4436_v15  ;;  %v8245_v26 = vld [vmem:[%s10928_s7 + $0x100] sm:$0xff]  }
 0x9fc   : > { %v4247_v27 = vsel %vm11332_vm14, %v7920_v3, %v7914_v1  ;;  %v4441_v1 = vsel %vm11006_vm15, %v7939_v7, %v7940_v16  ;;  %v8247_v3 = vld [vmem:[%s10928_s7 + $0x110] sm:$0xff]  }
 0x9fd   : > { %v7038_v50 = vpack.c.bf16 %v4247_v27, %v4245_v54  ;;  %v7063_v47 = vpack.c.bf16 %v4443_v57, %v4441_v1 }
 0xa01   : > { %6987 = vmatmul.mubr.msk.bf16.gmra.mrb[28].mxu0 %vm11325_vm2, %v8236_v45  ;;  %vm11331_vm2 = vmmov %vm11327_vm0  ;;  %vm4409_vm0 = vcmp.eq.s32.totalorder %v4404_v17, 1  ;;  %v7949_v45 = vunpack.i.l.bf16 %v7948_v6 }
 0xa02   : > { %4151 = vmatprep.mubr.bf16.mxu0 %v8297_v0  ;;  %v4246_v14 = vsel %vm11331_vm2, %v7909_v10, %v7910_v37  ;;  %vm11336_vm2 = vmmov %vm11333_vm3  ;;  %v8242_v37 = vld [vmem:[%s10928_s7 + $0xe8] sm:$0xff]   ;;  %v8243_v10 = vld [vmem:[%s10928_s7 + $0xf0] sm:$0xff]  }
 0xa03   : > { %v7035_v13 = vpack.c.bf16 %v4248_v53, %v4246_v14  ;;  %vm11337_vm12 = vmmov %vm11336_vm2  ;;  %v4440_v56 = vsel %vm11006_vm15, %v7949_v45, %v7939_v7  ;;  %v8246_v53 = vld [vmem:[%s10928_s7 + $0x108] sm:$0xff]  }
 0xa04   : > { %vm11338_vm14 = vmmov %vm11336_vm2  ;;  %v7066_v41 = vpack.c.bf16 %v4442_v4, %v4440_v56 }
 0xa09   : > { %7012 = vmatmul.mubr.msk.bf16.vlgmr.msra.gmra.mrb[16].mxu0 %vm11333_vm3, %v8237_v39  ;;  %vm10393_vm3 = vmpackc.low %vm4409_vm0, %vm4409_vm0  ;;  %v4596_v39 = vpop.permute.xlu0 %4595 }
 0xa0a   : > { %7033 = vmatpush1.bf16.msk.msra.mxu0 %vm10348_vm6, %v7032_v30  ;;  %4161 = vmatprep.mubr.bf16.mxu0 %v8297_v0  ;;  %v11340_v19 = vsel %vm10393_vm3, 4294967295, %v11339_v19  ;;  %vm11343_vm0 = vmmov %vm11336_vm2 }
 0xa0b   : > { %7036 = vmatprep.subr.msk.bf16.mxu0 %vm10310_vm4, %v7035_v13 }
 0xa0d   : > { %v4606_v25 = vpop.permute.xlu0 %4605 }
 0xa0e   : > { %7039 = vmatpush1.bf16.msk.msra.mxu0 %vm10348_vm6, %v7038_v50 }
 0xa0f   : > { %7058 = vmatprep.subr.msk.bf16.mxu0 %vm10363_vm9, %v7057_v55 }
 0xa11   : > { %7013 = vmatmul.mubr.msk.bf16.gmra.mrb[20].mxu0 %vm11336_vm2, %v8238_v9 }
 0xa12   : > { %4171 = vmatprep.mubr.bf16.mxu0 %v8297_v0 }
 0xa19   : > { %7014 = vmatmul.mubr.msk.bf16.gmra.mrb[24].mxu0 %vm11337_vm12, %v8239_v20  ;;  %vm11341_vm12 = vmmov %vm11336_vm2 }
 0xa1a   : > { %4181 = vmatprep.mubr.bf16.mxu0 %v8297_v0 }
 0xa21   : > { %7015 = vmatmul.mubr.msk.bf16.gmra.mrb[28].mxu0 %vm11338_vm14, %v8240_v38  ;;  %vm11342_vm14 = vmmov %vm11336_vm2 }
 0xa22   : > { %4333 = vmatprep.mubr.bf16.mxu0 %v8297_v0 }
 0xa29   : > { %7040 = vmatmul.mubr.msk.bf16.vlgmr.msra.gmra.mrb[16].mxu0 %vm11336_vm2, %v8241_v24  ;;  %vm11344_vm2 = vmmov %vm11343_vm0 }
 0xa2a   : > { %7061 = vmatpush1.bf16.msk.msra.mxu0 %vm10393_vm3, %v7060_v28  ;;  %4343 = vmatprep.mubr.bf16.mxu0 %v8297_v0 }
 0xa2b   : > { %7064 = vmatprep.subr.msk.bf16.mxu0 %vm10363_vm9, %v7063_v47  ;;  %v4616_v47 = vpop.permute.xlu0 %4615 }
 0xa2e   : > { %7067 = vmatpush1.bf16.msk.msra.mxu0 %vm10393_vm3, %v7066_v41 }
 0xa31   : > { %7041 = vmatmul.mubr.msk.bf16.gmra.mrb[20].mxu0 %vm11341_vm12, %v8242_v37  ;;  %vm11345_vm12 = vmmov %vm11343_vm0 }
 0xa32   : > { %4353 = vmatprep.mubr.bf16.mxu0 %v8297_v0 }
 0xa39   : > { %7042 = vmatmul.mubr.msk.bf16.gmra.mrb[24].mxu0 %vm11342_vm14, %v8243_v10  ;;  %vm11346_vm14 = vmmov %vm11343_vm0 }
 0xa3a   : > { %4363 = vmatprep.mubr.bf16.mxu0 %v8297_v0 }
 0xa41   : > { %7043 = vmatmul.mubr.msk.bf16.gmra.mrb[28].mxu0 %vm11343_vm0, %v8244_v29 }
 0xa42   : > { %4528 = vmatprep.mubr.bf16.mxu0 %v8297_v0 }
 0xa49   : > { %7068 = vmatmul.mubr.msk.bf16.vlgmr.msra.gmra.mrb[16].mxu0 %vm11344_vm2, %v8245_v26 }
 0xa4a   : > { %4538 = vmatprep.mubr.bf16.mxu0 %v8297_v0 }
 0xa51   : > { %7069 = vmatmul.mubr.msk.bf16.gmra.mrb[20].mxu0 %vm11345_vm12, %v8246_v53  ;;  %v4621_v53 = vpop.permute.xlu1 %4620 }
 0xa52   : > { %4548 = vmatprep.mubr.bf16.mxu0 %v8297_v0 }
 0xa59   : > { %7070 = vmatmul.mubr.msk.bf16.gmra.mrb[24].mxu0 %vm11346_vm14, %v8247_v3 }
 0xa5a   : > { %4558 = vmatprep.mubr.bf16.mxu0 %v8297_v0 }
 0xa61   : > { %7071 = vmatmul.mubr.msk.bf16.gmra.mrb[28].mxu0 %vm11343_vm0, %v8248_v36 }
 0xa62   : > { %6683 = vmatprep.mubr.bf16.mxu0 %v8297_v0 }
 0xb1c   : > { %v4530_v8 = vpop.f32.mrb[16].mxu0 }
 0xb1d   : > { %v4633_v51 = vadd.f32 %v4596_v39, %v4530_v8  ;;  %v4532_v46 = vpop.f32.mrb[17].mxu0 }
 0xb1e   : > { %v4634_v30 = vadd.f32 %v4596_v39, %v4532_v46  ;;  %v4534_v14 = vpop.f32.mrb[18].mxu0 }
 0xb1f   : > { %v4665_v13 = vmul.f32 0.1, %v4633_v51  ;;  %v4635_v27 = vadd.f32 %v4601_v48, %v4534_v14  ;;  %v4536_v54 = vpop.f32.mrb[19].mxu0  ;;  %vm4649_vm2 = vcmp.gt.f32.partialorder %v4633_v51, 0.0 }
 0xb20   : > { %v4666_v33 = vmul.f32 0.1, %v4634_v30  ;;  %v4636_v60 = vadd.f32 %v4601_v48, %v4536_v54  ;;  %vm4650_vm12 = vcmp.gt.f32.partialorder %v4634_v30, 0.0  ;;  %v4626_v54 = vpop.permute.xlu0 %4625 }
 0xb21   : > { %vm4651_vm14 = vcmp.gt.f32.partialorder %v4635_v27, 0.0  ;;  %v4667_v50 = vmul.f32 0.1, %v4635_v27  ;;  %v4681_v9 = vsel %vm4649_vm2, %v4633_v51, %v4665_v13 }
 0xb22   : > { %vm4652_vm15 = vcmp.gt.f32.partialorder %v4636_v60, 0.0  ;;  %v4668_v55 = vmul.f32 0.1, %v4636_v60  ;;  %v4682_v44 = vsel %vm4650_vm12, %v4634_v30, %v4666_v33 }
 0xb23   : > { %v4683_v20 = vsel %vm4651_vm14, %v4635_v27, %v4667_v50 }
 0xb24   : > { %v4701_v21 = vpack.c.bf16 %v4683_v20, %v4681_v9  ;;  %v4540_v38 = vpop.f32.mrb[20].mxu0  ;;  %v4684_v17 = vsel %vm4652_vm15, %v4636_v60, %v4668_v55 }
 0xb25   : > { %v4637_v43 = vadd.f32 %v4606_v25, %v4540_v38  ;;  %v4542_v49 = vpop.f32.mrb[21].mxu0  ;;  %v4702_v23 = vpack.c.bf16 %v4684_v17, %v4682_v44 }
 0xb26   : > { %v4638_v6 = vadd.f32 %v4606_v25, %v4542_v49  ;;  %v4544_v16 = vpop.f32.mrb[22].mxu0 }
 0xb27   : > { %v4669_v7 = vmul.f32 0.1, %v4637_v43  ;;  %v4639_v15 = vadd.f32 %v4611_v2, %v4544_v16  ;;  %v4546_v22 = vpop.f32.mrb[23].mxu0  ;;  %4749 = vmatprep.subr.bf16.mxu1 %v4702_v23  ;;  %vm4653_vm0 = vcmp.gt.f32.partialorder %v4637_v43, 0.0 }
 0xb28   : > { %v4670_v18 = vmul.f32 0.1, %v4638_v6  ;;  %v4640_v45 = vadd.f32 %v4611_v2, %v4546_v22  ;;  %4750 = vmatpush1.bf16.msra.mxu1 %v4701_v21  ;;  %vm4654_vm2 = vcmp.gt.f32.partialorder %v4638_v6, 0.0  ;;  %v4631_v21 = vpop.permute.xlu1 %4630 }
 0xb29   : > { %vm4655_vm14 = vcmp.gt.f32.partialorder %v4639_v15, 0.0  ;;  %v4671_v24 = vmul.f32 0.1, %v4639_v15  ;;  %v4685_v28 = vsel %vm4653_vm0, %v4637_v43, %v4669_v7 }
 0xb2a   : > { %vm4656_vm3 = vcmp.gt.f32.partialorder %v4640_v45, 0.0  ;;  %v4672_v57 = vmul.f32 0.1, %v4640_v45  ;;  %v4686_v41 = vsel %vm4654_vm2, %v4638_v6, %v4670_v18 }
 0xb2b   : > { %v4687_v1 = vsel %vm4655_vm14, %v4639_v15, %v4671_v24 }
 0xb2c   : > { %v4703_v4 = vpack.c.bf16 %v4687_v1, %v4685_v28  ;;  %v4550_v56 = vpop.f32.mrb[24].mxu0  ;;  %v4688_v37 = vsel %vm4656_vm3, %v4640_v45, %v4672_v57  ;;  %v8249_v57 = vld [vmem:[%s10930_s9] sm:$0xff]   ;;  %v8250_v28 = vld [vmem:[%s10930_s9 + $0x8] sm:$0xff]   ;;  %v4716_v1 = vpop.permute.xlu0 %4715 }
 0xb2d   : > { %v4641_v10 = vadd.f32 %v4616_v47, %v4550_v56  ;;  %v4552_v29 = vpop.f32.mrb[25].mxu0  ;;  %v4704_v26 = vpack.c.bf16 %v4688_v37, %v4686_v41  ;;  %v4721_v41 = vpop.permute.xlu1 %4720 }
 0xb2e   : > { %v4642_v3 = vadd.f32 %v4616_v47, %v4552_v29  ;;  %v4554_v36 = vpop.f32.mrb[26].mxu0 }
 0xb2f   : > { %v4673_v39 = vmul.f32 0.1, %v4641_v10  ;;  %v4643_v8 = vadd.f32 %v4621_v53, %v4554_v36  ;;  %v4556_v51 = vpop.f32.mrb[27].mxu0  ;;  %4751 = vmatprep.subr.bf16.mxu1 %v4704_v26  ;;  %vm4657_vm15 = vcmp.gt.f32.partialorder %v4641_v10, 0.0 }
 0xb30   : > { %v4674_v46 = vmul.f32 0.1, %v4642_v3  ;;  %v4644_v48 = vadd.f32 %v4621_v53, %v4556_v51  ;;  %4752 = vmatpush1.bf16.msra.mxu1 %v4703_v4  ;;  %vm4658_vm12 = vcmp.gt.f32.partialorder %v4642_v3, 0.0 }
 0xb31   : > { %vm4659_vm0 = vcmp.gt.f32.partialorder %v4643_v8, 0.0  ;;  %v4675_v30 = vmul.f32 0.1, %v4643_v8  ;;  %v4689_v13 = vsel %vm4657_vm15, %v4641_v10, %v4673_v39 }
 0xb32   : > { %vm4660_vm14 = vcmp.gt.f32.partialorder %v4644_v48, 0.0  ;;  %v4676_v14 = vmul.f32 0.1, %v4644_v48  ;;  %v4690_v50 = vsel %vm4658_vm12, %v4642_v3, %v4674_v46  ;;  %vm11347_vm12 = vcmask 523264  }
 0xb33   : > { %v4691_v27 = vsel %vm4659_vm0, %v4643_v8, %v4675_v30 }
 0xb34   : > { %v4705_v33 = vpack.c.bf16 %v4691_v27, %v4689_v13  ;;  %v4560_v60 = vpop.f32.mrb[28].mxu0  ;;  %v4692_v55 = vsel %vm4660_vm14, %v4644_v48, %v4676_v14  ;;  %vm11348_vm14 = vmmov %vm11347_vm12  ;;  %v4726_v48 = vpop.permute.xlu0 %4725 }
 0xb35   : > { %v4645_v9 = vadd.f32 %v4626_v54, %v4560_v60  ;;  %v4562_v20 = vpop.f32.mrb[29].mxu0  ;;  %v4706_v25 = vpack.c.bf16 %v4692_v55, %v4690_v50 }
 0xb36   : > { %v4646_v38 = vadd.f32 %v4626_v54, %v4562_v20  ;;  %v4564_v44 = vpop.f32.mrb[30].mxu0  ;;  %v4731_v54 = vpop.permute.xlu1 %4730 }
 0xb37   : > { %v4677_v17 = vmul.f32 0.1, %v4645_v9  ;;  %v4647_v43 = vadd.f32 %v4631_v21, %v4564_v44  ;;  %v4566_v49 = vpop.f32.mrb[31].mxu0  ;;  %4753 = vmatprep.subr.bf16.mxu1 %v4706_v25  ;;  %vm4661_vm3 = vcmp.gt.f32.partialorder %v4645_v9, 0.0 }
 0xb38   : > { %v4678_v23 = vmul.f32 0.1, %v4646_v38  ;;  %v4648_v2 = vadd.f32 %v4631_v21, %v4566_v49  ;;  %4754 = vmatpush1.bf16.msra.mxu1 %v4705_v33  ;;  %vm4662_vm2 = vcmp.gt.f32.partialorder %v4646_v38, 0.0 }
 0xb39   : > { %vm4663_vm15 = vcmp.gt.f32.partialorder %v4647_v43, 0.0  ;;  %v4679_v6 = vmul.f32 0.1, %v4647_v43  ;;  %v4693_v7 = vsel %vm4661_vm3, %v4645_v9, %v4677_v17 }
 0xb3a   : > { %vm4664_vm0 = vcmp.gt.f32.partialorder %v4648_v2, 0.0  ;;  %v4680_v16 = vmul.f32 0.1, %v4648_v2  ;;  %v4694_v18 = vsel %vm4662_vm2, %v4646_v38, %v4678_v23 }
 0xb3b   : > { %v4695_v15 = vsel %vm4663_vm15, %v4647_v43, %v4679_v6 }
 0xb3c   : > { %v4707_v22 = vpack.c.bf16 %v4695_v15, %v4693_v7  ;;  %v4696_v45 = vsel %vm4664_vm0, %v4648_v2, %v4680_v16 }
 0xb3d   : > { %v4708_v24 = vpack.c.bf16 %v4696_v45, %v4694_v18 }
 0xb3f   : > { %4755 = vmatprep.subr.bf16.mxu1 %v4708_v24 }
 0xb40   : > { %4756 = vmatpush1.bf16.msra.mxu1 %v4707_v22 }
 0xb43   : > { %7074 = vmatmul.mubr.msk.bf16.vlgmr.msra.gmra.mrb[8].mxu1 %vm11347_vm12, %v8249_v57 }
 0xb44   : > { %4791 = vmatprep.mubr.bf16.mxu1 %v8297_v0 }
 0xb4b   : > { %7075 = vmatmul.mubr.msk.bf16.gmra.mrb[12].mxu1 %vm11348_vm14, %v8250_v28 }
 0xb4c   : > { %5087 = vmatprep.mubr.bf16.mxu1 %v8297_v0 }
 0xc16   : > { %v4783_v47 = vpop.f32.mrb[8].mxu1 }
 0xc17   : > { %v4784_v4 = vadd.f32 %v4783_v47, %v4716_v1  ;;  %v4785_v56 = vpop.f32.mrb[9].mxu1 }
 0xc18   : > { %v4786_v37 = vadd.f32 %v4785_v56, %v4716_v1  ;;  %v4787_v10 = vpop.f32.mrb[10].mxu1 }
 0xc19   : > { %vm4802_vm3 = vcmp.gt.f32.partialorder %v4784_v4, 0.0  ;;  %v4810_v29 = vmul.f32 0.1, %v4784_v4  ;;  %v4788_v26 = vadd.f32 %v4787_v10, %v4721_v41  ;;  %v4789_v53 = vpop.f32.mrb[11].mxu1 }
 0xc1a   : > { %vm4803_vm2 = vcmp.gt.f32.partialorder %v4786_v37, 0.0  ;;  %v4811_v3 = vmul.f32 0.1, %v4786_v37  ;;  %v4790_v36 = vadd.f32 %v4789_v53, %v4721_v41 }
 0xc1b   : > { %v4812_v39 = vmul.f32 0.1, %v4788_v26  ;;  %v4818_v8 = vsel %vm4802_vm3, %v4784_v4, %v4810_v29  ;;  %vm4804_vm15 = vcmp.gt.f32.partialorder %v4788_v26, 0.0 }
 0xc1c   : > { %v4813_v51 = vmul.f32 0.1, %v4790_v36  ;;  %4834 = vrot.lane.b32.xlu0 %v4818_v8, %s8299_s23  ;;  %v4819_v46 = vsel %vm4803_vm2, %v4786_v37, %v4811_v3  ;;  %vm4805_vm0 = vcmp.gt.f32.partialorder %v4790_v36, 0.0 }
 0xc1d   : > { %4836 = vrot.lane.b32.xlu1 %v4819_v46, %s8299_s23  ;;  %v4820_v27 = vsel %vm4804_vm15, %v4788_v26, %v4812_v39  ;;  %vm11349_vm15 = vcmask 1047808  }
 0xc1e   : > { %v4793_v30 = vpop.f32.mrb[12].mxu1  ;;  %v4821_v50 = vsel %vm4805_vm0, %v4790_v36, %v4813_v51  ;;  %vm11350_vm0 = vcmask 261120   ;;  %vm11352_vm9 = vmmov %vm11349_vm15 }
 0xc1f   : > { %v4794_v14 = vadd.f32 %v4793_v30, %v4726_v48  ;;  %v4795_v13 = vpop.f32.mrb[13].mxu1  ;;  %vm11356_vm6 = vmmov %vm11350_vm0 }
 0xc20   : > { %v4796_v33 = vadd.f32 %v4795_v13, %v4726_v48  ;;  %v4797_v60 = vpop.f32.mrb[14].mxu1  ;;  %4838 = vrot.lane.b32.xlu0 %v4820_v27, %s8299_s23 }
 0xc21   : > { %vm4806_vm12 = vcmp.gt.f32.partialorder %v4794_v14, 0.0  ;;  %v4814_v55 = vmul.f32 0.1, %v4794_v14  ;;  %v4798_v9 = vadd.f32 %v4797_v60, %v4731_v54  ;;  %v4799_v20 = vpop.f32.mrb[15].mxu1  ;;  %4840 = vrot.lane.b32.xlu1 %v4821_v50, %s8299_s23  ;;  %v6489_v60 = vld [vmem:[%s10933_s12 + $0x10] sm:$0xff]  ;;  %v6490_v50 = vld [vmem:[%s10933_s12 + $0x18] sm:$0xff] }
 0xc22   : > { %vm4807_vm14 = vcmp.gt.f32.partialorder %v4796_v33, 0.0  ;;  %v4815_v25 = vmul.f32 0.1, %v4796_v33  ;;  %v4800_v21 = vadd.f32 %v4799_v20, %v4731_v54  ;;  %v6487_v54 = vld [vmem:[%s10933_s12] sm:$0xff] }
 0xc23   : > { %v4816_v38 = vmul.f32 0.1, %v4798_v9  ;;  %v4822_v44 = vsel %vm4806_vm12, %v4794_v14, %v4814_v55  ;;  %vm4808_vm3 = vcmp.gt.f32.partialorder %v4798_v9, 0.0  ;;  %vm11351_vm12 = vmmov %vm11350_vm0 }
 0xc24   : > { %v4817_v17 = vmul.f32 0.1, %v4800_v21  ;;  %4842 = vrot.lane.b32.xlu0 %v4822_v44, %s8299_s23  ;;  %v4823_v43 = vsel %vm4807_vm14, %v4796_v33, %v4815_v25  ;;  %vm4809_vm2 = vcmp.gt.f32.partialorder %v4800_v21, 0.0  ;;  %vm11353_vm14 = vmmov %vm11350_vm0  ;;  %v6488_v33 = vld [vmem:[%s10933_s12 + $0x8] sm:$0xff]  ;;  %v6491_v25 = vld [vmem:[%s10933_s12 + $0x20] sm:$0xff] }
 0xc25   : > { %4844 = vrot.lane.b32.xlu1 %v4823_v43, %s8299_s23  ;;  %v4824_v49 = vsel %vm4808_vm3, %v4798_v9, %v4816_v38  ;;  %vm11354_vm3 = vmmov %vm11350_vm0 }
 0xc26   : > { %v4825_v23 = vsel %vm4809_vm2, %v4800_v21, %v4817_v17  ;;  %vm11355_vm2 = vmmov %vm11352_vm9  ;;  %v6492_v21 = vld [vmem:[%s10933_s12 + $0x28] sm:$0xff] }
 0xc28   : > { %4846 = vrot.lane.b32.xlu0 %v4824_v49, %s8299_s23 }
 0xc29   : > { %4848 = vrot.lane.b32.xlu1 %v4825_v23, %s8299_s23  ;;  %s11360_s23 = smov 111  }
 0xc8e   : > { %v4835_v2 = vpop.permute.xlu0 %4834 }
 0xc8f   : > { %4866 = vst.msk [vmem:[#allocation2] sm:$0xff] %vm11349_vm15, %v4835_v2  ;;  %v4837_v6 = vpop.permute.xlu1 %4836  ;;  %vm11357_vm15 = vmmov %vm11350_vm0 }
 0xc90   : > { %v4850_v16 = vsel %vm11350_vm0, %v4835_v2, %v4837_v6  ;;  %4868 = vst.msk [vmem:[#allocation2 + $0x10] sm:$0xff] %vm11351_vm12, %v4837_v6  ;;  %vm11359_vm12 = vmmov %vm11350_vm0 }
 0xc92   : > { %v4839_v7 = vpop.permute.xlu0 %4838 }
 0xc93   : > { %4869 = vst.msk [vmem:[#allocation2 + $0x18] sm:$0xff] %vm11352_vm9, %v4839_v7  ;;  %v4841_v15 = vpop.permute.xlu1 %4840  ;;  %vm11358_vm9 = vmmov %vm11355_vm2 }
 0xc94   : > { %v4851_v22 = vsel %vm11353_vm14, %v4839_v7, %v4841_v15  ;;  %4871 = vst.msk [vmem:[#allocation2 + $0x28] sm:$0xff] %vm11354_vm3, %v4841_v15  ;;  %v6493_v15 = vld [vmem:[%s10933_s12 + $0x30] sm:$0xff] }
 0xc95   : > { %v5607_v48 = vpack.c.bf16 %v4851_v22, %v4850_v16 }
 0xc96   : > { %v4843_v18 = vpop.permute.xlu0 %4842  ;;  %v4886_v47 = vld [vmem:[#allocation2] sm:$0xff] }
 0xc97   : > { %4872 = vst.msk [vmem:[#allocation2 + $0x30] sm:$0xff] %vm11355_vm2, %v4843_v18  ;;  %v4845_v45 = vpop.permute.xlu1 %4844  ;;  %v4888_v24 = vld [vmem:[#allocation2 + $0x10] sm:$0xff] }
 0xc98   : > { %v4852_v57 = vsel %vm11356_vm6, %v4843_v18, %v4845_v45  ;;  %4874 = vst.msk [vmem:[#allocation2 + $0x40] sm:$0xff] %vm11357_vm15, %v4845_v45  ;;  %v10470_v28 = vpack.i.bf16 %v4888_v24, %v4850_v16  ;;  %vm11365_vm6 = vcmask 916480   ;;  %vm11369_vm15 = vnez %v11261_v11 }
 0xc99   : > { %vm11366_vm14 = vmmov %vm11365_vm6 }
 0xc9a   : > { %v4847_v1 = vpop.permute.xlu0 %4846  ;;  %7952 = vrot.lane.b32.xlu0 %v10470_v28, %s8304_s16  ;;  %v4889_v4 = vld [vmem:[#allocation2 + $0x18] sm:$0xff]  ;;  %vm11367_vm3 = vmmov %vm11365_vm6 }
 0xc9b   : > { %4875 = vst.msk [vmem:[#allocation2 + $0x48] sm:$0xff] %vm11358_vm9, %v4847_v1  ;;  %v4849_v56 = vpop.permute.xlu1 %4848  ;;  %v10475_v41 = vpack.i.bf16 %v4889_v4, %v4886_v47  ;;  %v4891_v37 = vld [vmem:[#allocation2 + $0x28] sm:$0xff]  ;;  %v5606_v30 = vpack.c.bf16 %v4889_v4, %v4886_v47  ;;  %vm11368_vm2 = vmmov %vm11367_vm3 }
 0xc9c   : > { %v4853_v10 = vsel %vm11350_vm0, %v4847_v1, %v4849_v56  ;;  %4877 = vst.msk [vmem:[#allocation2 + $0x58] sm:$0xff] %vm11359_vm12, %v4849_v56  ;;  %v7961_v29 = vpack.i.bf16 %v4891_v37, %v4851_v22  ;;  %v5608_v46 = vpack.c.bf16 %v4891_v37, %v4888_v24  ;;  %v6494_v22 = vld [vmem:[%s10933_s12 + $0x38] sm:$0xff]  ;;  %v6611_v1 = vld [vmem:[%s10935_s14] sm:$0xff]  ;;  %v6612_v47 = vld [vmem:[%s10935_s14 + $0x8] sm:$0xff] }
 0xc9d   : > { %v5610_v14 = vpack.c.bf16 %v4853_v10, %v4852_v57  ;;  %vm11370_vm9 = vmmov %vm11368_vm2 }
 0xc9e   : > { %7957 = vrot.lane.b32.xlu0 %v10475_v41, %s8304_s16  ;;  %7962 = vrot.lane.b32.xlu1 %v7961_v29, %s8304_s16  ;;  %v4892_v3 = vld [vmem:[#allocation2 + $0x30] sm:$0xff]  ;;  %vm11371_vm0 = vmmov %vm11368_vm2 }
 0xc9f   : > { %v4894_v26 = vld [vmem:[#allocation2 + $0x40] sm:$0xff]  ;;  %vm11372_vm12 = vmmov %vm11371_vm0 }
 0xca0   : > { %v7966_v53 = vpack.i.bf16 %v4894_v26, %v4852_v57 }
 0xca2   : > { %7967 = vrot.lane.b32.xlu1 %v7966_v53, %s8304_s16  ;;  %v4895_v36 = vld [vmem:[#allocation2 + $0x48] sm:$0xff] }
 0xca3   : > { %v7976_v39 = vpack.i.bf16 %v4895_v36, %v4892_v3  ;;  %v4897_v8 = vld [vmem:[#allocation2 + $0x58] sm:$0xff]  ;;  %v5609_v27 = vpack.c.bf16 %v4895_v36, %v4892_v3 }
 0xca4   : > { %v7971_v51 = vpack.i.bf16 %v4897_v8, %v4853_v10  ;;  %v5611_v13 = vpack.c.bf16 %v4897_v8, %v4894_v26  ;;  %v6614_v8 = vld [vmem:[%s10935_s14 + $0x18] sm:$0xff] }
 0xca6   : > { %7977 = vrot.lane.b32.xlu1 %v7976_v39, %s8304_s16  ;;  %7972 = vrot.lane.b32.xlu0 %v7971_v51, %s8304_s16  ;;  %s11361_s16 = smov 97  }
 0xcaa   : > { %7987 = vrot.lane.b32.xlu1 %v7961_v29, %s8307_s30  ;;  %7982 = vrot.lane.b32.xlu0 %v10470_v28, %s8307_s30 }
 0xcae   : > { %7997 = vrot.lane.b32.xlu1 %v7966_v53, %s8307_s30  ;;  %7992 = vrot.lane.b32.xlu0 %v10475_v41, %s8307_s30 }
 0xcb2   : > { %8007 = vrot.lane.b32.xlu1 %v7976_v39, %s8307_s30  ;;  %8002 = vrot.lane.b32.xlu0 %v7971_v51, %s8307_s30  ;;  %s11362_s30 = smov 96  }
 0xcb6   : > { %8017 = vrot.lane.b32.xlu1 %v7961_v29, %s11360_s23  ;;  %8012 = vrot.lane.b32.xlu0 %v10470_v28, %s11360_s23 }
 0xcba   : > { %8027 = vrot.lane.b32.xlu1 %v7966_v53, %s11360_s23  ;;  %8022 = vrot.lane.b32.xlu0 %v10475_v41, %s11360_s23 }
 0xcbe   : > { %8037 = vrot.lane.b32.xlu1 %v7976_v39, %s11360_s23  ;;  %8032 = vrot.lane.b32.xlu0 %v7971_v51, %s11360_s23 }
 0xcc2   : > { %8047 = vrot.lane.b32.xlu1 %v7961_v29, %s11361_s16  ;;  %8042 = vrot.lane.b32.xlu0 %v10470_v28, %s11361_s16 }
 0xcc6   : > { %8057 = vrot.lane.b32.xlu1 %v7966_v53, %s11361_s16  ;;  %8052 = vrot.lane.b32.xlu0 %v10475_v41, %s11361_s16 }
 0xcca   : > { %8067 = vrot.lane.b32.xlu1 %v7976_v39, %s11361_s16  ;;  %8062 = vrot.lane.b32.xlu0 %v7971_v51, %s11361_s16  ;;  %s11474_s16 = sshll.u32 %s11476_s19, 6 }
 0xcce   : > { %5642 = vrot.lane.b32.xlu1 %v5608_v46, %s11362_s30  ;;  %5640 = vrot.lane.b32.xlu0 %v5607_v48, %s11362_s30 }
 0xcd2   : > { %5638 = vrot.lane.b32.xlu0 %v5606_v30, %s11362_s30  ;;  %5646 = vrot.lane.b32.xlu1 %v5610_v14, %s11362_s30 }
 0xcd6   : > { %5648 = vrot.lane.b32.xlu0 %v5611_v13, %s11362_s30  ;;  %5644 = vrot.lane.b32.xlu1 %v5609_v27, %s11362_s30 }
 0xcda   : > { %8072 = vrot.lane.b32.xlu0 %v10470_v28, %s11363_s25  ;;  %8077 = vrot.lane.b32.xlu1 %v7961_v29, %s11363_s25 }
 0xcde   : > { %8082 = vrot.lane.b32.xlu0 %v10475_v41, %s11363_s25  ;;  %8087 = vrot.lane.b32.xlu1 %v7966_v53, %s11363_s25 }
 0xce2   : > { %8092 = vrot.lane.b32.xlu0 %v7971_v51, %s11363_s25  ;;  %8097 = vrot.lane.b32.xlu1 %v7976_v39, %s11363_s25 }
 0xce6   : > { %8102 = vrot.lane.b32.xlu0 %v10470_v28, %s11364_s27  ;;  %8107 = vrot.lane.b32.xlu1 %v7961_v29, %s11364_s27 }
 0xcea   : > { %8112 = vrot.lane.b32.xlu0 %v10475_v41, %s11364_s27  ;;  %8117 = vrot.lane.b32.xlu1 %v7966_v53, %s11364_s27 }
 0xcee   : > { %8122 = vrot.lane.b32.xlu0 %v7971_v51, %s11364_s27  ;;  %8127 = vrot.lane.b32.xlu1 %v7976_v39, %s11364_s27  ;;  %s10908_s27 = scalar_lea.vmem %s10936_s15, %s11474_s16 }
 0xcf2   : > { %8132 = vrot.lane.b32.xlu0 %v10470_v28, %s11251_s22  ;;  %8137 = vrot.lane.b32.xlu1 %v7961_v29, %s11251_s22 }
 0xcf6   : > { %8142 = vrot.lane.b32.xlu0 %v10475_v41, %s11251_s22  ;;  %8147 = vrot.lane.b32.xlu1 %v7966_v53, %s11251_s22 }
 0xcfa   : > { %8152 = vrot.lane.b32.xlu0 %v7971_v51, %s11251_s22  ;;  %8157 = vrot.lane.b32.xlu1 %v7976_v39, %s11251_s22 }
 0xcfe   : > { %8162 = vrot.lane.b32.xlu0 %v10470_v28, %s8311_s26  ;;  %8167 = vrot.lane.b32.xlu1 %v7961_v29, %s8311_s26 }
 0xd02   : > { %8172 = vrot.lane.b32.xlu0 %v10475_v41, %s8311_s26  ;;  %8177 = vrot.lane.b32.xlu1 %v7966_v53, %s8311_s26 }
 0xd06   : > { %8182 = vrot.lane.b32.xlu0 %v7971_v51, %s8311_s26  ;;  %8187 = vrot.lane.b32.xlu1 %v7976_v39, %s8311_s26  ;;  %v6613_v39 = vld [vmem:[%s10935_s14 + $0x10] sm:$0xff] }
 0xd0a   : > { %6497 = vperm.xlu0 %7619, %v6487_v54   ;;  %6502 = vperm.xlu1 %7620, %v6488_v33  }
 0xd0c   : > { %v7953_v55 = vpop.permute.xlu0 %7952 }
 0xd0d   : > { %v7955_v9 = vunpack.i.h.bf16 %v7953_v55  ;;  %v7954_v20 = vunpack.i.l.bf16 %v7953_v55 }
 0xd0e   : > { %6507 = vperm.xlu0 %7619, %v6489_v60   ;;  %6512 = vperm.xlu1 %7620, %v6490_v50   ;;  %v8251_v50 = vld [vmem:[%s10932_s11 + $0x20] sm:$0xff]  }
 0xd0f   : > { %v4996_v2 = vsel %vm11365_vm6, %v7954_v20, %v7955_v9  ;;  %vm11373_vm6 = vmmov %vm11371_vm0 }
 0xd10   : > { %v7963_v38 = vpop.permute.xlu1 %7962  ;;  %v7958_v44 = vpop.permute.xlu0 %7957 }
 0xd11   : > { %v7965_v17 = vunpack.i.h.bf16 %v7963_v38  ;;  %v7964_v43 = vunpack.i.l.bf16 %v7963_v38  ;;  %v7960_v49 = vunpack.i.h.bf16 %v7958_v44  ;;  %v7959_v23 = vunpack.i.l.bf16 %v7958_v44 }
 0xd12   : > { %6517 = vperm.xlu0 %7619, %v6491_v25   ;;  %6522 = vperm.xlu1 %7620, %v6492_v21  }
 0xd13   : > { %v4998_v6 = vsel %vm11366_vm14, %v7964_v43, %v7965_v17  ;;  %v4997_v16 = vsel %vm11367_vm3, %v7960_v49, %v7964_v43  ;;  %v4995_v7 = vsel %vm11368_vm2, %v7959_v23, %v7954_v20  ;;  %vm11374_vm14 = vcmask 924672  }
 0xd14   : > { %v7089_v18 = vpack.c.bf16 %v4998_v6, %v4996_v2  ;;  %v7092_v45 = vpack.c.bf16 %v4997_v16, %v4995_v7  ;;  %v7968_v24 = vpop.permute.xlu1 %7967  ;;  %vm11375_vm3 = vmmov %vm11374_vm14  ;;  %vm11376_vm2 = vnez %v11268_v31  ;;  %v8253_v31 = vld [vmem:[%s10932_s11 + $0x30] sm:$0xff]  }
 0xd15   : > { %v7970_v57 = vunpack.i.h.bf16 %v7968_v24  ;;  %v7969_v28 = vunpack.i.l.bf16 %v7968_v24 }
 0xd16   : > { %6527 = vperm.xlu0 %7619, %v6493_v15   ;;  %6532 = vperm.xlu1 %7620, %v6494_v22  }
 0xd17   : > { %7090 = vmatprep.subr.msk.bf16.mxu1 %vm10014_vm7, %v7089_v18  ;;  %v5000_v26 = vsel %vm11370_vm9, %v7969_v28, %v7970_v57  ;;  %vm11377_vm9 = vmmov %vm11375_vm3 }
 0xd18   : > { %7093 = vmatpush1.bf16.msk.msra.mxu1 %vm11369_vm15, %v7092_v45  ;;  %v7978_v4 = vpop.permute.xlu1 %7977  ;;  %v7973_v56 = vpop.permute.xlu0 %7972  ;;  %v8252_v45 = vld [vmem:[%s10932_s11 + $0x28] sm:$0xff]  }
 0xd19   : > { %v7980_v41 = vunpack.i.h.bf16 %v7978_v4  ;;  %v7979_v37 = vunpack.i.l.bf16 %v7978_v4  ;;  %v7975_v10 = vunpack.i.h.bf16 %v7973_v56  ;;  %v7974_v29 = vunpack.i.l.bf16 %v7973_v56 }
 0xd1a   : > { %6617 = vperm.xlu0 %7619, %v6611_v1   ;;  %6622 = vperm.xlu1 %7620, %v6612_v47  }
 0xd1b   : > { %v4999_v53 = vsel %vm11371_vm0, %v7979_v37, %v7969_v28  ;;  %v5001_v3 = vsel %vm11372_vm12, %v7980_v41, %v7974_v29  ;;  %v5002_v36 = vsel %vm11373_vm6, %v7974_v29, %v7975_v10  ;;  %vm11379_vm0 = vcmask 261120   ;;  %vm11381_vm12 = vmmov %vm11375_vm3 }
 0xd1c   : > { %v7095_v51 = vpack.c.bf16 %v5002_v36, %v5000_v26  ;;  %v7098_v46 = vpack.c.bf16 %v5001_v3, %v4999_v53  ;;  %v7988_v48 = vpop.permute.xlu1 %7987  ;;  %v7983_v30 = vpop.permute.xlu0 %7982  ;;  %vm11382_vm6 = vmmov %vm11375_vm3 }
 0xd1d   : > { %v7990_v14 = vunpack.i.h.bf16 %v7988_v48  ;;  %v7989_v13 = vunpack.i.l.bf16 %v7988_v48  ;;  %v7985_v27 = vunpack.i.h.bf16 %v7983_v30  ;;  %v7984_v54 = vunpack.i.l.bf16 %v7983_v30 }
 0xd1e   : > { %6627 = vperm.xlu0 %7619, %v6613_v39   ;;  %6632 = vperm.xlu1 %7620, %v6614_v8  }
 0xd1f   : > { %v4937_v33 = vsel %vm11374_vm14, %v7989_v13, %v7990_v14  ;;  %v4935_v60 = vsel %vm11375_vm3, %v7984_v54, %v7985_v27  ;;  %7096 = vmatprep.subr.msk.bf16.mxu1 %vm10014_vm7, %v7095_v51  ;;  %vm11378_vm7 = vmmov %vm11375_vm3 }
 0xd20   : > { %v7109_v55 = vpack.c.bf16 %v4937_v33, %v4935_v60  ;;  %7099 = vmatpush1.bf16.msk.msra.mxu1 %vm11369_vm15, %v7098_v46  ;;  %v7998_v9 = vpop.permute.xlu1 %7997  ;;  %v7993_v20 = vpop.permute.xlu0 %7992  ;;  %vm11380_vm15 = vnez %v11271_v42  ;;  %vm11383_vm14 = vmmov %vm11375_vm3  ;;  %v8254_v42 = vld [vmem:[%s10932_s11 + $0x38] sm:$0xff]  }
 0xd21   : > { %v7995_v25 = vunpack.i.h.bf16 %v7993_v20  ;;  %v7994_v21 = vunpack.i.l.bf16 %v7993_v20  ;;  %v8000_v38 = vunpack.i.h.bf16 %v7998_v9  ;;  %v7999_v44 = vunpack.i.l.bf16 %v7998_v9 }
 0xd22   : > { %7110 = vmatprep.subr.msk.bf16.mxu1 %vm11376_vm2, %v7109_v55  ;;  %v8255_v55 = vld [vmem:[%s10932_s11] sm:$0xff]  }
 0xd23   : > { %v4936_v52 = vsel %vm11377_vm9, %v7995_v25, %v7989_v13  ;;  %v4934_v17 = vsel %vm11378_vm7, %v7994_v21, %v7984_v54  ;;  %7100 = vmatmul.mubr.msk.bf16.vlgmr.msra.gmra.mrb[16].mxu1 %vm11379_vm0, %v8251_v50  ;;  %v4939_v7 = vsel %vm11381_vm12, %v7999_v44, %v8000_v38  ;;  %vm11384_vm9 = vcmask 908288  }
 0xd24   : > { %v7112_v43 = vpack.c.bf16 %v4936_v52, %v4934_v17  ;;  %v8008_v49 = vpop.permute.xlu1 %8007  ;;  %v8003_v23 = vpop.permute.xlu0 %8002  ;;  %5097 = vmatprep.mubr.bf16.mxu1 %v8297_v0  ;;  %vm11385_vm7 = vmmov %vm11384_vm9 }
 0xd25   : > { %v8010_v11 = vunpack.i.h.bf16 %v8008_v49  ;;  %v8009_v2 = vunpack.i.l.bf16 %v8008_v49  ;;  %v8005_v6 = vunpack.i.h.bf16 %v8003_v23  ;;  %v8004_v16 = vunpack.i.l.bf16 %v8003_v23  ;;  %vm11388_vm12 = vmmov %vm11385_vm7 }
 0xd26   : > { %7113 = vmatpush1.bf16.msk.msra.mxu1 %vm11380_vm15, %v7112_v43 }
 0xd27   : > { %v4938_v15 = vsel %vm11382_vm6, %v8009_v2, %v7999_v44  ;;  %v4940_v22 = vsel %vm11383_vm14, %v8010_v11, %v8004_v16  ;;  %v4941_v18 = vsel %vm11375_vm3, %v8004_v16, %v8005_v6  ;;  %vm11389_vm6 = vmmov %vm11385_vm7  ;;  %v8256_v6 = vld [vmem:[%s10932_s11 + $0x8] sm:$0xff]  }
 0xd28   : > { %v7115_v24 = vpack.c.bf16 %v4941_v18, %v4939_v7  ;;  %v7118_v57 = vpack.c.bf16 %v4940_v22, %v4938_v15  ;;  %v8018_v28 = vpop.permute.xlu1 %8017  ;;  %v8013_v1 = vpop.permute.xlu0 %8012  ;;  %vm11390_vm14 = vmmov %vm11389_vm6 }
 0xd29   : > { %v8020_v47 = vunpack.i.h.bf16 %v8018_v28  ;;  %v8019_v4 = vunpack.i.l.bf16 %v8018_v28  ;;  %v8015_v56 = vunpack.i.h.bf16 %v8013_v1  ;;  %v8014_v41 = vunpack.i.l.bf16 %v8013_v1  ;;  %vm11391_vm3 = vmmov %vm11389_vm6 }
 0xd2a   : > { %7116 = vmatprep.subr.msk.bf16.mxu1 %vm11376_vm2, %v7115_v24  ;;  %vm11386_vm2 = vmmov %vm11379_vm0 }
 0xd2b   : > { %v5269_v37 = vsel %vm11384_vm9, %v8019_v4, %v8020_v47  ;;  %v5267_v10 = vsel %vm11385_vm7, %v8014_v41, %v8015_v56  ;;  %7101 = vmatmul.mubr.msk.bf16.gmra.mrb[20].mxu1 %vm11379_vm0, %v8252_v45  ;;  %vm11392_vm9 = vmmov %vm11391_vm3 }
 0xd2c   : > { %v7137_v29 = vpack.c.bf16 %v5269_v37, %v5267_v10  ;;  %7119 = vmatpush1.bf16.msk.msra.mxu1 %vm11380_vm15, %v7118_v57  ;;  %5107 = vmatprep.mubr.bf16.mxu1 %v8297_v0  ;;  %v8028_v26 = vpop.permute.xlu1 %8027  ;;  %v8023_v53 = vpop.permute.xlu0 %8022  ;;  %vm11387_vm15 = vmmov %vm11379_vm0  ;;  %v8259_v37 = vld [vmem:[%s10932_s11 + $0x40] sm:$0xff]  }
 0xd2d   : > { %v8025_v39 = vunpack.i.h.bf16 %v8023_v53  ;;  %v8024_v8 = vunpack.i.l.bf16 %v8023_v53  ;;  %v8030_v14 = vunpack.i.h.bf16 %v8028_v26  ;;  %v8029_v13 = vunpack.i.l.bf16 %v8028_v26  ;;  %vm11393_vm7 = vmmov %vm11391_vm3 }
 0xd2e   : > { %7138 = vmatprep.subr.msk.bf16.mxu1 %vm10091_vm8, %v7137_v29 }
 0xd2f   : > { %v5268_v27 = vsel %vm11388_vm12, %v8025_v39, %v8019_v4  ;;  %v5266_v54 = vsel %vm11389_vm6, %v8024_v8, %v8014_v41  ;;  %v5271_v38 = vsel %vm11391_vm3, %v8029_v13, %v8030_v14  ;;  %vm11396_vm12 = vnez %v11276_v63  ;;  %vm11397_vm6 = vmmov %vm11379_vm0  ;;  %v8258_v63 = vld [vmem:[%s10932_s11 + $0x18] sm:$0xff]   ;;  %v8260_v8 = vld [vmem:[%s10932_s11 + $0x48] sm:$0xff]  }
 0xd30   : > { %v8038_v3 = vpop.permute.xlu1 %8037  ;;  %v8033_v36 = vpop.permute.xlu0 %8032  ;;  %v7140_v44 = vpack.c.bf16 %v5268_v27, %v5266_v54  ;;  %v8262_v14 = vld [vmem:[%s10932_s11 + $0x58] sm:$0xff]   ;;  %v8263_v54 = vld [vmem:[%s10932_s11 + $0x60] sm:$0xff]  }
 0xd31   : > { %v8035_v51 = vunpack.i.h.bf16 %v8033_v36  ;;  %v8034_v46 = vunpack.i.l.bf16 %v8033_v36  ;;  %v8040_v33 = vunpack.i.h.bf16 %v8038_v3  ;;  %v8039_v60 = vunpack.i.l.bf16 %v8038_v3 }
 0xd33   : > { %7102 = vmatmul.mubr.msk.bf16.gmra.mrb[24].mxu1 %vm11386_vm2, %v8253_v31  ;;  %v5273_v50 = vsel %vm11390_vm14, %v8034_v46, %v8035_v51  ;;  %v5270_v52 = vsel %vm11392_vm9, %v8039_v60, %v8029_v13  ;;  %v5272_v17 = vsel %vm11393_vm7, %v8040_v33, %v8034_v46  ;;  %vm11394_vm2 = vcmask 793600   ;;  %vm11399_vm14 = vmmov %vm11379_vm0 }
 0xd34   : > { %5117 = vmatprep.mubr.bf16.mxu1 %v8297_v0  ;;  %v8048_v48 = vpop.permute.xlu1 %8047  ;;  %v8043_v30 = vpop.permute.xlu0 %8042  ;;  %v7143_v43 = vpack.c.bf16 %v5273_v50, %v5271_v38  ;;  %v7146_v11 = vpack.c.bf16 %v5272_v17, %v5270_v52  ;;  %vm11400_vm3 = vmmov %vm11394_vm2  ;;  %v8264_v52 = vld [vmem:[%s10932_s11 + $0x68] sm:$0xff]   ;;  %v8265_v17 = vld [vmem:[%s10932_s11 + $0x70] sm:$0xff]  }
 0xd35   : > { %v8050_v9 = vunpack.i.h.bf16 %v8048_v48  ;;  %v8049_v20 = vunpack.i.l.bf16 %v8048_v48  ;;  %v8045_v25 = vunpack.i.h.bf16 %v8043_v30  ;;  %v8044_v21 = vunpack.i.l.bf16 %v8043_v30  ;;  %vm11401_vm9 = vmmov %vm11394_vm2 }
 0xd36   : > { %vm11402_vm7 = vmmov %vm11394_vm2 }
 0xd37   : > { %v5451_v49 = vsel %vm11394_vm2, %v8049_v20, %v8050_v9 }
 0xd38   : > { %v8053_v16 = vpop.permute.xlu0 %8052  ;;  %v8058_v7 = vpop.permute.xlu1 %8057 }
 0xd39   : > { %v8055_v22 = vunpack.i.h.bf16 %v8053_v16  ;;  %v8054_v18 = vunpack.i.l.bf16 %v8053_v16  ;;  %v8060_v28 = vunpack.i.h.bf16 %v8058_v7  ;;  %v8059_v1 = vunpack.i.l.bf16 %v8058_v7 }
 0xd3b   : > { %7103 = vmatmul.mubr.msk.bf16.gmra.mrb[28].mxu1 %vm11387_vm15, %v8254_v42  ;;  %vm11395_vm15 = vmmov %vm11394_vm2  ;;  %v5450_v47 = vsel %vm11400_vm3, %v8055_v22, %v8049_v20  ;;  %v5448_v4 = vsel %vm11401_vm9, %v8054_v18, %v8044_v21 }
 0xd3c   : > { %5192 = vmatprep.mubr.bf16.mxu1 %v8297_v0  ;;  %v5449_v23 = vsel %vm11395_vm15, %v8044_v21, %v8045_v25  ;;  %v8063_v15 = vpop.permute.xlu0 %8062  ;;  %v8068_v45 = vpop.permute.xlu1 %8067  ;;  %v7168_v31 = vpack.c.bf16 %v5450_v47, %v5448_v4  ;;  %v8267_v47 = vld [vmem:[%s10932_s11 + $0x80] sm:$0xff]  }
 0xd3d   : > { %v7165_v2 = vpack.c.bf16 %v5451_v49, %v5449_v23  ;;  %v8065_v24 = vunpack.i.h.bf16 %v8063_v15  ;;  %v8064_v57 = vunpack.i.l.bf16 %v8063_v15  ;;  %v8070_v56 = vunpack.i.h.bf16 %v8068_v45 }
 0xd3e   : > { %v8069_v41 = vunpack.i.l.bf16 %v8068_v45 }
 0xd3f   : > { %v5455_v10 = vsel %vm11402_vm7, %v8064_v57, %v8065_v24 }
 0xd40   : > { %v5643_v36 = vpop.permute.xlu1 %5642  ;;  %v5641_v42 = vpop.permute.xlu0 %5640 }
 0xd43   : > { %7120 = vmatmul.mubr.msk.bf16.vlgmr.msra.gmra.mrb[16].mxu1 %vm11379_vm0, %v8255_v55 }
 0xd44   : > { %7141 = vmatpush1.bf16.msk.msra.mxu1 %vm11396_vm12, %v7140_v44  ;;  %5202 = vmatprep.mubr.bf16.mxu1 %v8297_v0  ;;  %v5647_v46 = vpop.permute.xlu1 %5646  ;;  %v5639_v48 = vpop.permute.xlu0 %5638 }
 0xd45   : > { %7144 = vmatprep.subr.msk.bf16.mxu1 %vm10091_vm8, %v7143_v43  ;;  %vm11398_vm8 = vmmov %vm11379_vm0 }
 0xd46   : > { %vm11403_vm0 = vmmov %vm11394_vm2 }
 0xd47   : > { %v5453_v29 = vsel %vm11403_vm0, %v8059_v1, %v8060_v28  ;;  %vm11404_vm2 = vmmov %vm11403_vm0 }
 0xd48   : > { %7147 = vmatpush1.bf16.msk.msra.mxu1 %vm11396_vm12, %v7146_v11  ;;  %v5452_v26 = vsel %vm11404_vm2, %v8069_v41, %v8059_v1  ;;  %vm11405_vm15 = vmmov %vm11403_vm0  ;;  %v7171_v3 = vpack.c.bf16 %v5455_v10, %v5453_v29  ;;  %v5645_v30 = vpop.permute.xlu1 %5644  ;;  %vm11414_vm0 = vcmask 777216  }
 0xd49   : > { %7166 = vmatprep.subr.msk.bf16.mxu1 %vm10135_vm10, %v7165_v2  ;;  %v5454_v53 = vsel %vm11405_vm15, %v8070_v56, %v8064_v57  ;;  %vm11406_vm12 = vmmov %vm11397_vm6  ;;  %v8266_v2 = vld [vmem:[%s10932_s11 + $0x78] sm:$0xff]  }
 0xd4a   : > { %v7174_v39 = vpack.c.bf16 %v5454_v53, %v5452_v26  ;;  %vm11415_vm2 = vmmov %vm11414_vm0 }
 0xd4b   : > { %7121 = vmatmul.mubr.msk.bf16.gmra.mrb[20].mxu1 %vm11397_vm6, %v8256_v6  ;;  %vm11407_vm6 = vnez %v11289_v12  ;;  %v5649_v12 = vpop.permute.xlu0 %5648 }
 0xd4c   : > { %5212 = vmatprep.mubr.bf16.mxu1 %v8297_v0  ;;  %v8078_v13 = vpop.permute.xlu1 %8077 }
 0xd4d   : > { %v8080_v33 = vunpack.i.h.bf16 %v8078_v13  ;;  %v8079_v60 = vunpack.i.l.bf16 %v8078_v13 }
 0xd4f   : > { %v8073_v27 = vpop.permute.xlu0 %8072  ;;  %v5795_v20 = vsel %vm11414_vm0, %v8079_v60, %v8080_v33 }
 0xd50   : > { %v8075_v50 = vunpack.i.h.bf16 %v8073_v27  ;;  %v8074_v55 = vunpack.i.l.bf16 %v8073_v27  ;;  %v8088_v43 = vpop.permute.xlu1 %8087 }
 0xd51   : > { %v8090_v22 = vunpack.i.h.bf16 %v8088_v43  ;;  %v8089_v18 = vunpack.i.l.bf16 %v8088_v43 }
 0xd52   : > { %v5793_v25 = vsel %vm11415_vm2, %v8074_v55, %v8075_v50  ;;  %vm11425_vm2 = vmmov %vm11414_vm0 }
 0xd53   : > { %7122 = vmatmul.mubr.msk.bf16.gmra.mrb[24].mxu1 %vm11398_vm8, %v8257_v61  ;;  %vm11408_vm8 = vcmask 785408   ;;  %v7209_v44 = vpack.c.bf16 %v5795_v20, %v5793_v25  ;;  %v8083_v49 = vpop.permute.xlu0 %8082 }
 0xd54   : > { %5222 = vmatprep.mubr.bf16.mxu1 %v8297_v0  ;;  %v5651_v51 = vsel %vm11408_vm8, %v5641_v42, %v5643_v36  ;;  %vm11412_vm9 = vmmov %vm11408_vm8  ;;  %v8098_v23 = vpop.permute.xlu1 %8097  ;;  %v8085_v6 = vunpack.i.h.bf16 %v8083_v49  ;;  %v8084_v61 = vunpack.i.l.bf16 %v8083_v49 }
 0xd55   : > { %v5650_v9 = vsel %vm11412_vm9, %v5639_v48, %v5641_v42  ;;  %vm11416_vm15 = vmmov %vm11408_vm8  ;;  %v8100_v57 = vunpack.i.h.bf16 %v8098_v23  ;;  %v8099_v28 = vunpack.i.l.bf16 %v8098_v23  ;;  %v8270_v48 = vld [vmem:[%s10932_s11 + $0x98] sm:$0xff]  }
 0xd56   : > { %v5653_v21 = vsel %vm11416_vm15, %v5647_v46, %v5649_v12  ;;  %vm11423_vm9 = vmmov %vm11414_vm0 }
 0xd57   : > { %v8093_v11 = vpop.permute.xlu0 %8092 }
 0xd58   : > { %v8095_v16 = vunpack.i.h.bf16 %v8093_v11  ;;  %v8094_v7 = vunpack.i.l.bf16 %v8093_v11 }
 0xd5a   : > { %v5799_v1 = vsel %vm11423_vm9, %v8094_v7, %v8095_v16  ;;  %v5798_v26 = vsel %vm11425_vm2, %v8100_v57, %v8094_v7 }
 0xd5b   : > { %7123 = vmatmul.mubr.msk.bf16.gmra.mrb[28].mxu1 %vm11399_vm14, %v8258_v63  ;;  %vm11409_vm14 = vmmov %vm11406_vm12  ;;  %v8108_v63 = vpop.permute.xlu1 %8107  ;;  %v8103_v15 = vpop.permute.xlu0 %8102 }
 0xd5c   : > { %5358 = vmatprep.mubr.bf16.mxu1 %v8297_v0  ;;  %v8110_v4 = vunpack.i.h.bf16 %v8108_v63  ;;  %v8109_v56 = vunpack.i.l.bf16 %v8108_v63  ;;  %v8105_v41 = vunpack.i.h.bf16 %v8103_v15  ;;  %v8272_v63 = vld [vmem:[%s10932_s11 + $0xa8] sm:$0xff]  }
 0xd63   : > { %7148 = vmatmul.mubr.msk.bf16.vlgmr.msra.gmra.mrb[16].mxu1 %vm11406_vm12, %v8259_v37  ;;  %v8104_v37 = vunpack.i.l.bf16 %v8103_v15 }
 0xd64   : > { %7169 = vmatpush1.bf16.msk.msra.mxu1 %vm11407_vm6, %v7168_v31  ;;  %5368 = vmatprep.mubr.bf16.mxu1 %v8297_v0  ;;  %v5796_v31 = vsel %vm11414_vm0, %v8099_v28, %v8089_v18 }
 0xd65   : > { %7172 = vmatprep.subr.msk.bf16.mxu1 %vm10135_vm10, %v7171_v3  ;;  %vm11410_vm10 = vmmov %vm11406_vm12  ;;  %v7218_v42 = vpack.c.bf16 %v5798_v26, %v5796_v31 }
 0xd66   : > { %vm11411_vm3 = vmmov %vm11410_vm10 }
 0xd67   : > { %vm11413_vm7 = vmmov %vm11411_vm3 }
 0xd68   : > { %7175 = vmatpush1.bf16.msk.msra.mxu1 %vm11407_vm6, %v7174_v39  ;;  %vm11417_vm12 = vmmov %vm11408_vm8 }
 0xd69   : > { %5670 = vmatprep.subr.bf16.mxu1 %v5651_v51  ;;  %v5652_v38 = vsel %vm11417_vm12, %v5645_v30, %v5647_v46  ;;  %vm11418_vm6 = vmmov %vm11411_vm3  ;;  %vm11427_vm12 = vcmask 662528   ;;  %v8118_v51 = vpop.permute.xlu1 %8117 }
 0xd6a   : > { %vm11419_vm8 = vmmov %vm11411_vm3  ;;  %v5977_v3 = vsel %vm11427_vm12, %v8109_v56, %v8110_v4  ;;  %v8120_v33 = vunpack.i.h.bf16 %v8118_v51 }
 0xd6b   : > { %7149 = vmatmul.mubr.msk.bf16.gmra.mrb[20].mxu1 %vm11409_vm14, %v8260_v8  ;;  %vm11420_vm14 = vmmov %vm11411_vm3  ;;  %v8268_v8 = vld [vmem:[%s10932_s11 + $0x88] sm:$0xff]  }
 0xd6c   : > { %5378 = vmatprep.mubr.bf16.mxu1 %v8297_v0  ;;  %vm11426_vm15 = vmmov %vm11418_vm6 }
 0xd6d   : > { %v8128_v46 = vpop.permute.xlu1 %8127  ;;  %vm11437_vm2 = vmmov %vm11419_vm8 }
 0xd6e   : > { %v8129_v20 = vunpack.i.l.bf16 %v8128_v46 }
 0xd71   : > { %v8138_v27 = vpop.permute.xlu1 %8137 }
 0xd73   : > { %7150 = vmatmul.mubr.msk.bf16.gmra.mrb[24].mxu1 %vm11410_vm10, %v8261_v34  ;;  %vm11421_vm10 = vmmov %vm11414_vm0  ;;  %v8113_v34 = vpop.permute.xlu0 %8112 }
 0xd74   : > { %5388 = vmatprep.mubr.bf16.mxu1 %v8297_v0  ;;  %v5794_v45 = vsel %vm11421_vm10, %v8085_v6, %v8079_v60  ;;  %v8115_v30 = vunpack.i.h.bf16 %v8113_v34  ;;  %v8114_v12 = vunpack.i.l.bf16 %v8113_v34  ;;  %v8119_v60 = vunpack.i.l.bf16 %v8118_v51 }
 0xd75   : > { %v8148_v15 = vpop.permute.xlu1 %8147 }
 0xd77   : > { %v8123_v58 = vpop.permute.xlu0 %8122 }
 0xd78   : > { %v8124_v13 = vunpack.i.l.bf16 %v8123_v58 }
 0xd7b   : > { %7151 = vmatmul.mubr.msk.bf16.gmra.mrb[28].mxu1 %vm11411_vm3, %v8262_v14  ;;  %vm11422_vm3 = vmmov %vm11414_vm0  ;;  %v8125_v14 = vunpack.i.h.bf16 %v8123_v58 }
 0xd7c   : > { %5540 = vmatprep.mubr.bf16.mxu1 %v8297_v0  ;;  %v5792_v24 = vsel %vm11422_vm3, %v8084_v61, %v8074_v55 }
 0xd7d   : > { %v7212_v29 = vpack.c.bf16 %v5794_v45, %v5792_v24  ;;  %v8274_v45 = vld [vmem:[%s10932_s11 + $0xb8] sm:$0xff]  }
 0xd83   : > { %7176 = vmatmul.mubr.msk.bf16.vlgmr.msra.gmra.mrb[16].mxu1 %vm11413_vm7, %v8263_v54  ;;  %vm11424_vm7 = vmmov %vm11414_vm0  ;;  %v8133_v54 = vpop.permute.xlu0 %8132 }
 0xd84   : > { %5671 = vmatpush1.bf16.msra.mxu1 %v5650_v9  ;;  %5550 = vmatprep.mubr.bf16.mxu1 %v8297_v0  ;;  %v5797_v10 = vsel %vm11424_vm7, %v8089_v18, %v8090_v22  ;;  %v8130_v9 = vunpack.i.h.bf16 %v8128_v46  ;;  %v8158_v18 = vpop.permute.xlu1 %8157 }
 0xd85   : > { %5672 = vmatprep.subr.bf16.mxu1 %v5653_v21  ;;  %v7215_v53 = vpack.c.bf16 %v5799_v1, %v5797_v10  ;;  %v8271_v21 = vld [vmem:[%s10932_s11 + $0xa0] sm:$0xff]   ;;  %v8159_v31 = vunpack.i.l.bf16 %v8158_v18 }
 0xd87   : > { %v8143_v22 = vpop.permute.xlu0 %8142 }
 0xd88   : > { %5673 = vmatpush1.bf16.msra.mxu1 %v5652_v38  ;;  %v8140_v38 = vunpack.i.h.bf16 %v8138_v27  ;;  %v8145_v24 = vunpack.i.h.bf16 %v8143_v22  ;;  %v8144_v57 = vunpack.i.l.bf16 %v8143_v22 }
 0xd89   : > { %7210 = vmatprep.subr.msk.bf16.mxu1 %vm10210_vm13, %v7209_v44  ;;  %v8139_v44 = vunpack.i.l.bf16 %v8138_v27 }
 0xd8b   : > { %7177 = vmatmul.mubr.msk.bf16.gmra.mrb[20].mxu1 %vm11418_vm6, %v8264_v52  ;;  %vm11428_vm6 = vmmov %vm11427_vm12  ;;  %v8135_v52 = vunpack.i.h.bf16 %v8133_v54  ;;  %v8153_v32 = vpop.permute.xlu0 %8152 }
 0xd8c   : > { %5560 = vmatprep.mubr.bf16.mxu1 %v8297_v0  ;;  %v5975_v36 = vsel %vm11428_vm6, %v8104_v37, %v8105_v41  ;;  %vm11432_vm10 = vmmov %vm11428_vm6  ;;  %v8155_v28 = vunpack.i.h.bf16 %v8153_v32  ;;  %v8154_v1 = vunpack.i.l.bf16 %v8153_v32  ;;  %v8149_v41 = vunpack.i.l.bf16 %v8148_v15 }
 0xd8d   : > { %v7237_v39 = vpack.c.bf16 %v5977_v3, %v5975_v36  ;;  %v5974_v55 = vsel %vm11432_vm10, %v8114_v12, %v8104_v37  ;;  %vm11433_vm3 = vmmov %vm11428_vm6 }
 0xd8e   : > { %v5981_v25 = vsel %vm11433_vm3, %v8124_v13, %v8125_v14  ;;  %vm11434_vm9 = vmmov %vm11433_vm3  ;;  %v8276_v14 = vld [vmem:[%s10932_s11 + $0xc8] sm:$0xff]  }
 0xd8f   : > { %v5979_v43 = vsel %vm11434_vm9, %v8119_v60, %v8120_v33  ;;  %vm11435_vm7 = vmmov %vm11433_vm3  ;;  %v8163_v4 = vpop.permute.xlu0 %8162 }
 0xd90   : > { %v5978_v23 = vsel %vm11435_vm7, %v8129_v20, %v8119_v60  ;;  %vm11436_vm0 = vmmov %vm11433_vm3  ;;  %vm11450_vm7 = vcmask 646144  }
 0xd91   : > { %v5980_v11 = vsel %vm11436_vm0, %v8130_v9, %v8124_v13  ;;  %vm11451_vm0 = vmmov %vm11450_vm7 }
 0xd92   : > { %v7246_v16 = vpack.c.bf16 %v5980_v11, %v5978_v23 }
 0xd93   : > { %7178 = vmatmul.mubr.msk.bf16.gmra.mrb[24].mxu1 %vm11419_vm8, %v8265_v17  ;;  %v8134_v17 = vunpack.i.l.bf16 %v8133_v54  ;;  %v8173_v13 = vpop.permute.xlu0 %8172 }
 0xd94   : > { %5570 = vmatprep.mubr.bf16.mxu1 %v8297_v0  ;;  %v8175_v33 = vunpack.i.h.bf16 %v8173_v13  ;;  %v8174_v60 = vunpack.i.l.bf16 %v8173_v13 }
 0xd97   : > { %v8183_v54 = vpop.permute.xlu0 %8182 }
 0xd98   : > { %v8184_v9 = vunpack.i.l.bf16 %v8183_v54 }
 0xd9b   : > { %7179 = vmatmul.mubr.msk.bf16.gmra.mrb[28].mxu1 %vm11420_vm14, %v8266_v2  ;;  %vm11431_vm14 = vmmov %vm11428_vm6  ;;  %v7243_v2 = vpack.c.bf16 %v5981_v25, %v5979_v43  ;;  %v6498_v22 = vpop.permute.xlu0 %6497 }
 0xd9c   : > { %5702 = vmatprep.mubr.bf16.mxu1 %v8297_v0  ;;  %v5976_v50 = vsel %vm11431_vm14, %v8115_v30, %v8109_v56  ;;  %vm11440_vm6 = vmmov %vm11437_vm2  ;;  %v8150_v56 = vunpack.i.h.bf16 %v8148_v15  ;;  %v8286_v15 = vld [vmem:[%s10932_s11 + $0x118] sm:$0xff]  }
 0xd9d   : > { %v7240_v49 = vpack.c.bf16 %v5976_v50, %v5974_v55  ;;  %v8185_v55 = vunpack.i.h.bf16 %v8183_v54 }
 0xda3   : > { %7192 = vmatmul.mubr.msk.bf16.vlgmr.msra.gmra.mrb[16].mxu1 %vm11426_vm15, %v8267_v47  ;;  %vm11438_vm15 = vcmask 654336   ;;  %v8168_v47 = vpop.permute.xlu1 %8167 }
 0xda4   : > { %7213 = vmatpush1.bf16.msk.msra.mxu1 %vm10247_vm11, %v7212_v29  ;;  %5712 = vmatprep.mubr.bf16.mxu1 %v8297_v0  ;;  %v6159_v6 = vsel %vm11438_vm15, %v8139_v44, %v8140_v38  ;;  %vm11439_vm12 = vmmov %vm11438_vm15  ;;  %v8160_v29 = vunpack.i.h.bf16 %v8158_v18  ;;  %v8170_v3 = vunpack.i.h.bf16 %v8168_v47  ;;  %v8169_v36 = vunpack.i.l.bf16 %v8168_v47 }
 0xda5   : > { %7216 = vmatprep.subr.msk.bf16.mxu1 %vm10210_vm13, %v7215_v53  ;;  %vm11429_vm13 = vmmov %vm11419_vm8  ;;  %v6157_v61 = vsel %vm11439_vm12, %v8134_v17, %v8135_v52  ;;  %v8275_v53 = vld [vmem:[%s10932_s11 + $0xc0] sm:$0xff]   ;;  %vm11453_vm15 = vnez %v11335_v40  ;;  %v8282_v40 = vld [vmem:[%s10932_s11 + $0xf8] sm:$0xff]  }
 0xda6   : > { %v7265_v7 = vpack.c.bf16 %v6159_v6, %v6157_v61  ;;  %v6341_v58 = vsel %vm11450_vm7, %v8169_v36, %v8170_v3 }
 0xda7   : > { %v8178_v27 = vpop.permute.xlu1 %8177 }
 0xda8   : > { %7219 = vmatpush1.bf16.msk.msra.mxu1 %vm10247_vm11, %v7218_v42  ;;  %vm11430_vm11 = vmmov %vm11419_vm8  ;;  %v8165_v42 = vunpack.i.h.bf16 %v8163_v4  ;;  %v8180_v20 = vunpack.i.h.bf16 %v8178_v27  ;;  %v8179_v25 = vunpack.i.l.bf16 %v8178_v27 }
 0xda9   : > { %7238 = vmatprep.subr.msk.bf16.mxu1 %vm10262_vm1, %v7237_v39  ;;  %v8164_v39 = vunpack.i.l.bf16 %v8163_v4 }
 0xdab   : > { %7193 = vmatmul.mubr.msk.bf16.gmra.mrb[20].mxu1 %vm11419_vm8, %v8268_v8  ;;  %vm11443_vm8 = vmmov %vm11439_vm12  ;;  %v8188_v50 = vpop.permute.xlu1 %8187 }
 0xdac   : > { %5722 = vmatprep.mubr.bf16.mxu1 %v8297_v0  ;;  %v6158_v37 = vsel %vm11443_vm8, %v8145_v24, %v8139_v44  ;;  %vm11446_vm14 = vmmov %vm11443_vm8  ;;  %v8190_v44 = vunpack.i.h.bf16 %v8188_v50  ;;  %v8189_v52 = vunpack.i.l.bf16 %v8188_v50 }
 0xdad   : > { %v6161_v8 = vsel %vm11446_vm14, %v8149_v41, %v8150_v56  ;;  %vm11447_vm10 = vmmov %vm11443_vm8 }
 0xdae   : > { %v6160_v51 = vsel %vm11447_vm10, %v8159_v31, %v8149_v41  ;;  %vm11448_vm3 = vmmov %vm11443_vm8 }
 0xdaf   : > { %v6162_v34 = vsel %vm11448_vm3, %v8160_v29, %v8154_v1  ;;  %vm11462_vm14 = vmmov %vm11451_vm0  ;;  %vm11464_vm3 = vnez %v11340_v19  ;;  %v8283_v19 = vld [vmem:[%s10932_s11 + $0x100] sm:$0xff]   ;;  %v6503_v24 = vpop.permute.xlu1 %6502 }
 0xdb0   : > { %v7274_v30 = vpack.c.bf16 %v6162_v34, %v6160_v51 }
 0xdb3   : > { %7194 = vmatmul.mubr.msk.bf16.gmra.mrb[24].mxu1 %vm11429_vm13, %v8269_v5  ;;  %vm11444_vm13 = vmmov %vm11443_vm8  ;;  %v6513_v51 = vpop.permute.xlu1 %6512 }
 0xdb4   : > { %5732 = vmatprep.mubr.bf16.mxu1 %v8297_v0  ;;  %v6156_v10 = vsel %vm11444_vm13, %v8144_v57, %v8134_v17  ;;  %v8279_v17 = vld [vmem:[%s10932_s11 + $0xe0] sm:$0xff]   ;;  %vm11460_vm13 = vmmov %vm11451_vm0 }
 0xdb5   : > { %v7268_v5 = vpack.c.bf16 %v6158_v37, %v6156_v10 }
 0xdbb   : > { %7195 = vmatmul.mubr.msk.bf16.gmra.mrb[28].mxu1 %vm11430_vm11, %v8270_v48  ;;  %vm11445_vm11 = vmmov %vm11443_vm8  ;;  %v6339_v48 = vsel %vm11451_vm0, %v8164_v39, %v8165_v42 }
 0xdbc   : > { %5884 = vmatprep.mubr.bf16.mxu1 %v8297_v0  ;;  %v6163_v26 = vsel %vm11445_vm11, %v8154_v1, %v8155_v28  ;;  %v7293_v12 = vpack.c.bf16 %v6341_v58, %v6339_v48  ;;  %vm11459_vm8 = vmmov %vm11451_vm0 }
 0xdbd   : > { %v7271_v46 = vpack.c.bf16 %v6163_v26, %v6161_v8  ;;  %v6345_v43 = vsel %vm11459_vm8, %v8184_v9, %v8185_v55  ;;  %vm11461_vm11 = vmmov %vm11451_vm0  ;;  %v6508_v26 = vpop.permute.xlu0 %6507 }
 0xdbe   : > { %v6342_v11 = vsel %vm11461_vm11, %v8189_v52, %v8179_v25 }
 0xdc1   : > { %v6518_v54 = vpop.permute.xlu0 %6517 }
 0xdc3   : > { %7220 = vmatmul.mubr.msk.bf16.vlgmr.msra.gmra.mrb[16].mxu1 %vm11437_vm2, %v8271_v21 }
 0xdc4   : > { %7241 = vmatpush1.bf16.msk.msra.mxu1 %vm10292_vm5, %v7240_v49  ;;  %5894 = vmatprep.mubr.bf16.mxu1 %v8297_v0  ;;  %v6343_v49 = vsel %vm11460_vm13, %v8179_v25, %v8180_v20 }
 0xdc5   : > { %7244 = vmatprep.subr.msk.bf16.mxu1 %vm10262_vm1, %v7243_v2  ;;  %vm11441_vm1 = vmmov %vm11437_vm2  ;;  %vm11452_vm2 = vnez %v11330_v35  ;;  %v8278_v35 = vld [vmem:[%s10932_s11 + $0xd8] sm:$0xff]   ;;  %v6344_v2 = vsel %vm11462_vm14, %v8190_v44, %v8184_v9  ;;  %v7299_v6 = vpack.c.bf16 %v6345_v43, %v6343_v49 }
 0xdc6   : > { %vm11449_vm9 = vmmov %vm11441_vm1  ;;  %v7302_v61 = vpack.c.bf16 %v6344_v2, %v6342_v11 }
 0xdc7   : > { %vm11454_vm12 = vmmov %vm11441_vm1 }
 0xdc8   : > { %7247 = vmatpush1.bf16.msk.msra.mxu1 %vm10292_vm5, %v7246_v16  ;;  %vm11442_vm5 = vmmov %vm11441_vm1  ;;  %v8280_v16 = vld [vmem:[%s10932_s11 + $0xe8] sm:$0xff]  }
 0xdc9   : > { %7266 = vmatprep.subr.msk.bf16.mxu1 %vm10310_vm4, %v7265_v7  ;;  %v8281_v7 = vld [vmem:[%s10932_s11 + $0xf0] sm:$0xff]  }
 0xdcb   : > { %7221 = vmatmul.mubr.msk.bf16.gmra.mrb[20].mxu1 %vm11440_vm6, %v8272_v63  ;;  %vm11456_vm6 = vmmov %vm11441_vm1  ;;  %v8284_v63 = vld [vmem:[%s10932_s11 + $0x108] sm:$0xff]  }
 0xdcc   : > { %5904 = vmatprep.mubr.bf16.mxu1 %v8297_v0 }
 0xdd3   : > { %7222 = vmatmul.mubr.msk.bf16.gmra.mrb[24].mxu1 %vm11441_vm1, %v8273_v59  ;;  %v8285_v59 = vld [vmem:[%s10932_s11 + $0x110] sm:$0xff]  }
 0xdd4   : > { %5914 = vmatprep.mubr.bf16.mxu1 %v8297_v0 }
 0xddb   : > { %7223 = vmatmul.mubr.msk.bf16.gmra.mrb[28].mxu1 %vm11442_vm5, %v8274_v45  ;;  %vm11458_vm5 = vmmov %vm11451_vm0 }
 0xddc   : > { %6066 = vmatprep.mubr.bf16.mxu1 %v8297_v0  ;;  %v6338_v38 = vsel %vm11458_vm5, %v8174_v60, %v8164_v39 }
 0xde3   : > { %7248 = vmatmul.mubr.msk.bf16.vlgmr.msra.gmra.mrb[16].mxu1 %vm11449_vm9, %v8275_v53 }
 0xde4   : > { %7269 = vmatpush1.bf16.msk.msra.mxu1 %vm11452_vm2, %v7268_v5  ;;  %6076 = vmatprep.mubr.bf16.mxu1 %v8297_v0 }
 0xde5   : > { %7272 = vmatprep.subr.msk.bf16.mxu1 %vm10310_vm4, %v7271_v46  ;;  %vm11455_vm4 = vmmov %vm11441_vm1 }
 0xde6   : > { %vm11457_vm1 = vmmov %vm11451_vm0 }
 0xde7   : > { %v6340_v21 = vsel %vm11457_vm1, %v8175_v33, %v8169_v36  ;;  %vm11463_vm10 = vmmov %vm11455_vm4 }
 0xde8   : > { %7275 = vmatpush1.bf16.msk.msra.mxu1 %vm11452_vm2, %v7274_v30  ;;  %v7296_v23 = vpack.c.bf16 %v6340_v21, %v6338_v38  ;;  %vm11465_vm9 = vmmov %vm11455_vm4  ;;  %v6523_v21 = vpop.permute.xlu1 %6522 }
 0xde9   : > { %7294 = vmatprep.subr.msk.bf16.mxu1 %vm11453_vm15, %v7293_v12  ;;  %vm11466_vm7 = vmmov %vm11455_vm4 }
 0xdea   : > { %vm11467_vm0 = vmmov %vm11455_vm4 }
 0xdeb   : > { %7249 = vmatmul.mubr.msk.bf16.gmra.mrb[20].mxu1 %vm11454_vm12, %v8276_v14  ;;  %vm11468_vm2 = vmmov %vm11467_vm0 }
 0xdec   : > { %6086 = vmatprep.mubr.bf16.mxu1 %v8297_v0  ;;  %vm11470_vm12 = vmmov %vm11467_vm0 }
 0xdf3   : > { %7250 = vmatmul.mubr.msk.bf16.gmra.mrb[24].mxu1 %vm11455_vm4, %v8277_v62  ;;  %vm11471_vm4 = vmmov %vm11467_vm0 }
 0xdf4   : > { %6096 = vmatprep.mubr.bf16.mxu1 %v8297_v0 }
 0xdfb   : > { %7251 = vmatmul.mubr.msk.bf16.gmra.mrb[28].mxu1 %vm11456_vm6, %v8278_v35 }
 0xdfc   : > { %6248 = vmatprep.mubr.bf16.mxu1 %v8297_v0 }
 0xe03   : > { %7276 = vmatmul.mubr.msk.bf16.vlgmr.msra.gmra.mrb[16].mxu1 %vm11463_vm10, %v8279_v17 }
 0xe04   : > { %7297 = vmatpush1.bf16.msk.msra.mxu1 %vm11464_vm3, %v7296_v23  ;;  %6258 = vmatprep.mubr.bf16.mxu1 %v8297_v0 }
 0xe05   : > { %7300 = vmatprep.subr.msk.bf16.mxu1 %vm11453_vm15, %v7299_v6  ;;  %vm11469_vm15 = vmmov %vm11467_vm0 }
 0xe08   : > { %7303 = vmatpush1.bf16.msk.msra.mxu1 %vm11464_vm3, %v7302_v61 }
 0xe0b   : > { %7277 = vmatmul.mubr.msk.bf16.gmra.mrb[20].mxu1 %vm11465_vm9, %v8280_v16  ;;  %v6528_v16 = vpop.permute.xlu0 %6527 }
 0xe0c   : > { %6268 = vmatprep.mubr.bf16.mxu1 %v8297_v0 }
 0xe13   : > { %7278 = vmatmul.mubr.msk.bf16.gmra.mrb[24].mxu1 %vm11466_vm7, %v8281_v7 }
 0xe14   : > { %6278 = vmatprep.mubr.bf16.mxu1 %v8297_v0 }
 0xe1b   : > { %7279 = vmatmul.mubr.msk.bf16.gmra.mrb[28].mxu1 %vm11467_vm0, %v8282_v40 }
 0xe1c   : > { %6430 = vmatprep.mubr.bf16.mxu1 %v8297_v0 }
 0xe23   : > { %7304 = vmatmul.mubr.msk.bf16.vlgmr.msra.gmra.mrb[16].mxu1 %vm11468_vm2, %v8283_v19 }
 0xe24   : > { %6440 = vmatprep.mubr.bf16.mxu1 %v8297_v0 }
 0xe2b   : > { %7305 = vmatmul.mubr.msk.bf16.gmra.mrb[20].mxu1 %vm11469_vm15, %v8284_v63 }
 0xe2c   : > { %6450 = vmatprep.mubr.bf16.mxu1 %v8297_v0 }
 0xe33   : > { %7306 = vmatmul.mubr.msk.bf16.gmra.mrb[24].mxu1 %vm11470_vm12, %v8285_v59 }
 0xe34   : > { %6460 = vmatprep.mubr.bf16.mxu1 %v8297_v0 }
 0xe3b   : > { %7307 = vmatmul.mubr.msk.bf16.gmra.mrb[28].mxu1 %vm11471_vm4, %v8286_v15 }
 0xef6   : > { %v6432_v18 = vpop.f32.mrb[16].mxu1 }
 0xef7   : > { %v6535_v32 = vadd.f32 %v6498_v22, %v6432_v18  ;;  %v6434_v45 = vpop.f32.mrb[17].mxu1  ;;  %v6533_v18 = vpop.permute.xlu1 %6532 }
 0xef8   : > { %v6536_v57 = vadd.f32 %v6498_v22, %v6434_v45  ;;  %v6436_v28 = vpop.f32.mrb[18].mxu1 }
 0xef9   : > { %v6567_v1 = vmul.f32 0.1, %v6535_v32  ;;  %v6537_v47 = vadd.f32 %v6503_v24, %v6436_v28  ;;  %v6438_v4 = vpop.f32.mrb[19].mxu1  ;;  %vm6551_vm6 = vcmp.gt.f32.partialorder %v6535_v32, 0.0 }
 0xefa   : > { %v6568_v56 = vmul.f32 0.1, %v6536_v57  ;;  %v6538_v41 = vadd.f32 %v6503_v24, %v6438_v4  ;;  %vm6552_vm1 = vcmp.gt.f32.partialorder %v6536_v57, 0.0 }
 0xefb   : > { %vm6553_vm5 = vcmp.gt.f32.partialorder %v6537_v47, 0.0  ;;  %v6569_v37 = vmul.f32 0.1, %v6537_v47  ;;  %v6583_v29 = vsel %vm6551_vm6, %v6535_v32, %v6567_v1  ;;  %vm11472_vm6 = vcmask 523264  }
 0xefc   : > { %vm6554_vm8 = vcmp.gt.f32.partialorder %v6538_v41, 0.0  ;;  %v6570_v10 = vmul.f32 0.1, %v6538_v41  ;;  %v6584_v36 = vsel %vm6552_vm1, %v6536_v57, %v6568_v56  ;;  %vm11473_vm1 = vmmov %vm11472_vm6 }
 0xefd   : > { %v6585_v31 = vsel %vm6553_vm5, %v6537_v47, %v6569_v37 }
 0xefe   : > { %v6603_v53 = vpack.c.bf16 %v6585_v31, %v6583_v29  ;;  %v6442_v3 = vpop.f32.mrb[20].mxu1  ;;  %v6586_v42 = vsel %vm6554_vm8, %v6538_v41, %v6570_v10 }
 0xeff   : > { %v6539_v39 = vadd.f32 %v6508_v26, %v6442_v3  ;;  %v6444_v8 = vpop.f32.mrb[21].mxu1  ;;  %v6604_v5 = vpack.c.bf16 %v6586_v42, %v6584_v36  ;;  %v8288_v3 = vld [vmem:[%s10934_s13 + $0x8] sm:$0xff]   ;;  %v6618_v36 = vpop.permute.xlu0 %6617 }
 0xf00   : > { %v6540_v34 = vadd.f32 %v6508_v26, %v6444_v8  ;;  %v6446_v46 = vpop.f32.mrb[22].mxu1 }
 0xf01   : > { %v6571_v58 = vmul.f32 0.1, %v6539_v39  ;;  %v6541_v48 = vadd.f32 %v6513_v51, %v6446_v46  ;;  %v6448_v30 = vpop.f32.mrb[23].mxu1  ;;  %6651 = vmatprep.subr.bf16.mxu0 %v6604_v5  ;;  %vm6555_vm13 = vcmp.gt.f32.partialorder %v6539_v39, 0.0  ;;  %v6623_v5 = vpop.permute.xlu1 %6622 }
 0xf02   : > { %v6572_v12 = vmul.f32 0.1, %v6540_v34  ;;  %v6542_v14 = vadd.f32 %v6513_v51, %v6448_v30  ;;  %6652 = vmatpush1.bf16.msra.mxu0 %v6603_v53  ;;  %vm6556_vm11 = vcmp.gt.f32.partialorder %v6540_v34, 0.0  ;;  %v8287_v53 = vld [vmem:[%s10934_s13] sm:$0xff]  }
 0xf03   : > { %vm6557_vm14 = vcmp.gt.f32.partialorder %v6541_v48, 0.0  ;;  %v6573_v62 = vmul.f32 0.1, %v6541_v48  ;;  %v6587_v27 = vsel %vm6555_vm13, %v6539_v39, %v6571_v58 }
 0xf04   : > { %vm6558_vm10 = vcmp.gt.f32.partialorder %v6542_v14, 0.0  ;;  %v6574_v13 = vmul.f32 0.1, %v6542_v14  ;;  %v6588_v50 = vsel %vm6556_vm11, %v6540_v34, %v6572_v12 }
 0xf05   : > { %v6589_v35 = vsel %vm6557_vm14, %v6541_v48, %v6573_v62 }
 0xf06   : > { %v6605_v33 = vpack.c.bf16 %v6589_v35, %v6587_v27  ;;  %v6452_v60 = vpop.f32.mrb[24].mxu1  ;;  %v6590_v55 = vsel %vm6558_vm10, %v6542_v14, %v6574_v13  ;;  %v6628_v35 = vpop.permute.xlu0 %6627 }
 0xf07   : > { %v6543_v9 = vadd.f32 %v6518_v54, %v6452_v60  ;;  %v6454_v20 = vpop.f32.mrb[25].mxu1  ;;  %v6606_v25 = vpack.c.bf16 %v6590_v55, %v6588_v50  ;;  %v6633_v55 = vpop.permute.xlu1 %6632 }
 0xf08   : > { %v6544_v38 = vadd.f32 %v6518_v54, %v6454_v20  ;;  %v6456_v44 = vpop.f32.mrb[26].mxu1 }
 0xf09   : > { %v6575_v52 = vmul.f32 0.1, %v6543_v9  ;;  %v6545_v17 = vadd.f32 %v6523_v21, %v6456_v44  ;;  %v6458_v43 = vpop.f32.mrb[27].mxu1  ;;  %6653 = vmatprep.subr.bf16.mxu0 %v6606_v25  ;;  %vm6559_vm3 = vcmp.gt.f32.partialorder %v6543_v9, 0.0 }
 0xf0a   : > { %v6576_v49 = vmul.f32 0.1, %v6544_v38  ;;  %v6546_v23 = vadd.f32 %v6523_v21, %v6458_v43  ;;  %6654 = vmatpush1.bf16.msra.mxu0 %v6605_v33  ;;  %vm6560_vm9 = vcmp.gt.f32.partialorder %v6544_v38, 0.0 }
 0xf0b   : > { %vm6561_vm7 = vcmp.gt.f32.partialorder %v6545_v17, 0.0  ;;  %v6577_v11 = vmul.f32 0.1, %v6545_v17  ;;  %v6591_v6 = vsel %vm6559_vm3, %v6543_v9, %v6575_v52 }
 0xf0c   : > { %vm6562_vm0 = vcmp.gt.f32.partialorder %v6546_v23, 0.0  ;;  %v6578_v2 = vmul.f32 0.1, %v6546_v23  ;;  %v6592_v19 = vsel %vm6560_vm9, %v6544_v38, %v6576_v49 }
 0xf0d   : > { %v6593_v61 = vsel %vm6561_vm7, %v6545_v17, %v6577_v11 }
 0xf0e   : > { %v6607_v7 = vpack.c.bf16 %v6593_v61, %v6591_v6  ;;  %v6462_v40 = vpop.f32.mrb[28].mxu1  ;;  %v6594_v63 = vsel %vm6562_vm0, %v6546_v23, %v6578_v2 }
 0xf0f   : > { %v6547_v59 = vadd.f32 %v6528_v16, %v6462_v40  ;;  %v6464_v15 = vpop.f32.mrb[29].mxu1  ;;  %v6608_v22 = vpack.c.bf16 %v6594_v63, %v6592_v19 }
 0xf10   : > { %v6548_v32 = vadd.f32 %v6528_v16, %v6464_v15  ;;  %v6466_v45 = vpop.f32.mrb[30].mxu1 }
 0xf11   : > { %v6579_v24 = vmul.f32 0.1, %v6547_v59  ;;  %v6549_v57 = vadd.f32 %v6533_v18, %v6466_v45  ;;  %v6468_v28 = vpop.f32.mrb[31].mxu1  ;;  %6655 = vmatprep.subr.bf16.mxu0 %v6608_v22  ;;  %vm6563_vm2 = vcmp.gt.f32.partialorder %v6547_v59, 0.0 }
 0xf12   : > { %v6580_v1 = vmul.f32 0.1, %v6548_v32  ;;  %v6550_v47 = vadd.f32 %v6533_v18, %v6468_v28  ;;  %6656 = vmatpush1.bf16.msra.mxu0 %v6607_v7  ;;  %vm6564_vm15 = vcmp.gt.f32.partialorder %v6548_v32, 0.0 }
 0xf13   : > { %vm6565_vm12 = vcmp.gt.f32.partialorder %v6549_v57, 0.0  ;;  %v6581_v4 = vmul.f32 0.1, %v6549_v57  ;;  %v6595_v41 = vsel %vm6563_vm2, %v6547_v59, %v6579_v24 }
 0xf14   : > { %vm6566_vm4 = vcmp.gt.f32.partialorder %v6550_v47, 0.0  ;;  %v6582_v56 = vmul.f32 0.1, %v6550_v47  ;;  %v6596_v29 = vsel %vm6564_vm15, %v6548_v32, %v6580_v1 }
 0xf15   : > { %v6597_v37 = vsel %vm6565_vm12, %v6549_v57, %v6581_v4 }
 0xf16   : > { %v6609_v10 = vpack.c.bf16 %v6597_v37, %v6595_v41  ;;  %v6598_v31 = vsel %vm6566_vm4, %v6550_v47, %v6582_v56 }
 0xf17   : > { %v6610_v26 = vpack.c.bf16 %v6598_v31, %v6596_v29 }
 0xf19   : > { %6657 = vmatprep.subr.bf16.mxu0 %v6610_v26 }
 0xf1a   : > { %6658 = vmatpush1.bf16.msra.mxu0 %v6609_v10 }
 0xf1d   : > { %7310 = vmatmul.mubr.msk.bf16.vlgmr.msra.gmra.mrb[32].mxu0 %vm11472_vm6, %v8287_v53 }
 0xf1e   : > { %6693 = vmatprep.mubr.bf16.mxu0 %v8297_v0 }
 0xf25   : > { %7311 = vmatmul.mubr.msk.bf16.gmra.mrb[36].mxu0 %vm11473_vm1, %v8288_v3 }
 0xff0   : > { %v6685_v42 = vpop.f32.mrb[32].mxu0 }
 0xff1   : > { %v6686_v39 = vadd.f32 %v6685_v42, %v6618_v36  ;;  %v6687_v8 = vpop.f32.mrb[33].mxu0 }
 0xff2   : > { %v6688_v51 = vadd.f32 %v6687_v8, %v6618_v36  ;;  %v6689_v34 = vpop.f32.mrb[34].mxu0 }
 0xff3   : > { %vm6704_vm5 = vcmp.gt.f32.partialorder %v6686_v39, 0.0  ;;  %v6712_v0 = vmul.f32 0.1, %v6686_v39  ;;  %v6690_v46 = vadd.f32 %v6689_v34, %v6623_v5  ;;  %v6691_v58 = vpop.f32.mrb[35].mxu0 }
 0xff4   : > { %vm6705_vm8 = vcmp.gt.f32.partialorder %v6688_v51, 0.0  ;;  %v6713_v48 = vmul.f32 0.1, %v6688_v51  ;;  %v6692_v30 = vadd.f32 %v6691_v58, %v6623_v5 }
 0xff5   : > { %v6720_v12 = vsel %vm6704_vm5, %v6686_v39, %v6712_v0  ;;  %vm6706_vm13 = vcmp.gt.f32.partialorder %v6690_v46, 0.0  ;;  %v6714_v14 = vmul.f32 0.1, %v6690_v46 }
 0xff6   : > { %6728 = vst [vmem:[%s10908_s27] sm:$0xff] %v6720_v12  ;;  %v6721_v62 = vsel %vm6705_vm8, %v6688_v51, %v6713_v48  ;;  %vm6707_vm11 = vcmp.gt.f32.partialorder %v6692_v30, 0.0  ;;  %v6715_v13 = vmul.f32 0.1, %v6692_v30 }
 0xff7   : > { %6729 = vst [vmem:[%s10908_s27 + $0x8] sm:$0xff] %v6721_v62  ;;  %v6722_v27 = vsel %vm6706_vm13, %v6690_v46, %v6714_v14 }
 0xff8   : > { %6730 = vst [vmem:[%s10908_s27 + $0x10] sm:$0xff] %v6722_v27  ;;  %v6723_v54 = vsel %vm6707_vm11, %v6692_v30, %v6715_v13  ;;  %v6695_v33 = vpop.f32.mrb[36].mxu0 }
 0xff9   : > { %6731 = vst [vmem:[%s10908_s27 + $0x18] sm:$0xff] %v6723_v54  ;;  %v6696_v60 = vadd.f32 %v6695_v33, %v6628_v35  ;;  %v6697_v50 = vpop.f32.mrb[37].mxu0 }
 0xffa   : > { %v6698_v9 = vadd.f32 %v6697_v50, %v6628_v35  ;;  %v6699_v20 = vpop.f32.mrb[38].mxu0 }
 0xffb   : > { %vm6708_vm14 = vcmp.gt.f32.partialorder %v6696_v60, 0.0  ;;  %v6716_v25 = vmul.f32 0.1, %v6696_v60  ;;  %v6700_v21 = vadd.f32 %v6699_v20, %v6633_v55  ;;  %v6701_v38 = vpop.f32.mrb[39].mxu0 }
 0xffc   : > { %vm6709_vm10 = vcmp.gt.f32.partialorder %v6698_v9, 0.0  ;;  %v6717_v44 = vmul.f32 0.1, %v6698_v9  ;;  %v6702_v52 = vadd.f32 %v6701_v38, %v6633_v55 }
 0xffd   : > { %v6724_v17 = vsel %vm6708_vm14, %v6696_v60, %v6716_v25  ;;  %vm6710_vm3 = vcmp.gt.f32.partialorder %v6700_v21, 0.0  ;;  %v6718_v43 = vmul.f32 0.1, %v6700_v21 }
 0xffe   : > { %6732 = vst [vmem:[%s10908_s27 + $0x20] sm:$0xff] %v6724_v17  ;;  %v6725_v49 = vsel %vm6709_vm10, %v6698_v9, %v6717_v44  ;;  %vm6711_vm9 = vcmp.gt.f32.partialorder %v6702_v52, 0.0  ;;  %v6719_v23 = vmul.f32 0.1, %v6702_v52 }
 0xfff   : > { %6733 = vst [vmem:[%s10908_s27 + $0x28] sm:$0xff] %v6725_v49  ;;  %v6726_v11 = vsel %vm6710_vm3, %v6700_v21, %v6718_v43 }
0x1000   : > { %6734 = vst [vmem:[%s10908_s27 + $0x30] sm:$0xff] %v6726_v11  ;;  %v6727_v2 = vsel %vm6711_vm9, %v6702_v52, %v6719_v23 }
0x1001   : > { %6735 = vst [vmem:[%s10908_s27 + $0x38] sm:$0xff] %v6727_v2 }
0x1002 PF: > { %s25_s18 = sadd.s32 1, %s8295_s18  }
0x1003   : > { %p22_p4 = scmp.ge.s32.totalorder %s25_s18, 4  }
0x1005   :  { %24 = sbr.rel (!%p22_p4) target bundleno = 1 (0x1), region = 129 }

</bundles_post_ra>
